<compile_context>
chip_gen: v6e
topology: v6e:2x2x1
jax: 0.10.0
libtpu: 0.0.40
codegen_flags: <defaults>
</compile_context>

<pallas_src>
import functools

import jax
import jax.numpy as jnp
import numpy as np
from jax.experimental import pallas as pl
from jax.experimental.pallas import tpu as pltpu

_VMEM_LIMIT = 16 * 1024 * 1024  # right-sized (actual per-call footprint < 6 MiB)


# ----------------------------------------------------------------------------
# Pallas kernels
# ----------------------------------------------------------------------------
def _conv1_relu_pool_kernel(p_ref, w_ref, b_ref, o_ref):
    # p_ref: (1, 4, M, K) im2col patches for one image, axis-1 enumerates the
    #        four (hp, wp) taps of every 2x2 pool window (rows = (ho, wo)).
    # w_ref: (K, N) GEMM weight, b_ref: (1, N), o_ref: (1, M, N) pooled output.
    w = w_ref[...]
    b = b_ref[...]

    def tap(q):
        y = jnp.dot(p_ref[0, q, :, :], w, preferred_element_type=jnp.float32) + b
        return jnp.maximum(y, 0.0)           # ReLU fused before the pool max

    o_ref[0] = jnp.maximum(jnp.maximum(tap(0), tap(1)),
                           jnp.maximum(tap(2), tap(3)))


def _gemm_bias_kernel(x_ref, w_ref, b_ref, o_ref, *, apply_relu):
    # Plain GEMM + bias (+ optional ReLU) on the MXU (used for the res convs).
    acc = jnp.dot(x_ref[...], w_ref[...], preferred_element_type=jnp.float32)
    acc = acc + b_ref[...]
    if apply_relu:
        acc = jnp.maximum(acc, 0.0)
    o_ref[...] = acc


def _fc_fused_kernel(x_ref, w1_ref, b1_ref, w2_ref, b2_ref, o_ref, acc_ref):
    # K-tiled fc1 accumulation in VMEM scratch; fc1-bias + ReLU + fc2 epilogue
    # on the final grid step.  Keeps the (B, 128) intermediate entirely in VMEM.
    k = pl.program_id(0)

    @pl.when(k == 0)
    def _init():
        acc_ref[...] = jnp.zeros_like(acc_ref)

    acc_ref[...] += jnp.dot(x_ref[...], w1_ref[...],
                            preferred_element_type=jnp.float32)

    @pl.when(k == pl.num_programs(0) - 1)
    def _finalize():
        h = jnp.maximum(acc_ref[...] + b1_ref[...], 0.0)
        o_ref[...] = jnp.dot(h, w2_ref[...],
                             preferred_element_type=jnp.float32) + b2_ref[...]


# ----------------------------------------------------------------------------
# pallas_call wrappers
# ----------------------------------------------------------------------------
def conv1_relu_pool(patches, w_gemm, b):
    # patches: (B, 4, M, K); returns pooled (B, M, N) with rows (ho, wo).
    B, Q, M, K = patches.shape
    N = w_gemm.shape[1]
    return pl.pallas_call(
        _conv1_relu_pool_kernel,
        out_shape=jax.ShapeDtypeStruct((B, M, N), jnp.float32),
        grid=(B,),                                   # 2 steps -> both v7x cores
        in_specs=[pl.BlockSpec((1, Q, M, K), lambda i: (i, 0, 0, 0)),
                  pl.BlockSpec((K, N), lambda i: (0, 0)),
                  pl.BlockSpec((1, N), lambda i: (0, 0))],
        out_specs=pl.BlockSpec((1, M, N), lambda i: (i, 0, 0)),
        compiler_params=pltpu.CompilerParams(
            dimension_semantics=("parallel",),
            vmem_limit_bytes=_VMEM_LIMIT),
    )(patches, w_gemm, b)


def gemm_bias(x, w, b, *, apply_relu=False, tm=None):
    # x: (M, K), w: (K, N) GEMM-ready, b: (1, N).
    M, K = x.shape
    N = w.shape[1]
    if tm is None or M % tm != 0:
        tm = M
    return pl.pallas_call(
        functools.partial(_gemm_bias_kernel, apply_relu=apply_relu),
        out_shape=jax.ShapeDtypeStruct((M, N), jnp.float32),
        grid=(M // tm,),
        in_specs=[pl.BlockSpec((tm, K), lambda i: (i, 0)),
                  pl.BlockSpec((K, N), lambda i: (0, 0)),
                  pl.BlockSpec((1, N), lambda i: (0, 0))],
        out_specs=pl.BlockSpec((tm, N), lambda i: (i, 0)),
        compiler_params=pltpu.CompilerParams(
            dimension_semantics=("parallel",),
            vmem_limit_bytes=_VMEM_LIMIT),
    )(x, w, b)


def fc_fused(x, w1, b1, w2, b2, *, tk=2048):
    # x: (B, K), w1: (K, N1) pre-permuted, w2: (N1, N2).  fc1 K-tiled + fused fc2.
    B, K = x.shape
    N1 = w1.shape[1]
    N2 = w2.shape[1]
    assert K % tk == 0
    return pl.pallas_call(
        _fc_fused_kernel,
        out_shape=jax.ShapeDtypeStruct((B, N2), jnp.float32),
        grid=(K // tk,),
        in_specs=[pl.BlockSpec((B, tk), lambda k: (0, k)),
                  pl.BlockSpec((tk, N1), lambda k: (k, 0)),
                  pl.BlockSpec((1, N1), lambda k: (0, 0)),
                  pl.BlockSpec((N1, N2), lambda k: (0, 0)),
                  pl.BlockSpec((1, N2), lambda k: (0, 0))],
        out_specs=pl.BlockSpec((B, N2), lambda k: (0, 0)),
        scratch_shapes=[pltpu.VMEM((B, N1), jnp.float32)],
        compiler_params=pltpu.CompilerParams(
            dimension_semantics=("arbitrary",),      # K reduction axis
            vmem_limit_bytes=_VMEM_LIMIT),
    )(x, w1, b1, w2, b2)


# ----------------------------------------------------------------------------
# XLA-side patch gathers (small, fuse into a single producer)
# ----------------------------------------------------------------------------
def _im2col_3x3_quadrants(x):
    # x: (B, H, W, C) -> (B, 4, (H/2)*(W/2), 9*C); axis 1 = pool tap (hp, wp),
    # axis 2 = pooled position (ho, wo) row-major, columns ordered (ky, kx, c).
    B, H, W, C = x.shape
    Ho, Wo = H // 2, W // 2
    xp = jnp.pad(x, ((0, 0), (1, 1), (1, 1), (0, 0)))
    quads = []
    for hp in range(2):
        for wp in range(2):
            taps = [xp[:, ky + hp:ky + hp + H:2, kx + wp:kx + wp + W:2, :]
                    for ky in range(3) for kx in range(3)]
            q = jnp.concatenate(taps, axis=-1)          # (B, Ho, Wo, 9C)
            quads.append(q.reshape(B, 1, Ho * Wo, 9 * C))
    return jnp.concatenate(quads, axis=1)               # (B, 4, Ho*Wo, 9C)


def _im2col_3x3(x):
    # Standard im2col: (B, H, W, C) -> (B*H*W, 9*C), columns ordered (ky, kx, c).
    B, H, W, C = x.shape
    xp = jnp.pad(x, ((0, 0), (1, 1), (1, 1), (0, 0)))
    cols = [xp[:, ky:ky + H, kx:kx + W, :] for ky in range(3) for kx in range(3)]
    return jnp.concatenate(cols, axis=-1).reshape(B * H * W, 9 * C)


def conv3x3_gemm(x_nhwc, w_gemm, b, *, apply_relu, tm):
    B, H, W, _ = x_nhwc.shape
    Cout = w_gemm.shape[1]
    y = gemm_bias(_im2col_3x3(x_nhwc), w_gemm, b, apply_relu=apply_relu, tm=tm)
    return y.reshape(B, H, W, Cout)


# ----------------------------------------------------------------------------
# One-time parameter preparation (kills all runtime weight transposes)
# ----------------------------------------------------------------------------
def prepare_params(p, eps=1e-5):
    scale = p["bn_gamma"] / jnp.sqrt(p["bn_var"] + eps)
    shift = p["bn_beta"] - p["bn_mean"] * scale

    def conv_w_to_gemm(w_oihw):
        # (O, I, 3, 3) -> (ky, kx, cin, O) -> (9*cin, O) matching im2col columns
        o, i, kh, kw = w_oihw.shape
        return jnp.transpose(w_oihw, (2, 3, 1, 0)).reshape(kh * kw * i, o)

    # fc1: reorder input columns from NCHW-flatten (c,h,w) to NHWC-flatten
    # (h,w,c) and pre-transpose to (K, N) so the activation feeds it directly.
    fc1_w = p["fc1_w"].reshape(128, 16, 32, 32)                   # (N, C, H, W)
    fc1_wg = jnp.transpose(fc1_w, (2, 3, 1, 0)).reshape(32 * 32 * 16, 128)

    return dict(
        bn_scale=scale.reshape(1, 1, 1, 3),
        bn_shift=shift.reshape(1, 1, 1, 3),
        conv1_wg=conv_w_to_gemm(p["conv1_w"]),
        conv1_b=p["conv1_b"].reshape(1, 16),
        res1a_wg=conv_w_to_gemm(p["res1a_w"]),
        res1a_b=p["res1a_b"].reshape(1, 16),
        res1b_wg=conv_w_to_gemm(p["res1b_w"]),
        res1b_b=p["res1b_b"].reshape(1, 16),
        fc1_wg=fc1_wg,
        fc1_b=p["fc1_b"].reshape(1, 128),
        fc2_wg=jnp.transpose(p["fc2_w"]),                          # (128, 6)
        fc2_b=p["fc2_b"].reshape(1, 6),
    )


# ----------------------------------------------------------------------------
# Forward pass (matches CNNClassifier.forward in eval mode)
# ----------------------------------------------------------------------------
def cnn_classifier_forward(x_nchw, p):
    B = x_nchw.shape[0]
    x = jnp.transpose(x_nchw, (0, 2, 3, 1))            # NCHW -> NHWC (98 KB)

    # bn1 (eval): fused XLA elementwise; exact (zero padding stays zero).
    xb = x * p["bn_scale"] + p["bn_shift"]

    # conv1 + relu1 + pool1 fused in one kernel (quadrant-ordered im2col rows)
    patches = _im2col_3x3_quadrants(xb)                # (B, 4, 1024, 27)
    h = conv1_relu_pool(patches, p["conv1_wg"], p["conv1_b"])      # (B, 1024, 16)
    h = h.reshape(B, 32, 32, 16)                       # NHWC, pooled

    # res1 = conv -> relu -> conv (reference forward applies no skip add)
    h = conv3x3_gemm(h, p["res1a_wg"], p["res1a_b"], apply_relu=True, tm=1024)
    h = conv3x3_gemm(h, p["res1b_wg"], p["res1b_b"], apply_relu=False, tm=1024)

    # flatten in NHWC order (fc1 weight was pre-permuted to match), then
    # fc1 + relu2 + fc2 fused in one K-tiled kernel (dropouts = identity).
    flat = h.reshape(B, 32 * 32 * 16)
    return fc_fused(flat, p["fc1_wg"], p["fc1_b"], p["fc2_wg"], p["fc2_b"])


# ----------------------------------------------------------------------------
# Deterministic parameter init (shapes from CNNClassifier.__init__)
# ----------------------------------------------------------------------------
def init_params(key):
    ks = jax.random.split(key, 12)

    def uconv(k, cout, cin, kh, kw):
        bound = 1.0 / np.sqrt(cin * kh * kw)
        return jax.random.uniform(k, (cout, cin, kh, kw), jnp.float32, -bound, bound)

    def ubias(k, n, fan_in):
        bound = 1.0 / np.sqrt(fan_in)
        return jax.random.uniform(k, (n,), jnp.float32, -bound, bound)

    def ulin(k, out_f, in_f):
        bound = 1.0 / np.sqrt(in_f)
        return jax.random.uniform(k, (out_f, in_f), jnp.float32, -bound, bound)

    return dict(
        bn_gamma=jnp.ones((3,), jnp.float32) + 0.1 * jax.random.normal(ks[0], (3,)),
        bn_beta=0.1 * jax.random.normal(ks[1], (3,)),
        bn_mean=0.1 * jax.random.normal(ks[2], (3,)),
        bn_var=jnp.ones((3,), jnp.float32) + 0.1 * jax.random.uniform(ks[3], (3,)),
        conv1_w=uconv(ks[4], 16, 3, 3, 3),
        conv1_b=ubias(ks[5], 16, 3 * 9),
        res1a_w=uconv(ks[6], 16, 16, 3, 3),
        res1a_b=ubias(ks[7], 16, 16 * 9),
        res1b_w=uconv(ks[8], 16, 16, 3, 3),
        res1b_b=ubias(ks[9], 16, 16 * 9),
        fc1_w=ulin(ks[10], 128, 16 * 32 * 32),
        fc1_b=jnp.zeros((128,), jnp.float32),
        fc2_w=ulin(ks[11], 6, 128),
        fc2_b=jnp.zeros((6,), jnp.float32),
    )


# ----------------------------------------------------------------------------
# Pure-JAX reference (raw PyTorch-layout params) for a numerical sanity check
# ----------------------------------------------------------------------------
def reference_forward(x_nchw, p):
    eps = 1e-5
    scale = p["bn_gamma"] / jnp.sqrt(p["bn_var"] + eps)
    shift = p["bn_beta"] - p["bn_mean"] * scale
    x = x_nchw * scale[None, :, None, None] + shift[None, :, None, None]

    def conv(x, w, b):
        y = jax.lax.conv_general_dilated(
            x, w, (1, 1), ((1, 1), (1, 1)),
            dimension_numbers=("NCHW", "OIHW", "NCHW"))
        return y + b[None, :, None, None]

    h = jax.nn.relu(conv(x, p["conv1_w"], p["conv1_b"]))
    h = jax.lax.reduce_window(h, -jnp.inf, jax.lax.max,
                              (1, 1, 2, 2), (1, 1, 2, 2), "VALID")
    h = jax.nn.relu(conv(h, p["res1a_w"], p["res1a_b"]))
    h = conv(h, p["res1b_w"], p["res1b_b"])
    flat = h.reshape(h.shape[0], -1)
    f = jax.nn.relu(flat @ p["fc1_w"].T + p["fc1_b"])
    return f @ p["fc2_w"].T + p["fc2_b"]


if __name__ == "__main__":
    key = jax.random.PRNGKey(0)
    k_x, k_p = jax.random.split(key)
    # Input shape fixed by the module: (B, 3, 64, 64); fc1 expects 16*32*32 features.
    x = jax.random.normal(k_x, (2, 3, 64, 64), dtype=jnp.float32)
    raw_params = init_params(k_p)
    params = prepare_params(raw_params)          # one-time weight re-layout

    fwd = jax.jit(cnn_classifier_forward)
    out = jax.block_until_ready(fwd(x, params))
    assert out.shape == (2, 6)

    ref = jax.block_until_ready(reference_forward(x, raw_params))
    np.testing.assert_allclose(np.asarray(out), np.asarray(ref), rtol=1e-2, atol=2e-3)

    print("KERNEL_OK")
</pallas_src>

<mosaic_0001>
module attributes {stable_mosaic.version = 11 : i64} {
  func.func @_conv1_relu_pool_kernel(%arg0: i32, %arg1: memref<1x4x1024x27xf32, #tpu.memory_space<vmem>>, %arg2: memref<27x16xf32, #tpu.memory_space<vmem>>, %arg3: memref<1x16xf32, #tpu.memory_space<vmem>>, %arg4: memref<1x1024x16xf32, #tpu.memory_space<vmem>>) attributes {dimension_semantics = [#tpu.dimension_semantics<parallel>], iteration_bounds = array<i64: 2>, scalar_prefetch = 0 : i64, scratch_operands = 0 : i64, tpu.core_type = #tpu.core_type<tc>, window_params = [{transform_indices = @transform_0, window_bounds = array<i64: 1, 4, 1024, 27>}, {pipeline_mode = #tpu.pipeline_mode<synchronous>, transform_indices = @transform_1, window_bounds = array<i64: 27, 16>}, {pipeline_mode = #tpu.pipeline_mode<synchronous>, transform_indices = @transform_2, window_bounds = array<i64: 1, 16>}, {transform_indices = @transform_3, window_bounds = array<i64: 1, 1024, 16>}]} {
    %c0 = arith.constant 0 : index
    %c0_0 = arith.constant 0 : index
    %0 = vector.load %arg2[%c0, %c0_0] : memref<27x16xf32, #tpu.memory_space<vmem>>, vector<27x16xf32>
    %c0_1 = arith.constant 0 : index
    %c0_2 = arith.constant 0 : index
    %1 = vector.load %arg3[%c0_1, %c0_2] : memref<1x16xf32, #tpu.memory_space<vmem>>, vector<1x16xf32>
    %c0_3 = arith.constant 0 : index
    %c0_4 = arith.constant 0 : index
    %c0_5 = arith.constant 0 : index
    %c0_6 = arith.constant 0 : index
    %2 = vector.load %arg1[%c0_3, %c0_4, %c0_5, %c0_6] : memref<1x4x1024x27xf32, #tpu.memory_space<vmem>>, vector<1x1x1024x27xf32>
    %3 = vector.shape_cast %2 : vector<1x1x1024x27xf32> to vector<1024x27xf32>
    %cst = arith.constant dense<0.000000e+00> : vector<1024x16xf32>
    %4 = tpu.matmul %3, %0, %cst {dimension_numbers = #tpu.dot_dimension_numbers<[1], [0], [0], [1], [0, 0, 1, 1], [], []>} : vector<1024x27xf32>, vector<27x16xf32>, vector<1024x16xf32> -> vector<1024x16xf32>
    %5 = vector.broadcast %1 : vector<1x16xf32> to vector<1024x16xf32>
    %6 = arith.addf %4, %5 : vector<1024x16xf32>
    %cst_7 = arith.constant 0.000000e+00 : f32
    %7 = vector.broadcast %cst_7 : f32 to vector<1024x16xf32>
    %8 = arith.maximumf %6, %7 : vector<1024x16xf32>
    %c0_8 = arith.constant 0 : index
    %c1 = arith.constant 1 : index
    %c0_9 = arith.constant 0 : index
    %c0_10 = arith.constant 0 : index
    %9 = vector.load %arg1[%c0_8, %c1, %c0_9, %c0_10] : memref<1x4x1024x27xf32, #tpu.memory_space<vmem>>, vector<1x1x1024x27xf32>
    %10 = vector.shape_cast %9 : vector<1x1x1024x27xf32> to vector<1024x27xf32>
    %cst_11 = arith.constant dense<0.000000e+00> : vector<1024x16xf32>
    %11 = tpu.matmul %10, %0, %cst_11 {dimension_numbers = #tpu.dot_dimension_numbers<[1], [0], [0], [1], [0, 0, 1, 1], [], []>} : vector<1024x27xf32>, vector<27x16xf32>, vector<1024x16xf32> -> vector<1024x16xf32>
    %12 = vector.broadcast %1 : vector<1x16xf32> to vector<1024x16xf32>
    %13 = arith.addf %11, %12 : vector<1024x16xf32>
    %cst_12 = arith.constant 0.000000e+00 : f32
    %14 = vector.broadcast %cst_12 : f32 to vector<1024x16xf32>
    %15 = arith.maximumf %13, %14 : vector<1024x16xf32>
    %16 = arith.maximumf %8, %15 : vector<1024x16xf32>
    %c0_13 = arith.constant 0 : index
    %c2 = arith.constant 2 : index
    %c0_14 = arith.constant 0 : index
    %c0_15 = arith.constant 0 : index
    %17 = vector.load %arg1[%c0_13, %c2, %c0_14, %c0_15] : memref<1x4x1024x27xf32, #tpu.memory_space<vmem>>, vector<1x1x1024x27xf32>
    %18 = vector.shape_cast %17 : vector<1x1x1024x27xf32> to vector<1024x27xf32>
    %cst_16 = arith.constant dense<0.000000e+00> : vector<1024x16xf32>
    %19 = tpu.matmul %18, %0, %cst_16 {dimension_numbers = #tpu.dot_dimension_numbers<[1], [0], [0], [1], [0, 0, 1, 1], [], []>} : vector<1024x27xf32>, vector<27x16xf32>, vector<1024x16xf32> -> vector<1024x16xf32>
    %20 = vector.broadcast %1 : vector<1x16xf32> to vector<1024x16xf32>
    %21 = arith.addf %19, %20 : vector<1024x16xf32>
    %cst_17 = arith.constant 0.000000e+00 : f32
    %22 = vector.broadcast %cst_17 : f32 to vector<1024x16xf32>
    %23 = arith.maximumf %21, %22 : vector<1024x16xf32>
    %c0_18 = arith.constant 0 : index
    %c3 = arith.constant 3 : index
    %c0_19 = arith.constant 0 : index
    %c0_20 = arith.constant 0 : index
    %24 = vector.load %arg1[%c0_18, %c3, %c0_19, %c0_20] : memref<1x4x1024x27xf32, #tpu.memory_space<vmem>>, vector<1x1x1024x27xf32>
    %25 = vector.shape_cast %24 : vector<1x1x1024x27xf32> to vector<1024x27xf32>
    %cst_21 = arith.constant dense<0.000000e+00> : vector<1024x16xf32>
    %26 = tpu.matmul %25, %0, %cst_21 {dimension_numbers = #tpu.dot_dimension_numbers<[1], [0], [0], [1], [0, 0, 1, 1], [], []>} : vector<1024x27xf32>, vector<27x16xf32>, vector<1024x16xf32> -> vector<1024x16xf32>
    %27 = vector.broadcast %1 : vector<1x16xf32> to vector<1024x16xf32>
    %28 = arith.addf %26, %27 : vector<1024x16xf32>
    %cst_22 = arith.constant 0.000000e+00 : f32
    %29 = vector.broadcast %cst_22 : f32 to vector<1024x16xf32>
    %30 = arith.maximumf %28, %29 : vector<1024x16xf32>
    %31 = arith.maximumf %23, %30 : vector<1024x16xf32>
    %32 = arith.maximumf %16, %31 : vector<1024x16xf32>
    %c0_23 = arith.constant 0 : index
    %c0_24 = arith.constant 0 : index
    %c0_25 = arith.constant 0 : index
    %33 = vector.load %arg4[%c0_23, %c0_24, %c0_25] : memref<1x1024x16xf32, #tpu.memory_space<vmem>>, vector<1x1024x16xf32>
    %34 = vector.shape_cast %33 : vector<1x1024x16xf32> to vector<1024x16xf32>
    %35 = vector.shape_cast %32 : vector<1024x16xf32> to vector<1x1024x16xf32>
    tpu.vector_store %arg4[%c0_23, %c0_24, %c0_25], %35 {strides = array<i32>} : memref<1x1024x16xf32, #tpu.memory_space<vmem>>, vector<1x1024x16xf32>,
    return
  }
  func.func @transform_0(%arg0: i32) -> (i32, i32, i32, i32) {
    %c0_i32 = arith.constant 0 : i32
    %c0_i32_0 = arith.constant 0 : i32
    %c0_i32_1 = arith.constant 0 : i32
    %c0_i32_2 = arith.constant 0 : i32
    return %arg0, %c0_i32, %c0_i32_0, %c0_i32_1 : i32, i32, i32, i32
  }
  func.func @transform_1(%arg0: i32) -> (i32, i32) {
    %c0_i32 = arith.constant 0 : i32
    %c0_i32_0 = arith.constant 0 : i32
    %c0_i32_1 = arith.constant 0 : i32
    return %c0_i32, %c0_i32_0 : i32, i32
  }
  func.func @transform_2(%arg0: i32) -> (i32, i32) {
    %c0_i32 = arith.constant 0 : i32
    %c0_i32_0 = arith.constant 0 : i32
    %c0_i32_1 = arith.constant 0 : i32
    return %c0_i32, %c0_i32_0 : i32, i32
  }
  func.func @transform_3(%arg0: i32) -> (i32, i32, i32) {
    %c0_i32 = arith.constant 0 : i32
    %c0_i32_0 = arith.constant 0 : i32
    %c0_i32_1 = arith.constant 0 : i32
    return %arg0, %c0_i32, %c0_i32_0 : i32, i32, i32
  }
}

module attributes {stable_mosaic.version = 11 : i64} {
  func.func @_gemm_bias_kernel(%arg0: i32, %arg1: memref<1024x144xf32, #tpu.memory_space<vmem>>, %arg2: memref<144x16xf32, #tpu.memory_space<vmem>>, %arg3: memref<1x16xf32, #tpu.memory_space<vmem>>, %arg4: memref<1024x16xf32, #tpu.memory_space<vmem>>) attributes {dimension_semantics = [#tpu.dimension_semantics<parallel>], iteration_bounds = array<i64: 2>, scalar_prefetch = 0 : i64, scratch_operands = 0 : i64, tpu.core_type = #tpu.core_type<tc>, window_params = [{transform_indices = @transform_0, window_bounds = array<i64: 1024, 144>}, {pipeline_mode = #tpu.pipeline_mode<synchronous>, transform_indices = @transform_1, window_bounds = array<i64: 144, 16>}, {pipeline_mode = #tpu.pipeline_mode<synchronous>, transform_indices = @transform_2, window_bounds = array<i64: 1, 16>}, {transform_indices = @transform_3, window_bounds = array<i64: 1024, 16>}]} {
    %c0 = arith.constant 0 : index
    %c0_0 = arith.constant 0 : index
    %0 = vector.load %arg1[%c0, %c0_0] : memref<1024x144xf32, #tpu.memory_space<vmem>>, vector<1024x144xf32>
    %c0_1 = arith.constant 0 : index
    %c0_2 = arith.constant 0 : index
    %1 = vector.load %arg2[%c0_1, %c0_2] : memref<144x16xf32, #tpu.memory_space<vmem>>, vector<144x16xf32>
    %cst = arith.constant dense<0.000000e+00> : vector<1024x16xf32>
    %2 = tpu.matmul %0, %1, %cst {dimension_numbers = #tpu.dot_dimension_numbers<[1], [0], [0], [1], [0, 0, 1, 1], [], []>} : vector<1024x144xf32>, vector<144x16xf32>, vector<1024x16xf32> -> vector<1024x16xf32>
    %c0_3 = arith.constant 0 : index
    %c0_4 = arith.constant 0 : index
    %3 = vector.load %arg3[%c0_3, %c0_4] : memref<1x16xf32, #tpu.memory_space<vmem>>, vector<1x16xf32>
    %4 = vector.broadcast %3 : vector<1x16xf32> to vector<1024x16xf32>
    %5 = arith.addf %2, %4 : vector<1024x16xf32>
    %cst_5 = arith.constant 0.000000e+00 : f32
    %6 = vector.broadcast %cst_5 : f32 to vector<1024x16xf32>
    %7 = arith.maximumf %5, %6 : vector<1024x16xf32>
    %c0_6 = arith.constant 0 : index
    %c0_7 = arith.constant 0 : index
    %8 = vector.load %arg4[%c0_6, %c0_7] : memref<1024x16xf32, #tpu.memory_space<vmem>>, vector<1024x16xf32>
    tpu.vector_store %arg4[%c0_6, %c0_7], %7 {strides = array<i32>} : memref<1024x16xf32, #tpu.memory_space<vmem>>, vector<1024x16xf32>,
    return
  }
  func.func @transform_0(%arg0: i32) -> (i32, i32) {
    %c0_i32 = arith.constant 0 : i32
    %c0_i32_0 = arith.constant 0 : i32
    return %arg0, %c0_i32 : i32, i32
  }
  func.func @transform_1(%arg0: i32) -> (i32, i32) {
    %c0_i32 = arith.constant 0 : i32
    %c0_i32_0 = arith.constant 0 : i32
    %c0_i32_1 = arith.constant 0 : i32
    return %c0_i32, %c0_i32_0 : i32, i32
  }
  func.func @transform_2(%arg0: i32) -> (i32, i32) {
    %c0_i32 = arith.constant 0 : i32
    %c0_i32_0 = arith.constant 0 : i32
    %c0_i32_1 = arith.constant 0 : i32
    return %c0_i32, %c0_i32_0 : i32, i32
  }
  func.func @transform_3(%arg0: i32) -> (i32, i32) {
    %c0_i32 = arith.constant 0 : i32
    %c0_i32_0 = arith.constant 0 : i32
    return %arg0, %c0_i32 : i32, i32
  }
}

module attributes {stable_mosaic.version = 11 : i64} {
  func.func @_gemm_bias_kernel(%arg0: i32, %arg1: memref<1024x144xf32, #tpu.memory_space<vmem>>, %arg2: memref<144x16xf32, #tpu.memory_space<vmem>>, %arg3: memref<1x16xf32, #tpu.memory_space<vmem>>, %arg4: memref<1024x16xf32, #tpu.memory_space<vmem>>) attributes {dimension_semantics = [#tpu.dimension_semantics<parallel>], iteration_bounds = array<i64: 2>, scalar_prefetch = 0 : i64, scratch_operands = 0 : i64, tpu.core_type = #tpu.core_type<tc>, window_params = [{transform_indices = @transform_0, window_bounds = array<i64: 1024, 144>}, {pipeline_mode = #tpu.pipeline_mode<synchronous>, transform_indices = @transform_1, window_bounds = array<i64: 144, 16>}, {pipeline_mode = #tpu.pipeline_mode<synchronous>, transform_indices = @transform_2, window_bounds = array<i64: 1, 16>}, {transform_indices = @transform_3, window_bounds = array<i64: 1024, 16>}]} {
    %c0 = arith.constant 0 : index
    %c0_0 = arith.constant 0 : index
    %0 = vector.load %arg1[%c0, %c0_0] : memref<1024x144xf32, #tpu.memory_space<vmem>>, vector<1024x144xf32>
    %c0_1 = arith.constant 0 : index
    %c0_2 = arith.constant 0 : index
    %1 = vector.load %arg2[%c0_1, %c0_2] : memref<144x16xf32, #tpu.memory_space<vmem>>, vector<144x16xf32>
    %cst = arith.constant dense<0.000000e+00> : vector<1024x16xf32>
    %2 = tpu.matmul %0, %1, %cst {dimension_numbers = #tpu.dot_dimension_numbers<[1], [0], [0], [1], [0, 0, 1, 1], [], []>} : vector<1024x144xf32>, vector<144x16xf32>, vector<1024x16xf32> -> vector<1024x16xf32>
    %c0_3 = arith.constant 0 : index
    %c0_4 = arith.constant 0 : index
    %3 = vector.load %arg3[%c0_3, %c0_4] : memref<1x16xf32, #tpu.memory_space<vmem>>, vector<1x16xf32>
    %4 = vector.broadcast %3 : vector<1x16xf32> to vector<1024x16xf32>
    %5 = arith.addf %2, %4 : vector<1024x16xf32>
    %c0_5 = arith.constant 0 : index
    %c0_6 = arith.constant 0 : index
    %6 = vector.load %arg4[%c0_5, %c0_6] : memref<1024x16xf32, #tpu.memory_space<vmem>>, vector<1024x16xf32>
    tpu.vector_store %arg4[%c0_5, %c0_6], %5 {strides = array<i32>} : memref<1024x16xf32, #tpu.memory_space<vmem>>, vector<1024x16xf32>,
    return
  }
  func.func @transform_0(%arg0: i32) -> (i32, i32) {
    %c0_i32 = arith.constant 0 : i32
    %c0_i32_0 = arith.constant 0 : i32
    return %arg0, %c0_i32 : i32, i32
  }
  func.func @transform_1(%arg0: i32) -> (i32, i32) {
    %c0_i32 = arith.constant 0 : i32
    %c0_i32_0 = arith.constant 0 : i32
    %c0_i32_1 = arith.constant 0 : i32
    return %c0_i32, %c0_i32_0 : i32, i32
  }
  func.func @transform_2(%arg0: i32) -> (i32, i32) {
    %c0_i32 = arith.constant 0 : i32
    %c0_i32_0 = arith.constant 0 : i32
    %c0_i32_1 = arith.constant 0 : i32
    return %c0_i32, %c0_i32_0 : i32, i32
  }
  func.func @transform_3(%arg0: i32) -> (i32, i32) {
    %c0_i32 = arith.constant 0 : i32
    %c0_i32_0 = arith.constant 0 : i32
    return %arg0, %c0_i32 : i32, i32
  }
}

module attributes {stable_mosaic.version = 11 : i64} {
  func.func @_fc_fused_kernel(%arg0: i32, %arg1: memref<2x2048xf32, #tpu.memory_space<vmem>>, %arg2: memref<2048x128xf32, #tpu.memory_space<vmem>>, %arg3: memref<1x128xf32, #tpu.memory_space<vmem>>, %arg4: memref<128x6xf32, #tpu.memory_space<vmem>>, %arg5: memref<1x6xf32, #tpu.memory_space<vmem>>, %arg6: memref<2x6xf32, #tpu.memory_space<vmem>>, %arg7: memref<2x128xf32, #tpu.memory_space<vmem>>) attributes {dimension_semantics = [#tpu.dimension_semantics<arbitrary>], iteration_bounds = array<i64: 8>, scalar_prefetch = 0 : i64, scratch_operands = 1 : i64, tpu.core_type = #tpu.core_type<tc>, window_params = [{transform_indices = @transform_0, window_bounds = array<i64: 2, 2048>}, {transform_indices = @transform_1, window_bounds = array<i64: 2048, 128>}, {pipeline_mode = #tpu.pipeline_mode<synchronous>, transform_indices = @transform_2, window_bounds = array<i64: 1, 128>}, {pipeline_mode = #tpu.pipeline_mode<synchronous>, transform_indices = @transform_3, window_bounds = array<i64: 128, 6>}, {pipeline_mode = #tpu.pipeline_mode<synchronous>, transform_indices = @transform_4, window_bounds = array<i64: 1, 6>}, {pipeline_mode = #tpu.pipeline_mode<synchronous>, transform_indices = @transform_5, window_bounds = array<i64: 2, 6>}]} {
    %c0_i32 = arith.constant 0 : i32
    %0 = arith.cmpi eq, %arg0, %c0_i32 : i32
    %1 = arith.extui %0 : i1 to i32
    %c0_i32_0 = arith.constant 0 : i32
    %2 = arith.cmpi ne, %1, %c0_i32_0 : i32
    scf.if %2 {
      %cst_9 = arith.constant 0.000000e+00 : f32
      %12 = vector.broadcast %cst_9 : f32 to vector<2x128xf32>
      %c0_10 = arith.constant 0 : index
      %c0_11 = arith.constant 0 : index
      %13 = vector.load %arg7[%c0_10, %c0_11] : memref<2x128xf32, #tpu.memory_space<vmem>>, vector<2x128xf32>
      tpu.vector_store %arg7[%c0_10, %c0_11], %12 {strides = array<i32>} : memref<2x128xf32, #tpu.memory_space<vmem>>, vector<2x128xf32>,
    } else {
    }
    %c0 = arith.constant 0 : index
    %c0_1 = arith.constant 0 : index
    %3 = vector.load %arg7[%c0, %c0_1] : memref<2x128xf32, #tpu.memory_space<vmem>>, vector<2x128xf32>
    %c0_2 = arith.constant 0 : index
    %c0_3 = arith.constant 0 : index
    %4 = vector.load %arg1[%c0_2, %c0_3] : memref<2x2048xf32, #tpu.memory_space<vmem>>, vector<2x2048xf32>
    %c0_4 = arith.constant 0 : index
    %c0_5 = arith.constant 0 : index
    %5 = vector.load %arg2[%c0_4, %c0_5] : memref<2048x128xf32, #tpu.memory_space<vmem>>, vector<2048x128xf32>
    %cst = arith.constant dense<0.000000e+00> : vector<2x128xf32>
    %6 = tpu.matmul %4, %5, %cst {dimension_numbers = #tpu.dot_dimension_numbers<[1], [0], [0], [1], [0, 0, 1, 1], [], []>} : vector<2x2048xf32>, vector<2048x128xf32>, vector<2x128xf32> -> vector<2x128xf32>
    %7 = arith.addf %3, %6 : vector<2x128xf32>
    %c0_6 = arith.constant 0 : index
    %c0_7 = arith.constant 0 : index
    %8 = vector.load %arg7[%c0_6, %c0_7] : memref<2x128xf32, #tpu.memory_space<vmem>>, vector<2x128xf32>
    tpu.vector_store %arg7[%c0_6, %c0_7], %7 {strides = array<i32>} : memref<2x128xf32, #tpu.memory_space<vmem>>, vector<2x128xf32>,
    %c7_i32 = arith.constant 7 : i32
    %9 = arith.cmpi eq, %arg0, %c7_i32 : i32
    %10 = arith.extui %9 : i1 to i32
    %c0_i32_8 = arith.constant 0 : i32
    %11 = arith.cmpi ne, %10, %c0_i32_8 : i32
    scf.if %11 {
      %c0_9 = arith.constant 0 : index
      %c0_10 = arith.constant 0 : index
      %12 = vector.load %arg7[%c0_9, %c0_10] : memref<2x128xf32, #tpu.memory_space<vmem>>, vector<2x128xf32>
      %c0_11 = arith.constant 0 : index
      %c0_12 = arith.constant 0 : index
      %13 = vector.load %arg3[%c0_11, %c0_12] : memref<1x128xf32, #tpu.memory_space<vmem>>, vector<1x128xf32>
      %14 = vector.broadcast %13 : vector<1x128xf32> to vector<2x128xf32>
      %15 = arith.addf %12, %14 : vector<2x128xf32>
      %cst_13 = arith.constant 0.000000e+00 : f32
      %16 = vector.broadcast %cst_13 : f32 to vector<2x128xf32>
      %17 = arith.maximumf %15, %16 : vector<2x128xf32>
      %c0_14 = arith.constant 0 : index
      %c0_15 = arith.constant 0 : index
      %18 = vector.load %arg4[%c0_14, %c0_15] : memref<128x6xf32, #tpu.memory_space<vmem>>, vector<128x6xf32>
      %cst_16 = arith.constant dense<0.000000e+00> : vector<2x6xf32>
      %19 = tpu.matmul %17, %18, %cst_16 {dimension_numbers = #tpu.dot_dimension_numbers<[1], [0], [0], [1], [0, 0, 1, 1], [], []>} : vector<2x128xf32>, vector<128x6xf32>, vector<2x6xf32> -> vector<2x6xf32>
      %c0_17 = arith.constant 0 : index
      %c0_18 = arith.constant 0 : index
      %20 = vector.load %arg5[%c0_17, %c0_18] : memref<1x6xf32, #tpu.memory_space<vmem>>, vector<1x6xf32>
      %21 = vector.broadcast %20 : vector<1x6xf32> to vector<2x6xf32>
      %22 = arith.addf %19, %21 : vector<2x6xf32>
      %c0_19 = arith.constant 0 : index
      %c0_20 = arith.constant 0 : index
      %23 = vector.load %arg6[%c0_19, %c0_20] : memref<2x6xf32, #tpu.memory_space<vmem>>, vector<2x6xf32>
      tpu.vector_store %arg6[%c0_19, %c0_20], %22 {strides = array<i32>} : memref<2x6xf32, #tpu.memory_space<vmem>>, vector<2x6xf32>,
    } else {
    }
    return
  }
  func.func @transform_0(%arg0: i32) -> (i32, i32) {
    %c0_i32 = arith.constant 0 : i32
    %c0_i32_0 = arith.constant 0 : i32
    return %c0_i32, %arg0 : i32, i32
  }
  func.func @transform_1(%arg0: i32) -> (i32, i32) {
    %c0_i32 = arith.constant 0 : i32
    %c0_i32_0 = arith.constant 0 : i32
    return %arg0, %c0_i32 : i32, i32
  }
  func.func @transform_2(%arg0: i32) -> (i32, i32) {
    %c0_i32 = arith.constant 0 : i32
    %c0_i32_0 = arith.constant 0 : i32
    %c0_i32_1 = arith.constant 0 : i32
    return %c0_i32, %c0_i32_0 : i32, i32
  }
  func.func @transform_3(%arg0: i32) -> (i32, i32) {
    %c0_i32 = arith.constant 0 : i32
    %c0_i32_0 = arith.constant 0 : i32
    %c0_i32_1 = arith.constant 0 : i32
    return %c0_i32, %c0_i32_0 : i32, i32
  }
  func.func @transform_4(%arg0: i32) -> (i32, i32) {
    %c0_i32 = arith.constant 0 : i32
    %c0_i32_0 = arith.constant 0 : i32
    %c0_i32_1 = arith.constant 0 : i32
    return %c0_i32, %c0_i32_0 : i32, i32
  }
  func.func @transform_5(%arg0: i32) -> (i32, i32) {
    %c0_i32 = arith.constant 0 : i32
    %c0_i32_0 = arith.constant 0 : i32
    %c0_i32_1 = arith.constant 0 : i32
    return %c0_i32, %c0_i32_0 : i32, i32
  }
}

</mosaic_0001>

<bundles_post_ra>
// kernel: cnn_classifier_forward.4
= control target key start
LH: loop header
LB: loop body
LE: loop exit
PB: predicated region body
PF: predicated region fallthrough
CT: control target
= control target key end

     0   :  { %s8421_s12 = smov 0   ;;  %s10682_s0 = inlined_call_operand.vmem [shape: f32[2,4,1024,27], index: 0, kind: input, shape index: {}]   ;;  %s10683_s1 = inlined_call_operand.vmem [shape: f32[27,16], index: 1, kind: input, shape index: {}]   ;;  %s10684_s2 = inlined_call_operand.vmem [shape: f32[1,16], index: 2, kind: input, shape index: {}]   ;;  %s10685_s3 = inlined_call_operand.vmem [shape: f32[2,1024,16], index: 3, kind: output, shape index: {}]  }
   0x1 LB: > { %s6138_s13 = sadd.s32 4294967295, %s8399_s12   ;;  %p6142_p0 = scmp.ge.s32.totalorder %s8399_s12, 1  ;;  %s8399_s12 = sphi %s8421_s12, %s13_s12  }
   0x2   : > { %p137_p1 = scmp.lt.s32.totalorder %s8399_s12, 3 }
   0x4   : > { %p138_p2 = pnand %p6142_p0, %p137_p1 }
   0x6   : > { %141 = sbr.rel (%p138_p2) target bundleno = 734 (0x2de), region = 32 }
   0xb   : > { %v174_v0 = vld [vmem:[%s10683_s1 + $0x18] sm:$0x7]  ;;  %vm695_vm0 = vcmask 1042432   ;;  %v173_v1 = vld [vmem:[%s10683_s1 + $0x10] sm:$0xff]  ;;  %p161_p3 = scmp.lt.s32.totalorder %s6138_s13, 1  ;;  %v172_v2 = vld [vmem:[%s10683_s1 + $0x8] sm:$0xff] }
   0xc   : > { %7580 = vmatprep.subr.msk.mxu0 %vm695_vm0, %v174_v0  ;;  %7780 = vmatprep.subr.msk.mxu1 %vm695_vm0, %v174_v0  ;;  %v8447_v3 = vld [vmem:[%s10683_s1] sm:$0xff]  ;;  %vm310_vm1 = vcmask 220160   ;;  %vm5954_vm2 = vcmask 130048  }
   0xd   : > { %7581 = vmatpush3.msk.msra.mxu0 %vm695_vm0, %v174_v0  ;;  %7781 = vmatpush3.msk.msra.mxu1 %vm695_vm0, %v174_v0  ;;  %s10857_s13 = smov (!%p161_p3, %s6138_s13), 1 }
   0xe   : > { %7582 = vmatprep.subr.mxu0 %v173_v1  ;;  %7782 = vmatprep.subr.mxu1 %v173_v1  ;;  %s7050_s22 = sshll.u32 %s10857_s13, 12  ;;  %s7051_s5 = sshll.u32 %s10857_s13, 10 }
   0xf   : > { %7583 = vmatpush3.msra.mxu0 %v173_v1  ;;  %7783 = vmatpush3.msra.mxu1 %v173_v1  ;;  %s8453_s25 = scalar_lea.vmem %s10682_s0, %s7050_s22  ;;  %s9924_s8 = scalar_lea.vmem %s10685_s3, %s7051_s5 }
  0x10   : > { %7584 = vmatprep.subr.mxu0 %v172_v2  ;;  %7784 = vmatprep.subr.mxu1 %v172_v2  ;;  %v176_v4 = vld [vmem:[%s8453_s25] sm:$0xff]  ;;  %v177_v6 = vld [vmem:[%s8453_s25 + $0x8] sm:$0xff]  ;;  %v178_v8 = vld [vmem:[%s8453_s25 + $0x10] sm:$0xff] }
  0x11   : > { %7585 = vmatpush3.msra.mxu0 %v172_v2  ;;  %7785 = vmatpush3.msra.mxu1 %v172_v2  ;;  %v6277_v5 = vld [vmem:[%s8453_s25 + $0x400] sm:$0xff]  ;;  %v6278_v7 = vld [vmem:[%s8453_s25 + $0x408] sm:$0xff]  ;;  %v6279_v9 = vld [vmem:[%s8453_s25 + $0x410] sm:$0xff] }
  0x12   : > { %7586 = vmatprep.subr.mxu0 %v8447_v3  ;;  %7786 = vmatprep.subr.mxu1 %v8447_v3  ;;  %v179_v10 = vld [vmem:[%s8453_s25 + $0x18] sm:$0xff]  ;;  %v180_v12 = vld [vmem:[%s8453_s25 + $0x20] sm:$0xff]  ;;  %v181_v14 = vld [vmem:[%s8453_s25 + $0x28] sm:$0xff] }
  0x13   : > { %7587 = vmatpush3.msra.mxu0 %v8447_v3  ;;  %7588 = vmatprep.mubr.msk.f32.mxu0 %vm310_vm1, %v176_v4  ;;  %v6280_v11 = vld [vmem:[%s8453_s25 + $0x418] sm:$0xff]  ;;  %v6281_v13 = vld [vmem:[%s8453_s25 + $0x420] sm:$0xff]  ;;  %v6282_v15 = vld [vmem:[%s8453_s25 + $0x428] sm:$0xff] }
  0x14   : > { %7787 = vmatpush3.msra.mxu1 %v8447_v3  ;;  %7788 = vmatprep.mubr.msk.f32.mxu1 %vm310_vm1, %v6277_v5  ;;  %v182_v16 = vld [vmem:[%s8453_s25 + $0x30] sm:$0xff]  ;;  %v183_v18 = vld [vmem:[%s8453_s25 + $0x38] sm:$0xff]  ;;  %v184_v20 = vld [vmem:[%s8453_s25 + $0x40] sm:$0xff] }
  0x15   : > { %7589 = vmatmul.mubr.msk.f32.vlgmr.msra.gmra.mxu0 %vm310_vm1, %v177_v6  ;;  %7789 = vmatmul.mubr.msk.f32.vlgmr.msra.gmra.mxu1 %vm310_vm1, %v6278_v7  ;;  %v6283_v17 = vld [vmem:[%s8453_s25 + $0x430] sm:$0xff]  ;;  %v6284_v19 = vld [vmem:[%s8453_s25 + $0x438] sm:$0xff]  ;;  %v6285_v21 = vld [vmem:[%s8453_s25 + $0x440] sm:$0xff] }
  0x16   : > { %7980 = vmatprep.subr.msk.mxu0 %vm695_vm0, %v174_v0  ;;  %8180 = vmatprep.subr.msk.mxu1 %vm695_vm0, %v174_v0  ;;  %v185_v22 = vld [vmem:[%s8453_s25 + $0x48] sm:$0xff]  ;;  %v186_v24 = vld [vmem:[%s8453_s25 + $0x50] sm:$0xff]  ;;  %v187_v26 = vld [vmem:[%s8453_s25 + $0x58] sm:$0xff] }
  0x17   : > { %7981 = vmatpush3.msk.msra.mxu0 %vm695_vm0, %v174_v0  ;;  %8181 = vmatpush3.msk.msra.mxu1 %vm695_vm0, %v174_v0  ;;  %v6286_v23 = vld [vmem:[%s8453_s25 + $0x448] sm:$0xff]  ;;  %v6287_v25 = vld [vmem:[%s8453_s25 + $0x450] sm:$0xff]  ;;  %v6288_v27 = vld [vmem:[%s8453_s25 + $0x458] sm:$0xff] }
  0x18   : > { %7591 = vmatprep.mubr.msk.f32.mxu0 %vm310_vm1, %v178_v8  ;;  %7791 = vmatprep.mubr.msk.f32.mxu1 %vm310_vm1, %v6279_v9  ;;  %v188_v28 = vld [vmem:[%s8453_s25 + $0x60] sm:$0xff]  ;;  %v189_v30 = vld [vmem:[%s8453_s25 + $0x68] sm:$0xff]  ;;  %v190_v32 = vld [vmem:[%s8453_s25 + $0x70] sm:$0xff] }
  0x19   : > { %7592 = vmatmul.mubr.msk.f32.gmra.mxu0 %vm310_vm1, %v179_v10  ;;  %7792 = vmatmul.mubr.msk.f32.gmra.mxu1 %vm310_vm1, %v6280_v11  ;;  %v6289_v29 = vld [vmem:[%s8453_s25 + $0x460] sm:$0xff]  ;;  %v6290_v31 = vld [vmem:[%s8453_s25 + $0x468] sm:$0xff]  ;;  %v6291_v33 = vld [vmem:[%s8453_s25 + $0x470] sm:$0xff] }
  0x1a   : > { %7594 = vmatprep.mubr.msk.f32.mxu0 %vm310_vm1, %v180_v12  ;;  %7794 = vmatprep.mubr.msk.f32.mxu1 %vm310_vm1, %v6281_v13  ;;  %v191_v34 = vld [vmem:[%s8453_s25 + $0x78] sm:$0xff]  ;;  %v192_v36 = vld [vmem:[%s8453_s25 + $0x80] sm:$0xff]  ;;  %v193_v38 = vld [vmem:[%s8453_s25 + $0x88] sm:$0xff] }
  0x1b   : > { %7982 = vmatprep.subr.mxu0 %v173_v1  ;;  %8182 = vmatprep.subr.mxu1 %v173_v1  ;;  %v6292_v35 = vld [vmem:[%s8453_s25 + $0x478] sm:$0xff]  ;;  %v6293_v37 = vld [vmem:[%s8453_s25 + $0x480] sm:$0xff]  ;;  %v6294_v39 = vld [vmem:[%s8453_s25 + $0x488] sm:$0xff] }
  0x1c   : > { %7983 = vmatpush3.msra.mxu0 %v173_v1  ;;  %8183 = vmatpush3.msra.mxu1 %v173_v1  ;;  %v194_v40 = vld [vmem:[%s8453_s25 + $0x90] sm:$0xff]  ;;  %v195_v42 = vld [vmem:[%s8453_s25 + $0x98] sm:$0xff]  ;;  %v196_v44 = vld [vmem:[%s8453_s25 + $0xa0] sm:$0xff] }
  0x1d   : > { %7595 = vmatmul.mubr.msk.f32.gmra.mxu0 %vm310_vm1, %v181_v14  ;;  %7795 = vmatmul.mubr.msk.f32.gmra.mxu1 %vm310_vm1, %v6282_v15  ;;  %v6295_v41 = vld [vmem:[%s8453_s25 + $0x490] sm:$0xff]  ;;  %v6296_v43 = vld [vmem:[%s8453_s25 + $0x498] sm:$0xff]  ;;  %v6297_v45 = vld [vmem:[%s8453_s25 + $0x4a0] sm:$0xff] }
  0x1e   : > { %7597 = vmatprep.mubr.msk.f32.mxu0 %vm310_vm1, %v182_v16  ;;  %7797 = vmatprep.mubr.msk.f32.mxu1 %vm310_vm1, %v6283_v17  ;;  %v197_v46 = vld [vmem:[%s8453_s25 + $0xa8] sm:$0xff]  ;;  %v198_v48 = vld [vmem:[%s8453_s25 + $0xb0] sm:$0xff]  ;;  %v199_v50 = vld [vmem:[%s8453_s25 + $0xb8] sm:$0xff] }
  0x1f   : > { %7984 = vmatprep.subr.mxu0 %v172_v2  ;;  %8184 = vmatprep.subr.mxu1 %v172_v2  ;;  %v6298_v47 = vld [vmem:[%s8453_s25 + $0x4a8] sm:$0xff]  ;;  %v6299_v49 = vld [vmem:[%s8453_s25 + $0x4b0] sm:$0xff]  ;;  %v6300_v51 = vld [vmem:[%s8453_s25 + $0x4b8] sm:$0xff] }
  0x20   : > { %7985 = vmatpush3.msra.mxu0 %v172_v2  ;;  %8185 = vmatpush3.msra.mxu1 %v172_v2  ;;  %v200_v52 = vld [vmem:[%s8453_s25 + $0xc0] sm:$0xff]  ;;  %v201_v54 = vld [vmem:[%s8453_s25 + $0xc8] sm:$0xff]  ;;  %v202_v56 = vld [vmem:[%s8453_s25 + $0xd0] sm:$0xff] }
  0x21   : > { %7598 = vmatmul.mubr.msk.f32.gmra.mxu0 %vm310_vm1, %v183_v18  ;;  %7798 = vmatmul.mubr.msk.f32.gmra.mxu1 %vm310_vm1, %v6284_v19  ;;  %v6301_v53 = vld [vmem:[%s8453_s25 + $0x4c0] sm:$0xff]  ;;  %v6302_v55 = vld [vmem:[%s8453_s25 + $0x4c8] sm:$0xff]  ;;  %v6303_v57 = vld [vmem:[%s8453_s25 + $0x4d0] sm:$0xff] }
  0x22   : > { %7600 = vmatprep.mubr.msk.f32.mxu0 %vm310_vm1, %v184_v20  ;;  %7800 = vmatprep.mubr.msk.f32.mxu1 %vm310_vm1, %v6285_v21  ;;  %v203_v58 = vld [vmem:[%s8453_s25 + $0xd8] sm:$0xff]  ;;  %v204_v60 = vld [vmem:[%s8453_s25 + $0xe0] sm:$0xff]  ;;  %v205_v62 = vld [vmem:[%s8453_s25 + $0xe8] sm:$0xff] }
  0x23   : > { %7986 = vmatprep.subr.mxu0 %v8447_v3  ;;  %8186 = vmatprep.subr.mxu1 %v8447_v3  ;;  %v6304_v59 = vld [vmem:[%s8453_s25 + $0x4d8] sm:$0xff]  ;;  %v6305_v61 = vld [vmem:[%s8453_s25 + $0x4e0] sm:$0xff]  ;;  %v6306_v63 = vld [vmem:[%s8453_s25 + $0x4e8] sm:$0xff] }
  0x24   : > { %7987 = vmatpush3.msra.mxu0 %v8447_v3  ;;  %8187 = vmatpush3.msra.mxu1 %v8447_v3  ;;  %v206_v0 = vld [vmem:[%s8453_s25 + $0xf0] sm:$0xff]  ;;  %v207_v2 = vld [vmem:[%s8453_s25 + $0xf8] sm:$0xff]  ;;  %v208_v4 = vld [vmem:[%s8453_s25 + $0x100] sm:$0xff] }
  0x25   : > { %7601 = vmatmul.mubr.msk.f32.gmra.mxu0 %vm310_vm1, %v185_v22  ;;  %7801 = vmatmul.mubr.msk.f32.gmra.mxu1 %vm310_vm1, %v6286_v23  ;;  %v6307_v1 = vld [vmem:[%s8453_s25 + $0x4f0] sm:$0xff]  ;;  %v6308_v3 = vld [vmem:[%s8453_s25 + $0x4f8] sm:$0xff]  ;;  %v6309_v5 = vld [vmem:[%s8453_s25 + $0x500] sm:$0xff] }
  0x26   : > { %7603 = vmatprep.mubr.msk.f32.mxu0 %vm310_vm1, %v186_v24  ;;  %7803 = vmatprep.mubr.msk.f32.mxu1 %vm310_vm1, %v6287_v25  ;;  %v209_v6 = vld [vmem:[%s8453_s25 + $0x108] sm:$0xff]  ;;  %v210_v8 = vld [vmem:[%s8453_s25 + $0x110] sm:$0xff]  ;;  %v211_v10 = vld [vmem:[%s8453_s25 + $0x118] sm:$0xff] }
  0x27   : > { %v6310_v7 = vld [vmem:[%s8453_s25 + $0x508] sm:$0xff]  ;;  %v6311_v9 = vld [vmem:[%s8453_s25 + $0x510] sm:$0xff]  ;;  %v6312_v11 = vld [vmem:[%s8453_s25 + $0x518] sm:$0xff] }
  0x28   : > { %v212_v12 = vld [vmem:[%s8453_s25 + $0x120] sm:$0xff]  ;;  %v213_v14 = vld [vmem:[%s8453_s25 + $0x128] sm:$0xff]  ;;  %v214_v16 = vld [vmem:[%s8453_s25 + $0x130] sm:$0xff] }
  0x29   : > { %7604 = vmatmul.mubr.msk.f32.gmra.mxu0 %vm310_vm1, %v187_v26  ;;  %7804 = vmatmul.mubr.msk.f32.gmra.mxu1 %vm310_vm1, %v6288_v27  ;;  %v6313_v13 = vld [vmem:[%s8453_s25 + $0x520] sm:$0xff]  ;;  %v6314_v15 = vld [vmem:[%s8453_s25 + $0x528] sm:$0xff]  ;;  %v6315_v17 = vld [vmem:[%s8453_s25 + $0x530] sm:$0xff] }
  0x2a   : > { %7606 = vmatprep.mubr.msk.f32.mxu0 %vm310_vm1, %v188_v28  ;;  %7806 = vmatprep.mubr.msk.f32.mxu1 %vm310_vm1, %v6289_v29  ;;  %v215_v18 = vld [vmem:[%s8453_s25 + $0x138] sm:$0xff]  ;;  %v216_v20 = vld [vmem:[%s8453_s25 + $0x140] sm:$0xff]  ;;  %v217_v22 = vld [vmem:[%s8453_s25 + $0x148] sm:$0xff] }
  0x2b   : > { %v6316_v19 = vld [vmem:[%s8453_s25 + $0x538] sm:$0xff]  ;;  %v6317_v21 = vld [vmem:[%s8453_s25 + $0x540] sm:$0xff]  ;;  %v6318_v23 = vld [vmem:[%s8453_s25 + $0x548] sm:$0xff] }
  0x2c   : > { %v218_v24 = vld [vmem:[%s8453_s25 + $0x150] sm:$0xff]  ;;  %v219_v26 = vld [vmem:[%s8453_s25 + $0x158] sm:$0xff]  ;;  %v220_v28 = vld [vmem:[%s8453_s25 + $0x160] sm:$0xff] }
  0x2d   : > { %7607 = vmatmul.mubr.msk.f32.gmra.mxu0 %vm310_vm1, %v189_v30  ;;  %7807 = vmatmul.mubr.msk.f32.gmra.mxu1 %vm310_vm1, %v6290_v31  ;;  %v6319_v25 = vld [vmem:[%s8453_s25 + $0x550] sm:$0xff]  ;;  %v6320_v27 = vld [vmem:[%s8453_s25 + $0x558] sm:$0xff]  ;;  %v6321_v29 = vld [vmem:[%s8453_s25 + $0x560] sm:$0xff] }
  0x2e   : > { %7609 = vmatprep.mubr.msk.f32.mxu0 %vm310_vm1, %v190_v32  ;;  %7809 = vmatprep.mubr.msk.f32.mxu1 %vm310_vm1, %v6291_v33  ;;  %v221_v30 = vld [vmem:[%s8453_s25 + $0x168] sm:$0xff]  ;;  %v222_v32 = vld [vmem:[%s8453_s25 + $0x170] sm:$0xff] }
  0x2f   : > { %v6322_v31 = vld [vmem:[%s8453_s25 + $0x568] sm:$0xff]  ;;  %v6323_v33 = vld [vmem:[%s8453_s25 + $0x570] sm:$0xff] }
  0x31   : > { %7610 = vmatmul.mubr.msk.f32.gmra.mxu0 %vm310_vm1, %v191_v34  ;;  %7810 = vmatmul.mubr.msk.f32.gmra.mxu1 %vm310_vm1, %v6292_v35  ;;  %v223_v34 = vld [vmem:[%s8453_s25 + $0x178] sm:$0xff] }
  0x32   : > { %7612 = vmatprep.mubr.msk.f32.mxu0 %vm310_vm1, %v192_v36  ;;  %7812 = vmatprep.mubr.msk.f32.mxu1 %vm310_vm1, %v6293_v37  ;;  %v6324_v35 = vld [vmem:[%s8453_s25 + $0x578] sm:$0xff]  ;;  %v224_v36 = vld [vmem:[%s8453_s25 + $0x180] sm:$0xff] }
  0x33   : > { %v6325_v37 = vld [vmem:[%s8453_s25 + $0x580] sm:$0xff] }
  0x35   : > { %7613 = vmatmul.mubr.msk.f32.gmra.mxu0 %vm310_vm1, %v193_v38  ;;  %7813 = vmatmul.mubr.msk.f32.gmra.mxu1 %vm310_vm1, %v6294_v39  ;;  %v225_v38 = vld [vmem:[%s8453_s25 + $0x188] sm:$0xff] }
  0x36   : > { %7615 = vmatprep.mubr.msk.f32.mxu0 %vm310_vm1, %v194_v40  ;;  %7815 = vmatprep.mubr.msk.f32.mxu1 %vm310_vm1, %v6295_v41  ;;  %v6326_v39 = vld [vmem:[%s8453_s25 + $0x588] sm:$0xff]  ;;  %v226_v40 = vld [vmem:[%s8453_s25 + $0x190] sm:$0xff] }
  0x37   : > { %v6327_v41 = vld [vmem:[%s8453_s25 + $0x590] sm:$0xff] }
  0x39   : > { %7616 = vmatmul.mubr.msk.f32.gmra.mxu0 %vm310_vm1, %v195_v42  ;;  %7816 = vmatmul.mubr.msk.f32.gmra.mxu1 %vm310_vm1, %v6296_v43  ;;  %v227_v42 = vld [vmem:[%s8453_s25 + $0x198] sm:$0xff] }
  0x3a   : > { %7618 = vmatprep.mubr.msk.f32.mxu0 %vm310_vm1, %v196_v44  ;;  %7818 = vmatprep.mubr.msk.f32.mxu1 %vm310_vm1, %v6297_v45  ;;  %v6328_v43 = vld [vmem:[%s8453_s25 + $0x598] sm:$0xff]  ;;  %v228_v44 = vld [vmem:[%s8453_s25 + $0x1a0] sm:$0xff] }
  0x3b   : > { %v6329_v45 = vld [vmem:[%s8453_s25 + $0x5a0] sm:$0xff] }
  0x3d   : > { %7619 = vmatmul.mubr.msk.f32.gmra.mxu0 %vm310_vm1, %v197_v46  ;;  %7819 = vmatmul.mubr.msk.f32.gmra.mxu1 %vm310_vm1, %v6298_v47  ;;  %v229_v46 = vld [vmem:[%s8453_s25 + $0x1a8] sm:$0xff] }
  0x3e   : > { %7621 = vmatprep.mubr.msk.f32.mxu0 %vm310_vm1, %v198_v48  ;;  %7821 = vmatprep.mubr.msk.f32.mxu1 %vm310_vm1, %v6299_v49  ;;  %v6330_v47 = vld [vmem:[%s8453_s25 + $0x5a8] sm:$0xff]  ;;  %v230_v48 = vld [vmem:[%s8453_s25 + $0x1b0] sm:$0xff] }
  0x3f   : > { %v6331_v49 = vld [vmem:[%s8453_s25 + $0x5b0] sm:$0xff] }
  0x41   : > { %7622 = vmatmul.mubr.msk.f32.gmra.mxu0 %vm310_vm1, %v199_v50  ;;  %7822 = vmatmul.mubr.msk.f32.gmra.mxu1 %vm310_vm1, %v6300_v51  ;;  %v231_v50 = vld [vmem:[%s8453_s25 + $0x1b8] sm:$0xff] }
  0x42   : > { %7624 = vmatprep.mubr.msk.f32.mxu0 %vm310_vm1, %v200_v52  ;;  %7824 = vmatprep.mubr.msk.f32.mxu1 %vm310_vm1, %v6301_v53  ;;  %v6332_v51 = vld [vmem:[%s8453_s25 + $0x5b8] sm:$0xff]  ;;  %v232_v52 = vld [vmem:[%s8453_s25 + $0x1c0] sm:$0xff] }
  0x43   : > { %v6333_v53 = vld [vmem:[%s8453_s25 + $0x5c0] sm:$0xff] }
  0x45   : > { %7625 = vmatmul.mubr.msk.f32.gmra.mxu0 %vm310_vm1, %v201_v54  ;;  %7825 = vmatmul.mubr.msk.f32.gmra.mxu1 %vm310_vm1, %v6302_v55  ;;  %v233_v54 = vld [vmem:[%s8453_s25 + $0x1c8] sm:$0xff] }
  0x46   : > { %7627 = vmatprep.mubr.msk.f32.mxu0 %vm310_vm1, %v202_v56  ;;  %7827 = vmatprep.mubr.msk.f32.mxu1 %vm310_vm1, %v6303_v57  ;;  %v6334_v55 = vld [vmem:[%s8453_s25 + $0x5c8] sm:$0xff]  ;;  %v234_v56 = vld [vmem:[%s8453_s25 + $0x1d0] sm:$0xff] }
  0x47   : > { %v6335_v57 = vld [vmem:[%s8453_s25 + $0x5d0] sm:$0xff] }
  0x49   : > { %7628 = vmatmul.mubr.msk.f32.gmra.mxu0 %vm310_vm1, %v203_v58  ;;  %7828 = vmatmul.mubr.msk.f32.gmra.mxu1 %vm310_vm1, %v6304_v59  ;;  %v235_v58 = vld [vmem:[%s8453_s25 + $0x1d8] sm:$0xff] }
  0x4a   : > { %7630 = vmatprep.mubr.msk.f32.mxu0 %vm310_vm1, %v204_v60  ;;  %7830 = vmatprep.mubr.msk.f32.mxu1 %vm310_vm1, %v6305_v61  ;;  %v6336_v59 = vld [vmem:[%s8453_s25 + $0x5d8] sm:$0xff]  ;;  %v236_v60 = vld [vmem:[%s8453_s25 + $0x1e0] sm:$0xff] }
  0x4b   : > { %v6337_v61 = vld [vmem:[%s8453_s25 + $0x5e0] sm:$0xff] }
  0x4d   : > { %7631 = vmatmul.mubr.msk.f32.gmra.mxu0 %vm310_vm1, %v205_v62  ;;  %7831 = vmatmul.mubr.msk.f32.gmra.mxu1 %vm310_vm1, %v6306_v63  ;;  %v237_v62 = vld [vmem:[%s8453_s25 + $0x1e8] sm:$0xff] }
  0x4e   : > { %7633 = vmatprep.mubr.msk.f32.mxu0 %vm310_vm1, %v206_v0  ;;  %7833 = vmatprep.mubr.msk.f32.mxu1 %vm310_vm1, %v6307_v1  ;;  %v6338_v63 = vld [vmem:[%s8453_s25 + $0x5e8] sm:$0xff]  ;;  %v238_v0 = vld [vmem:[%s8453_s25 + $0x1f0] sm:$0xff] }
  0x4f   : > { %v6339_v1 = vld [vmem:[%s8453_s25 + $0x5f0] sm:$0xff] }
  0x51   : > { %7634 = vmatmul.mubr.msk.f32.gmra.mxu0 %vm310_vm1, %v207_v2  ;;  %7834 = vmatmul.mubr.msk.f32.gmra.mxu1 %vm310_vm1, %v6308_v3  ;;  %v239_v2 = vld [vmem:[%s8453_s25 + $0x1f8] sm:$0xff] }
  0x52   : > { %7636 = vmatprep.mubr.msk.f32.mxu0 %vm310_vm1, %v208_v4  ;;  %7836 = vmatprep.mubr.msk.f32.mxu1 %vm310_vm1, %v6309_v5  ;;  %v6340_v3 = vld [vmem:[%s8453_s25 + $0x5f8] sm:$0xff]  ;;  %v240_v4 = vld [vmem:[%s8453_s25 + $0x200] sm:$0xff] }
  0x53   : > { %v6341_v5 = vld [vmem:[%s8453_s25 + $0x600] sm:$0xff] }
  0x55   : > { %7637 = vmatmul.mubr.msk.f32.gmra.mxu0 %vm310_vm1, %v209_v6  ;;  %7837 = vmatmul.mubr.msk.f32.gmra.mxu1 %vm310_vm1, %v6310_v7  ;;  %v241_v6 = vld [vmem:[%s8453_s25 + $0x208] sm:$0xff] }
  0x56   : > { %7639 = vmatprep.mubr.msk.f32.mxu0 %vm310_vm1, %v210_v8  ;;  %7839 = vmatprep.mubr.msk.f32.mxu1 %vm310_vm1, %v6311_v9  ;;  %v6342_v7 = vld [vmem:[%s8453_s25 + $0x608] sm:$0xff]  ;;  %v242_v8 = vld [vmem:[%s8453_s25 + $0x210] sm:$0xff] }
  0x57   : > { %v6343_v9 = vld [vmem:[%s8453_s25 + $0x610] sm:$0xff] }
  0x59   : > { %7640 = vmatmul.mubr.msk.f32.gmra.mxu0 %vm310_vm1, %v211_v10  ;;  %7840 = vmatmul.mubr.msk.f32.gmra.mxu1 %vm310_vm1, %v6312_v11  ;;  %v243_v10 = vld [vmem:[%s8453_s25 + $0x218] sm:$0xff] }
  0x5a   : > { %7642 = vmatprep.mubr.msk.f32.mxu0 %vm310_vm1, %v212_v12  ;;  %7842 = vmatprep.mubr.msk.f32.mxu1 %vm310_vm1, %v6313_v13  ;;  %v6344_v11 = vld [vmem:[%s8453_s25 + $0x618] sm:$0xff]  ;;  %v244_v12 = vld [vmem:[%s8453_s25 + $0x220] sm:$0xff] }
  0x5b   : > { %v6345_v13 = vld [vmem:[%s8453_s25 + $0x620] sm:$0xff] }
  0x5d   : > { %7643 = vmatmul.mubr.msk.f32.gmra.mxu0 %vm310_vm1, %v213_v14  ;;  %7843 = vmatmul.mubr.msk.f32.gmra.mxu1 %vm310_vm1, %v6314_v15  ;;  %v245_v14 = vld [vmem:[%s8453_s25 + $0x228] sm:$0xff] }
  0x5e   : > { %7645 = vmatprep.mubr.msk.f32.mxu0 %vm310_vm1, %v214_v16  ;;  %7845 = vmatprep.mubr.msk.f32.mxu1 %vm310_vm1, %v6315_v17  ;;  %v6346_v15 = vld [vmem:[%s8453_s25 + $0x628] sm:$0xff]  ;;  %v246_v16 = vld [vmem:[%s8453_s25 + $0x230] sm:$0xff] }
  0x5f   : > { %v6347_v17 = vld [vmem:[%s8453_s25 + $0x630] sm:$0xff] }
  0x61   : > { %7646 = vmatmul.mubr.msk.f32.gmra.mxu0 %vm310_vm1, %v215_v18  ;;  %7846 = vmatmul.mubr.msk.f32.gmra.mxu1 %vm310_vm1, %v6316_v19  ;;  %v247_v18 = vld [vmem:[%s8453_s25 + $0x238] sm:$0xff] }
  0x62   : > { %7648 = vmatprep.mubr.msk.f32.mxu0 %vm310_vm1, %v216_v20  ;;  %7848 = vmatprep.mubr.msk.f32.mxu1 %vm310_vm1, %v6317_v21  ;;  %v6348_v19 = vld [vmem:[%s8453_s25 + $0x638] sm:$0xff]  ;;  %v248_v20 = vld [vmem:[%s8453_s25 + $0x240] sm:$0xff] }
  0x63   : > { %v6349_v21 = vld [vmem:[%s8453_s25 + $0x640] sm:$0xff] }
  0x65   : > { %7649 = vmatmul.mubr.msk.f32.gmra.mxu0 %vm310_vm1, %v217_v22  ;;  %7849 = vmatmul.mubr.msk.f32.gmra.mxu1 %vm310_vm1, %v6318_v23  ;;  %v249_v22 = vld [vmem:[%s8453_s25 + $0x248] sm:$0xff] }
  0x66   : > { %7651 = vmatprep.mubr.msk.f32.mxu0 %vm310_vm1, %v218_v24  ;;  %7851 = vmatprep.mubr.msk.f32.mxu1 %vm310_vm1, %v6319_v25  ;;  %v6350_v23 = vld [vmem:[%s8453_s25 + $0x648] sm:$0xff]  ;;  %v250_v24 = vld [vmem:[%s8453_s25 + $0x250] sm:$0xff] }
  0x67   : > { %v6351_v25 = vld [vmem:[%s8453_s25 + $0x650] sm:$0xff] }
  0x69   : > { %7652 = vmatmul.mubr.msk.f32.gmra.mxu0 %vm310_vm1, %v219_v26  ;;  %7852 = vmatmul.mubr.msk.f32.gmra.mxu1 %vm310_vm1, %v6320_v27  ;;  %v251_v26 = vld [vmem:[%s8453_s25 + $0x258] sm:$0xff] }
  0x6a   : > { %7654 = vmatprep.mubr.msk.f32.mxu0 %vm310_vm1, %v220_v28  ;;  %7854 = vmatprep.mubr.msk.f32.mxu1 %vm310_vm1, %v6321_v29  ;;  %v6352_v27 = vld [vmem:[%s8453_s25 + $0x658] sm:$0xff]  ;;  %v252_v28 = vld [vmem:[%s8453_s25 + $0x260] sm:$0xff] }
  0x6b   : > { %v6353_v29 = vld [vmem:[%s8453_s25 + $0x660] sm:$0xff] }
  0x6d   : > { %7655 = vmatmul.mubr.msk.f32.gmra.mxu0 %vm310_vm1, %v221_v30  ;;  %7855 = vmatmul.mubr.msk.f32.gmra.mxu1 %vm310_vm1, %v6322_v31  ;;  %v253_v30 = vld [vmem:[%s8453_s25 + $0x268] sm:$0xff] }
  0x6e   : > { %7657 = vmatprep.mubr.msk.f32.mxu0 %vm310_vm1, %v222_v32  ;;  %7857 = vmatprep.mubr.msk.f32.mxu1 %vm310_vm1, %v6323_v33  ;;  %v6354_v31 = vld [vmem:[%s8453_s25 + $0x668] sm:$0xff]  ;;  %v254_v32 = vld [vmem:[%s8453_s25 + $0x270] sm:$0xff] }
  0x6f   : > { %v6355_v33 = vld [vmem:[%s8453_s25 + $0x670] sm:$0xff] }
  0x71   : > { %7658 = vmatmul.mubr.msk.f32.gmra.mxu0 %vm310_vm1, %v223_v34  ;;  %7858 = vmatmul.mubr.msk.f32.gmra.mxu1 %vm310_vm1, %v6324_v35  ;;  %v255_v34 = vld [vmem:[%s8453_s25 + $0x278] sm:$0xff] }
  0x72   : > { %7660 = vmatprep.mubr.msk.f32.mxu0 %vm310_vm1, %v224_v36  ;;  %7860 = vmatprep.mubr.msk.f32.mxu1 %vm310_vm1, %v6325_v37  ;;  %v6356_v35 = vld [vmem:[%s8453_s25 + $0x678] sm:$0xff]  ;;  %v256_v36 = vld [vmem:[%s8453_s25 + $0x280] sm:$0xff] }
  0x73   : > { %v6357_v37 = vld [vmem:[%s8453_s25 + $0x680] sm:$0xff] }
  0x75   : > { %7661 = vmatmul.mubr.msk.f32.gmra.mxu0 %vm310_vm1, %v225_v38  ;;  %7861 = vmatmul.mubr.msk.f32.gmra.mxu1 %vm310_vm1, %v6326_v39  ;;  %v257_v38 = vld [vmem:[%s8453_s25 + $0x288] sm:$0xff] }
  0x76   : > { %7663 = vmatprep.mubr.msk.f32.mxu0 %vm310_vm1, %v226_v40  ;;  %7863 = vmatprep.mubr.msk.f32.mxu1 %vm310_vm1, %v6327_v41  ;;  %v6358_v39 = vld [vmem:[%s8453_s25 + $0x688] sm:$0xff]  ;;  %v258_v40 = vld [vmem:[%s8453_s25 + $0x290] sm:$0xff] }
  0x77   : > { %v6359_v41 = vld [vmem:[%s8453_s25 + $0x690] sm:$0xff] }
  0x79   : > { %7664 = vmatmul.mubr.msk.f32.gmra.mxu0 %vm310_vm1, %v227_v42  ;;  %7864 = vmatmul.mubr.msk.f32.gmra.mxu1 %vm310_vm1, %v6328_v43  ;;  %v259_v42 = vld [vmem:[%s8453_s25 + $0x298] sm:$0xff] }
  0x7a   : > { %7666 = vmatprep.mubr.msk.f32.mxu0 %vm310_vm1, %v228_v44  ;;  %7866 = vmatprep.mubr.msk.f32.mxu1 %vm310_vm1, %v6329_v45  ;;  %v6360_v43 = vld [vmem:[%s8453_s25 + $0x698] sm:$0xff]  ;;  %v260_v44 = vld [vmem:[%s8453_s25 + $0x2a0] sm:$0xff] }
  0x7b   : > { %v6361_v45 = vld [vmem:[%s8453_s25 + $0x6a0] sm:$0xff] }
  0x7d   : > { %7667 = vmatmul.mubr.msk.f32.gmra.mxu0 %vm310_vm1, %v229_v46  ;;  %7867 = vmatmul.mubr.msk.f32.gmra.mxu1 %vm310_vm1, %v6330_v47  ;;  %v261_v46 = vld [vmem:[%s8453_s25 + $0x2a8] sm:$0xff] }
  0x7e   : > { %7669 = vmatprep.mubr.msk.f32.mxu0 %vm310_vm1, %v230_v48  ;;  %7869 = vmatprep.mubr.msk.f32.mxu1 %vm310_vm1, %v6331_v49  ;;  %v6362_v47 = vld [vmem:[%s8453_s25 + $0x6a8] sm:$0xff]  ;;  %v262_v48 = vld [vmem:[%s8453_s25 + $0x2b0] sm:$0xff] }
  0x7f   : > { %v6363_v49 = vld [vmem:[%s8453_s25 + $0x6b0] sm:$0xff] }
  0x81   : > { %7670 = vmatmul.mubr.msk.f32.gmra.mxu0 %vm310_vm1, %v231_v50  ;;  %7870 = vmatmul.mubr.msk.f32.gmra.mxu1 %vm310_vm1, %v6332_v51  ;;  %v263_v50 = vld [vmem:[%s8453_s25 + $0x2b8] sm:$0xff] }
  0x82   : > { %7672 = vmatprep.mubr.msk.f32.mxu0 %vm310_vm1, %v232_v52  ;;  %7872 = vmatprep.mubr.msk.f32.mxu1 %vm310_vm1, %v6333_v53  ;;  %v6364_v51 = vld [vmem:[%s8453_s25 + $0x6b8] sm:$0xff]  ;;  %v264_v52 = vld [vmem:[%s8453_s25 + $0x2c0] sm:$0xff] }
  0x83   : > { %v6365_v53 = vld [vmem:[%s8453_s25 + $0x6c0] sm:$0xff] }
  0x85   : > { %7673 = vmatmul.mubr.msk.f32.gmra.mxu0 %vm310_vm1, %v233_v54  ;;  %7873 = vmatmul.mubr.msk.f32.gmra.mxu1 %vm310_vm1, %v6334_v55  ;;  %v265_v54 = vld [vmem:[%s8453_s25 + $0x2c8] sm:$0xff] }
  0x86   : > { %7675 = vmatprep.mubr.msk.f32.mxu0 %vm310_vm1, %v234_v56  ;;  %7875 = vmatprep.mubr.msk.f32.mxu1 %vm310_vm1, %v6335_v57  ;;  %v6366_v55 = vld [vmem:[%s8453_s25 + $0x6c8] sm:$0xff]  ;;  %v266_v56 = vld [vmem:[%s8453_s25 + $0x2d0] sm:$0xff] }
  0x87   : > { %v6367_v57 = vld [vmem:[%s8453_s25 + $0x6d0] sm:$0xff] }
  0x89   : > { %7676 = vmatmul.mubr.msk.f32.gmra.mxu0 %vm310_vm1, %v235_v58  ;;  %7876 = vmatmul.mubr.msk.f32.gmra.mxu1 %vm310_vm1, %v6336_v59  ;;  %v267_v58 = vld [vmem:[%s8453_s25 + $0x2d8] sm:$0xff] }
  0x8a   : > { %7678 = vmatprep.mubr.msk.f32.mxu0 %vm310_vm1, %v236_v60  ;;  %7878 = vmatprep.mubr.msk.f32.mxu1 %vm310_vm1, %v6337_v61  ;;  %v6368_v59 = vld [vmem:[%s8453_s25 + $0x6d8] sm:$0xff]  ;;  %v268_v60 = vld [vmem:[%s8453_s25 + $0x2e0] sm:$0xff] }
  0x8b   : > { %v6369_v61 = vld [vmem:[%s8453_s25 + $0x6e0] sm:$0xff] }
  0x8d   : > { %7679 = vmatmul.mubr.msk.f32.gmra.mxu0 %vm310_vm1, %v237_v62  ;;  %7879 = vmatmul.mubr.msk.f32.gmra.mxu1 %vm310_vm1, %v6338_v63  ;;  %v269_v62 = vld [vmem:[%s8453_s25 + $0x2e8] sm:$0xff] }
  0x8e   : > { %7681 = vmatprep.mubr.msk.f32.mxu0 %vm310_vm1, %v238_v0  ;;  %7881 = vmatprep.mubr.msk.f32.mxu1 %vm310_vm1, %v6339_v1  ;;  %v6370_v63 = vld [vmem:[%s8453_s25 + $0x6e8] sm:$0xff]  ;;  %v270_v0 = vld [vmem:[%s8453_s25 + $0x2f0] sm:$0xff] }
  0x8f   : > { %v6371_v1 = vld [vmem:[%s8453_s25 + $0x6f0] sm:$0xff] }
  0x91   : > { %7682 = vmatmul.mubr.msk.f32.gmra.mxu0 %vm310_vm1, %v239_v2  ;;  %7882 = vmatmul.mubr.msk.f32.gmra.mxu1 %vm310_vm1, %v6340_v3  ;;  %v271_v2 = vld [vmem:[%s8453_s25 + $0x2f8] sm:$0xff] }
  0x92   : > { %7684 = vmatprep.mubr.msk.f32.mxu0 %vm310_vm1, %v240_v4  ;;  %7884 = vmatprep.mubr.msk.f32.mxu1 %vm310_vm1, %v6341_v5  ;;  %v6372_v3 = vld [vmem:[%s8453_s25 + $0x6f8] sm:$0xff]  ;;  %v272_v4 = vld [vmem:[%s8453_s25 + $0x300] sm:$0xff] }
  0x93   : > { %v6373_v5 = vld [vmem:[%s8453_s25 + $0x700] sm:$0xff] }
  0x95   : > { %7685 = vmatmul.mubr.msk.f32.gmra.mxu0 %vm310_vm1, %v241_v6  ;;  %7885 = vmatmul.mubr.msk.f32.gmra.mxu1 %vm310_vm1, %v6342_v7  ;;  %v273_v6 = vld [vmem:[%s8453_s25 + $0x308] sm:$0xff] }
  0x96   : > { %7687 = vmatprep.mubr.msk.f32.mxu0 %vm310_vm1, %v242_v8  ;;  %7887 = vmatprep.mubr.msk.f32.mxu1 %vm310_vm1, %v6343_v9  ;;  %v6374_v7 = vld [vmem:[%s8453_s25 + $0x708] sm:$0xff]  ;;  %v8860_v8 = vld [vmem:[%s10684_s2] ss:$0 sm:$0xff]  ;;  %v274_v9 = vld [vmem:[%s8453_s25 + $0x310] sm:$0xff] }
  0x99   : > { %7688 = vmatmul.mubr.msk.f32.gmra.mxu0 %vm310_vm1, %v243_v10  ;;  %7888 = vmatmul.mubr.msk.f32.gmra.mxu1 %vm310_vm1, %v6344_v11  ;;  %v6375_v10 = vld [vmem:[%s8453_s25 + $0x710] sm:$0xff] }
  0x9a   : > { %7690 = vmatprep.mubr.msk.f32.mxu0 %vm310_vm1, %v244_v12  ;;  %7890 = vmatprep.mubr.msk.f32.mxu1 %vm310_vm1, %v6345_v13 }
  0x9d   : > { %7691 = vmatmul.mubr.msk.f32.gmra.mxu0 %vm310_vm1, %v245_v14  ;;  %7891 = vmatmul.mubr.msk.f32.gmra.mxu1 %vm310_vm1, %v6346_v15  ;;  %v275_v15 = vld [vmem:[%s8453_s25 + $0x318] sm:$0xff] }
  0x9e   : > { %7693 = vmatprep.mubr.msk.f32.mxu0 %vm310_vm1, %v246_v16  ;;  %7893 = vmatprep.mubr.msk.f32.mxu1 %vm310_vm1, %v6347_v17  ;;  %v6376_v16 = vld [vmem:[%s8453_s25 + $0x718] sm:$0xff] }
  0xa1   : > { %7694 = vmatmul.mubr.msk.f32.gmra.mxu0 %vm310_vm1, %v247_v18  ;;  %7894 = vmatmul.mubr.msk.f32.gmra.mxu1 %vm310_vm1, %v6348_v19  ;;  %v276_v19 = vld [vmem:[%s8453_s25 + $0x320] sm:$0xff] }
  0xa2   : > { %7696 = vmatprep.mubr.msk.f32.mxu0 %vm310_vm1, %v248_v20  ;;  %7896 = vmatprep.mubr.msk.f32.mxu1 %vm310_vm1, %v6349_v21  ;;  %v6377_v20 = vld [vmem:[%s8453_s25 + $0x720] sm:$0xff] }
  0xa5   : > { %7697 = vmatmul.mubr.msk.f32.gmra.mxu0 %vm310_vm1, %v249_v22  ;;  %7897 = vmatmul.mubr.msk.f32.gmra.mxu1 %vm310_vm1, %v6350_v23 }
  0xa6   : > { %7699 = vmatprep.mubr.msk.f32.mxu0 %vm310_vm1, %v250_v24  ;;  %7899 = vmatprep.mubr.msk.f32.mxu1 %vm310_vm1, %v6351_v25 }
  0xa9   : > { %7700 = vmatmul.mubr.msk.f32.gmra.mxu0 %vm310_vm1, %v251_v26  ;;  %7900 = vmatmul.mubr.msk.f32.gmra.mxu1 %vm310_vm1, %v6352_v27 }
  0xaa   : > { %7702 = vmatprep.mubr.msk.f32.mxu0 %vm310_vm1, %v252_v28  ;;  %7902 = vmatprep.mubr.msk.f32.mxu1 %vm310_vm1, %v6353_v29 }
  0xad   : > { %7703 = vmatmul.mubr.msk.f32.gmra.mxu0 %vm310_vm1, %v253_v30  ;;  %7903 = vmatmul.mubr.msk.f32.gmra.mxu1 %vm310_vm1, %v6354_v31  ;;  %v277_v31 = vld [vmem:[%s8453_s25 + $0x328] sm:$0xff] }
  0xae   : > { %7705 = vmatprep.mubr.msk.f32.mxu0 %vm310_vm1, %v254_v32  ;;  %7905 = vmatprep.mubr.msk.f32.mxu1 %vm310_vm1, %v6355_v33  ;;  %v6378_v32 = vld [vmem:[%s8453_s25 + $0x728] sm:$0xff] }
  0xb1   : > { %7706 = vmatmul.mubr.msk.f32.gmra.mxu0 %vm310_vm1, %v255_v34  ;;  %7906 = vmatmul.mubr.msk.f32.gmra.mxu1 %vm310_vm1, %v6356_v35 }
  0xb2   : > { %7708 = vmatprep.mubr.msk.f32.mxu0 %vm310_vm1, %v256_v36  ;;  %7908 = vmatprep.mubr.msk.f32.mxu1 %vm310_vm1, %v6357_v37  ;;  %v278_v36 = vld [vmem:[%s8453_s25 + $0x330] sm:$0xff] }
  0xb3   : > { %v6379_v37 = vld [vmem:[%s8453_s25 + $0x730] sm:$0xff] }
  0xb5   : > { %7709 = vmatmul.mubr.msk.f32.gmra.mxu0 %vm310_vm1, %v257_v38  ;;  %7909 = vmatmul.mubr.msk.f32.gmra.mxu1 %vm310_vm1, %v6358_v39 }
  0xb6   : > { %7711 = vmatprep.mubr.msk.f32.mxu0 %vm310_vm1, %v258_v40  ;;  %7911 = vmatprep.mubr.msk.f32.mxu1 %vm310_vm1, %v6359_v41 }
  0xb9   : > { %7712 = vmatmul.mubr.msk.f32.gmra.mxu0 %vm310_vm1, %v259_v42  ;;  %7912 = vmatmul.mubr.msk.f32.gmra.mxu1 %vm310_vm1, %v6360_v43 }
  0xba   : > { %7714 = vmatprep.mubr.msk.f32.mxu0 %vm310_vm1, %v260_v44  ;;  %7914 = vmatprep.mubr.msk.f32.mxu1 %vm310_vm1, %v6361_v45 }
  0xbd   : > { %7715 = vmatmul.mubr.msk.f32.gmra.mxu0 %vm310_vm1, %v261_v46  ;;  %7915 = vmatmul.mubr.msk.f32.gmra.mxu1 %vm310_vm1, %v6362_v47 }
  0xbe   : > { %7717 = vmatprep.mubr.msk.f32.mxu0 %vm310_vm1, %v262_v48  ;;  %7917 = vmatprep.mubr.msk.f32.mxu1 %vm310_vm1, %v6363_v49  ;;  %v279_v49 = vld [vmem:[%s8453_s25 + $0x338] sm:$0xff] }
  0xc1   : > { %7718 = vmatmul.mubr.msk.f32.gmra.mxu0 %vm310_vm1, %v263_v50  ;;  %7918 = vmatmul.mubr.msk.f32.gmra.mxu1 %vm310_vm1, %v6364_v51  ;;  %v6380_v50 = vld [vmem:[%s8453_s25 + $0x738] sm:$0xff] }
  0xc2   : > { %7720 = vmatprep.mubr.msk.f32.mxu0 %vm310_vm1, %v264_v52  ;;  %7920 = vmatprep.mubr.msk.f32.mxu1 %vm310_vm1, %v6365_v53 }
  0xc5   : > { %7721 = vmatmul.mubr.msk.f32.gmra.mxu0 %vm310_vm1, %v265_v54  ;;  %7921 = vmatmul.mubr.msk.f32.gmra.mxu1 %vm310_vm1, %v6366_v55  ;;  %v280_v54 = vld [vmem:[%s8453_s25 + $0x340] sm:$0xff] }
  0xc6   : > { %7723 = vmatprep.mubr.msk.f32.mxu0 %vm310_vm1, %v266_v56  ;;  %7923 = vmatprep.mubr.msk.f32.mxu1 %vm310_vm1, %v6367_v57  ;;  %v6381_v55 = vld [vmem:[%s8453_s25 + $0x740] sm:$0xff] }
  0xc9   : > { %7724 = vmatmul.mubr.msk.f32.gmra.mxu0 %vm310_vm1, %v267_v58  ;;  %7924 = vmatmul.mubr.msk.f32.gmra.mxu1 %vm310_vm1, %v6368_v59 }
  0xca   : > { %7726 = vmatprep.mubr.msk.f32.mxu0 %vm310_vm1, %v268_v60  ;;  %7926 = vmatprep.mubr.msk.f32.mxu1 %vm310_vm1, %v6369_v61 }
  0xcd   : > { %7727 = vmatmul.mubr.msk.f32.gmra.mxu0 %vm310_vm1, %v269_v62  ;;  %7927 = vmatmul.mubr.msk.f32.gmra.mxu1 %vm310_vm1, %v6370_v63 }
  0xce   : > { %7729 = vmatprep.mubr.msk.f32.mxu0 %vm310_vm1, %v270_v0  ;;  %7929 = vmatprep.mubr.msk.f32.mxu1 %vm310_vm1, %v6371_v1 }
  0xd1   : > { %7730 = vmatmul.mubr.msk.f32.gmra.mxu0 %vm310_vm1, %v271_v2  ;;  %7930 = vmatmul.mubr.msk.f32.gmra.mxu1 %vm310_vm1, %v6372_v3  ;;  %v281_v3 = vld [vmem:[%s8453_s25 + $0x348] sm:$0xff] }
  0xd2   : > { %7732 = vmatprep.mubr.msk.f32.mxu0 %vm310_vm1, %v272_v4  ;;  %7932 = vmatprep.mubr.msk.f32.mxu1 %vm310_vm1, %v6373_v5  ;;  %v6382_v4 = vld [vmem:[%s8453_s25 + $0x748] sm:$0xff] }
  0xd5   : > { %v7590_v11 = vpop.f32.mrf.mxu0  ;;  %7733 = vmatmul.mubr.msk.f32.gmra.mxu0 %vm310_vm1, %v273_v6  ;;  %v7790_v12 = vpop.f32.mrf.mxu1  ;;  %7933 = vmatmul.mubr.msk.f32.gmra.mxu1 %vm310_vm1, %v6374_v7 }
  0xd6   : > { %v771_v13 = vadd.f32 %v7590_v11, %v8860_v8  ;;  %v2117_v14 = vadd.f32 %v7790_v12, %v8860_v8  ;;  %7735 = vmatprep.mubr.msk.f32.mxu0 %vm310_vm1, %v274_v9  ;;  %7935 = vmatprep.mubr.msk.f32.mxu1 %vm310_vm1, %v6375_v10  ;;  %v282_v9 = vld [vmem:[%s8453_s25 + $0x350] sm:$0xff] }
  0xd7   : > { %v765_v17 = vpop.f32.mrf.mxu0  ;;  %v2111_v18 = vpop.f32.mrf.mxu1  ;;  %v6383_v10 = vld [vmem:[%s8453_s25 + $0x750] sm:$0xff] }
  0xd8   : > { %v1405_v21 = vmax.f32 %v771_v13, 0.0  ;;  %v2751_v22 = vmax.f32 %v2117_v14, 0.0  ;;  %v766_v23 = vadd.f32 %v8860_v8, %v765_v17  ;;  %v2112_v24 = vadd.f32 %v8860_v8, %v2111_v18 }
  0xd9   : > { %v7593_v25 = vpop.f32.mrf.mxu0  ;;  %7736 = vmatmul.mubr.msk.f32.gmra.mxu0 %vm310_vm1, %v275_v15  ;;  %v7793_v26 = vpop.f32.mrf.mxu1  ;;  %7936 = vmatmul.mubr.msk.f32.gmra.mxu1 %vm310_vm1, %v6376_v16 }
  0xda   : > { %v8878_v27 = vmax.f32 %v1405_v21, %v2751_v22  ;;  %v1404_v28 = vmax.f32 %v766_v23, 0.0  ;;  %v2750_v29 = vmax.f32 %v2112_v24, 0.0  ;;  %v781_v30 = vadd.f32 %v7593_v25, %v8860_v8  ;;  %7738 = vmatprep.mubr.msk.f32.mxu0 %vm310_vm1, %v276_v19  ;;  %7938 = vmatprep.mubr.msk.f32.mxu1 %vm310_vm1, %v6377_v20  ;;  %v283_v22 = vld [vmem:[%s8453_s25 + $0x358] sm:$0xff] }
  0xdb   : > { %v2127_v33 = vadd.f32 %v7793_v26, %v8860_v8  ;;  %v775_v34 = vpop.f32.mrf.mxu0  ;;  %v2121_v35 = vpop.f32.mrf.mxu1  ;;  %v6384_v23 = vld [vmem:[%s8453_s25 + $0x758] sm:$0xff] }
  0xdc   : > { %v8888_v38 = vmax.f32 %v1404_v28, %v2750_v29  ;;  %v1407_v39 = vmax.f32 %v781_v30, 0.0  ;;  %v776_v40 = vadd.f32 %v8860_v8, %v775_v34  ;;  %v2122_v41 = vadd.f32 %v8860_v8, %v2121_v35  ;;  %v284_v28 = vld [vmem:[%s8453_s25 + $0x360] sm:$0xff] }
  0xdd   : > { %v2753_v42 = vmax.f32 %v2127_v33, 0.0  ;;  %v7596_v43 = vpop.f32.mrf.mxu0  ;;  %7739 = vmatmul.mubr.msk.f32.gmra.mxu0 %vm310_vm1, %v277_v31  ;;  %v7796_v44 = vpop.f32.mrf.mxu1  ;;  %7939 = vmatmul.mubr.msk.f32.gmra.mxu1 %vm310_vm1, %v6378_v32  ;;  %v6385_v29 = vld [vmem:[%s8453_s25 + $0x760] sm:$0xff] }
  0xde   : > { %v1406_v45 = vmax.f32 %v776_v40, 0.0  ;;  %v2752_v46 = vmax.f32 %v2122_v41, 0.0  ;;  %v791_v47 = vadd.f32 %v7596_v43, %v8860_v8  ;;  %v2137_v48 = vadd.f32 %v7796_v44, %v8860_v8  ;;  %7741 = vmatprep.mubr.msk.f32.mxu0 %vm310_vm1, %v278_v36  ;;  %7941 = vmatprep.mubr.msk.f32.mxu1 %vm310_vm1, %v6379_v37  ;;  %v6386_v43 = vld [vmem:[%s8453_s25 + $0x768] sm:$0xff] }
  0xdf   : > { %v8900_v51 = vmax.f32 %v1407_v39, %v2753_v42  ;;  %v785_v52 = vpop.f32.mrf.mxu0  ;;  %v2131_v53 = vpop.f32.mrf.mxu1  ;;  %v285_v42 = vld [vmem:[%s8453_s25 + $0x368] sm:$0xff] }
  0xe0   : > { %v8904_v56 = vmax.f32 %v1406_v45, %v2752_v46  ;;  %v1409_v57 = vmax.f32 %v791_v47, 0.0  ;;  %v2755_v58 = vmax.f32 %v2137_v48, 0.0  ;;  %v786_v59 = vadd.f32 %v8860_v8, %v785_v52  ;;  %v286_v47 = vld [vmem:[%s8453_s25 + $0x370] sm:$0xff] }
  0xe1   : > { %v2132_v60 = vadd.f32 %v8860_v8, %v2131_v53  ;;  %v7599_v61 = vpop.f32.mrf.mxu0  ;;  %7742 = vmatmul.mubr.msk.f32.gmra.mxu0 %vm310_vm1, %v279_v49  ;;  %v7799_v62 = vpop.f32.mrf.mxu1  ;;  %7942 = vmatmul.mubr.msk.f32.gmra.mxu1 %vm310_vm1, %v6380_v50  ;;  %v6387_v48 = vld [vmem:[%s8453_s25 + $0x770] sm:$0xff] }
  0xe2   : > { %v8910_v63 = vmax.f32 %v1409_v57, %v2755_v58  ;;  %v1408_v0 = vmax.f32 %v786_v59, 0.0  ;;  %v801_v1 = vadd.f32 %v7599_v61, %v8860_v8  ;;  %v2147_v2 = vadd.f32 %v7799_v62, %v8860_v8  ;;  %7744 = vmatprep.mubr.msk.f32.mxu0 %vm310_vm1, %v280_v54  ;;  %7944 = vmatprep.mubr.msk.f32.mxu1 %vm310_vm1, %v6381_v55  ;;  %v287_v62 = vld [vmem:[%s8453_s25 + $0x378] sm:$0xff] }
  0xe3   : > { %v2754_v5 = vmax.f32 %v2132_v60, 0.0  ;;  %v795_v6 = vpop.f32.mrf.mxu0  ;;  %v2141_v7 = vpop.f32.mrf.mxu1 }
  0xe4   : > { %v1411_v11 = vmax.f32 %v801_v1, 0.0  ;;  %v2757_v12 = vmax.f32 %v2147_v2, 0.0  ;;  %v796_v13 = vadd.f32 %v8860_v8, %v795_v6  ;;  %v2142_v14 = vadd.f32 %v8860_v8, %v2141_v7 }
  0xe5   : > { %v8922_v15 = vmax.f32 %v1408_v0, %v2754_v5  ;;  %v7602_v16 = vpop.f32.mrf.mxu0  ;;  %7745 = vmatmul.mubr.msk.f32.gmra.mxu0 %vm310_vm1, %v281_v3  ;;  %v7802_v17 = vpop.f32.mrf.mxu1  ;;  %7945 = vmatmul.mubr.msk.f32.gmra.mxu1 %vm310_vm1, %v6382_v4  ;;  %v6388_v0 = vld [vmem:[%s8453_s25 + $0x778] sm:$0xff]  ;;  %v288_v4 = vld [vmem:[%s8453_s25 + $0x380] sm:$0xff] }
  0xe6   : > { %v8926_v18 = vmax.f32 %v1411_v11, %v2757_v12  ;;  %v1410_v19 = vmax.f32 %v796_v13, 0.0  ;;  %v2756_v20 = vmax.f32 %v2142_v14, 0.0  ;;  %v811_v21 = vadd.f32 %v7602_v16, %v8860_v8  ;;  %7747 = vmatprep.mubr.msk.f32.mxu0 %vm310_vm1, %v282_v9  ;;  %7947 = vmatprep.mubr.msk.f32.mxu1 %vm310_vm1, %v6383_v10  ;;  %v6389_v5 = vld [vmem:[%s8453_s25 + $0x780] sm:$0xff] }
  0xe7   : > { %v2157_v24 = vadd.f32 %v7802_v17, %v8860_v8  ;;  %v805_v25 = vpop.f32.mrf.mxu0  ;;  %v2151_v26 = vpop.f32.mrf.mxu1 }
  0xe8   : > { %v8936_v30 = vmax.f32 %v1410_v19, %v2756_v20  ;;  %v1413_v31 = vmax.f32 %v811_v21, 0.0  ;;  %v806_v32 = vadd.f32 %v8860_v8, %v805_v25  ;;  %v2152_v33 = vadd.f32 %v8860_v8, %v2151_v26  ;;  %v289_v20 = vld [vmem:[%s8453_s25 + $0x388] sm:$0xff]  ;;  %v290_v25 = vld [vmem:[%s8453_s25 + $0x390] sm:$0xff] }
  0xe9   : > { %v2759_v34 = vmax.f32 %v2157_v24, 0.0  ;;  %v7605_v35 = vpop.f32.mrf.mxu0  ;;  %7748 = vmatmul.mubr.msk.f32.gmra.mxu0 %vm310_vm1, %v283_v22  ;;  %v7805_v36 = vpop.f32.mrf.mxu1  ;;  %7948 = vmatmul.mubr.msk.f32.gmra.mxu1 %vm310_vm1, %v6384_v23  ;;  %v6390_v21 = vld [vmem:[%s8453_s25 + $0x788] sm:$0xff]  ;;  %v6391_v26 = vld [vmem:[%s8453_s25 + $0x790] sm:$0xff] }
  0xea   : > { %v1412_v37 = vmax.f32 %v806_v32, 0.0  ;;  %v2758_v39 = vmax.f32 %v2152_v33, 0.0  ;;  %v821_v40 = vadd.f32 %v7605_v35, %v8860_v8  ;;  %v2167_v41 = vadd.f32 %v7805_v36, %v8860_v8  ;;  %7750 = vmatprep.mubr.msk.f32.mxu0 %vm310_vm1, %v284_v28  ;;  %7950 = vmatprep.mubr.msk.f32.mxu1 %vm310_vm1, %v6385_v29 }
  0xeb   : > { %v8948_v44 = vmax.f32 %v1413_v31, %v2759_v34  ;;  %v815_v45 = vpop.f32.mrf.mxu0  ;;  %v2161_v46 = vpop.f32.mrf.mxu1 }
  0xec   : > { %v8952_v49 = vmax.f32 %v1412_v37, %v2758_v39  ;;  %v1415_v50 = vmax.f32 %v821_v40, 0.0  ;;  %v2761_v52 = vmax.f32 %v2167_v41, 0.0  ;;  %v816_v53 = vadd.f32 %v8860_v8, %v815_v45  ;;  %v291_v41 = vld [vmem:[%s8453_s25 + $0x398] sm:$0xff] }
  0xed   : > { %v2162_v54 = vadd.f32 %v8860_v8, %v2161_v46  ;;  %v7608_v55 = vpop.f32.mrf.mxu0  ;;  %7751 = vmatmul.mubr.msk.f32.gmra.mxu0 %vm310_vm1, %v285_v42  ;;  %v7808_v57 = vpop.f32.mrf.mxu1  ;;  %7951 = vmatmul.mubr.msk.f32.gmra.mxu1 %vm310_vm1, %v6386_v43  ;;  %v6392_v42 = vld [vmem:[%s8453_s25 + $0x798] sm:$0xff] }
  0xee   : > { %v8958_v58 = vmax.f32 %v1415_v50, %v2761_v52  ;;  %v1414_v59 = vmax.f32 %v816_v53, 0.0  ;;  %v831_v60 = vadd.f32 %v7608_v55, %v8860_v8  ;;  %v2177_v61 = vadd.f32 %v7808_v57, %v8860_v8  ;;  %7753 = vmatprep.mubr.msk.f32.mxu0 %vm310_vm1, %v286_v47  ;;  %7953 = vmatprep.mubr.msk.f32.mxu1 %vm310_vm1, %v6387_v48  ;;  %v292_v47 = vld [vmem:[%s8453_s25 + $0x3a0] sm:$0xff] }
  0xef   : > { %v2760_v1 = vmax.f32 %v2162_v54, 0.0  ;;  %v825_v2 = vpop.f32.mrf.mxu0  ;;  %v2171_v3 = vpop.f32.mrf.mxu1  ;;  %v6393_v48 = vld [vmem:[%s8453_s25 + $0x7a0] sm:$0xff] }
  0xf0   : > { %v1417_v6 = vmax.f32 %v831_v60, 0.0  ;;  %v2763_v7 = vmax.f32 %v2177_v61, 0.0  ;;  %v826_v9 = vadd.f32 %v8860_v8, %v825_v2  ;;  %v2172_v10 = vadd.f32 %v8860_v8, %v2171_v3  ;;  %v6394_v2 = vld [vmem:[%s8453_s25 + $0x7a8] sm:$0xff] }
  0xf1   : > { %v8970_v11 = vmax.f32 %v1414_v59, %v2760_v1  ;;  %v7611_v12 = vpop.f32.mrf.mxu0  ;;  %7754 = vmatmul.mubr.msk.f32.gmra.mxu0 %vm310_vm1, %v287_v62  ;;  %v7811_v13 = vpop.f32.mrf.mxu1  ;;  %7954 = vmatmul.mubr.msk.f32.gmra.mxu1 %vm310_vm1, %v6388_v0  ;;  %v293_v1 = vld [vmem:[%s8453_s25 + $0x3a8] sm:$0xff] }
  0xf2   : > { %v8974_v14 = vmax.f32 %v1417_v6, %v2763_v7  ;;  %v1416_v16 = vmax.f32 %v826_v9, 0.0  ;;  %v2762_v17 = vmax.f32 %v2172_v10, 0.0  ;;  %v841_v19 = vadd.f32 %v7611_v12, %v8860_v8  ;;  %7756 = vmatprep.mubr.msk.f32.mxu0 %vm310_vm1, %v288_v4  ;;  %7956 = vmatprep.mubr.msk.f32.mxu1 %vm310_vm1, %v6389_v5  ;;  %v294_v6 = vld [vmem:[%s8453_s25 + $0x3b0] sm:$0xff] }
  0xf3   : > { %v2187_v22 = vadd.f32 %v7811_v13, %v8860_v8  ;;  %v835_v23 = vpop.f32.mrf.mxu0  ;;  %v2181_v24 = vpop.f32.mrf.mxu1  ;;  %v6395_v7 = vld [vmem:[%s8453_s25 + $0x7b0] sm:$0xff] }
  0xf4   : > { %v8984_v28 = vmax.f32 %v1416_v16, %v2762_v17  ;;  %v1419_v29 = vmax.f32 %v841_v19, 0.0  ;;  %v836_v31 = vadd.f32 %v8860_v8, %v835_v23  ;;  %v2182_v32 = vadd.f32 %v8860_v8, %v2181_v24  ;;  %v295_v24 = vld [vmem:[%s8453_s25 + $0x3b8] sm:$0xff] }
  0xf5   : > { %v2765_v33 = vmax.f32 %v2187_v22, 0.0  ;;  %v7614_v34 = vpop.f32.mrf.mxu0  ;;  %7757 = vmatmul.mubr.msk.f32.gmra.mxu0 %vm310_vm1, %v289_v20  ;;  %v7814_v35 = vpop.f32.mrf.mxu1  ;;  %7957 = vmatmul.mubr.msk.f32.gmra.mxu1 %vm310_vm1, %v6390_v21 }
  0xf6   : > { %v1418_v36 = vmax.f32 %v836_v31, 0.0  ;;  %v2764_v37 = vmax.f32 %v2182_v32, 0.0  ;;  %v851_v39 = vadd.f32 %v7614_v34, %v8860_v8  ;;  %v2197_v40 = vadd.f32 %v7814_v35, %v8860_v8  ;;  %7759 = vmatprep.mubr.msk.f32.mxu0 %vm310_vm1, %v290_v25  ;;  %7959 = vmatprep.mubr.msk.f32.mxu1 %vm310_vm1, %v6391_v26  ;;  %v6396_v25 = vld [vmem:[%s8453_s25 + $0x7b8] sm:$0xff]  ;;  %v296_v32 = vld [vmem:[%s8453_s25 + $0x3c0] sm:$0xff] }
  0xf7   : > { %v8996_v43 = vmax.f32 %v1419_v29, %v2765_v33  ;;  %v845_v45 = vpop.f32.mrf.mxu0  ;;  %v2191_v46 = vpop.f32.mrf.mxu1  ;;  %v6397_v33 = vld [vmem:[%s8453_s25 + $0x7c0] sm:$0xff] }
  0xf8   : > { %v9000_v50 = vmax.f32 %v1418_v36, %v2764_v37  ;;  %v1421_v52 = vmax.f32 %v851_v39, 0.0  ;;  %v2767_v53 = vmax.f32 %v2197_v40, 0.0  ;;  %v846_v54 = vadd.f32 %v8860_v8, %v845_v45 }
  0xf9   : > { %v2192_v55 = vadd.f32 %v8860_v8, %v2191_v46  ;;  %v7617_v57 = vpop.f32.mrf.mxu0  ;;  %7760 = vmatmul.mubr.msk.f32.gmra.mxu0 %vm310_vm1, %v291_v41  ;;  %v7817_v59 = vpop.f32.mrf.mxu1  ;;  %7960 = vmatmul.mubr.msk.f32.gmra.mxu1 %vm310_vm1, %v6392_v42 }
  0xfa   : > { %v9006_v60 = vmax.f32 %v1421_v52, %v2767_v53  ;;  %v1420_v61 = vmax.f32 %v846_v54, 0.0  ;;  %v861_v62 = vadd.f32 %v7617_v57, %v8860_v8  ;;  %v2207_v0 = vadd.f32 %v7817_v59, %v8860_v8  ;;  %7762 = vmatprep.mubr.msk.f32.mxu0 %vm310_vm1, %v292_v47  ;;  %7962 = vmatprep.mubr.msk.f32.mxu1 %vm310_vm1, %v6393_v48  ;;  %v297_v48 = vld [vmem:[%s8453_s25 + $0x3c8] sm:$0xff]  ;;  %v298_v57 = vld [vmem:[%s8453_s25 + $0x3d0] sm:$0xff] }
  0xfb   : > { %v2766_v3 = vmax.f32 %v2192_v55, 0.0  ;;  %v855_v4 = vpop.f32.mrf.mxu0  ;;  %v2201_v5 = vpop.f32.mrf.mxu1  ;;  %v6398_v52 = vld [vmem:[%s8453_s25 + $0x7c8] sm:$0xff]  ;;  %v6399_v59 = vld [vmem:[%s8453_s25 + $0x7d0] sm:$0xff] }
  0xfc   : > { %v1423_v9 = vmax.f32 %v861_v62, 0.0  ;;  %v2769_v10 = vmax.f32 %v2207_v0, 0.0  ;;  %v856_v12 = vadd.f32 %v8860_v8, %v855_v4  ;;  %v2202_v13 = vadd.f32 %v8860_v8, %v2201_v5 }
  0xfd   : > { %v9018_v16 = vmax.f32 %v1420_v61, %v2766_v3  ;;  %v7620_v17 = vpop.f32.mrf.mxu0  ;;  %7763 = vmatmul.mubr.msk.f32.gmra.mxu0 %vm310_vm1, %v293_v1  ;;  %v7820_v19 = vpop.f32.mrf.mxu1  ;;  %7963 = vmatmul.mubr.msk.f32.gmra.mxu1 %vm310_vm1, %v6394_v2 }
  0xfe   : > { %v9022_v20 = vmax.f32 %v1423_v9, %v2769_v10  ;;  %v1422_v21 = vmax.f32 %v856_v12, 0.0  ;;  %v2768_v22 = vmax.f32 %v2202_v13, 0.0  ;;  %v871_v23 = vadd.f32 %v7620_v17, %v8860_v8  ;;  %7765 = vmatprep.mubr.msk.f32.mxu0 %vm310_vm1, %v294_v6  ;;  %7965 = vmatprep.mubr.msk.f32.mxu1 %vm310_vm1, %v6395_v7  ;;  %v299_v10 = vld [vmem:[%s8453_s25 + $0x3d8] sm:$0xff] }
  0xff   : > { %v2217_v26 = vadd.f32 %v7820_v19, %v8860_v8  ;;  %v865_v29 = vpop.f32.mrf.mxu0  ;;  %v2211_v31 = vpop.f32.mrf.mxu1  ;;  %v6400_v12 = vld [vmem:[%s8453_s25 + $0x7d8] sm:$0xff] }
 0x100   : > { %v9032_v34 = vmax.f32 %v1422_v21, %v2768_v22  ;;  %v1425_v35 = vmax.f32 %v871_v23, 0.0  ;;  %v866_v36 = vadd.f32 %v8860_v8, %v865_v29  ;;  %v2212_v37 = vadd.f32 %v8860_v8, %v2211_v31  ;;  %v300_v21 = vld [vmem:[%s8453_s25 + $0x3e0] sm:$0xff] }
 0x101   : > { %v2771_v39 = vmax.f32 %v2217_v26, 0.0  ;;  %v7623_v40 = vpop.f32.mrf.mxu0  ;;  %7766 = vmatmul.mubr.msk.f32.gmra.mxu0 %vm310_vm1, %v295_v24  ;;  %v7823_v41 = vpop.f32.mrf.mxu1  ;;  %7966 = vmatmul.mubr.msk.f32.gmra.mxu1 %vm310_vm1, %v6396_v25  ;;  %v6401_v22 = vld [vmem:[%s8453_s25 + $0x7e0] sm:$0xff] }
 0x102   : > { %v1424_v42 = vmax.f32 %v866_v36, 0.0  ;;  %v2770_v45 = vmax.f32 %v2212_v37, 0.0  ;;  %v881_v46 = vadd.f32 %v7623_v40, %v8860_v8  ;;  %v2227_v47 = vadd.f32 %v7823_v41, %v8860_v8  ;;  %7768 = vmatprep.mubr.msk.f32.mxu0 %vm310_vm1, %v296_v32  ;;  %7968 = vmatprep.mubr.msk.f32.mxu1 %vm310_vm1, %v6397_v33  ;;  %v6402_v40 = vld [vmem:[%s8453_s25 + $0x7e8] sm:$0xff] }
 0x103   : > { %v9044_v53 = vmax.f32 %v1425_v35, %v2771_v39  ;;  %v875_v54 = vpop.f32.mrf.mxu0  ;;  %v2221_v55 = vpop.f32.mrf.mxu1  ;;  %v301_v39 = vld [vmem:[%s8453_s25 + $0x3e8] sm:$0xff] }
 0x104   : > { %v9048_v61 = vmax.f32 %v1424_v42, %v2770_v45  ;;  %v1427_v62 = vmax.f32 %v881_v46, 0.0  ;;  %v2773_v0 = vmax.f32 %v2227_v47, 0.0  ;;  %v876_v1 = vadd.f32 %v8860_v8, %v875_v54  ;;  %v302_v46 = vld [vmem:[%s8453_s25 + $0x3f0] sm:$0xff] }
 0x105   : > { %v2222_v2 = vadd.f32 %v8860_v8, %v2221_v55  ;;  %v7626_v3 = vpop.f32.mrf.mxu0  ;;  %7769 = vmatmul.mubr.msk.f32.gmra.mxu0 %vm310_vm1, %v297_v48  ;;  %v7826_v4 = vpop.f32.mrf.mxu1  ;;  %7969 = vmatmul.mubr.msk.f32.gmra.mxu1 %vm310_vm1, %v6398_v52  ;;  %v6403_v47 = vld [vmem:[%s8453_s25 + $0x7f0] sm:$0xff] }
 0x106   : > { %v9054_v5 = vmax.f32 %v1427_v62, %v2773_v0  ;;  %v1426_v6 = vmax.f32 %v876_v1, 0.0  ;;  %v891_v7 = vadd.f32 %v7626_v3, %v8860_v8  ;;  %v2237_v9 = vadd.f32 %v7826_v4, %v8860_v8  ;;  %7771 = vmatprep.mubr.msk.f32.mxu0 %vm310_vm1, %v298_v57  ;;  %7971 = vmatprep.mubr.msk.f32.mxu1 %vm310_vm1, %v6399_v59  ;;  %v303_v4 = vld [vmem:[%s8453_s25 + $0x3f8] sm:$0xff] }
 0x107   : > { %v2772_v13 = vmax.f32 %v2222_v2, 0.0  ;;  %v885_v17 = vpop.f32.mrf.mxu0  ;;  %v2231_v19 = vpop.f32.mrf.mxu1 }
 0x108   : > { %v1429_v23 = vmax.f32 %v891_v7, 0.0  ;;  %v2775_v24 = vmax.f32 %v2237_v9, 0.0  ;;  %v886_v25 = vadd.f32 %v8860_v8, %v885_v17  ;;  %v2232_v26 = vadd.f32 %v8860_v8, %v2231_v19 }
 0x109   : > { %v9066_v29 = vmax.f32 %v1426_v6, %v2772_v13  ;;  %v7629_v31 = vpop.f32.mrf.mxu0  ;;  %7772 = vmatmul.mubr.msk.f32.gmra.mxu0 %vm310_vm1, %v299_v10  ;;  %v7829_v32 = vpop.f32.mrf.mxu1  ;;  %7972 = vmatmul.mubr.msk.f32.gmra.mxu1 %vm310_vm1, %v6400_v12  ;;  %v6404_v6 = vld [vmem:[%s8453_s25 + $0x7f8] sm:$0xff]  ;;  %v6534_v12 = vld [vmem:[%s8453_s25 + $0x800] sm:$0xff] }
 0x10a   : > { %v9070_v33 = vmax.f32 %v1429_v23, %v2775_v24  ;;  %v1428_v35 = vmax.f32 %v886_v25, 0.0  ;;  %v2774_v36 = vmax.f32 %v2232_v26, 0.0  ;;  %v901_v37 = vadd.f32 %v7629_v31, %v8860_v8  ;;  %7774 = vmatprep.mubr.msk.f32.mxu0 %vm310_vm1, %v300_v21  ;;  %7974 = vmatprep.mubr.msk.f32.mxu1 %vm310_vm1, %v6401_v22  ;;  %v6791_v13 = vld [vmem:[%s8453_s25 + $0xc00] sm:$0xff] }
 0x10b   : > { %v2247_v41 = vadd.f32 %v7829_v32, %v8860_v8  ;;  %v895_v42 = vpop.f32.mrf.mxu0  ;;  %v2241_v45 = vpop.f32.mrf.mxu1 }
 0x10c   : > { %v9080_v48 = vmax.f32 %v1428_v35, %v2774_v36  ;;  %v1431_v52 = vmax.f32 %v901_v37, 0.0  ;;  %v896_v54 = vadd.f32 %v8860_v8, %v895_v42  ;;  %v2242_v55 = vadd.f32 %v8860_v8, %v2241_v45  ;;  %v6535_v36 = vld [vmem:[%s8453_s25 + $0x808] sm:$0xff]  ;;  %v6536_v42 = vld [vmem:[%s8453_s25 + $0x810] sm:$0xff] }
 0x10d   : > { %v2777_v57 = vmax.f32 %v2247_v41, 0.0  ;;  %v7632_v59 = vpop.f32.mrf.mxu0  ;;  %7775 = vmatmul.mubr.msk.f32.gmra.mxu0 %vm310_vm1, %v301_v39  ;;  %v7832_v62 = vpop.f32.mrf.mxu1  ;;  %7975 = vmatmul.mubr.msk.f32.gmra.mxu1 %vm310_vm1, %v6402_v40  ;;  %v6792_v37 = vld [vmem:[%s8453_s25 + $0xc08] sm:$0xff]  ;;  %v6793_v45 = vld [vmem:[%s8453_s25 + $0xc10] sm:$0xff] }
 0x10e   : > { %v1430_v0 = vmax.f32 %v896_v54, 0.0  ;;  %v2776_v1 = vmax.f32 %v2242_v55, 0.0  ;;  %v911_v2 = vadd.f32 %v7632_v59, %v8860_v8  ;;  %v2257_v3 = vadd.f32 %v7832_v62, %v8860_v8  ;;  %7777 = vmatprep.mubr.msk.f32.mxu0 %vm310_vm1, %v302_v46  ;;  %7977 = vmatprep.mubr.msk.f32.mxu1 %vm310_vm1, %v6403_v47 }
 0x10f   : > { %v9092_v7 = vmax.f32 %v1431_v52, %v2777_v57  ;;  %v905_v9 = vpop.f32.mrf.mxu0  ;;  %v2251_v10 = vpop.f32.mrf.mxu1 }
 0x110   : > { %v9096_v17 = vmax.f32 %v1430_v0, %v2776_v1  ;;  %v1433_v19 = vmax.f32 %v911_v2, 0.0  ;;  %v2779_v21 = vmax.f32 %v2257_v3, 0.0  ;;  %v906_v22 = vadd.f32 %v8860_v8, %v905_v9  ;;  %v6537_v3 = vld [vmem:[%s8453_s25 + $0x818] sm:$0xff] }
 0x111   : > { %v2252_v23 = vadd.f32 %v8860_v8, %v2251_v10  ;;  %v7635_v24 = vpop.f32.mrf.mxu0  ;;  %7778 = vmatmul.mubr.msk.f32.gmra.mxu0 %vm310_vm1, %v303_v4  ;;  %v7835_v25 = vpop.f32.mrf.mxu1  ;;  %7978 = vmatmul.mubr.msk.f32.gmra.mxu1 %vm310_vm1, %v6404_v6  ;;  %v6794_v4 = vld [vmem:[%s8453_s25 + $0xc18] sm:$0xff] }
 0x112   : > { %v9102_v26 = vmax.f32 %v1433_v19, %v2779_v21  ;;  %v1432_v31 = vmax.f32 %v906_v22, 0.0  ;;  %v921_v32 = vadd.f32 %v7635_v24, %v8860_v8  ;;  %v2267_v35 = vadd.f32 %v7835_v25, %v8860_v8  ;;  %7988 = vmatprep.mubr.msk.f32.mxu0 %vm310_vm1, %v6534_v12  ;;  %8188 = vmatprep.mubr.msk.f32.mxu1 %vm310_vm1, %v6791_v13  ;;  %v6538_v12 = vld [vmem:[%s8453_s25 + $0x820] sm:$0xff] }
 0x113   : > { %v2778_v39 = vmax.f32 %v2252_v23, 0.0  ;;  %v915_v40 = vpop.f32.mrf.mxu0  ;;  %v2261_v41 = vpop.f32.mrf.mxu1  ;;  %v6795_v13 = vld [vmem:[%s8453_s25 + $0xc20] sm:$0xff] }
 0x114   : > { %v1435_v46 = vmax.f32 %v921_v32, 0.0  ;;  %v2781_v47 = vmax.f32 %v2267_v35, 0.0  ;;  %v916_v52 = vadd.f32 %v8860_v8, %v915_v40  ;;  %v2262_v54 = vadd.f32 %v8860_v8, %v2261_v41  ;;  %v6796_v40 = vld [vmem:[%s8453_s25 + $0xc28] sm:$0xff] }
 0x115   : > { %v9114_v55 = vmax.f32 %v1432_v31, %v2778_v39  ;;  %v7638_v57 = vpop.f32.mrf.mxu0  ;;  %v7838_v59 = vpop.f32.mrf.mxu1  ;;  %7989 = vmatmul.mubr.msk.f32.vlgmr.msra.gmra.mxu0 %vm310_vm1, %v6535_v36  ;;  %8189 = vmatmul.mubr.msk.f32.vlgmr.msra.gmra.mxu1 %vm310_vm1, %v6792_v37  ;;  %v6539_v39 = vld [vmem:[%s8453_s25 + $0x828] sm:$0xff] }
 0x116   : > { %v9118_v62 = vmax.f32 %v1435_v46, %v2781_v47  ;;  %v1434_v0 = vmax.f32 %v916_v52, 0.0  ;;  %v2780_v1 = vmax.f32 %v2262_v54, 0.0  ;;  %v931_v2 = vadd.f32 %v7638_v57, %v8860_v8  ;;  %7991 = vmatprep.mubr.msk.f32.mxu0 %vm310_vm1, %v6536_v42  ;;  %8191 = vmatprep.mubr.msk.f32.mxu1 %vm310_vm1, %v6793_v45  ;;  %v6540_v46 = vld [vmem:[%s8453_s25 + $0x830] sm:$0xff] }
 0x117   : > { %v2277_v6 = vadd.f32 %v7838_v59, %v8860_v8  ;;  %v925_v9 = vpop.f32.mrf.mxu0  ;;  %v2271_v10 = vpop.f32.mrf.mxu1  ;;  %v6797_v47 = vld [vmem:[%s8453_s25 + $0xc30] sm:$0xff] }
 0x118   : > { %v9128_v19 = vmax.f32 %v1434_v0, %v2780_v1  ;;  %v1437_v21 = vmax.f32 %v931_v2, 0.0  ;;  %v926_v22 = vadd.f32 %v8860_v8, %v925_v9  ;;  %v2272_v23 = vadd.f32 %v8860_v8, %v2271_v10  ;;  %v6541_v10 = vld [vmem:[%s8453_s25 + $0x838] sm:$0xff] }
 0x119   : > { %v2783_v24 = vmax.f32 %v2277_v6, 0.0  ;;  %v7641_v25 = vpop.f32.mrf.mxu0  ;;  %v7841_v31 = vpop.f32.mrf.mxu1  ;;  %7992 = vmatmul.mubr.msk.f32.gmra.mxu0 %vm310_vm1, %v6537_v3  ;;  %8192 = vmatmul.mubr.msk.f32.gmra.mxu1 %vm310_vm1, %v6794_v4 }
 0x11a   : > { %v1436_v32 = vmax.f32 %v926_v22, 0.0  ;;  %v2782_v35 = vmax.f32 %v2272_v23, 0.0  ;;  %v941_v36 = vadd.f32 %v7641_v25, %v8860_v8  ;;  %v2287_v37 = vadd.f32 %v7841_v31, %v8860_v8  ;;  %7994 = vmatprep.mubr.msk.f32.mxu0 %vm310_vm1, %v6538_v12  ;;  %8194 = vmatprep.mubr.msk.f32.mxu1 %vm310_vm1, %v6795_v13  ;;  %v6798_v12 = vld [vmem:[%s8453_s25 + $0xc38] sm:$0xff]  ;;  %v6542_v23 = vld [vmem:[%s8453_s25 + $0x840] sm:$0xff] }
 0x11b   : > { %v9140_v41 = vmax.f32 %v1437_v21, %v2783_v24  ;;  %v935_v42 = vpop.f32.mrf.mxu0  ;;  %v2281_v45 = vpop.f32.mrf.mxu1  ;;  %v6799_v24 = vld [vmem:[%s8453_s25 + $0xc40] sm:$0xff] }
 0x11c   : > { %v9144_v52 = vmax.f32 %v1436_v32, %v2782_v35  ;;  %v1439_v54 = vmax.f32 %v941_v36, 0.0  ;;  %v2785_v57 = vmax.f32 %v2287_v37, 0.0  ;;  %v936_v59 = vadd.f32 %v8860_v8, %v935_v42 }
 0x11d   : > { %v2282_v0 = vadd.f32 %v8860_v8, %v2281_v45  ;;  %v7644_v1 = vpop.f32.mrf.mxu0  ;;  %v7844_v2 = vpop.f32.mrf.mxu1  ;;  %7995 = vmatmul.mubr.msk.f32.gmra.mxu0 %vm310_vm1, %v6539_v39  ;;  %8195 = vmatmul.mubr.msk.f32.gmra.mxu1 %vm310_vm1, %v6796_v40 }
 0x11e   : > { %v9150_v3 = vmax.f32 %v1439_v54, %v2785_v57  ;;  %v1438_v4 = vmax.f32 %v936_v59, 0.0  ;;  %v951_v6 = vadd.f32 %v7644_v1, %v8860_v8  ;;  %v2297_v9 = vadd.f32 %v7844_v2, %v8860_v8  ;;  %7997 = vmatprep.mubr.msk.f32.mxu0 %vm310_vm1, %v6540_v46  ;;  %8197 = vmatprep.mubr.msk.f32.mxu1 %vm310_vm1, %v6797_v47  ;;  %v6543_v47 = vld [vmem:[%s8453_s25 + $0x848] sm:$0xff]  ;;  %v6544_v1 = vld [vmem:[%s8453_s25 + $0x850] sm:$0xff] }
 0x11f   : > { %v2784_v13 = vmax.f32 %v2282_v0, 0.0  ;;  %v945_v21 = vpop.f32.mrf.mxu0  ;;  %v2291_v22 = vpop.f32.mrf.mxu1  ;;  %v6800_v54 = vld [vmem:[%s8453_s25 + $0xc48] sm:$0xff]  ;;  %v6801_v2 = vld [vmem:[%s8453_s25 + $0xc50] sm:$0xff] }
 0x120   : > { %v1441_v25 = vmax.f32 %v951_v6, 0.0  ;;  %v2787_v31 = vmax.f32 %v2297_v9, 0.0  ;;  %v946_v32 = vadd.f32 %v8860_v8, %v945_v21  ;;  %v2292_v35 = vadd.f32 %v8860_v8, %v2291_v22 }
 0x121   : > { %v9162_v36 = vmax.f32 %v1438_v4, %v2784_v13  ;;  %v7647_v37 = vpop.f32.mrf.mxu0  ;;  %v7847_v39 = vpop.f32.mrf.mxu1  ;;  %7998 = vmatmul.mubr.msk.f32.gmra.mxu0 %vm310_vm1, %v6541_v10  ;;  %8198 = vmatmul.mubr.msk.f32.gmra.mxu1 %vm310_vm1, %v6798_v12 }
 0x122   : > { %v9166_v40 = vmax.f32 %v1441_v25, %v2787_v31  ;;  %v1440_v42 = vmax.f32 %v946_v32, 0.0  ;;  %v2786_v45 = vmax.f32 %v2292_v35, 0.0  ;;  %v961_v46 = vadd.f32 %v7647_v37, %v8860_v8  ;;  %8000 = vmatprep.mubr.msk.f32.mxu0 %vm310_vm1, %v6542_v23  ;;  %8200 = vmatprep.mubr.msk.f32.mxu1 %vm310_vm1, %v6799_v24  ;;  %v6545_v31 = vld [vmem:[%s8453_s25 + $0x858] sm:$0xff] }
 0x123   : > { %v2307_v57 = vadd.f32 %v7847_v39, %v8860_v8  ;;  %v955_v59 = vpop.f32.mrf.mxu0  ;;  %v2301_v0 = vpop.f32.mrf.mxu1  ;;  %v6802_v32 = vld [vmem:[%s8453_s25 + $0xc58] sm:$0xff] }
 0x124   : > { %v9176_v4 = vmax.f32 %v1440_v42, %v2786_v45  ;;  %v1443_v6 = vmax.f32 %v961_v46, 0.0  ;;  %v956_v9 = vadd.f32 %v8860_v8, %v955_v59  ;;  %v2302_v10 = vadd.f32 %v8860_v8, %v2301_v0  ;;  %v6546_v42 = vld [vmem:[%s8453_s25 + $0x860] sm:$0xff] }
 0x125   : > { %v2789_v12 = vmax.f32 %v2307_v57, 0.0  ;;  %v7650_v13 = vpop.f32.mrf.mxu0  ;;  %v7850_v21 = vpop.f32.mrf.mxu1  ;;  %8001 = vmatmul.mubr.msk.f32.gmra.mxu0 %vm310_vm1, %v6543_v47  ;;  %8201 = vmatmul.mubr.msk.f32.gmra.mxu1 %vm310_vm1, %v6800_v54  ;;  %v6803_v45 = vld [vmem:[%s8453_s25 + $0xc60] sm:$0xff] }
 0x126   : > { %v1442_v22 = vmax.f32 %v956_v9, 0.0  ;;  %v2788_v23 = vmax.f32 %v2302_v10, 0.0  ;;  %v971_v24 = vadd.f32 %v7650_v13, %v8860_v8  ;;  %v2317_v25 = vadd.f32 %v7850_v21, %v8860_v8  ;;  %8003 = vmatprep.mubr.msk.f32.mxu0 %vm310_vm1, %v6544_v1  ;;  %8203 = vmatprep.mubr.msk.f32.mxu1 %vm310_vm1, %v6801_v2  ;;  %v6804_v13 = vld [vmem:[%s8453_s25 + $0xc68] sm:$0xff] }
 0x127   : > { %v9188_v35 = vmax.f32 %v1443_v6, %v2789_v12  ;;  %v965_v37 = vpop.f32.mrf.mxu0  ;;  %v2311_v39 = vpop.f32.mrf.mxu1  ;;  %v6547_v12 = vld [vmem:[%s8453_s25 + $0x868] sm:$0xff] }
 0x128   : > { %v9192_v46 = vmax.f32 %v1442_v22, %v2788_v23  ;;  %v1445_v47 = vmax.f32 %v971_v24, 0.0  ;;  %v2791_v54 = vmax.f32 %v2317_v25, 0.0  ;;  %v966_v57 = vadd.f32 %v8860_v8, %v965_v37  ;;  %v6548_v24 = vld [vmem:[%s8453_s25 + $0x870] sm:$0xff] }
 0x129   : > { %v2312_v59 = vadd.f32 %v8860_v8, %v2311_v39  ;;  %v7653_v0 = vpop.f32.mrf.mxu0  ;;  %v7853_v1 = vpop.f32.mrf.mxu1  ;;  %8004 = vmatmul.mubr.msk.f32.gmra.mxu0 %vm310_vm1, %v6545_v31  ;;  %8204 = vmatmul.mubr.msk.f32.gmra.mxu1 %vm310_vm1, %v6802_v32  ;;  %v6805_v25 = vld [vmem:[%s8453_s25 + $0xc70] sm:$0xff] }
 0x12a   : > { %v9198_v2 = vmax.f32 %v1445_v47, %v2791_v54  ;;  %v1444_v6 = vmax.f32 %v966_v57, 0.0  ;;  %v981_v9 = vadd.f32 %v7653_v0, %v8860_v8  ;;  %v2327_v10 = vadd.f32 %v7853_v1, %v8860_v8  ;;  %8006 = vmatprep.mubr.msk.f32.mxu0 %vm310_vm1, %v6546_v42  ;;  %8206 = vmatprep.mubr.msk.f32.mxu1 %vm310_vm1, %v6803_v45  ;;  %v6549_v1 = vld [vmem:[%s8453_s25 + $0x878] sm:$0xff] }
 0x12b   : > { %v2790_v21 = vmax.f32 %v2312_v59, 0.0  ;;  %v975_v22 = vpop.f32.mrf.mxu0  ;;  %v2321_v23 = vpop.f32.mrf.mxu1 }
 0x12c   : > { %v1447_v31 = vmax.f32 %v981_v9, 0.0  ;;  %v2793_v32 = vmax.f32 %v2327_v10, 0.0  ;;  %v976_v37 = vadd.f32 %v8860_v8, %v975_v22  ;;  %v2322_v39 = vadd.f32 %v8860_v8, %v2321_v23  ;;  %v6550_v22 = vld [vmem:[%s8453_s25 + $0x880] sm:$0xff] }
 0x12d   : > { %v9210_v47 = vmax.f32 %v1444_v6, %v2790_v21  ;;  %v7656_v42 = vpop.f32.mrf.mxu0  ;;  %v7856_v45 = vpop.f32.mrf.mxu1  ;;  %8007 = vmatmul.mubr.msk.f32.gmra.mxu0 %vm310_vm1, %v6547_v12  ;;  %8207 = vmatmul.mubr.msk.f32.gmra.mxu1 %vm310_vm1, %v6804_v13  ;;  %v6806_v6 = vld [vmem:[%s8453_s25 + $0xc78] sm:$0xff]  ;;  %v6807_v12 = vld [vmem:[%s8453_s25 + $0xc80] sm:$0xff] }
 0x12e   : > { %v9214_v54 = vmax.f32 %v1447_v31, %v2793_v32  ;;  %v1446_v57 = vmax.f32 %v976_v37, 0.0  ;;  %v2792_v59 = vmax.f32 %v2322_v39, 0.0  ;;  %v991_v0 = vadd.f32 %v7656_v42, %v8860_v8  ;;  %8009 = vmatprep.mubr.msk.f32.mxu0 %vm310_vm1, %v6548_v24  ;;  %8209 = vmatprep.mubr.msk.f32.mxu1 %vm310_vm1, %v6805_v25 }
 0x12f   : > { %v2337_v9 = vadd.f32 %v7856_v45, %v8860_v8  ;;  %v985_v10 = vpop.f32.mrf.mxu0  ;;  %v2331_v21 = vpop.f32.mrf.mxu1 }
 0x130   : > { %10686 = vst [vmem:[#allocation2_spill] sm:$0xff] %v9214_v54  ;;  %v9224_v23 = vmax.f32 %v1446_v57, %v2792_v59  ;;  %v1449_v13 = vmax.f32 %v991_v0, 0.0  ;;  %v986_v31 = vadd.f32 %v8860_v8, %v985_v10  ;;  %v2332_v32 = vadd.f32 %v8860_v8, %v2331_v21  ;;  %v9234_v57 = vld [vmem:[%s10684_s2] ss:$0 sm:$0xff]  ;;  %v6551_v0 = vld [vmem:[%s8453_s25 + $0x888] sm:$0xff]  ;;  %v6552_v21 = vld [vmem:[%s8453_s25 + $0x890] sm:$0xff] }
 0x131   : > { %v2795_v24 = vmax.f32 %v2337_v9, 0.0  ;;  %v7659_v37 = vpop.f32.mrf.mxu0  ;;  %v7859_v25 = vpop.f32.mrf.mxu1  ;;  %8010 = vmatmul.mubr.msk.f32.gmra.mxu0 %vm310_vm1, %v6549_v1  ;;  %8210 = vmatmul.mubr.msk.f32.gmra.mxu1 %vm310_vm1, %v6806_v6  ;;  %v6808_v9 = vld [vmem:[%s8453_s25 + $0xc88] sm:$0xff] }
 0x132   : > { %10687 = vst [vmem:[#allocation3_spill] sm:$0xff] %v9224_v23  ;;  %v1448_v39 = vmax.f32 %v986_v31, 0.0  ;;  %v2794_v42 = vmax.f32 %v2332_v32, 0.0  ;;  %v1001_v45 = vadd.f32 %v7659_v37, %v8860_v8  ;;  %v2347_v59 = vadd.f32 %v9234_v57, %v7859_v25  ;;  %8012 = vmatprep.mubr.msk.f32.mxu0 %vm310_vm1, %v6550_v22  ;;  %8212 = vmatprep.mubr.msk.f32.mxu1 %vm310_vm1, %v6807_v12  ;;  %v6809_v31 = vld [vmem:[%s8453_s25 + $0xc90] sm:$0xff] }
 0x133   : > { %v9241_v1 = vmax.f32 %v1449_v13, %v2795_v24  ;;  %v995_v6 = vpop.f32.mrf.mxu0  ;;  %v2341_v10 = vpop.f32.mrf.mxu1 }
 0x134   : > { %v9245_v8 = vmax.f32 %v1448_v39, %v2794_v42  ;;  %v1451_v32 = vmax.f32 %v1001_v45, 0.0  ;;  %v2797_v37 = vmax.f32 %v2347_v59, 0.0  ;;  %v996_v25 = vadd.f32 %v9234_v57, %v995_v6  ;;  %v6553_v45 = vld [vmem:[%s8453_s25 + $0x898] sm:$0xff] }
 0x135   : > { %10688 = vst [vmem:[#allocation4_spill] sm:$0xff] %v9241_v1  ;;  %v2342_v22 = vadd.f32 %v9234_v57, %v2341_v10  ;;  %v7662_v12 = vpop.f32.mrf.mxu0  ;;  %v7862_v23 = vpop.f32.mrf.mxu1  ;;  %8013 = vmatmul.mubr.msk.f32.gmra.mxu0 %vm310_vm1, %v6551_v0  ;;  %8213 = vmatmul.mubr.msk.f32.gmra.mxu1 %vm310_vm1, %v6808_v9  ;;  %v6810_v59 = vld [vmem:[%s8453_s25 + $0xc98] sm:$0xff]  ;;  %v6554_v1 = vld [vmem:[%s8453_s25 + $0x8a0] sm:$0xff] }
 0x136   : > { %10689 = vst [vmem:[#allocation5_spill] sm:$0xff] %v9245_v8  ;;  %v9251_v13 = vmax.f32 %v1451_v32, %v2797_v37  ;;  %v1450_v24 = vmax.f32 %v996_v25, 0.0  ;;  %v1011_v39 = vadd.f32 %v9234_v57, %v7662_v12  ;;  %v2357_v42 = vadd.f32 %v9234_v57, %v7862_v23  ;;  %8015 = vmatprep.mubr.msk.f32.mxu0 %vm310_vm1, %v6552_v21  ;;  %v6811_v0 = vld [vmem:[%s8453_s25 + $0xca0] sm:$0xff] }
 0x137   : > { %8215 = vmatprep.mubr.msk.f32.mxu1 %vm310_vm1, %v6809_v31  ;;  %v2796_v6 = vmax.f32 %v2342_v22, 0.0  ;;  %v1005_v10 = vpop.f32.mrf.mxu0  ;;  %v2351_v8 = vpop.f32.mrf.mxu1 }
 0x138   : > { %10690 = vst [vmem:[#allocation6_spill] sm:$0xff] %v9251_v13  ;;  %v1453_v9 = vmax.f32 %v1011_v39, 0.0  ;;  %v2799_v32 = vmax.f32 %v2357_v42, 0.0  ;;  %v1006_v37 = vadd.f32 %v9234_v57, %v1005_v10  ;;  %v2352_v25 = vadd.f32 %v9234_v57, %v2351_v8  ;;  %v6555_v8 = vld [vmem:[%s8453_s25 + $0x8a8] sm:$0xff]  ;;  %v6556_v13 = vld [vmem:[%s8453_s25 + $0x8b0] sm:$0xff] }
 0x139   : > { %v9263_v23 = vmax.f32 %v1450_v24, %v2796_v6  ;;  %v7665_v21 = vpop.f32.mrf.mxu0  ;;  %v7865_v31 = vpop.f32.mrf.mxu1  ;;  %8016 = vmatmul.mubr.msk.f32.gmra.mxu0 %vm310_vm1, %v6553_v45  ;;  %8216 = vmatmul.mubr.msk.f32.gmra.mxu1 %vm310_vm1, %v6810_v59  ;;  %v6812_v24 = vld [vmem:[%s8453_s25 + $0xca8] sm:$0xff]  ;;  %v6813_v45 = vld [vmem:[%s8453_s25 + $0xcb0] sm:$0xff] }
 0x13a   : > { %v9267_v22 = vmax.f32 %v1453_v9, %v2799_v32  ;;  %v1452_v12 = vmax.f32 %v1006_v37, 0.0  ;;  %v2798_v39 = vmax.f32 %v2352_v25, 0.0  ;;  %v1021_v42 = vadd.f32 %v9234_v57, %v7665_v21  ;;  %8018 = vmatprep.mubr.msk.f32.mxu0 %vm310_vm1, %v6554_v1  ;;  %8218 = vmatprep.mubr.msk.f32.mxu1 %vm310_vm1, %v6811_v0 }
 0x13b   : > { %10691 = vst [vmem:[#allocation7_spill] sm:$0xff] %v9263_v23  ;;  %v2367_v6 = vadd.f32 %v9234_v57, %v7865_v31  ;;  %v1015_v10 = vpop.f32.mrf.mxu0  ;;  %v2361_v23 = vpop.f32.mrf.mxu1 }
 0x13c   : > { %10692 = vst [vmem:[#allocation8_spill] sm:$0xff] %v9267_v22  ;;  %v9277_v59 = vmax.f32 %v1452_v12, %v2798_v39  ;;  %v1455_v9 = vmax.f32 %v1021_v42, 0.0  ;;  %v1016_v32 = vadd.f32 %v9234_v57, %v1015_v10  ;;  %v2362_v37 = vadd.f32 %v9234_v57, %v2361_v23  ;;  %v6557_v23 = vld [vmem:[%s8453_s25 + $0x8b8] sm:$0xff]  ;;  %v6558_v22 = vld [vmem:[%s8453_s25 + $0x8c0] sm:$0xff] }
 0x13d   : > { %v2801_v1 = vmax.f32 %v2367_v6, 0.0  ;;  %v7668_v0 = vpop.f32.mrf.mxu0  ;;  %v7868_v25 = vpop.f32.mrf.mxu1  ;;  %8019 = vmatmul.mubr.msk.f32.gmra.mxu0 %vm310_vm1, %v6555_v8  ;;  %8219 = vmatmul.mubr.msk.f32.gmra.mxu1 %vm310_vm1, %v6812_v24  ;;  %v6814_v42 = vld [vmem:[%s8453_s25 + $0xcb8] sm:$0xff]  ;;  %v6815_v8 = vld [vmem:[%s8453_s25 + $0xcc0] sm:$0xff] }
 0x13e   : > { %10693 = vst [vmem:[#allocation9_spill] sm:$0xff] %v9277_v59  ;;  %v1454_v21 = vmax.f32 %v1016_v32, 0.0  ;;  %v2800_v31 = vmax.f32 %v2362_v37, 0.0  ;;  %v1031_v12 = vadd.f32 %v9234_v57, %v7668_v0  ;;  %v2377_v39 = vadd.f32 %v9234_v57, %v7868_v25  ;;  %8021 = vmatprep.mubr.msk.f32.mxu0 %vm310_vm1, %v6556_v13  ;;  %8221 = vmatprep.mubr.msk.f32.mxu1 %vm310_vm1, %v6813_v45 }
 0x13f   : > { %v9289_v6 = vmax.f32 %v1455_v9, %v2801_v1  ;;  %v1025_v10 = vpop.f32.mrf.mxu0  ;;  %v2371_v59 = vpop.f32.mrf.mxu1 }
 0x140   : > { %v9293_v24 = vmax.f32 %v1454_v21, %v2800_v31  ;;  %v1457_v32 = vmax.f32 %v1031_v12, 0.0  ;;  %v2803_v37 = vmax.f32 %v2377_v39, 0.0  ;;  %v1026_v0 = vadd.f32 %v9234_v57, %v1025_v10  ;;  %v6816_v12 = vld [vmem:[%s8453_s25 + $0xcc8] sm:$0xff] }
 0x141   : > { %10694 = vst [vmem:[#allocation10_spill] sm:$0xff] %v9289_v6  ;;  %v2372_v13 = vadd.f32 %v9234_v57, %v2371_v59  ;;  %v7671_v45 = vpop.f32.mrf.mxu0  ;;  %v7871_v25 = vpop.f32.mrf.mxu1  ;;  %8022 = vmatmul.mubr.msk.f32.gmra.mxu0 %vm310_vm1, %v6557_v23  ;;  %8222 = vmatmul.mubr.msk.f32.gmra.mxu1 %vm310_vm1, %v6814_v42  ;;  %v6559_v59 = vld [vmem:[%s8453_s25 + $0x8c8] sm:$0xff]  ;;  %v6560_v6 = vld [vmem:[%s8453_s25 + $0x8d0] sm:$0xff] }
 0x142   : > { %10695 = vst [vmem:[#allocation11_spill] sm:$0xff] %v9293_v24  ;;  %v9299_v9 = vmax.f32 %v1457_v32, %v2803_v37  ;;  %v1456_v1 = vmax.f32 %v1026_v0, 0.0  ;;  %v1041_v21 = vadd.f32 %v9234_v57, %v7671_v45  ;;  %v2387_v31 = vadd.f32 %v9234_v57, %v7871_v25  ;;  %8024 = vmatprep.mubr.msk.f32.mxu0 %vm310_vm1, %v6558_v22  ;;  %v6817_v23 = vld [vmem:[%s8453_s25 + $0xcd0] sm:$0xff] }
 0x143   : > { %8224 = vmatprep.mubr.msk.f32.mxu1 %vm310_vm1, %v6815_v8  ;;  %v2802_v39 = vmax.f32 %v2372_v13, 0.0  ;;  %v1035_v10 = vpop.f32.mrf.mxu0  ;;  %v2381_v24 = vpop.f32.mrf.mxu1 }
 0x144   : > { %10696 = vst [vmem:[#allocation12_spill] sm:$0xff] %v9299_v9  ;;  %v1459_v42 = vmax.f32 %v1041_v21, 0.0  ;;  %v2805_v32 = vmax.f32 %v2387_v31, 0.0  ;;  %v1036_v37 = vadd.f32 %v9234_v57, %v1035_v10  ;;  %v2382_v0 = vadd.f32 %v9234_v57, %v2381_v24  ;;  %v6561_v24 = vld [vmem:[%s8453_s25 + $0x8d8] sm:$0xff]  ;;  %v6562_v9 = vld [vmem:[%s8453_s25 + $0x8e0] sm:$0xff] }
 0x145   : > { %v9311_v45 = vmax.f32 %v1456_v1, %v2802_v39  ;;  %v7674_v22 = vpop.f32.mrf.mxu0  ;;  %v7874_v8 = vpop.f32.mrf.mxu1  ;;  %8025 = vmatmul.mubr.msk.f32.gmra.mxu0 %vm310_vm1, %v6559_v59  ;;  %8225 = vmatmul.mubr.msk.f32.gmra.mxu1 %vm310_vm1, %v6816_v12  ;;  %v6818_v1 = vld [vmem:[%s8453_s25 + $0xcd8] sm:$0xff]  ;;  %v6819_v59 = vld [vmem:[%s8453_s25 + $0xce0] sm:$0xff] }
 0x146   : > { %v9315_v13 = vmax.f32 %v1459_v42, %v2805_v32  ;;  %v1458_v25 = vmax.f32 %v1036_v37, 0.0  ;;  %v2804_v21 = vmax.f32 %v2382_v0, 0.0  ;;  %v1051_v31 = vadd.f32 %v9234_v57, %v7674_v22  ;;  %8027 = vmatprep.mubr.msk.f32.mxu0 %vm310_vm1, %v6560_v6  ;;  %8227 = vmatprep.mubr.msk.f32.mxu1 %vm310_vm1, %v6817_v23 }
 0x147   : > { %10697 = vst [vmem:[#allocation13_spill] sm:$0xff] %v9311_v45  ;;  %v2397_v39 = vadd.f32 %v9234_v57, %v7874_v8  ;;  %v1045_v10 = vpop.f32.mrf.mxu0  ;;  %v2391_v45 = vpop.f32.mrf.mxu1 }
 0x148   : > { %10698 = vst [vmem:[#allocation14_spill] sm:$0xff] %v9315_v13  ;;  %v9325_v12 = vmax.f32 %v1458_v25, %v2804_v21  ;;  %v1461_v42 = vmax.f32 %v1051_v31, 0.0  ;;  %v1046_v32 = vadd.f32 %v9234_v57, %v1045_v10  ;;  %v2392_v37 = vadd.f32 %v9234_v57, %v2391_v45  ;;  %v6563_v45 = vld [vmem:[%s8453_s25 + $0x8e8] sm:$0xff]  ;;  %v6564_v13 = vld [vmem:[%s8453_s25 + $0x8f0] sm:$0xff] }
 0x149   : > { %v2807_v6 = vmax.f32 %v2397_v39, 0.0  ;;  %v7677_v23 = vpop.f32.mrf.mxu0  ;;  %v7877_v0 = vpop.f32.mrf.mxu1  ;;  %8028 = vmatmul.mubr.msk.f32.gmra.mxu0 %vm310_vm1, %v6561_v24  ;;  %8228 = vmatmul.mubr.msk.f32.gmra.mxu1 %vm310_vm1, %v6818_v1  ;;  %v6820_v31 = vld [vmem:[%s8453_s25 + $0xce8] sm:$0xff]  ;;  %v6821_v24 = vld [vmem:[%s8453_s25 + $0xcf0] sm:$0xff] }
 0x14a   : > { %10699 = vst [vmem:[#allocation15_spill] sm:$0xff] %v9325_v12  ;;  %v1460_v22 = vmax.f32 %v1046_v32, 0.0  ;;  %v2806_v8 = vmax.f32 %v2392_v37, 0.0  ;;  %v1061_v25 = vadd.f32 %v9234_v57, %v7677_v23  ;;  %v2407_v21 = vadd.f32 %v9234_v57, %v7877_v0  ;;  %8030 = vmatprep.mubr.msk.f32.mxu0 %vm310_vm1, %v6562_v9  ;;  %8230 = vmatprep.mubr.msk.f32.mxu1 %vm310_vm1, %v6819_v59 }
 0x14b   : > { %v9337_v39 = vmax.f32 %v1461_v42, %v2807_v6  ;;  %v1055_v10 = vpop.f32.mrf.mxu0  ;;  %v2401_v12 = vpop.f32.mrf.mxu1 }
 0x14c   : > { %v9341_v1 = vmax.f32 %v1460_v22, %v2806_v8  ;;  %v1463_v32 = vmax.f32 %v1061_v25, 0.0  ;;  %v2809_v37 = vmax.f32 %v2407_v21, 0.0  ;;  %v1056_v23 = vadd.f32 %v9234_v57, %v1055_v10  ;;  %v6822_v25 = vld [vmem:[%s8453_s25 + $0xcf8] sm:$0xff] }
 0x14d   : > { %10700 = vst [vmem:[#allocation16_spill] sm:$0xff] %v9337_v39  ;;  %v2402_v9 = vadd.f32 %v9234_v57, %v2401_v12  ;;  %v7680_v59 = vpop.f32.mrf.mxu0  ;;  %v7880_v0 = vpop.f32.mrf.mxu1  ;;  %8031 = vmatmul.mubr.msk.f32.gmra.mxu0 %vm310_vm1, %v6563_v45  ;;  %8231 = vmatmul.mubr.msk.f32.gmra.mxu1 %vm310_vm1, %v6820_v31  ;;  %v6565_v12 = vld [vmem:[%s8453_s25 + $0x8f8] sm:$0xff]  ;;  %v6566_v39 = vld [vmem:[%s8453_s25 + $0x900] sm:$0xff] }
 0x14e   : > { %10701 = vst [vmem:[#allocation17_spill] sm:$0xff] %v9341_v1  ;;  %v9347_v42 = vmax.f32 %v1463_v32, %v2809_v37  ;;  %v1462_v6 = vmax.f32 %v1056_v23, 0.0  ;;  %v1071_v22 = vadd.f32 %v9234_v57, %v7680_v59  ;;  %v2417_v8 = vadd.f32 %v9234_v57, %v7880_v0  ;;  %8033 = vmatprep.mubr.msk.f32.mxu0 %vm310_vm1, %v6564_v13  ;;  %v6823_v45 = vld [vmem:[%s8453_s25 + $0xd00] sm:$0xff] }
 0x14f   : > { %8233 = vmatprep.mubr.msk.f32.mxu1 %vm310_vm1, %v6821_v24  ;;  %v2808_v21 = vmax.f32 %v2402_v9, 0.0  ;;  %v1065_v10 = vpop.f32.mrf.mxu0  ;;  %v2411_v1 = vpop.f32.mrf.mxu1 }
 0x150   : > { %10702 = vst [vmem:[#allocation18_spill] sm:$0xff] %v9347_v42  ;;  %v1465_v31 = vmax.f32 %v1071_v22, 0.0  ;;  %v2811_v32 = vmax.f32 %v2417_v8, 0.0  ;;  %v1066_v37 = vadd.f32 %v9234_v57, %v1065_v10  ;;  %v2412_v23 = vadd.f32 %v9234_v57, %v2411_v1  ;;  %v6567_v1 = vld [vmem:[%s8453_s25 + $0x908] sm:$0xff]  ;;  %v6568_v42 = vld [vmem:[%s8453_s25 + $0x910] sm:$0xff] }
 0x151   : > { %v9359_v59 = vmax.f32 %v1462_v6, %v2808_v21  ;;  %v7683_v13 = vpop.f32.mrf.mxu0  ;;  %v7883_v24 = vpop.f32.mrf.mxu1  ;;  %8034 = vmatmul.mubr.msk.f32.gmra.mxu0 %vm310_vm1, %v6565_v12  ;;  %8234 = vmatmul.mubr.msk.f32.gmra.mxu1 %vm310_vm1, %v6822_v25  ;;  %v6824_v6 = vld [vmem:[%s8453_s25 + $0xd08] sm:$0xff]  ;;  %v6825_v12 = vld [vmem:[%s8453_s25 + $0xd10] sm:$0xff] }
 0x152   : > { %v9363_v9 = vmax.f32 %v1465_v31, %v2811_v32  ;;  %v1464_v0 = vmax.f32 %v1066_v37, 0.0  ;;  %v2810_v22 = vmax.f32 %v2412_v23, 0.0  ;;  %v1081_v8 = vadd.f32 %v9234_v57, %v7683_v13  ;;  %8036 = vmatprep.mubr.msk.f32.mxu0 %vm310_vm1, %v6566_v39  ;;  %8236 = vmatprep.mubr.msk.f32.mxu1 %vm310_vm1, %v6823_v45 }
 0x153   : > { %10703 = vst [vmem:[#allocation19_spill] sm:$0xff] %v9359_v59  ;;  %v2427_v21 = vadd.f32 %v9234_v57, %v7883_v24  ;;  %v1075_v10 = vpop.f32.mrf.mxu0  ;;  %v2421_v59 = vpop.f32.mrf.mxu1 }
 0x154   : > { %10704 = vst [vmem:[#allocation20_spill] sm:$0xff] %v9363_v9  ;;  %v9373_v25 = vmax.f32 %v1464_v0, %v2810_v22  ;;  %v1467_v31 = vmax.f32 %v1081_v8, 0.0  ;;  %v1076_v32 = vadd.f32 %v9234_v57, %v1075_v10  ;;  %v2422_v37 = vadd.f32 %v9234_v57, %v2421_v59  ;;  %v6569_v59 = vld [vmem:[%s8453_s25 + $0x918] sm:$0xff]  ;;  %v6570_v9 = vld [vmem:[%s8453_s25 + $0x920] sm:$0xff] }
 0x155   : > { %v2813_v39 = vmax.f32 %v2427_v21, 0.0  ;;  %v7686_v45 = vpop.f32.mrf.mxu0  ;;  %v7886_v23 = vpop.f32.mrf.mxu1  ;;  %8037 = vmatmul.mubr.msk.f32.gmra.mxu0 %vm310_vm1, %v6567_v1  ;;  %8237 = vmatmul.mubr.msk.f32.gmra.mxu1 %vm310_vm1, %v6824_v6  ;;  %v6826_v8 = vld [vmem:[%s8453_s25 + $0xd18] sm:$0xff]  ;;  %v6827_v1 = vld [vmem:[%s8453_s25 + $0xd20] sm:$0xff] }
 0x156   : > { %10705 = vst [vmem:[#allocation21_spill] sm:$0xff] %v9373_v25  ;;  %v1466_v13 = vmax.f32 %v1076_v32, 0.0  ;;  %v2812_v24 = vmax.f32 %v2422_v37, 0.0  ;;  %v1091_v0 = vadd.f32 %v9234_v57, %v7686_v45  ;;  %v2437_v22 = vadd.f32 %v9234_v57, %v7886_v23  ;;  %8039 = vmatprep.mubr.msk.f32.mxu0 %vm310_vm1, %v6568_v42  ;;  %8239 = vmatprep.mubr.msk.f32.mxu1 %vm310_vm1, %v6825_v12 }
 0x157   : > { %v9385_v21 = vmax.f32 %v1467_v31, %v2813_v39  ;;  %v1085_v10 = vpop.f32.mrf.mxu0  ;;  %v2431_v25 = vpop.f32.mrf.mxu1 }
 0x158   : > { %v9389_v6 = vmax.f32 %v1466_v13, %v2812_v24  ;;  %v1469_v32 = vmax.f32 %v1091_v0, 0.0  ;;  %v2815_v37 = vmax.f32 %v2437_v22, 0.0  ;;  %v1086_v45 = vadd.f32 %v9234_v57, %v1085_v10  ;;  %v6828_v0 = vld [vmem:[%s8453_s25 + $0xd28] sm:$0xff] }
 0x159   : > { %10706 = vst [vmem:[#allocation22_spill] sm:$0xff] %v9385_v21  ;;  %v2432_v42 = vadd.f32 %v9234_v57, %v2431_v25  ;;  %v7689_v12 = vpop.f32.mrf.mxu0  ;;  %v7889_v23 = vpop.f32.mrf.mxu1  ;;  %8040 = vmatmul.mubr.msk.f32.gmra.mxu0 %vm310_vm1, %v6569_v59  ;;  %8240 = vmatmul.mubr.msk.f32.gmra.mxu1 %vm310_vm1, %v6826_v8  ;;  %v6571_v25 = vld [vmem:[%s8453_s25 + $0x928] sm:$0xff]  ;;  %v6572_v21 = vld [vmem:[%s8453_s25 + $0x930] sm:$0xff] }
 0x15a   : > { %10707 = vst [vmem:[#allocation23_spill] sm:$0xff] %v9389_v6  ;;  %v9395_v31 = vmax.f32 %v1469_v32, %v2815_v37  ;;  %v1468_v39 = vmax.f32 %v1086_v45, 0.0  ;;  %v1101_v13 = vadd.f32 %v9234_v57, %v7689_v12  ;;  %v2447_v24 = vadd.f32 %v9234_v57, %v7889_v23  ;;  %8042 = vmatprep.mubr.msk.f32.mxu0 %vm310_vm1, %v6570_v9  ;;  %v6829_v59 = vld [vmem:[%s8453_s25 + $0xd30] sm:$0xff] }
 0x15b   : > { %8242 = vmatprep.mubr.msk.f32.mxu1 %vm310_vm1, %v6827_v1  ;;  %v2814_v22 = vmax.f32 %v2432_v42, 0.0  ;;  %v1095_v10 = vpop.f32.mrf.mxu0  ;;  %v2441_v6 = vpop.f32.mrf.mxu1 }
 0x15c   : > { %10708 = vst [vmem:[#allocation24_spill] sm:$0xff] %v9395_v31  ;;  %v1471_v8 = vmax.f32 %v1101_v13, 0.0  ;;  %v2817_v32 = vmax.f32 %v2447_v24, 0.0  ;;  %v1096_v37 = vadd.f32 %v9234_v57, %v1095_v10  ;;  %v2442_v45 = vadd.f32 %v9234_v57, %v2441_v6  ;;  %v6573_v6 = vld [vmem:[%s8453_s25 + $0x938] sm:$0xff]  ;;  %v6574_v31 = vld [vmem:[%s8453_s25 + $0x940] sm:$0xff] }
 0x15d   : > { %v9407_v12 = vmax.f32 %v1468_v39, %v2814_v22  ;;  %v7692_v9 = vpop.f32.mrf.mxu0  ;;  %v7892_v1 = vpop.f32.mrf.mxu1  ;;  %8043 = vmatmul.mubr.msk.f32.gmra.mxu0 %vm310_vm1, %v6571_v25  ;;  %8243 = vmatmul.mubr.msk.f32.gmra.mxu1 %vm310_vm1, %v6828_v0  ;;  %v6830_v39 = vld [vmem:[%s8453_s25 + $0xd38] sm:$0xff]  ;;  %v6831_v25 = vld [vmem:[%s8453_s25 + $0xd40] sm:$0xff] }
 0x15e   : > { %v9411_v42 = vmax.f32 %v1471_v8, %v2817_v32  ;;  %v1470_v23 = vmax.f32 %v1096_v37, 0.0  ;;  %v2816_v13 = vmax.f32 %v2442_v45, 0.0  ;;  %v1111_v24 = vadd.f32 %v9234_v57, %v7692_v9  ;;  %8045 = vmatprep.mubr.msk.f32.mxu0 %vm310_vm1, %v6572_v21  ;;  %8245 = vmatprep.mubr.msk.f32.mxu1 %vm310_vm1, %v6829_v59 }
 0x15f   : > { %10709 = vst [vmem:[#allocation25_spill] sm:$0xff] %v9407_v12  ;;  %v2457_v22 = vadd.f32 %v9234_v57, %v7892_v1  ;;  %v1105_v10 = vpop.f32.mrf.mxu0  ;;  %v2451_v12 = vpop.f32.mrf.mxu1 }
 0x160   : > { %10710 = vst [vmem:[#allocation26_spill] sm:$0xff] %v9411_v42  ;;  %v9421_v0 = vmax.f32 %v1470_v23, %v2816_v13  ;;  %v1473_v8 = vmax.f32 %v1111_v24, 0.0  ;;  %v1106_v32 = vadd.f32 %v9234_v57, %v1105_v10  ;;  %v2452_v37 = vadd.f32 %v9234_v57, %v2451_v12  ;;  %v6575_v12 = vld [vmem:[%s8453_s25 + $0x948] sm:$0xff]  ;;  %v6576_v42 = vld [vmem:[%s8453_s25 + $0x950] sm:$0xff] }
 0x161   : > { %v2819_v21 = vmax.f32 %v2457_v22, 0.0  ;;  %v7695_v59 = vpop.f32.mrf.mxu0  ;;  %v7895_v45 = vpop.f32.mrf.mxu1  ;;  %8046 = vmatmul.mubr.msk.f32.gmra.mxu0 %vm310_vm1, %v6573_v6  ;;  %8246 = vmatmul.mubr.msk.f32.gmra.mxu1 %vm310_vm1, %v6830_v39  ;;  %v6832_v24 = vld [vmem:[%s8453_s25 + $0xd48] sm:$0xff]  ;;  %v6833_v6 = vld [vmem:[%s8453_s25 + $0xd50] sm:$0xff] }
 0x162   : > { %10711 = vst [vmem:[#allocation27_spill] sm:$0xff] %v9421_v0  ;;  %v1472_v9 = vmax.f32 %v1106_v32, 0.0  ;;  %v2818_v1 = vmax.f32 %v2452_v37, 0.0  ;;  %v1121_v23 = vadd.f32 %v9234_v57, %v7695_v59  ;;  %v2467_v13 = vadd.f32 %v9234_v57, %v7895_v45  ;;  %8048 = vmatprep.mubr.msk.f32.mxu0 %vm310_vm1, %v6574_v31  ;;  %8248 = vmatprep.mubr.msk.f32.mxu1 %vm310_vm1, %v6831_v25 }
 0x163   : > { %v9433_v22 = vmax.f32 %v1473_v8, %v2819_v21  ;;  %v1115_v10 = vpop.f32.mrf.mxu0  ;;  %v2461_v0 = vpop.f32.mrf.mxu1 }
 0x164   : > { %v9437_v39 = vmax.f32 %v1472_v9, %v2818_v1  ;;  %v1475_v32 = vmax.f32 %v1121_v23, 0.0  ;;  %v2821_v37 = vmax.f32 %v2467_v13, 0.0  ;;  %v1116_v59 = vadd.f32 %v9234_v57, %v1115_v10  ;;  %v6834_v23 = vld [vmem:[%s8453_s25 + $0xd58] sm:$0xff] }
 0x165   : > { %10712 = vst [vmem:[#allocation28_spill] sm:$0xff] %v9433_v22  ;;  %v2462_v31 = vadd.f32 %v9234_v57, %v2461_v0  ;;  %v7698_v25 = vpop.f32.mrf.mxu0  ;;  %v7898_v45 = vpop.f32.mrf.mxu1  ;;  %8049 = vmatmul.mubr.msk.f32.gmra.mxu0 %vm310_vm1, %v6575_v12  ;;  %8249 = vmatmul.mubr.msk.f32.gmra.mxu1 %vm310_vm1, %v6832_v24  ;;  %v6577_v0 = vld [vmem:[%s8453_s25 + $0x958] sm:$0xff]  ;;  %v6578_v22 = vld [vmem:[%s8453_s25 + $0x960] sm:$0xff] }
 0x166   : > { %10713 = vst [vmem:[#allocation29_spill] sm:$0xff] %v9437_v39  ;;  %v9443_v8 = vmax.f32 %v1475_v32, %v2821_v37  ;;  %v1474_v21 = vmax.f32 %v1116_v59, 0.0  ;;  %v1131_v9 = vadd.f32 %v9234_v57, %v7698_v25  ;;  %v2477_v1 = vadd.f32 %v9234_v57, %v7898_v45  ;;  %8051 = vmatprep.mubr.msk.f32.mxu0 %vm310_vm1, %v6576_v42  ;;  %v6835_v12 = vld [vmem:[%s8453_s25 + $0xd60] sm:$0xff] }
 0x167   : > { %8251 = vmatprep.mubr.msk.f32.mxu1 %vm310_vm1, %v6833_v6  ;;  %v2820_v13 = vmax.f32 %v2462_v31, 0.0  ;;  %v1125_v10 = vpop.f32.mrf.mxu0  ;;  %v2471_v39 = vpop.f32.mrf.mxu1 }
 0x168   : > { %10714 = vst [vmem:[#allocation30_spill] sm:$0xff] %v9443_v8  ;;  %v1477_v24 = vmax.f32 %v1131_v9, 0.0  ;;  %v2823_v32 = vmax.f32 %v2477_v1, 0.0  ;;  %v1126_v37 = vadd.f32 %v9234_v57, %v1125_v10  ;;  %v2472_v59 = vadd.f32 %v9234_v57, %v2471_v39  ;;  %v6579_v39 = vld [vmem:[%s8453_s25 + $0x968] sm:$0xff]  ;;  %v6580_v8 = vld [vmem:[%s8453_s25 + $0x970] sm:$0xff] }
 0x169   : > { %v9455_v25 = vmax.f32 %v1474_v21, %v2820_v13  ;;  %v7701_v42 = vpop.f32.mrf.mxu0  ;;  %v7901_v6 = vpop.f32.mrf.mxu1  ;;  %8052 = vmatmul.mubr.msk.f32.gmra.mxu0 %vm310_vm1, %v6577_v0  ;;  %8252 = vmatmul.mubr.msk.f32.gmra.mxu1 %vm310_vm1, %v6834_v23  ;;  %v6836_v21 = vld [vmem:[%s8453_s25 + $0xd68] sm:$0xff]  ;;  %v6837_v0 = vld [vmem:[%s8453_s25 + $0xd70] sm:$0xff] }
 0x16a   : > { %v9459_v31 = vmax.f32 %v1477_v24, %v2823_v32  ;;  %v1476_v45 = vmax.f32 %v1126_v37, 0.0  ;;  %v2822_v9 = vmax.f32 %v2472_v59, 0.0  ;;  %v1141_v1 = vadd.f32 %v9234_v57, %v7701_v42  ;;  %8054 = vmatprep.mubr.msk.f32.mxu0 %vm310_vm1, %v6578_v22  ;;  %8254 = vmatprep.mubr.msk.f32.mxu1 %vm310_vm1, %v6835_v12 }
 0x16b   : > { %10715 = vst [vmem:[#allocation31_spill] sm:$0xff] %v9455_v25  ;;  %v2487_v13 = vadd.f32 %v9234_v57, %v7901_v6  ;;  %v1135_v10 = vpop.f32.mrf.mxu0  ;;  %v2481_v25 = vpop.f32.mrf.mxu1 }
 0x16c   : > { %10716 = vst [vmem:[#allocation32_spill] sm:$0xff] %v9459_v31  ;;  %v9469_v23 = vmax.f32 %v1476_v45, %v2822_v9  ;;  %v1479_v24 = vmax.f32 %v1141_v1, 0.0  ;;  %v1136_v32 = vadd.f32 %v9234_v57, %v1135_v10  ;;  %v2482_v37 = vadd.f32 %v9234_v57, %v2481_v25  ;;  %v6581_v25 = vld [vmem:[%s8453_s25 + $0x978] sm:$0xff]  ;;  %v6582_v31 = vld [vmem:[%s8453_s25 + $0x980] sm:$0xff] }
 0x16d   : > { %v2825_v22 = vmax.f32 %v2487_v13, 0.0  ;;  %v7704_v12 = vpop.f32.mrf.mxu0  ;;  %v7904_v59 = vpop.f32.mrf.mxu1  ;;  %8055 = vmatmul.mubr.msk.f32.gmra.mxu0 %vm310_vm1, %v6579_v39  ;;  %8255 = vmatmul.mubr.msk.f32.gmra.mxu1 %vm310_vm1, %v6836_v21  ;;  %v6838_v1 = vld [vmem:[%s8453_s25 + $0xd78] sm:$0xff]  ;;  %v6839_v39 = vld [vmem:[%s8453_s25 + $0xd80] sm:$0xff] }
 0x16e   : > { %10717 = vst [vmem:[#allocation33_spill] sm:$0xff] %v9469_v23  ;;  %v1478_v42 = vmax.f32 %v1136_v32, 0.0  ;;  %v2824_v6 = vmax.f32 %v2482_v37, 0.0  ;;  %v1151_v45 = vadd.f32 %v9234_v57, %v7704_v12  ;;  %v2497_v9 = vadd.f32 %v9234_v57, %v7904_v59  ;;  %8057 = vmatprep.mubr.msk.f32.mxu0 %vm310_vm1, %v6580_v8  ;;  %8257 = vmatprep.mubr.msk.f32.mxu1 %vm310_vm1, %v6837_v0 }
 0x16f   : > { %v9481_v13 = vmax.f32 %v1479_v24, %v2825_v22  ;;  %v1145_v10 = vpop.f32.mrf.mxu0  ;;  %v2491_v23 = vpop.f32.mrf.mxu1 }
 0x170   : > { %v9485_v21 = vmax.f32 %v1478_v42, %v2824_v6  ;;  %v1481_v32 = vmax.f32 %v1151_v45, 0.0  ;;  %v2827_v37 = vmax.f32 %v2497_v9, 0.0  ;;  %v1146_v12 = vadd.f32 %v9234_v57, %v1145_v10  ;;  %v6840_v45 = vld [vmem:[%s8453_s25 + $0xd88] sm:$0xff] }
 0x171   : > { %10718 = vst [vmem:[#allocation34_spill] sm:$0xff] %v9481_v13  ;;  %v2492_v8 = vadd.f32 %v9234_v57, %v2491_v23  ;;  %v7707_v0 = vpop.f32.mrf.mxu0  ;;  %v7907_v59 = vpop.f32.mrf.mxu1  ;;  %8058 = vmatmul.mubr.msk.f32.gmra.mxu0 %vm310_vm1, %v6581_v25  ;;  %8258 = vmatmul.mubr.msk.f32.gmra.mxu1 %vm310_vm1, %v6838_v1  ;;  %v6583_v23 = vld [vmem:[%s8453_s25 + $0x988] sm:$0xff]  ;;  %v6584_v13 = vld [vmem:[%s8453_s25 + $0x990] sm:$0xff] }
 0x172   : > { %10719 = vst [vmem:[#allocation35_spill] sm:$0xff] %v9485_v21  ;;  %v9491_v24 = vmax.f32 %v1481_v32, %v2827_v37  ;;  %v1480_v22 = vmax.f32 %v1146_v12, 0.0  ;;  %v1161_v42 = vadd.f32 %v9234_v57, %v7707_v0  ;;  %v2507_v6 = vadd.f32 %v9234_v57, %v7907_v59  ;;  %8060 = vmatprep.mubr.msk.f32.mxu0 %vm310_vm1, %v6582_v31  ;;  %v6841_v25 = vld [vmem:[%s8453_s25 + $0xd90] sm:$0xff] }
 0x173   : > { %8260 = vmatprep.mubr.msk.f32.mxu1 %vm310_vm1, %v6839_v39  ;;  %v2826_v9 = vmax.f32 %v2492_v8, 0.0  ;;  %v1155_v10 = vpop.f32.mrf.mxu0  ;;  %v2501_v21 = vpop.f32.mrf.mxu1 }
 0x174   : > { %10720 = vst [vmem:[#allocation36_spill] sm:$0xff] %v9491_v24  ;;  %v1483_v1 = vmax.f32 %v1161_v42, 0.0  ;;  %v2829_v32 = vmax.f32 %v2507_v6, 0.0  ;;  %v1156_v37 = vadd.f32 %v9234_v57, %v1155_v10  ;;  %v2502_v12 = vadd.f32 %v9234_v57, %v2501_v21  ;;  %v6585_v21 = vld [vmem:[%s8453_s25 + $0x998] sm:$0xff]  ;;  %v6586_v24 = vld [vmem:[%s8453_s25 + $0x9a0] sm:$0xff] }
 0x175   : > { %v9503_v0 = vmax.f32 %v1480_v22, %v2826_v9  ;;  %v7710_v31 = vpop.f32.mrf.mxu0  ;;  %v7910_v39 = vpop.f32.mrf.mxu1  ;;  %8061 = vmatmul.mubr.msk.f32.gmra.mxu0 %vm310_vm1, %v6583_v23  ;;  %8261 = vmatmul.mubr.msk.f32.gmra.mxu1 %vm310_vm1, %v6840_v45  ;;  %v6842_v22 = vld [vmem:[%s8453_s25 + $0xd98] sm:$0xff]  ;;  %v6843_v23 = vld [vmem:[%s8453_s25 + $0xda0] sm:$0xff] }
 0x176   : > { %v9507_v8 = vmax.f32 %v1483_v1, %v2829_v32  ;;  %v1482_v59 = vmax.f32 %v1156_v37, 0.0  ;;  %v2828_v42 = vmax.f32 %v2502_v12, 0.0  ;;  %v1171_v6 = vadd.f32 %v9234_v57, %v7710_v31  ;;  %8063 = vmatprep.mubr.msk.f32.mxu0 %vm310_vm1, %v6584_v13  ;;  %8263 = vmatprep.mubr.msk.f32.mxu1 %vm310_vm1, %v6841_v25 }
 0x177   : > { %10721 = vst [vmem:[#allocation37_spill] sm:$0xff] %v9503_v0  ;;  %v2517_v9 = vadd.f32 %v9234_v57, %v7910_v39  ;;  %v1165_v10 = vpop.f32.mrf.mxu0  ;;  %v2511_v0 = vpop.f32.mrf.mxu1 }
 0x178   : > { %10722 = vst [vmem:[#allocation38_spill] sm:$0xff] %v9507_v8  ;;  %v9517_v45 = vmax.f32 %v1482_v59, %v2828_v42  ;;  %v1485_v1 = vmax.f32 %v1171_v6, 0.0  ;;  %v1166_v32 = vadd.f32 %v9234_v57, %v1165_v10  ;;  %v2512_v37 = vadd.f32 %v9234_v57, %v2511_v0  ;;  %v6587_v0 = vld [vmem:[%s8453_s25 + $0x9a8] sm:$0xff]  ;;  %v6588_v8 = vld [vmem:[%s8453_s25 + $0x9b0] sm:$0xff] }
 0x179   : > { %v2831_v13 = vmax.f32 %v2517_v9, 0.0  ;;  %v7713_v25 = vpop.f32.mrf.mxu0  ;;  %v7913_v12 = vpop.f32.mrf.mxu1  ;;  %8064 = vmatmul.mubr.msk.f32.gmra.mxu0 %vm310_vm1, %v6585_v21  ;;  %8264 = vmatmul.mubr.msk.f32.gmra.mxu1 %vm310_vm1, %v6842_v22  ;;  %v6844_v6 = vld [vmem:[%s8453_s25 + $0xda8] sm:$0xff]  ;;  %v6845_v21 = vld [vmem:[%s8453_s25 + $0xdb0] sm:$0xff] }
 0x17a   : > { %10723 = vst [vmem:[#allocation39_spill] sm:$0xff] %v9517_v45  ;;  %v1484_v31 = vmax.f32 %v1166_v32, 0.0  ;;  %v2830_v39 = vmax.f32 %v2512_v37, 0.0  ;;  %v1181_v59 = vadd.f32 %v9234_v57, %v7713_v25  ;;  %v2527_v42 = vadd.f32 %v9234_v57, %v7913_v12  ;;  %8066 = vmatprep.mubr.msk.f32.mxu0 %vm310_vm1, %v6586_v24  ;;  %8266 = vmatprep.mubr.msk.f32.mxu1 %vm310_vm1, %v6843_v23 }
 0x17b   : > { %v9529_v9 = vmax.f32 %v1485_v1, %v2831_v13  ;;  %v1175_v10 = vpop.f32.mrf.mxu0  ;;  %v2521_v45 = vpop.f32.mrf.mxu1 }
 0x17c   : > { %v9533_v22 = vmax.f32 %v1484_v31, %v2830_v39  ;;  %v1487_v32 = vmax.f32 %v1181_v59, 0.0  ;;  %v2833_v37 = vmax.f32 %v2527_v42, 0.0  ;;  %v1176_v25 = vadd.f32 %v9234_v57, %v1175_v10  ;;  %v6846_v59 = vld [vmem:[%s8453_s25 + $0xdb8] sm:$0xff] }
 0x17d   : > { %10724 = vst [vmem:[#allocation40_spill] sm:$0xff] %v9529_v9  ;;  %v2522_v24 = vadd.f32 %v9234_v57, %v2521_v45  ;;  %v7716_v23 = vpop.f32.mrf.mxu0  ;;  %v7916_v12 = vpop.f32.mrf.mxu1  ;;  %8067 = vmatmul.mubr.msk.f32.gmra.mxu0 %vm310_vm1, %v6587_v0  ;;  %8267 = vmatmul.mubr.msk.f32.gmra.mxu1 %vm310_vm1, %v6844_v6  ;;  %v6589_v45 = vld [vmem:[%s8453_s25 + $0x9b8] sm:$0xff]  ;;  %v6590_v9 = vld [vmem:[%s8453_s25 + $0x9c0] sm:$0xff] }
 0x17e   : > { %10725 = vst [vmem:[#allocation41_spill] sm:$0xff] %v9533_v22  ;;  %v9539_v1 = vmax.f32 %v1487_v32, %v2833_v37  ;;  %v1486_v13 = vmax.f32 %v1176_v25, 0.0  ;;  %v1191_v31 = vadd.f32 %v9234_v57, %v7716_v23  ;;  %v2537_v39 = vadd.f32 %v9234_v57, %v7916_v12  ;;  %8069 = vmatprep.mubr.msk.f32.mxu0 %vm310_vm1, %v6588_v8  ;;  %v6847_v0 = vld [vmem:[%s8453_s25 + $0xdc0] sm:$0xff] }
 0x17f   : > { %8269 = vmatprep.mubr.msk.f32.mxu1 %vm310_vm1, %v6845_v21  ;;  %v2832_v42 = vmax.f32 %v2522_v24, 0.0  ;;  %v1185_v10 = vpop.f32.mrf.mxu0  ;;  %v2531_v22 = vpop.f32.mrf.mxu1 }
 0x180   : > { %10726 = vst [vmem:[#allocation42_spill] sm:$0xff] %v9539_v1  ;;  %v1489_v6 = vmax.f32 %v1191_v31, 0.0  ;;  %v2835_v32 = vmax.f32 %v2537_v39, 0.0  ;;  %v1186_v37 = vadd.f32 %v9234_v57, %v1185_v10  ;;  %v2532_v25 = vadd.f32 %v9234_v57, %v2531_v22  ;;  %v6591_v22 = vld [vmem:[%s8453_s25 + $0x9c8] sm:$0xff]  ;;  %v6592_v1 = vld [vmem:[%s8453_s25 + $0x9d0] sm:$0xff] }
 0x181   : > { %v9551_v23 = vmax.f32 %v1486_v13, %v2832_v42  ;;  %v7719_v8 = vpop.f32.mrf.mxu0  ;;  %v7919_v21 = vpop.f32.mrf.mxu1  ;;  %8070 = vmatmul.mubr.msk.f32.gmra.mxu0 %vm310_vm1, %v6589_v45  ;;  %8270 = vmatmul.mubr.msk.f32.gmra.mxu1 %vm310_vm1, %v6846_v59  ;;  %v6848_v13 = vld [vmem:[%s8453_s25 + $0xdc8] sm:$0xff]  ;;  %v6849_v45 = vld [vmem:[%s8453_s25 + $0xdd0] sm:$0xff] }
 0x182   : > { %v9555_v24 = vmax.f32 %v1489_v6, %v2835_v32  ;;  %v1488_v12 = vmax.f32 %v1186_v37, 0.0  ;;  %v2834_v31 = vmax.f32 %v2532_v25, 0.0  ;;  %v1201_v39 = vadd.f32 %v9234_v57, %v7719_v8  ;;  %8072 = vmatprep.mubr.msk.f32.mxu0 %vm310_vm1, %v6590_v9  ;;  %8272 = vmatprep.mubr.msk.f32.mxu1 %vm310_vm1, %v6847_v0 }
 0x183   : > { %10727 = vst [vmem:[#allocation43_spill] sm:$0xff] %v9551_v23  ;;  %v2547_v42 = vadd.f32 %v9234_v57, %v7919_v21  ;;  %v1195_v10 = vpop.f32.mrf.mxu0  ;;  %v2541_v23 = vpop.f32.mrf.mxu1 }
 0x184   : > { %10728 = vst [vmem:[#allocation44_spill] sm:$0xff] %v9555_v24  ;;  %v9565_v59 = vmax.f32 %v1488_v12, %v2834_v31  ;;  %v1491_v6 = vmax.f32 %v1201_v39, 0.0  ;;  %v1196_v32 = vadd.f32 %v9234_v57, %v1195_v10  ;;  %v2542_v37 = vadd.f32 %v9234_v57, %v2541_v23  ;;  %v6593_v23 = vld [vmem:[%s8453_s25 + $0x9d8] sm:$0xff]  ;;  %v6594_v24 = vld [vmem:[%s8453_s25 + $0x9e0] sm:$0xff] }
 0x185   : > { %v2837_v9 = vmax.f32 %v2547_v42, 0.0  ;;  %v7722_v0 = vpop.f32.mrf.mxu0  ;;  %v7922_v25 = vpop.f32.mrf.mxu1  ;;  %8073 = vmatmul.mubr.msk.f32.gmra.mxu0 %vm310_vm1, %v6591_v22  ;;  %8273 = vmatmul.mubr.msk.f32.gmra.mxu1 %vm310_vm1, %v6848_v13  ;;  %v6850_v39 = vld [vmem:[%s8453_s25 + $0xdd8] sm:$0xff]  ;;  %v6851_v22 = vld [vmem:[%s8453_s25 + $0xde0] sm:$0xff] }
 0x186   : > { %10729 = vst [vmem:[#allocation45_spill] sm:$0xff] %v9565_v59  ;;  %v1490_v8 = vmax.f32 %v1196_v32, 0.0  ;;  %v2836_v21 = vmax.f32 %v2542_v37, 0.0  ;;  %v1211_v12 = vadd.f32 %v9234_v57, %v7722_v0  ;;  %v2557_v31 = vadd.f32 %v9234_v57, %v7922_v25  ;;  %8075 = vmatprep.mubr.msk.f32.mxu0 %vm310_vm1, %v6592_v1  ;;  %8275 = vmatprep.mubr.msk.f32.mxu1 %vm310_vm1, %v6849_v45 }
 0x187   : > { %v9577_v42 = vmax.f32 %v1491_v6, %v2837_v9  ;;  %v1205_v10 = vpop.f32.mrf.mxu0  ;;  %v2551_v59 = vpop.f32.mrf.mxu1 }
 0x188   : > { %v9581_v13 = vmax.f32 %v1490_v8, %v2836_v21  ;;  %v1493_v32 = vmax.f32 %v1211_v12, 0.0  ;;  %v2839_v37 = vmax.f32 %v2557_v31, 0.0  ;;  %v1206_v0 = vadd.f32 %v9234_v57, %v1205_v10  ;;  %v6852_v12 = vld [vmem:[%s8453_s25 + $0xde8] sm:$0xff] }
 0x189   : > { %10730 = vst [vmem:[#allocation46_spill] sm:$0xff] %v9577_v42  ;;  %v2552_v1 = vadd.f32 %v9234_v57, %v2551_v59  ;;  %v7725_v45 = vpop.f32.mrf.mxu0  ;;  %v7925_v25 = vpop.f32.mrf.mxu1  ;;  %8076 = vmatmul.mubr.msk.f32.gmra.mxu0 %vm310_vm1, %v6593_v23  ;;  %8276 = vmatmul.mubr.msk.f32.gmra.mxu1 %vm310_vm1, %v6850_v39  ;;  %v6595_v59 = vld [vmem:[%s8453_s25 + $0x9e8] sm:$0xff]  ;;  %v6596_v42 = vld [vmem:[%s8453_s25 + $0x9f0] sm:$0xff] }
 0x18a   : > { %10731 = vst [vmem:[#allocation47_spill] sm:$0xff] %v9581_v13  ;;  %v9587_v6 = vmax.f32 %v1493_v32, %v2839_v37  ;;  %v1492_v9 = vmax.f32 %v1206_v0, 0.0  ;;  %v1221_v8 = vadd.f32 %v9234_v57, %v7725_v45  ;;  %v2567_v21 = vadd.f32 %v9234_v57, %v7925_v25  ;;  %8078 = vmatprep.mubr.msk.f32.mxu0 %vm310_vm1, %v6594_v24  ;;  %v6853_v23 = vld [vmem:[%s8453_s25 + $0xdf0] sm:$0xff] }
 0x18b   : > { %8278 = vmatprep.mubr.msk.f32.mxu1 %vm310_vm1, %v6851_v22  ;;  %v2838_v31 = vmax.f32 %v2552_v1, 0.0  ;;  %v1215_v10 = vpop.f32.mrf.mxu0  ;;  %v2561_v13 = vpop.f32.mrf.mxu1 }
 0x18c   : > { %10732 = vst [vmem:[#allocation48_spill] sm:$0xff] %v9587_v6  ;;  %v1495_v39 = vmax.f32 %v1221_v8, 0.0  ;;  %v2841_v32 = vmax.f32 %v2567_v21, 0.0  ;;  %v1216_v37 = vadd.f32 %v9234_v57, %v1215_v10  ;;  %v2562_v0 = vadd.f32 %v9234_v57, %v2561_v13  ;;  %v6597_v13 = vld [vmem:[%s8453_s25 + $0x9f8] sm:$0xff]  ;;  %v6598_v6 = vld [vmem:[%s8453_s25 + $0xa00] sm:$0xff] }
 0x18d   : > { %v9599_v45 = vmax.f32 %v1492_v9, %v2838_v31  ;;  %v7728_v24 = vpop.f32.mrf.mxu0  ;;  %v7928_v22 = vpop.f32.mrf.mxu1  ;;  %8079 = vmatmul.mubr.msk.f32.gmra.mxu0 %vm310_vm1, %v6595_v59  ;;  %8279 = vmatmul.mubr.msk.f32.gmra.mxu1 %vm310_vm1, %v6852_v12  ;;  %v6854_v9 = vld [vmem:[%s8453_s25 + $0xdf8] sm:$0xff]  ;;  %v6855_v59 = vld [vmem:[%s8453_s25 + $0xe00] sm:$0xff] }
 0x18e   : > { %v9603_v1 = vmax.f32 %v1495_v39, %v2841_v32  ;;  %v1494_v25 = vmax.f32 %v1216_v37, 0.0  ;;  %v2840_v8 = vmax.f32 %v2562_v0, 0.0  ;;  %v1231_v21 = vadd.f32 %v9234_v57, %v7728_v24  ;;  %8081 = vmatprep.mubr.msk.f32.mxu0 %vm310_vm1, %v6596_v42  ;;  %8281 = vmatprep.mubr.msk.f32.mxu1 %vm310_vm1, %v6853_v23  ;;  %v9618_v39 = vld [vmem:[%s10684_s2] ss:$0 sm:$0xff] }
 0x18f   : > { %10733 = vst [vmem:[#allocation49_spill] sm:$0xff] %v9599_v45  ;;  %v2577_v31 = vadd.f32 %v9234_v57, %v7928_v22  ;;  %v1225_v10 = vpop.f32.mrf.mxu0  ;;  %v2571_v45 = vpop.f32.mrf.mxu1 }
 0x190   : > { %v9613_v54 = vmax.f32 %v1494_v25, %v2840_v8  ;;  %v1497_v12 = vmax.f32 %v1231_v21, 0.0  ;;  %v1226_v42 = vadd.f32 %v9618_v39, %v1225_v10  ;;  %v2572_v23 = vadd.f32 %v9618_v39, %v2571_v45  ;;  %v6599_v45 = vld [vmem:[%s8453_s25 + $0xa08] sm:$0xff] }
 0x191   : > { %v2843_v32 = vmax.f32 %v2577_v31, 0.0  ;;  %v7731_v57 = vpop.f32.mrf.mxu0  ;;  %v7931_v37 = vpop.f32.mrf.mxu1  ;;  %8082 = vmatmul.mubr.msk.f32.gmra.mxu0 %vm310_vm1, %v6597_v13  ;;  %8282 = vmatmul.mubr.msk.f32.gmra.mxu1 %vm310_vm1, %v6854_v9  ;;  %v6856_v8 = vld [vmem:[%s8453_s25 + $0xe08] sm:$0xff]  ;;  %v6857_v13 = vld [vmem:[%s8453_s25 + $0xe10] sm:$0xff] }
 0x192   : > { %10734 = vst [vmem:[#allocation50_spill] sm:$0xff] %v9613_v54  ;;  %v1496_v0 = vmax.f32 %v1226_v42, 0.0  ;;  %v2842_v24 = vmax.f32 %v2572_v23, 0.0  ;;  %v1241_v22 = vadd.f32 %v9618_v39, %v7731_v57  ;;  %v2587_v25 = vadd.f32 %v9618_v39, %v7931_v37  ;;  %8084 = vmatprep.mubr.msk.f32.mxu0 %vm310_vm1, %v6598_v6  ;;  %8284 = vmatprep.mubr.msk.f32.mxu1 %vm310_vm1, %v6855_v59  ;;  %v6600_v54 = vld [vmem:[%s8453_s25 + $0xa10] sm:$0xff] }
 0x193   : > { %v9630_v21 = vmax.f32 %v1497_v12, %v2843_v32  ;;  %v1235_v31 = vpop.f32.mrf.mxu0  ;;  %v2581_v10 = vpop.f32.mrf.mxu1 }
 0x194   : > { %v9634_v9 = vmax.f32 %v1496_v0, %v2842_v24  ;;  %v1499_v42 = vmax.f32 %v1241_v22, 0.0  ;;  %v2845_v23 = vmax.f32 %v2587_v25, 0.0  ;;  %v1236_v57 = vadd.f32 %v9618_v39, %v1235_v31  ;;  %v6601_v22 = vld [vmem:[%s8453_s25 + $0xa18] sm:$0xff] }
 0x195   : > { %10735 = vst [vmem:[#allocation51_spill] sm:$0xff] %v9630_v21  ;;  %v2582_v6 = vadd.f32 %v9618_v39, %v2581_v10  ;;  %v7734_v59 = vpop.f32.mrf.mxu0  ;;  %v7934_v37 = vpop.f32.mrf.mxu1  ;;  %8085 = vmatmul.mubr.msk.f32.gmra.mxu0 %vm310_vm1, %v6599_v45  ;;  %8285 = vmatmul.mubr.msk.f32.gmra.mxu1 %vm310_vm1, %v6856_v8  ;;  %v6858_v25 = vld [vmem:[%s8453_s25 + $0xe18] sm:$0xff]  ;;  %v6602_v21 = vld [vmem:[%s8453_s25 + $0xa20] sm:$0xff] }
 0x196   : > { %10736 = vst [vmem:[#allocation52_spill] sm:$0xff] %v9634_v9  ;;  %v9640_v12 = vmax.f32 %v1499_v42, %v2845_v23  ;;  %v1498_v32 = vmax.f32 %v1236_v57, 0.0  ;;  %v1251_v0 = vadd.f32 %v9618_v39, %v7734_v59  ;;  %v2597_v24 = vadd.f32 %v9618_v39, %v7934_v37  ;;  %8087 = vmatprep.mubr.msk.f32.mxu0 %vm310_vm1, %v6600_v54  ;;  %v6859_v45 = vld [vmem:[%s8453_s25 + $0xe20] sm:$0xff] }
 0x197   : > { %8287 = vmatprep.mubr.msk.f32.mxu1 %vm310_vm1, %v6857_v13  ;;  %v2844_v31 = vmax.f32 %v2582_v6, 0.0  ;;  %v1245_v10 = vpop.f32.mrf.mxu0  ;;  %v2591_v9 = vpop.f32.mrf.mxu1 }
 0x198   : > { %10737 = vst [vmem:[#allocation53_spill] sm:$0xff] %v9640_v12  ;;  %v1501_v8 = vmax.f32 %v1251_v0, 0.0  ;;  %v2847_v42 = vmax.f32 %v2597_v24, 0.0  ;;  %v1246_v23 = vadd.f32 %v9618_v39, %v1245_v10  ;;  %v2592_v57 = vadd.f32 %v9618_v39, %v2591_v9  ;;  %v6603_v9 = vld [vmem:[%s8453_s25 + $0xa28] sm:$0xff]  ;;  %v6604_v12 = vld [vmem:[%s8453_s25 + $0xa30] sm:$0xff] }
 0x199   : > { %v9652_v59 = vmax.f32 %v1498_v32, %v2844_v31  ;;  %v7737_v54 = vpop.f32.mrf.mxu0  ;;  %v7937_v13 = vpop.f32.mrf.mxu1  ;;  %8088 = vmatmul.mubr.msk.f32.gmra.mxu0 %vm310_vm1, %v6601_v22  ;;  %8288 = vmatmul.mubr.msk.f32.gmra.mxu1 %vm310_vm1, %v6858_v25  ;;  %v6860_v32 = vld [vmem:[%s8453_s25 + $0xe28] sm:$0xff]  ;;  %v6861_v22 = vld [vmem:[%s8453_s25 + $0xe30] sm:$0xff] }
 0x19a   : > { %v9656_v6 = vmax.f32 %v1501_v8, %v2847_v42  ;;  %v1500_v37 = vmax.f32 %v1246_v23, 0.0  ;;  %v2846_v0 = vmax.f32 %v2592_v57, 0.0  ;;  %v1261_v24 = vadd.f32 %v9618_v39, %v7737_v54  ;;  %8090 = vmatprep.mubr.msk.f32.mxu0 %vm310_vm1, %v6602_v21  ;;  %8290 = vmatprep.mubr.msk.f32.mxu1 %vm310_vm1, %v6859_v45 }
 0x19b   : > { %10738 = vst [vmem:[#allocation54_spill] sm:$0xff] %v9652_v59  ;;  %v2607_v31 = vadd.f32 %v9618_v39, %v7937_v13  ;;  %v1255_v10 = vpop.f32.mrf.mxu0  ;;  %v2601_v59 = vpop.f32.mrf.mxu1 }
 0x19c   : > { %10739 = vst [vmem:[#allocation55_spill] sm:$0xff] %v9656_v6  ;;  %v9666_v25 = vmax.f32 %v1500_v37, %v2846_v0  ;;  %v1503_v8 = vmax.f32 %v1261_v24, 0.0  ;;  %v1256_v42 = vadd.f32 %v9618_v39, %v1255_v10  ;;  %v2602_v23 = vadd.f32 %v9618_v39, %v2601_v59  ;;  %v6605_v59 = vld [vmem:[%s8453_s25 + $0xa38] sm:$0xff]  ;;  %v6606_v6 = vld [vmem:[%s8453_s25 + $0xa40] sm:$0xff] }
 0x19d   : > { %v2849_v21 = vmax.f32 %v2607_v31, 0.0  ;;  %v7740_v45 = vpop.f32.mrf.mxu0  ;;  %v7940_v57 = vpop.f32.mrf.mxu1  ;;  %8091 = vmatmul.mubr.msk.f32.gmra.mxu0 %vm310_vm1, %v6603_v9  ;;  %8291 = vmatmul.mubr.msk.f32.gmra.mxu1 %vm310_vm1, %v6860_v32  ;;  %v6862_v24 = vld [vmem:[%s8453_s25 + $0xe38] sm:$0xff]  ;;  %v6863_v9 = vld [vmem:[%s8453_s25 + $0xe40] sm:$0xff] }
 0x19e   : > { %10740 = vst [vmem:[#allocation56_spill] sm:$0xff] %v9666_v25  ;;  %v1502_v54 = vmax.f32 %v1256_v42, 0.0  ;;  %v2848_v13 = vmax.f32 %v2602_v23, 0.0  ;;  %v1271_v37 = vadd.f32 %v9618_v39, %v7740_v45  ;;  %v2617_v0 = vadd.f32 %v9618_v39, %v7940_v57  ;;  %8093 = vmatprep.mubr.msk.f32.mxu0 %vm310_vm1, %v6604_v12  ;;  %8293 = vmatprep.mubr.msk.f32.mxu1 %vm310_vm1, %v6861_v22 }
 0x19f   : > { %v9678_v31 = vmax.f32 %v1503_v8, %v2849_v21  ;;  %v1265_v10 = vpop.f32.mrf.mxu0  ;;  %v2611_v25 = vpop.f32.mrf.mxu1 }
 0x1a0   : > { %v9682_v32 = vmax.f32 %v1502_v54, %v2848_v13  ;;  %v1505_v42 = vmax.f32 %v1271_v37, 0.0  ;;  %v2851_v23 = vmax.f32 %v2617_v0, 0.0  ;;  %v1266_v45 = vadd.f32 %v9618_v39, %v1265_v10  ;;  %v6864_v37 = vld [vmem:[%s8453_s25 + $0xe48] sm:$0xff] }
 0x1a1   : > { %10741 = vst [vmem:[#allocation57_spill] sm:$0xff] %v9678_v31  ;;  %v2612_v12 = vadd.f32 %v9618_v39, %v2611_v25  ;;  %v7743_v22 = vpop.f32.mrf.mxu0  ;;  %v7943_v57 = vpop.f32.mrf.mxu1  ;;  %8094 = vmatmul.mubr.msk.f32.gmra.mxu0 %vm310_vm1, %v6605_v59  ;;  %8294 = vmatmul.mubr.msk.f32.gmra.mxu1 %vm310_vm1, %v6862_v24  ;;  %v6607_v25 = vld [vmem:[%s8453_s25 + $0xa48] sm:$0xff]  ;;  %v6608_v31 = vld [vmem:[%s8453_s25 + $0xa50] sm:$0xff] }
 0x1a2   : > { %10742 = vst [vmem:[#allocation58_spill] sm:$0xff] %v9682_v32  ;;  %v9688_v8 = vmax.f32 %v1505_v42, %v2851_v23  ;;  %v1504_v21 = vmax.f32 %v1266_v45, 0.0  ;;  %v1281_v54 = vadd.f32 %v9618_v39, %v7743_v22  ;;  %v2627_v13 = vadd.f32 %v9618_v39, %v7943_v57  ;;  %8096 = vmatprep.mubr.msk.f32.mxu0 %vm310_vm1, %v6606_v6  ;;  %v6865_v59 = vld [vmem:[%s8453_s25 + $0xe50] sm:$0xff] }
 0x1a3   : > { %8296 = vmatprep.mubr.msk.f32.mxu1 %vm310_vm1, %v6863_v9  ;;  %v2850_v0 = vmax.f32 %v2612_v12, 0.0  ;;  %v1275_v10 = vpop.f32.mrf.mxu0  ;;  %v2621_v32 = vpop.f32.mrf.mxu1 }
 0x1a4   : > { %10743 = vst [vmem:[#allocation59_spill] sm:$0xff] %v9688_v8  ;;  %v1507_v24 = vmax.f32 %v1281_v54, 0.0  ;;  %v2853_v42 = vmax.f32 %v2627_v13, 0.0  ;;  %v1276_v23 = vadd.f32 %v9618_v39, %v1275_v10  ;;  %v2622_v45 = vadd.f32 %v9618_v39, %v2621_v32  ;;  %v6609_v32 = vld [vmem:[%s8453_s25 + $0xa58] sm:$0xff]  ;;  %v6610_v8 = vld [vmem:[%s8453_s25 + $0xa60] sm:$0xff] }
 0x1a5   : > { %v9700_v22 = vmax.f32 %v1504_v21, %v2850_v0  ;;  %v7746_v6 = vpop.f32.mrf.mxu0  ;;  %v7946_v9 = vpop.f32.mrf.mxu1  ;;  %8097 = vmatmul.mubr.msk.f32.gmra.mxu0 %vm310_vm1, %v6607_v25  ;;  %8297 = vmatmul.mubr.msk.f32.gmra.mxu1 %vm310_vm1, %v6864_v37  ;;  %v6866_v21 = vld [vmem:[%s8453_s25 + $0xe58] sm:$0xff]  ;;  %v6867_v25 = vld [vmem:[%s8453_s25 + $0xe60] sm:$0xff] }
 0x1a6   : > { %v9704_v12 = vmax.f32 %v1507_v24, %v2853_v42  ;;  %v1506_v57 = vmax.f32 %v1276_v23, 0.0  ;;  %v2852_v54 = vmax.f32 %v2622_v45, 0.0  ;;  %v1291_v13 = vadd.f32 %v9618_v39, %v7746_v6  ;;  %8099 = vmatprep.mubr.msk.f32.mxu0 %vm310_vm1, %v6608_v31  ;;  %8299 = vmatprep.mubr.msk.f32.mxu1 %vm310_vm1, %v6865_v59 }
 0x1a7   : > { %10744 = vst [vmem:[#allocation60_spill] sm:$0xff] %v9700_v22  ;;  %v2637_v0 = vadd.f32 %v9618_v39, %v7946_v9  ;;  %v1285_v10 = vpop.f32.mrf.mxu0  ;;  %v2631_v22 = vpop.f32.mrf.mxu1 }
 0x1a8   : > { %10745 = vst [vmem:[#allocation61_spill] sm:$0xff] %v9704_v12  ;;  %v9714_v37 = vmax.f32 %v1506_v57, %v2852_v54  ;;  %v1509_v24 = vmax.f32 %v1291_v13, 0.0  ;;  %v1286_v42 = vadd.f32 %v9618_v39, %v1285_v10  ;;  %v2632_v23 = vadd.f32 %v9618_v39, %v2631_v22  ;;  %v6611_v22 = vld [vmem:[%s8453_s25 + $0xa68] sm:$0xff]  ;;  %v6612_v12 = vld [vmem:[%s8453_s25 + $0xa70] sm:$0xff] }
 0x1a9   : > { %v2855_v31 = vmax.f32 %v2637_v0, 0.0  ;;  %v7749_v59 = vpop.f32.mrf.mxu0  ;;  %v7949_v45 = vpop.f32.mrf.mxu1  ;;  %8100 = vmatmul.mubr.msk.f32.gmra.mxu0 %vm310_vm1, %v6609_v32  ;;  %8300 = vmatmul.mubr.msk.f32.gmra.mxu1 %vm310_vm1, %v6866_v21  ;;  %v6868_v13 = vld [vmem:[%s8453_s25 + $0xe68] sm:$0xff]  ;;  %v6869_v32 = vld [vmem:[%s8453_s25 + $0xe70] sm:$0xff] }
 0x1aa   : > { %10746 = vst [vmem:[#allocation62_spill] sm:$0xff] %v9714_v37  ;;  %v1508_v6 = vmax.f32 %v1286_v42, 0.0  ;;  %v2854_v9 = vmax.f32 %v2632_v23, 0.0  ;;  %v1301_v57 = vadd.f32 %v9618_v39, %v7749_v59  ;;  %v2647_v54 = vadd.f32 %v9618_v39, %v7949_v45  ;;  %8102 = vmatprep.mubr.msk.f32.mxu0 %vm310_vm1, %v6610_v8  ;;  %8302 = vmatprep.mubr.msk.f32.mxu1 %vm310_vm1, %v6867_v25 }
 0x1ab   : > { %v9726_v0 = vmax.f32 %v1509_v24, %v2855_v31  ;;  %v1295_v10 = vpop.f32.mrf.mxu0  ;;  %v2641_v37 = vpop.f32.mrf.mxu1 }
 0x1ac   : > { %v9730_v21 = vmax.f32 %v1508_v6, %v2854_v9  ;;  %v1511_v42 = vmax.f32 %v1301_v57, 0.0  ;;  %v2857_v23 = vmax.f32 %v2647_v54, 0.0  ;;  %v1296_v59 = vadd.f32 %v9618_v39, %v1295_v10  ;;  %v6870_v57 = vld [vmem:[%s8453_s25 + $0xe78] sm:$0xff] }
 0x1ad   : > { %10747 = vst [vmem:[#allocation63_spill] sm:$0xff] %v9726_v0  ;;  %v2642_v8 = vadd.f32 %v9618_v39, %v2641_v37  ;;  %v7752_v25 = vpop.f32.mrf.mxu0  ;;  %v7952_v45 = vpop.f32.mrf.mxu1  ;;  %8103 = vmatmul.mubr.msk.f32.gmra.mxu0 %vm310_vm1, %v6611_v22  ;;  %8303 = vmatmul.mubr.msk.f32.gmra.mxu1 %vm310_vm1, %v6868_v13  ;;  %v6613_v37 = vld [vmem:[%s8453_s25 + $0xa78] sm:$0xff]  ;;  %v6614_v0 = vld [vmem:[%s8453_s25 + $0xa80] sm:$0xff] }
 0x1ae   : > { %10748 = vst [vmem:[#allocation64_spill] sm:$0xff] %v9730_v21  ;;  %v9736_v24 = vmax.f32 %v1511_v42, %v2857_v23  ;;  %v1510_v31 = vmax.f32 %v1296_v59, 0.0  ;;  %v1311_v6 = vadd.f32 %v9618_v39, %v7752_v25  ;;  %v2657_v9 = vadd.f32 %v9618_v39, %v7952_v45  ;;  %8105 = vmatprep.mubr.msk.f32.mxu0 %vm310_vm1, %v6612_v12  ;;  %v6871_v22 = vld [vmem:[%s8453_s25 + $0xe80] sm:$0xff] }
 0x1af   : > { %8305 = vmatprep.mubr.msk.f32.mxu1 %vm310_vm1, %v6869_v32  ;;  %v2856_v54 = vmax.f32 %v2642_v8, 0.0  ;;  %v1305_v10 = vpop.f32.mrf.mxu0  ;;  %v2651_v21 = vpop.f32.mrf.mxu1 }
 0x1b0   : > { %10749 = vst [vmem:[#allocation65_spill] sm:$0xff] %v9736_v24  ;;  %v1513_v13 = vmax.f32 %v1311_v6, 0.0  ;;  %v2859_v42 = vmax.f32 %v2657_v9, 0.0  ;;  %v1306_v23 = vadd.f32 %v9618_v39, %v1305_v10  ;;  %v2652_v59 = vadd.f32 %v9618_v39, %v2651_v21  ;;  %v6615_v21 = vld [vmem:[%s8453_s25 + $0xa88] sm:$0xff]  ;;  %v6616_v24 = vld [vmem:[%s8453_s25 + $0xa90] sm:$0xff] }
 0x1b1   : > { %v9748_v25 = vmax.f32 %v1510_v31, %v2856_v54  ;;  %v7755_v12 = vpop.f32.mrf.mxu0  ;;  %v7955_v32 = vpop.f32.mrf.mxu1  ;;  %8106 = vmatmul.mubr.msk.f32.gmra.mxu0 %vm310_vm1, %v6613_v37  ;;  %8306 = vmatmul.mubr.msk.f32.gmra.mxu1 %vm310_vm1, %v6870_v57  ;;  %v6872_v31 = vld [vmem:[%s8453_s25 + $0xe88] sm:$0xff]  ;;  %v6873_v37 = vld [vmem:[%s8453_s25 + $0xe90] sm:$0xff] }
 0x1b2   : > { %v9752_v8 = vmax.f32 %v1513_v13, %v2859_v42  ;;  %v1512_v45 = vmax.f32 %v1306_v23, 0.0  ;;  %v2858_v6 = vmax.f32 %v2652_v59, 0.0  ;;  %v1321_v9 = vadd.f32 %v9618_v39, %v7755_v12  ;;  %8108 = vmatprep.mubr.msk.f32.mxu0 %vm310_vm1, %v6614_v0  ;;  %8308 = vmatprep.mubr.msk.f32.mxu1 %vm310_vm1, %v6871_v22 }
 0x1b3   : > { %10750 = vst [vmem:[#allocation66_spill] sm:$0xff] %v9748_v25  ;;  %v2667_v54 = vadd.f32 %v9618_v39, %v7955_v32  ;;  %v1315_v10 = vpop.f32.mrf.mxu0  ;;  %v2661_v25 = vpop.f32.mrf.mxu1 }
 0x1b4   : > { %10751 = vst [vmem:[#allocation67_spill] sm:$0xff] %v9752_v8  ;;  %v9762_v57 = vmax.f32 %v1512_v45, %v2858_v6  ;;  %v1515_v13 = vmax.f32 %v1321_v9, 0.0  ;;  %v1316_v42 = vadd.f32 %v9618_v39, %v1315_v10  ;;  %v2662_v23 = vadd.f32 %v9618_v39, %v2661_v25  ;;  %v6617_v25 = vld [vmem:[%s8453_s25 + $0xa98] sm:$0xff]  ;;  %v6618_v8 = vld [vmem:[%s8453_s25 + $0xaa0] sm:$0xff] }
 0x1b5   : > { %v2861_v0 = vmax.f32 %v2667_v54, 0.0  ;;  %v7758_v22 = vpop.f32.mrf.mxu0  ;;  %v7958_v59 = vpop.f32.mrf.mxu1  ;;  %8109 = vmatmul.mubr.msk.f32.gmra.mxu0 %vm310_vm1, %v6615_v21  ;;  %8309 = vmatmul.mubr.msk.f32.gmra.mxu1 %vm310_vm1, %v6872_v31  ;;  %v6874_v9 = vld [vmem:[%s8453_s25 + $0xe98] sm:$0xff]  ;;  %v6875_v21 = vld [vmem:[%s8453_s25 + $0xea0] sm:$0xff] }
 0x1b6   : > { %10752 = vst [vmem:[#allocation68_spill] sm:$0xff] %v9762_v57  ;;  %v1514_v12 = vmax.f32 %v1316_v42, 0.0  ;;  %v2860_v32 = vmax.f32 %v2662_v23, 0.0  ;;  %v1331_v45 = vadd.f32 %v9618_v39, %v7758_v22  ;;  %v2677_v6 = vadd.f32 %v9618_v39, %v7958_v59  ;;  %8111 = vmatprep.mubr.msk.f32.mxu0 %vm310_vm1, %v6616_v24  ;;  %8311 = vmatprep.mubr.msk.f32.mxu1 %vm310_vm1, %v6873_v37 }
 0x1b7   : > { %v9774_v54 = vmax.f32 %v1515_v13, %v2861_v0  ;;  %v1325_v10 = vpop.f32.mrf.mxu0  ;;  %v2671_v57 = vpop.f32.mrf.mxu1 }
 0x1b8   : > { %v9778_v31 = vmax.f32 %v1514_v12, %v2860_v32  ;;  %v1517_v42 = vmax.f32 %v1331_v45, 0.0  ;;  %v2863_v23 = vmax.f32 %v2677_v6, 0.0  ;;  %v1326_v22 = vadd.f32 %v9618_v39, %v1325_v10  ;;  %v6876_v45 = vld [vmem:[%s8453_s25 + $0xea8] sm:$0xff] }
 0x1b9   : > { %10753 = vst [vmem:[#allocation69_spill] sm:$0xff] %v9774_v54  ;;  %v2672_v24 = vadd.f32 %v9618_v39, %v2671_v57  ;;  %v7761_v37 = vpop.f32.mrf.mxu0  ;;  %v7961_v59 = vpop.f32.mrf.mxu1  ;;  %8112 = vmatmul.mubr.msk.f32.gmra.mxu0 %vm310_vm1, %v6617_v25  ;;  %8312 = vmatmul.mubr.msk.f32.gmra.mxu1 %vm310_vm1, %v6874_v9  ;;  %v6619_v57 = vld [vmem:[%s8453_s25 + $0xaa8] sm:$0xff]  ;;  %v6620_v54 = vld [vmem:[%s8453_s25 + $0xab0] sm:$0xff] }
 0x1ba   : > { %10754 = vst [vmem:[#allocation70_spill] sm:$0xff] %v9778_v31  ;;  %v9784_v13 = vmax.f32 %v1517_v42, %v2863_v23  ;;  %v1516_v0 = vmax.f32 %v1326_v22, 0.0  ;;  %v1341_v12 = vadd.f32 %v9618_v39, %v7761_v37  ;;  %v2687_v32 = vadd.f32 %v9618_v39, %v7961_v59  ;;  %8114 = vmatprep.mubr.msk.f32.mxu0 %vm310_vm1, %v6618_v8  ;;  %v6877_v25 = vld [vmem:[%s8453_s25 + $0xeb0] sm:$0xff] }
 0x1bb   : > { %8314 = vmatprep.mubr.msk.f32.mxu1 %vm310_vm1, %v6875_v21  ;;  %v2862_v6 = vmax.f32 %v2672_v24, 0.0  ;;  %v1335_v10 = vpop.f32.mrf.mxu0  ;;  %v2681_v31 = vpop.f32.mrf.mxu1 }
 0x1bc   : > { %10755 = vst [vmem:[#allocation71_spill] sm:$0xff] %v9784_v13  ;;  %v1519_v9 = vmax.f32 %v1341_v12, 0.0  ;;  %v2865_v42 = vmax.f32 %v2687_v32, 0.0  ;;  %v1336_v23 = vadd.f32 %v9618_v39, %v1335_v10  ;;  %v2682_v22 = vadd.f32 %v9618_v39, %v2681_v31  ;;  %v6621_v31 = vld [vmem:[%s8453_s25 + $0xab8] sm:$0xff]  ;;  %v6622_v13 = vld [vmem:[%s8453_s25 + $0xac0] sm:$0xff] }
 0x1bd   : > { %v9796_v37 = vmax.f32 %v1516_v0, %v2862_v6  ;;  %v7764_v8 = vpop.f32.mrf.mxu0  ;;  %v7964_v21 = vpop.f32.mrf.mxu1  ;;  %8115 = vmatmul.mubr.msk.f32.gmra.mxu0 %vm310_vm1, %v6619_v57  ;;  %8315 = vmatmul.mubr.msk.f32.gmra.mxu1 %vm310_vm1, %v6876_v45  ;;  %v6878_v0 = vld [vmem:[%s8453_s25 + $0xeb8] sm:$0xff]  ;;  %v6879_v57 = vld [vmem:[%s8453_s25 + $0xec0] sm:$0xff] }
 0x1be   : > { %v9800_v24 = vmax.f32 %v1519_v9, %v2865_v42  ;;  %v1518_v59 = vmax.f32 %v1336_v23, 0.0  ;;  %v2864_v12 = vmax.f32 %v2682_v22, 0.0  ;;  %v1351_v32 = vadd.f32 %v9618_v39, %v7764_v8  ;;  %8117 = vmatprep.mubr.msk.f32.mxu0 %vm310_vm1, %v6620_v54  ;;  %8317 = vmatprep.mubr.msk.f32.mxu1 %vm310_vm1, %v6877_v25 }
 0x1bf   : > { %10756 = vst [vmem:[#allocation72_spill] sm:$0xff] %v9796_v37  ;;  %v2697_v6 = vadd.f32 %v9618_v39, %v7964_v21  ;;  %v1345_v10 = vpop.f32.mrf.mxu0  ;;  %v2691_v37 = vpop.f32.mrf.mxu1 }
 0x1c0   : > { %10757 = vst [vmem:[#allocation73_spill] sm:$0xff] %v9800_v24  ;;  %v9810_v45 = vmax.f32 %v1518_v59, %v2864_v12  ;;  %v1521_v9 = vmax.f32 %v1351_v32, 0.0  ;;  %v1346_v42 = vadd.f32 %v9618_v39, %v1345_v10  ;;  %v2692_v23 = vadd.f32 %v9618_v39, %v2691_v37  ;;  %v6623_v37 = vld [vmem:[%s8453_s25 + $0xac8] sm:$0xff]  ;;  %v6624_v24 = vld [vmem:[%s8453_s25 + $0xad0] sm:$0xff] }
 0x1c1   : > { %v2867_v54 = vmax.f32 %v2697_v6, 0.0  ;;  %v7767_v25 = vpop.f32.mrf.mxu0  ;;  %v7967_v22 = vpop.f32.mrf.mxu1  ;;  %8118 = vmatmul.mubr.msk.f32.gmra.mxu0 %vm310_vm1, %v6621_v31  ;;  %8318 = vmatmul.mubr.msk.f32.gmra.mxu1 %vm310_vm1, %v6878_v0  ;;  %v6880_v32 = vld [vmem:[%s8453_s25 + $0xec8] sm:$0xff]  ;;  %v6881_v31 = vld [vmem:[%s8453_s25 + $0xed0] sm:$0xff] }
 0x1c2   : > { %10758 = vst [vmem:[#allocation74_spill] sm:$0xff] %v9810_v45  ;;  %v1520_v8 = vmax.f32 %v1346_v42, 0.0  ;;  %v2866_v21 = vmax.f32 %v2692_v23, 0.0  ;;  %v1361_v59 = vadd.f32 %v9618_v39, %v7767_v25  ;;  %v2707_v12 = vadd.f32 %v9618_v39, %v7967_v22  ;;  %8120 = vmatprep.mubr.msk.f32.mxu0 %vm310_vm1, %v6622_v13  ;;  %8320 = vmatprep.mubr.msk.f32.mxu1 %vm310_vm1, %v6879_v57 }
 0x1c3   : > { %v9822_v6 = vmax.f32 %v1521_v9, %v2867_v54  ;;  %v1355_v10 = vpop.f32.mrf.mxu0  ;;  %v2701_v45 = vpop.f32.mrf.mxu1 }
 0x1c4   : > { %v9826_v0 = vmax.f32 %v1520_v8, %v2866_v21  ;;  %v1523_v42 = vmax.f32 %v1361_v59, 0.0  ;;  %v2869_v23 = vmax.f32 %v2707_v12, 0.0  ;;  %v1356_v25 = vadd.f32 %v9618_v39, %v1355_v10  ;;  %v6882_v59 = vld [vmem:[%s8453_s25 + $0xed8] sm:$0xff] }
 0x1c5   : > { %10759 = vst [vmem:[#allocation75_spill] sm:$0xff] %v9822_v6  ;;  %v2702_v13 = vadd.f32 %v9618_v39, %v2701_v45  ;;  %v7770_v57 = vpop.f32.mrf.mxu0  ;;  %v7970_v22 = vpop.f32.mrf.mxu1  ;;  %8121 = vmatmul.mubr.msk.f32.gmra.mxu0 %vm310_vm1, %v6623_v37  ;;  %8321 = vmatmul.mubr.msk.f32.gmra.mxu1 %vm310_vm1, %v6880_v32  ;;  %v6625_v45 = vld [vmem:[%s8453_s25 + $0xad8] sm:$0xff]  ;;  %v6626_v6 = vld [vmem:[%s8453_s25 + $0xae0] sm:$0xff] }
 0x1c6   : > { %10760 = vst [vmem:[#allocation76_spill] sm:$0xff] %v9826_v0  ;;  %v9832_v9 = vmax.f32 %v1523_v42, %v2869_v23  ;;  %v1522_v54 = vmax.f32 %v1356_v25, 0.0  ;;  %v1371_v8 = vadd.f32 %v9618_v39, %v7770_v57  ;;  %v2717_v21 = vadd.f32 %v9618_v39, %v7970_v22  ;;  %8123 = vmatprep.mubr.msk.f32.mxu0 %vm310_vm1, %v6624_v24  ;;  %v6883_v37 = vld [vmem:[%s8453_s25 + $0xee0] sm:$0xff] }
 0x1c7   : > { %8323 = vmatprep.mubr.msk.f32.mxu1 %vm310_vm1, %v6881_v31  ;;  %v2868_v12 = vmax.f32 %v2702_v13, 0.0  ;;  %v1365_v10 = vpop.f32.mrf.mxu0  ;;  %v2711_v0 = vpop.f32.mrf.mxu1 }
 0x1c8   : > { %10761 = vst [vmem:[#allocation77_spill] sm:$0xff] %v9832_v9  ;;  %v1525_v32 = vmax.f32 %v1371_v8, 0.0  ;;  %v2871_v42 = vmax.f32 %v2717_v21, 0.0  ;;  %v1366_v23 = vadd.f32 %v9618_v39, %v1365_v10  ;;  %v2712_v25 = vadd.f32 %v9618_v39, %v2711_v0  ;;  %v6627_v0 = vld [vmem:[%s8453_s25 + $0xae8] sm:$0xff]  ;;  %v6628_v9 = vld [vmem:[%s8453_s25 + $0xaf0] sm:$0xff] }
 0x1c9   : > { %v9844_v57 = vmax.f32 %v1522_v54, %v2868_v12  ;;  %v7773_v24 = vpop.f32.mrf.mxu0  ;;  %v7973_v31 = vpop.f32.mrf.mxu1  ;;  %8124 = vmatmul.mubr.msk.f32.gmra.mxu0 %vm310_vm1, %v6625_v45  ;;  %8324 = vmatmul.mubr.msk.f32.gmra.mxu1 %vm310_vm1, %v6882_v59  ;;  %v6884_v54 = vld [vmem:[%s8453_s25 + $0xee8] sm:$0xff]  ;;  %v6885_v45 = vld [vmem:[%s8453_s25 + $0xef0] sm:$0xff] }
 0x1ca   : > { %v9848_v13 = vmax.f32 %v1525_v32, %v2871_v42  ;;  %v1524_v22 = vmax.f32 %v1366_v23, 0.0  ;;  %v2870_v8 = vmax.f32 %v2712_v25, 0.0  ;;  %v1381_v21 = vadd.f32 %v9618_v39, %v7773_v24  ;;  %8126 = vmatprep.mubr.msk.f32.mxu0 %vm310_vm1, %v6626_v6  ;;  %8326 = vmatprep.mubr.msk.f32.mxu1 %vm310_vm1, %v6883_v37 }
 0x1cb   : > { %10762 = vst [vmem:[#allocation78_spill] sm:$0xff] %v9844_v57  ;;  %v2727_v12 = vadd.f32 %v9618_v39, %v7973_v31  ;;  %v1375_v10 = vpop.f32.mrf.mxu0  ;;  %v2721_v57 = vpop.f32.mrf.mxu1 }
 0x1cc   : > { %10763 = vst [vmem:[#allocation79_spill] sm:$0xff] %v9848_v13  ;;  %v9858_v59 = vmax.f32 %v1524_v22, %v2870_v8  ;;  %v1527_v32 = vmax.f32 %v1381_v21, 0.0  ;;  %v1376_v42 = vadd.f32 %v9618_v39, %v1375_v10  ;;  %v2722_v23 = vadd.f32 %v9618_v39, %v2721_v57  ;;  %v6629_v57 = vld [vmem:[%s8453_s25 + $0xaf8] sm:$0xff]  ;;  %v6630_v13 = vld [vmem:[%s8453_s25 + $0xb00] sm:$0xff] }
 0x1cd   : > { %v2873_v6 = vmax.f32 %v2727_v12, 0.0  ;;  %v7776_v37 = vpop.f32.mrf.mxu0  ;;  %v7976_v25 = vpop.f32.mrf.mxu1  ;;  %8127 = vmatmul.mubr.msk.f32.gmra.mxu0 %vm310_vm1, %v6627_v0  ;;  %8327 = vmatmul.mubr.msk.f32.gmra.mxu1 %vm310_vm1, %v6884_v54  ;;  %v6886_v21 = vld [vmem:[%s8453_s25 + $0xef8] sm:$0xff]  ;;  %v6887_v0 = vld [vmem:[%s8453_s25 + $0xf00] sm:$0xff] }
 0x1ce   : > { %10764 = vst [vmem:[#allocation80_spill] sm:$0xff] %v9858_v59  ;;  %v1526_v24 = vmax.f32 %v1376_v42, 0.0  ;;  %v2872_v31 = vmax.f32 %v2722_v23, 0.0  ;;  %v1391_v22 = vadd.f32 %v9618_v39, %v7776_v37  ;;  %v2737_v8 = vadd.f32 %v9618_v39, %v7976_v25  ;;  %8129 = vmatprep.mubr.msk.f32.mxu0 %vm310_vm1, %v6628_v9  ;;  %8329 = vmatprep.mubr.msk.f32.mxu1 %vm310_vm1, %v6885_v45 }
 0x1cf   : > { %v9870_v12 = vmax.f32 %v1527_v32, %v2873_v6  ;;  %v1385_v10 = vpop.f32.mrf.mxu0  ;;  %v2731_v59 = vpop.f32.mrf.mxu1 }
 0x1d0   : > { %v9874_v54 = vmax.f32 %v1526_v24, %v2872_v31  ;;  %v1529_v42 = vmax.f32 %v1391_v22, 0.0  ;;  %v2875_v23 = vmax.f32 %v2737_v8, 0.0  ;;  %v1386_v37 = vadd.f32 %v9618_v39, %v1385_v10  ;;  %v6888_v22 = vld [vmem:[%s8453_s25 + $0xf08] sm:$0xff] }
 0x1d1   : > { %10765 = vst [vmem:[#allocation81_spill] sm:$0xff] %v9870_v12  ;;  %v2732_v9 = vadd.f32 %v9618_v39, %v2731_v59  ;;  %v7779_v45 = vpop.f32.mrf.mxu0  ;;  %v7979_v25 = vpop.f32.mrf.mxu1  ;;  %8130 = vmatmul.mubr.msk.f32.gmra.mxu0 %vm310_vm1, %v6629_v57  ;;  %8330 = vmatmul.mubr.msk.f32.gmra.mxu1 %vm310_vm1, %v6886_v21  ;;  %v6631_v59 = vld [vmem:[%s8453_s25 + $0xb08] sm:$0xff]  ;;  %v6632_v12 = vld [vmem:[%s8453_s25 + $0xb10] sm:$0xff] }
 0x1d2   : > { %10766 = vst [vmem:[#allocation82_spill] sm:$0xff] %v9874_v54  ;;  %v9880_v32 = vmax.f32 %v1529_v42, %v2875_v23  ;;  %v1528_v6 = vmax.f32 %v1386_v37, 0.0  ;;  %v1401_v24 = vadd.f32 %v9618_v39, %v7779_v45  ;;  %v2747_v31 = vadd.f32 %v9618_v39, %v7979_v25  ;;  %8132 = vmatprep.mubr.msk.f32.mxu0 %vm310_vm1, %v6630_v13  ;;  %v6889_v57 = vld [vmem:[%s8453_s25 + $0xf10] sm:$0xff] }
 0x1d3   : > { %8332 = vmatprep.mubr.msk.f32.mxu1 %vm310_vm1, %v6887_v0  ;;  %v2874_v8 = vmax.f32 %v2732_v9, 0.0  ;;  %v1395_v10 = vpop.f32.mrf.mxu0  ;;  %v2741_v54 = vpop.f32.mrf.mxu1 }
 0x1d4   : > { %10767 = vst [vmem:[#allocation83_spill] sm:$0xff] %v9880_v32  ;;  %v1531_v21 = vmax.f32 %v1401_v24, 0.0  ;;  %v2877_v42 = vmax.f32 %v2747_v31, 0.0  ;;  %v1396_v23 = vadd.f32 %v9618_v39, %v1395_v10  ;;  %v2742_v37 = vadd.f32 %v9618_v39, %v2741_v54  ;;  %v6633_v54 = vld [vmem:[%s8453_s25 + $0xb18] sm:$0xff]  ;;  %v6891_v32 = vld [vmem:[%s8453_s25 + $0xf20] sm:$0xff] }
 0x1d5   : > { %v9892_v45 = vmax.f32 %v1528_v6, %v2874_v8  ;;  %v7990_v13 = vpop.f32.mrf.mxu0  ;;  %8133 = vmatmul.mubr.msk.f32.gmra.mxu0 %vm310_vm1, %v6631_v59  ;;  %v8190_v0 = vpop.f32.mrf.mxu1  ;;  %8333 = vmatmul.mubr.msk.f32.gmra.mxu1 %vm310_vm1, %v6888_v22  ;;  %v6890_v6 = vld [vmem:[%s8453_s25 + $0xf18] sm:$0xff] }
 0x1d6   : > { %v9896_v9 = vmax.f32 %v1531_v21, %v2877_v42  ;;  %v1530_v25 = vmax.f32 %v1396_v23, 0.0  ;;  %v2876_v24 = vmax.f32 %v2742_v37, 0.0  ;;  %v3591_v31 = vadd.f32 %v9618_v39, %v7990_v13  ;;  %8135 = vmatprep.mubr.msk.f32.mxu0 %vm310_vm1, %v6632_v12  ;;  %8335 = vmatprep.mubr.msk.f32.mxu1 %vm310_vm1, %v6889_v57 }
 0x1d7   : > { %10768 = vst [vmem:[#allocation84_spill] sm:$0xff] %v9892_v45  ;;  %v4937_v8 = vadd.f32 %v9618_v39, %v8190_v0  ;;  %v3585_v10 = vpop.f32.mrf.mxu0  ;;  %v4931_v59 = vpop.f32.mrf.mxu1  ;;  %v6634_v45 = vld [vmem:[%s8453_s25 + $0xb20] sm:$0xff] }
 0x1d8   : > { %10769 = vst [vmem:[#allocation85_spill] sm:$0xff] %v9896_v9  ;;  %v9906_v22 = vmax.f32 %v1530_v25, %v2876_v24  ;;  %v4225_v21 = vmax.f32 %v3591_v31, 0.0  ;;  %v3586_v42 = vadd.f32 %v9618_v39, %v3585_v10  ;;  %v4932_v23 = vadd.f32 %v9618_v39, %v4931_v59  ;;  %v6635_v31 = vld [vmem:[%s8453_s25 + $0xb28] sm:$0xff]  ;;  %v6893_v9 = vld [vmem:[%s8453_s25 + $0xf30] sm:$0xff] }
 0x1d9   : > { %v5571_v12 = vmax.f32 %v4937_v8, 0.0  ;;  %v7993_v57 = vpop.f32.mrf.mxu0  ;;  %8136 = vmatmul.mubr.msk.f32.gmra.mxu0 %vm310_vm1, %v6633_v54  ;;  %v8193_v37 = vpop.f32.mrf.mxu1  ;;  %8336 = vmatmul.mubr.msk.f32.gmra.mxu1 %vm310_vm1, %v6890_v6  ;;  %v6892_v8 = vld [vmem:[%s8453_s25 + $0xf28] sm:$0xff] }
 0x1da   : > { %10770 = vst [vmem:[#allocation86_spill] sm:$0xff] %v9906_v22  ;;  %v4224_v13 = vmax.f32 %v3586_v42, 0.0  ;;  %v5570_v0 = vmax.f32 %v4932_v23, 0.0  ;;  %v3601_v25 = vadd.f32 %v9618_v39, %v7993_v57  ;;  %v4947_v24 = vadd.f32 %v9618_v39, %v8193_v37  ;;  %8138 = vmatprep.mubr.msk.f32.mxu0 %vm310_vm1, %v6634_v45  ;;  %8338 = vmatprep.mubr.msk.f32.mxu1 %vm310_vm1, %v6891_v32  ;;  %v6636_v22 = vld [vmem:[%s8453_s25 + $0xb30] sm:$0xff] }
 0x1db   : > { %v5699_v10 = vmax.f32 %v4225_v21, %v5571_v12  ;;  %v3595_v59 = vpop.f32.mrf.mxu0  ;;  %v4941_v54 = vpop.f32.mrf.mxu1 }
 0x1dc   : > { %v5698_v6 = vmax.f32 %v4224_v13, %v5570_v0  ;;  %v4227_v42 = vmax.f32 %v3601_v25, 0.0  ;;  %v5573_v45 = vmax.f32 %v4947_v24, 0.0  ;;  %v3596_v32 = vadd.f32 %v9618_v39, %v3595_v59  ;;  %v6894_v24 = vld [vmem:[%s8453_s25 + $0xf38] sm:$0xff] }
 0x1dd   : > { %v5827_v21 = vmax.f32 %v8878_v27, %v5699_v10  ;;  %v4942_v23 = vadd.f32 %v9618_v39, %v4941_v54  ;;  %v7996_v12 = vpop.f32.mrf.mxu0  ;;  %8139 = vmatmul.mubr.msk.f32.gmra.mxu0 %vm310_vm1, %v6635_v31  ;;  %v8196_v57 = vpop.f32.mrf.mxu1  ;;  %8339 = vmatmul.mubr.msk.f32.gmra.mxu1 %vm310_vm1, %v6892_v8  ;;  %v6637_v27 = vld [vmem:[%s8453_s25 + $0xb38] sm:$0xff]  ;;  %v6638_v54 = vld [vmem:[%s8453_s25 + $0xb40] sm:$0xff] }
 0x1de   : > { %v5826_v37 = vmax.f32 %v8888_v38, %v5698_v6  ;;  %v5701_v13 = vmax.f32 %v4227_v42, %v5573_v45  ;;  %v4226_v0 = vmax.f32 %v3596_v32, 0.0  ;;  %v3611_v25 = vadd.f32 %v9618_v39, %v7996_v12  ;;  %8141 = vmatprep.mubr.msk.f32.mxu0 %vm310_vm1, %v6636_v22  ;;  %8341 = vmatprep.mubr.msk.f32.mxu1 %vm310_vm1, %v6893_v9  ;;  %v6895_v38 = vld [vmem:[%s8453_s25 + $0xf40] sm:$0xff] }
 0x1df   : > { %5956 = vst.msk [vmem:[%s9924_s8 + $0x8] sm:$0xff] %vm5954_vm2, %v5827_v21  ;;  %v5572_v31 = vmax.f32 %v4942_v23, 0.0  ;;  %v4957_v10 = vadd.f32 %v9618_v39, %v8196_v57  ;;  %v3605_v8 = vpop.f32.mrf.mxu0  ;;  %v4951_v59 = vpop.f32.mrf.mxu1 }
 0x1e0   : > { %5955 = vst.msk [vmem:[%s9924_s8] sm:$0xff] %vm5954_vm2, %v5826_v37  ;;  %v5829_v6 = vmax.f32 %v8900_v51, %v5701_v13  ;;  %v4229_v42 = vmax.f32 %v3611_v25, 0.0  ;;  %v3606_v9 = vadd.f32 %v9618_v39, %v3605_v8  ;;  %v4952_v22 = vadd.f32 %v9618_v39, %v4951_v59  ;;  %v6639_v13 = vld [vmem:[%s8453_s25 + $0xb48] sm:$0xff]  ;;  %v6897_v8 = vld [vmem:[%s8453_s25 + $0xf50] sm:$0xff] }
 0x1e1   : > { %v5700_v45 = vmax.f32 %v4226_v0, %v5572_v31  ;;  %v5575_v32 = vmax.f32 %v4957_v10, 0.0  ;;  %v7999_v21 = vpop.f32.mrf.mxu0  ;;  %8142 = vmatmul.mubr.msk.f32.gmra.mxu0 %vm310_vm1, %v6637_v27  ;;  %v8199_v23 = vpop.f32.mrf.mxu1  ;;  %8342 = vmatmul.mubr.msk.f32.gmra.mxu1 %vm310_vm1, %v6894_v24  ;;  %v6896_v0 = vld [vmem:[%s8453_s25 + $0xf48] sm:$0xff]  ;;  %v6640_v10 = vld [vmem:[%s8453_s25 + $0xb50] sm:$0xff] }
 0x1e2   : > { %5958 = vst.msk [vmem:[%s9924_s8 + $0x18] sm:$0xff] %vm5954_vm2, %v5829_v6  ;;  %v4228_v51 = vmax.f32 %v3606_v9, 0.0  ;;  %v5574_v12 = vmax.f32 %v4952_v22, 0.0  ;;  %v3621_v57 = vadd.f32 %v9618_v39, %v7999_v21  ;;  %v4967_v37 = vadd.f32 %v9618_v39, %v8199_v23  ;;  %8144 = vmatprep.mubr.msk.f32.mxu0 %vm310_vm1, %v6638_v54  ;;  %8344 = vmatprep.mubr.msk.f32.mxu1 %vm310_vm1, %v6895_v38 }
 0x1e3   : > { %v5828_v25 = vmax.f32 %v8904_v56, %v5700_v45  ;;  %v5703_v27 = vmax.f32 %v4229_v42, %v5575_v32  ;;  %v3615_v31 = vpop.f32.mrf.mxu0  ;;  %v4961_v24 = vpop.f32.mrf.mxu1 }
 0x1e4   : > { %v5702_v59 = vmax.f32 %v4228_v51, %v5574_v12  ;;  %v4231_v6 = vmax.f32 %v3621_v57, 0.0  ;;  %v5577_v9 = vmax.f32 %v4967_v37, 0.0  ;;  %v3616_v22 = vadd.f32 %v9618_v39, %v3615_v31  ;;  %v6898_v51 = vld [vmem:[%s8453_s25 + $0xf58] sm:$0xff] }
 0x1e5   : > { %5957 = vst.msk [vmem:[%s9924_s8 + $0x10] sm:$0xff] %vm5954_vm2, %v5828_v25  ;;  %v5831_v54 = vmax.f32 %v8910_v63, %v5703_v27  ;;  %v4962_v38 = vadd.f32 %v9618_v39, %v4961_v24  ;;  %v8002_v56 = vpop.f32.mrf.mxu0  ;;  %8145 = vmatmul.mubr.msk.f32.gmra.mxu0 %vm310_vm1, %v6639_v13  ;;  %v8202_v42 = vpop.f32.mrf.mxu1  ;;  %8345 = vmatmul.mubr.msk.f32.gmra.mxu1 %vm310_vm1, %v6896_v0  ;;  %v6641_v63 = vld [vmem:[%s8453_s25 + $0xb58] sm:$0xff]  ;;  %v6642_v0 = vld [vmem:[%s8453_s25 + $0xb60] sm:$0xff] }
 0x1e6   : > { %v5830_v45 = vmax.f32 %v8922_v15, %v5702_v59  ;;  %v5705_v32 = vmax.f32 %v4231_v6, %v5577_v9  ;;  %v4230_v21 = vmax.f32 %v3616_v22, 0.0  ;;  %v3631_v23 = vadd.f32 %v9618_v39, %v8002_v56  ;;  %8147 = vmatprep.mubr.msk.f32.mxu0 %vm310_vm1, %v6640_v10  ;;  %8347 = vmatprep.mubr.msk.f32.mxu1 %vm310_vm1, %v6897_v8  ;;  %v6899_v15 = vld [vmem:[%s8453_s25 + $0xf60] sm:$0xff]  ;;  %v6900_v56 = vld [vmem:[%s8453_s25 + $0xf68] sm:$0xff] }
 0x1e7   : > { %5960 = vst.msk [vmem:[%s9924_s8 + $0x28] sm:$0xff] %vm5954_vm2, %v5831_v54  ;;  %v5576_v12 = vmax.f32 %v4962_v38, 0.0  ;;  %v4977_v57 = vadd.f32 %v9618_v39, %v8202_v42  ;;  %v3625_v37 = vpop.f32.mrf.mxu0  ;;  %v4971_v13 = vpop.f32.mrf.mxu1  ;;  %v6643_v38 = vld [vmem:[%s8453_s25 + $0xb68] sm:$0xff] }
 0x1e8   : > { %5959 = vst.msk [vmem:[%s9924_s8 + $0x20] sm:$0xff] %vm5954_vm2, %v5830_v45  ;;  %v5833_v25 = vmax.f32 %v8926_v18, %v5705_v32  ;;  %v4233_v27 = vmax.f32 %v3631_v23, 0.0  ;;  %v3626_v31 = vadd.f32 %v9618_v39, %v3625_v37  ;;  %v4972_v24 = vadd.f32 %v9618_v39, %v4971_v13  ;;  %v6644_v23 = vld [vmem:[%s8453_s25 + $0xb70] sm:$0xff] }
 0x1e9   : > { %v5704_v10 = vmax.f32 %v4230_v21, %v5576_v12  ;;  %v5579_v8 = vmax.f32 %v4977_v57, 0.0  ;;  %v8005_v59 = vpop.f32.mrf.mxu0  ;;  %8148 = vmatmul.mubr.msk.f32.gmra.mxu0 %vm310_vm1, %v6641_v63  ;;  %v8205_v6 = vpop.f32.mrf.mxu1  ;;  %8348 = vmatmul.mubr.msk.f32.gmra.mxu1 %vm310_vm1, %v6898_v51  ;;  %v6901_v63 = vld [vmem:[%s8453_s25 + $0xf70] sm:$0xff] }
 0x1ea   : > { %5962 = vst.msk [vmem:[%s9924_s8 + $0x38] sm:$0xff] %vm5954_vm2, %v5833_v25  ;;  %v4232_v18 = vmax.f32 %v3626_v31, 0.0  ;;  %v5578_v9 = vmax.f32 %v4972_v24, 0.0  ;;  %v3641_v22 = vadd.f32 %v9618_v39, %v8005_v59  ;;  %v4987_v54 = vadd.f32 %v9618_v39, %v8205_v6  ;;  %8150 = vmatprep.mubr.msk.f32.mxu0 %vm310_vm1, %v6642_v0  ;;  %8350 = vmatprep.mubr.msk.f32.mxu1 %vm310_vm1, %v6899_v15  ;;  %v9999_v39 = vld [vmem:[%s10684_s2] ss:$0 sm:$0xff] }
 0x1eb   : > { %v5832_v42 = vmax.f32 %v8936_v30, %v5704_v10  ;;  %v5707_v45 = vmax.f32 %v4233_v27, %v5579_v8  ;;  %v3635_v32 = vpop.f32.mrf.mxu0  ;;  %v4981_v21 = vpop.f32.mrf.mxu1  ;;  %v6902_v10 = vld [vmem:[%s8453_s25 + $0xf78] sm:$0xff] }
 0x1ec   : > { %v5706_v51 = vmax.f32 %v4232_v18, %v5578_v9  ;;  %v4235_v12 = vmax.f32 %v3641_v22, 0.0  ;;  %v5581_v57 = vmax.f32 %v4987_v54, 0.0  ;;  %v3636_v37 = vadd.f32 %v9999_v39, %v3635_v32  ;;  %v6646_v9 = vld [vmem:[%s8453_s25 + $0xb80] sm:$0xff] }
 0x1ed   : > { %5961 = vst.msk [vmem:[%s9924_s8 + $0x30] sm:$0xff] %vm5954_vm2, %v5832_v42  ;;  %v5835_v30 = vmax.f32 %v8948_v44, %v5707_v45  ;;  %v4982_v13 = vadd.f32 %v9999_v39, %v4981_v21  ;;  %v8008_v0 = vpop.f32.mrf.mxu0  ;;  %8151 = vmatmul.mubr.msk.f32.gmra.mxu0 %vm310_vm1, %v6643_v38  ;;  %v8208_v15 = vpop.f32.mrf.mxu1  ;;  %8351 = vmatmul.mubr.msk.f32.gmra.mxu1 %vm310_vm1, %v6900_v56  ;;  %v6645_v44 = vld [vmem:[%s8453_s25 + $0xb78] sm:$0xff] }
 0x1ee   : > { %v5834_v25 = vmax.f32 %v8952_v49, %v5706_v51  ;;  %v5709_v27 = vmax.f32 %v4235_v12, %v5581_v57  ;;  %v4234_v31 = vmax.f32 %v3636_v37, 0.0  ;;  %v3651_v24 = vadd.f32 %v9999_v39, %v8008_v0  ;;  %8153 = vmatprep.mubr.msk.f32.mxu0 %vm310_vm1, %v6644_v23  ;;  %8353 = vmatprep.mubr.msk.f32.mxu1 %vm310_vm1, %v6901_v63  ;;  %v6903_v49 = vld [vmem:[%s8453_s25 + $0xf80] sm:$0xff]  ;;  %v6647_v12 = vld [vmem:[%s8453_s25 + $0xb88] sm:$0xff] }
 0x1ef   : > { %5964 = vst.msk [vmem:[%s9924_s8 + $0x48] sm:$0xff] %vm5954_vm2, %v5835_v30  ;;  %v5580_v8 = vmax.f32 %v4982_v13, 0.0  ;;  %v4997_v59 = vadd.f32 %v9999_v39, %v8208_v15  ;;  %v3645_v6 = vpop.f32.mrf.mxu0  ;;  %v4991_v18 = vpop.f32.mrf.mxu1  ;;  %v6904_v57 = vld [vmem:[%s8453_s25 + $0xf88] sm:$0xff]  ;;  %v6648_v15 = vld [vmem:[%s8453_s25 + $0xb90] sm:$0xff] }
 0x1f0   : > { %5963 = vst.msk [vmem:[%s9924_s8 + $0x40] sm:$0xff] %vm5954_vm2, %v5834_v25  ;;  %v5837_v22 = vmax.f32 %v8958_v58, %v5709_v27  ;;  %v4237_v54 = vmax.f32 %v3651_v24, 0.0  ;;  %v3646_v38 = vadd.f32 %v9999_v39, %v3645_v6  ;;  %v4992_v56 = vadd.f32 %v9999_v39, %v4991_v18  ;;  %v6905_v25 = vld [vmem:[%s8453_s25 + $0xf90] sm:$0xff] }
 0x1f1   : > { %v5708_v42 = vmax.f32 %v4234_v31, %v5580_v8  ;;  %v5583_v45 = vmax.f32 %v4997_v59, 0.0  ;;  %v8011_v32 = vpop.f32.mrf.mxu0  ;;  %8154 = vmatmul.mubr.msk.f32.gmra.mxu0 %vm310_vm1, %v6645_v44  ;;  %v8211_v21 = vpop.f32.mrf.mxu1  ;;  %8354 = vmatmul.mubr.msk.f32.gmra.mxu1 %vm310_vm1, %v6902_v10 }
 0x1f2   : > { %5966 = vst.msk [vmem:[%s9924_s8 + $0x58] sm:$0xff] %vm5954_vm2, %v5837_v22  ;;  %v4236_v58 = vmax.f32 %v3646_v38, 0.0  ;;  %v5582_v23 = vmax.f32 %v4992_v56, 0.0  ;;  %v3661_v63 = vadd.f32 %v9999_v39, %v8011_v32  ;;  %v5007_v51 = vadd.f32 %v9999_v39, %v8211_v21  ;;  %8156 = vmatprep.mubr.msk.f32.mxu0 %vm310_vm1, %v6646_v9  ;;  %8356 = vmatprep.mubr.msk.f32.mxu1 %vm310_vm1, %v6903_v49  ;;  %v6906_v22 = vld [vmem:[%s8453_s25 + $0xf98] sm:$0xff] }
 0x1f3   : > { %v5836_v37 = vmax.f32 %v8970_v11, %v5708_v42  ;;  %v5711_v30 = vmax.f32 %v4237_v54, %v5583_v45  ;;  %v3655_v13 = vpop.f32.mrf.mxu0  ;;  %v5001_v0 = vpop.f32.mrf.mxu1  ;;  %v6650_v45 = vld [vmem:[%s8453_s25 + $0xba0] sm:$0xff] }
 0x1f4   : > { %v5710_v27 = vmax.f32 %v4236_v58, %v5582_v23  ;;  %v4239_v31 = vmax.f32 %v3661_v63, 0.0  ;;  %v5585_v24 = vmax.f32 %v5007_v51, 0.0  ;;  %v3656_v44 = vadd.f32 %v9999_v39, %v3655_v13 }
 0x1f5   : > { %5965 = vst.msk [vmem:[%s9924_s8 + $0x50] sm:$0xff] %vm5954_vm2, %v5836_v37  ;;  %v5839_v10 = vmax.f32 %v8974_v14, %v5711_v30  ;;  %v5002_v8 = vadd.f32 %v9999_v39, %v5001_v0  ;;  %v8014_v11 = vpop.f32.mrf.mxu0  ;;  %8157 = vmatmul.mubr.msk.f32.gmra.mxu0 %vm310_vm1, %v6647_v12  ;;  %v8214_v59 = vpop.f32.mrf.mxu1  ;;  %8357 = vmatmul.mubr.msk.f32.gmra.mxu1 %vm310_vm1, %v6904_v57  ;;  %v6649_v14 = vld [vmem:[%s8453_s25 + $0xb98] sm:$0xff]  ;;  %v6651_v0 = vld [vmem:[%s8453_s25 + $0xba8] sm:$0xff] }
 0x1f6   : > { %v5838_v6 = vmax.f32 %v8984_v28, %v5710_v27  ;;  %v5713_v18 = vmax.f32 %v4239_v31, %v5585_v24  ;;  %v4238_v9 = vmax.f32 %v3656_v44, 0.0  ;;  %v3671_v49 = vadd.f32 %v9999_v39, %v8014_v11  ;;  %8159 = vmatprep.mubr.msk.f32.mxu0 %vm310_vm1, %v6648_v15  ;;  %8359 = vmatprep.mubr.msk.f32.mxu1 %vm310_vm1, %v6905_v25  ;;  %v6907_v28 = vld [vmem:[%s8453_s25 + $0xfa0] sm:$0xff]  ;;  %v6908_v15 = vld [vmem:[%s8453_s25 + $0xfa8] sm:$0xff]  ;;  %v6652_v44 = vld [vmem:[%s8453_s25 + $0xbb0] sm:$0xff] }
 0x1f7   : > { %5968 = vst.msk [vmem:[%s9924_s8 + $0x68] sm:$0xff] %vm5954_vm2, %v5839_v10  ;;  %v5584_v54 = vmax.f32 %v5002_v8, 0.0  ;;  %v5017_v38 = vadd.f32 %v9999_v39, %v8214_v59  ;;  %v3665_v56 = vpop.f32.mrf.mxu0  ;;  %v5011_v42 = vpop.f32.mrf.mxu1  ;;  %v6909_v10 = vld [vmem:[%s8453_s25 + $0xfb0] sm:$0xff] }
 0x1f8   : > { %5967 = vst.msk [vmem:[%s9924_s8 + $0x60] sm:$0xff] %vm5954_vm2, %v5838_v6  ;;  %v5841_v32 = vmax.f32 %v8996_v43, %v5713_v18  ;;  %v4241_v21 = vmax.f32 %v3671_v49, 0.0  ;;  %v3666_v58 = vadd.f32 %v9999_v39, %v3665_v56  ;;  %v5012_v23 = vadd.f32 %v9999_v39, %v5011_v42  ;;  %v6910_v56 = vld [vmem:[%s8453_s25 + $0xfb8] sm:$0xff] }
 0x1f9   : > { %v5712_v63 = vmax.f32 %v4238_v9, %v5584_v54  ;;  %v5587_v51 = vmax.f32 %v5017_v38, 0.0  ;;  %v8017_v12 = vpop.f32.mrf.mxu0  ;;  %8160 = vmatmul.mubr.msk.f32.gmra.mxu0 %vm310_vm1, %v6649_v14  ;;  %v8217_v57 = vpop.f32.mrf.mxu1  ;;  %8360 = vmatmul.mubr.msk.f32.gmra.mxu1 %vm310_vm1, %v6906_v22 }
 0x1fa   : > { %5970 = vst.msk [vmem:[%s9924_s8 + $0x78] sm:$0xff] %vm5954_vm2, %v5841_v32  ;;  %v4240_v43 = vmax.f32 %v3666_v58, 0.0  ;;  %v5586_v37 = vmax.f32 %v5012_v23, 0.0  ;;  %v3681_v30 = vadd.f32 %v9999_v39, %v8017_v12  ;;  %v5027_v13 = vadd.f32 %v9999_v39, %v8217_v57  ;;  %8162 = vmatprep.mubr.msk.f32.mxu0 %vm310_vm1, %v6650_v45  ;;  %8362 = vmatprep.mubr.msk.f32.mxu1 %vm310_vm1, %v6907_v28 }
 0x1fb   : > { %v5840_v25 = vmax.f32 %v9000_v50, %v5712_v63  ;;  %v5715_v27 = vmax.f32 %v4241_v21, %v5587_v51  ;;  %v3675_v31 = vpop.f32.mrf.mxu0  ;;  %v5021_v24 = vpop.f32.mrf.mxu1  ;;  %v6654_v21 = vld [vmem:[%s8453_s25 + $0xbc0] sm:$0xff] }
 0x1fc   : > { %v5714_v8 = vmax.f32 %v4240_v43, %v5586_v37  ;;  %v4243_v11 = vmax.f32 %v3681_v30, 0.0  ;;  %v5589_v59 = vmax.f32 %v5027_v13, 0.0  ;;  %v3676_v6 = vadd.f32 %v9999_v39, %v3675_v31 }
 0x1fd   : > { %5969 = vst.msk [vmem:[%s9924_s8 + $0x70] sm:$0xff] %vm5954_vm2, %v5840_v25  ;;  %v5843_v18 = vmax.f32 %v9006_v60, %v5715_v27  ;;  %v5022_v9 = vadd.f32 %v9999_v39, %v5021_v24  ;;  %v8020_v50 = vpop.f32.mrf.mxu0  ;;  %8163 = vmatmul.mubr.msk.f32.gmra.mxu0 %vm310_vm1, %v6651_v0  ;;  %v8220_v49 = vpop.f32.mrf.mxu1  ;;  %8363 = vmatmul.mubr.msk.f32.gmra.mxu1 %vm310_vm1, %v6908_v15  ;;  %v6653_v60 = vld [vmem:[%s8453_s25 + $0xbb8] sm:$0xff]  ;;  %v6655_v15 = vld [vmem:[%s8453_s25 + $0xbc8] sm:$0xff] }
 0x1fe   : > { %v5842_v14 = vmax.f32 %v9018_v16, %v5714_v8  ;;  %v5717_v22 = vmax.f32 %v4243_v11, %v5589_v59  ;;  %v4242_v54 = vmax.f32 %v3676_v6, 0.0  ;;  %v3691_v38 = vadd.f32 %v9999_v39, %v8020_v50  ;;  %8165 = vmatprep.mubr.msk.f32.mxu0 %vm310_vm1, %v6652_v44  ;;  %8365 = vmatprep.mubr.msk.f32.mxu1 %vm310_vm1, %v6909_v10  ;;  %v6911_v16 = vld [vmem:[%s8453_s25 + $0xfc0] sm:$0xff]  ;;  %v6912_v25 = vld [vmem:[%s8453_s25 + $0xfc8] sm:$0xff]  ;;  %v6656_v10 = vld [vmem:[%s8453_s25 + $0xbd0] sm:$0xff] }
 0x1ff   : > { %5972 = vst.msk [vmem:[%s9924_s8 + $0x88] sm:$0xff] %vm5954_vm2, %v5843_v18  ;;  %v5588_v42 = vmax.f32 %v5022_v9, 0.0  ;;  %v5037_v45 = vadd.f32 %v9999_v39, %v8220_v49  ;;  %v3685_v28 = vpop.f32.mrf.mxu0  ;;  %v5031_v32 = vpop.f32.mrf.mxu1  ;;  %v6913_v8 = vld [vmem:[%s8453_s25 + $0xfd0] sm:$0xff] }
 0x200   : > { %5971 = vst.msk [vmem:[%s9924_s8 + $0x80] sm:$0xff] %vm5954_vm2, %v5842_v14  ;;  %v5845_v58 = vmax.f32 %v9022_v20, %v5717_v22  ;;  %v4245_v23 = vmax.f32 %v3691_v38, 0.0  ;;  %v3686_v63 = vadd.f32 %v9999_v39, %v3685_v28  ;;  %v5032_v51 = vadd.f32 %v9999_v39, %v5031_v32  ;;  %v6658_v32 = vld [vmem:[%s8453_s25 + $0xbe0] sm:$0xff] }
 0x201   : > { %v5716_v12 = vmax.f32 %v4242_v54, %v5588_v42  ;;  %v5591_v57 = vmax.f32 %v5037_v45, 0.0  ;;  %v8023_v43 = vpop.f32.mrf.mxu0  ;;  %8166 = vmatmul.mubr.msk.f32.gmra.mxu0 %vm310_vm1, %v6653_v60  ;;  %v8223_v37 = vpop.f32.mrf.mxu1  ;;  %8366 = vmatmul.mubr.msk.f32.gmra.mxu1 %vm310_vm1, %v6910_v56  ;;  %v6914_v60 = vld [vmem:[%s8453_s25 + $0xfd8] sm:$0xff] }
 0x202   : > { %5974 = vst.msk [vmem:[%s9924_s8 + $0x98] sm:$0xff] %vm5954_vm2, %v5845_v58  ;;  %v4244_v20 = vmax.f32 %v3686_v63, 0.0  ;;  %v5590_v30 = vmax.f32 %v5032_v51, 0.0  ;;  %v3701_v13 = vadd.f32 %v9999_v39, %v8023_v43  ;;  %v5047_v0 = vadd.f32 %v9999_v39, %v8223_v37  ;;  %8168 = vmatprep.mubr.msk.f32.mxu0 %vm310_vm1, %v6654_v21  ;;  %8368 = vmatprep.mubr.msk.f32.mxu1 %vm310_vm1, %v6911_v16 }
 0x203   : > { %v5844_v27 = vmax.f32 %v9032_v34, %v5716_v12  ;;  %v5719_v31 = vmax.f32 %v4245_v23, %v5591_v57  ;;  %v3695_v24 = vpop.f32.mrf.mxu0  ;;  %v5041_v44 = vpop.f32.mrf.mxu1 }
 0x204   : > { %v5718_v11 = vmax.f32 %v4244_v20, %v5590_v30  ;;  %v4247_v59 = vmax.f32 %v3701_v13, 0.0  ;;  %v5593_v6 = vmax.f32 %v5047_v0, 0.0  ;;  %v3696_v18 = vadd.f32 %v9999_v39, %v3695_v24  ;;  %v6659_v30 = vld [vmem:[%s8453_s25 + $0xbe8] sm:$0xff]  ;;  %v6917_v24 = vld [vmem:[%s8453_s25 + $0xff0] sm:$0xff] }
 0x205   : > { %5973 = vst.msk [vmem:[%s9924_s8 + $0x90] sm:$0xff] %vm5954_vm2, %v5844_v27  ;;  %v5847_v9 = vmax.f32 %v9044_v53, %v5719_v31  ;;  %v5042_v50 = vadd.f32 %v9999_v39, %v5041_v44  ;;  %v8026_v34 = vpop.f32.mrf.mxu0  ;;  %8169 = vmatmul.mubr.msk.f32.gmra.mxu0 %vm310_vm1, %v6655_v15  ;;  %v8226_v49 = vpop.f32.mrf.mxu1  ;;  %8369 = vmatmul.mubr.msk.f32.gmra.mxu1 %vm310_vm1, %v6912_v25  ;;  %v6657_v53 = vld [vmem:[%s8453_s25 + $0xbd8] sm:$0xff]  ;;  %v6916_v13 = vld [vmem:[%s8453_s25 + $0xfe8] sm:$0xff]  ;;  %v6660_v31 = vld [vmem:[%s8453_s25 + $0xbf0] sm:$0xff] }
 0x206   : > { %v5846_v14 = vmax.f32 %v9048_v61, %v5718_v11  ;;  %v5721_v22 = vmax.f32 %v4247_v59, %v5593_v6  ;;  %v4246_v54 = vmax.f32 %v3696_v18, 0.0  ;;  %v3711_v38 = vadd.f32 %v9999_v39, %v8026_v34  ;;  %8171 = vmatprep.mubr.msk.f32.mxu0 %vm310_vm1, %v6656_v10  ;;  %8371 = vmatprep.mubr.msk.f32.mxu1 %vm310_vm1, %v6913_v8  ;;  %v6915_v61 = vld [vmem:[%s8453_s25 + $0xfe0] sm:$0xff] }
 0x207   : > { %5976 = vst.msk [vmem:[%s9924_s8 + $0xa8] sm:$0xff] %vm5954_vm2, %v5847_v9  ;;  %v5592_v56 = vmax.f32 %v5042_v50, 0.0  ;;  %v5057_v42 = vadd.f32 %v9999_v39, %v8226_v49  ;;  %v3705_v45 = vpop.f32.mrf.mxu0  ;;  %v5051_v28 = vpop.f32.mrf.mxu1 }
 0x208   : > { %5975 = vst.msk [vmem:[%s9924_s8 + $0xa0] sm:$0xff] %vm5954_vm2, %v5846_v14  ;;  %v5849_v21 = vmax.f32 %v9054_v5, %v5721_v22  ;;  %v4249_v16 = vmax.f32 %v3711_v38, 0.0  ;;  %v3706_v58 = vadd.f32 %v9999_v39, %v3705_v45  ;;  %v5052_v23 = vadd.f32 %v9999_v39, %v5051_v28  ;;  %v6918_v14 = vld [vmem:[%s8453_s25 + $0xff8] sm:$0xff] }
 0x209   : > { %v5720_v63 = vmax.f32 %v4246_v54, %v5592_v56  ;;  %v5595_v51 = vmax.f32 %v5057_v42, 0.0  ;;  %v8029_v12 = vpop.f32.mrf.mxu0  ;;  %8172 = vmatmul.mubr.msk.f32.gmra.mxu0 %vm310_vm1, %v6657_v53  ;;  %v8229_v57 = vpop.f32.mrf.mxu1  ;;  %8372 = vmatmul.mubr.msk.f32.gmra.mxu1 %vm310_vm1, %v6914_v60 }
 0x20a   : > { %5978 = vst.msk [vmem:[%s9924_s8 + $0xb8] sm:$0xff] %vm5954_vm2, %v5849_v21  ;;  %v4248_v5 = vmax.f32 %v3706_v58, 0.0  ;;  %v5594_v43 = vmax.f32 %v5052_v23, 0.0  ;;  %v3721_v37 = vadd.f32 %v9999_v39, %v8029_v12  ;;  %v5067_v20 = vadd.f32 %v9999_v39, %v8229_v57  ;;  %8174 = vmatprep.mubr.msk.f32.mxu0 %vm310_vm1, %v6658_v32  ;;  %8374 = vmatprep.mubr.msk.f32.mxu1 %vm310_vm1, %v6915_v61 }
 0x20b   : > { %v5848_v0 = vmax.f32 %v9066_v29, %v5720_v63  ;;  %v5723_v15 = vmax.f32 %v4249_v16, %v5595_v51  ;;  %v3715_v25 = vpop.f32.mrf.mxu0  ;;  %v5061_v27 = vpop.f32.mrf.mxu1 }
 0x20c   : > { %v5722_v44 = vmax.f32 %v4248_v5, %v5594_v43  ;;  %v4251_v10 = vmax.f32 %v3721_v37, 0.0  ;;  %v5597_v8 = vmax.f32 %v5067_v20, 0.0  ;;  %v3716_v11 = vadd.f32 %v9999_v39, %v3715_v25 }
 0x20d   : > { %5977 = vst.msk [vmem:[%s9924_s8 + $0xb0] sm:$0xff] %vm5954_vm2, %v5848_v0  ;;  %v5851_v59 = vmax.f32 %v9070_v33, %v5723_v15  ;;  %v5062_v6 = vadd.f32 %v9999_v39, %v5061_v27  ;;  %v8032_v29 = vpop.f32.mrf.mxu0  ;;  %8175 = vmatmul.mubr.msk.f32.gmra.mxu0 %vm310_vm1, %v6659_v30  ;;  %v8232_v18 = vpop.f32.mrf.mxu1  ;;  %8375 = vmatmul.mubr.msk.f32.gmra.mxu1 %vm310_vm1, %v6916_v13  ;;  %v6661_v33 = vld [vmem:[%s8453_s25 + $0xbf8] sm:$0xff] }
 0x20e   : > { %v5850_v9 = vmax.f32 %v9080_v48, %v5722_v44  ;;  %v5725_v50 = vmax.f32 %v4251_v10, %v5597_v8  ;;  %v4250_v34 = vmax.f32 %v3716_v11, 0.0  ;;  %v3731_v49 = vadd.f32 %v9999_v39, %v8032_v29  ;;  %8177 = vmatprep.mubr.msk.f32.mxu0 %vm310_vm1, %v6660_v31  ;;  %8377 = vmatprep.mubr.msk.f32.mxu1 %vm310_vm1, %v6917_v24 }
 0x20f   : > { %5980 = vst.msk [vmem:[%s9924_s8 + $0xc8] sm:$0xff] %vm5954_vm2, %v5851_v59  ;;  %v5596_v22 = vmax.f32 %v5062_v6, 0.0  ;;  %v5077_v54 = vadd.f32 %v9999_v39, %v8232_v18  ;;  %v3725_v38 = vpop.f32.mrf.mxu0  ;;  %v5071_v53 = vpop.f32.mrf.mxu1 }
 0x210   : > { %5979 = vst.msk [vmem:[%s9924_s8 + $0xc0] sm:$0xff] %vm5954_vm2, %v5850_v9  ;;  %v5853_v48 = vmax.f32 %v9092_v7, %v5725_v50  ;;  %v4253_v60 = vmax.f32 %v3731_v49, 0.0  ;;  %v3726_v56 = vadd.f32 %v9999_v39, %v3725_v38  ;;  %v5072_v42 = vadd.f32 %v9999_v39, %v5071_v53 }
 0x211   : > { %v5724_v45 = vmax.f32 %v4250_v34, %v5596_v22  ;;  %v5599_v28 = vmax.f32 %v5077_v54, 0.0  ;;  %v8035_v32 = vpop.f32.mrf.mxu0  ;;  %8178 = vmatmul.mubr.msk.f32.gmra.mxu0 %vm310_vm1, %v6661_v33  ;;  %v8235_v61 = vpop.f32.mrf.mxu1  ;;  %8378 = vmatmul.mubr.msk.f32.gmra.mxu1 %vm310_vm1, %v6918_v14 }
 0x212   : > { %5982 = vst.msk [vmem:[%s9924_s8 + $0xd8] sm:$0xff] %vm5954_vm2, %v5853_v48  ;;  %v4252_v21 = vmax.f32 %v3726_v56, 0.0  ;;  %v5598_v16 = vmax.f32 %v5072_v42, 0.0  ;;  %v3741_v7 = vadd.f32 %v9999_v39, %v8035_v32  ;;  %v5087_v58 = vadd.f32 %v9999_v39, %v8235_v61 }
 0x213   : > { %v5852_v23 = vmax.f32 %v9096_v17, %v5724_v45  ;;  %v5727_v63 = vmax.f32 %v4253_v60, %v5599_v28  ;;  %v3735_v51 = vpop.f32.mrf.mxu0  ;;  %v5081_v12 = vpop.f32.mrf.mxu1 }
 0x214   : > { %v5726_v57 = vmax.f32 %v4252_v21, %v5598_v16  ;;  %v4255_v5 = vmax.f32 %v3741_v7, 0.0  ;;  %v5601_v43 = vmax.f32 %v5087_v58, 0.0  ;;  %v3736_v37 = vadd.f32 %v9999_v39, %v3735_v51 }
 0x215   : > { %5981 = vst.msk [vmem:[%s9924_s8 + $0xd0] sm:$0xff] %vm5954_vm2, %v5852_v23  ;;  %v5855_v20 = vmax.f32 %v9102_v26, %v5727_v63  ;;  %v5082_v30 = vadd.f32 %v9999_v39, %v5081_v12  ;;  %v8038_v13 = vpop.f32.mrf.mxu0  ;;  %v8238_v0 = vpop.f32.mrf.mxu1 }
 0x216   : > { %v5854_v17 = vmax.f32 %v9114_v55, %v5726_v57  ;;  %v5729_v15 = vmax.f32 %v4255_v5, %v5601_v43  ;;  %v4254_v25 = vmax.f32 %v3736_v37, 0.0  ;;  %v3751_v27 = vadd.f32 %v9999_v39, %v8038_v13 }
 0x217   : > { %5984 = vst.msk [vmem:[%s9924_s8 + $0xe8] sm:$0xff] %vm5954_vm2, %v5855_v20  ;;  %v5600_v31 = vmax.f32 %v5082_v30, 0.0  ;;  %v5097_v24 = vadd.f32 %v9999_v39, %v8238_v0  ;;  %v3745_v44 = vpop.f32.mrf.mxu0  ;;  %v5091_v10 = vpop.f32.mrf.mxu1 }
 0x218   : > { %5983 = vst.msk [vmem:[%s9924_s8 + $0xe0] sm:$0xff] %vm5954_vm2, %v5854_v17  ;;  %v5857_v26 = vmax.f32 %v9118_v62, %v5729_v15  ;;  %v4257_v8 = vmax.f32 %v3751_v27, 0.0  ;;  %v3746_v11 = vadd.f32 %v9999_v39, %v3745_v44  ;;  %v5092_v55 = vadd.f32 %v9999_v39, %v5091_v10 }
 0x219   : > { %v5728_v59 = vmax.f32 %v4254_v25, %v5600_v31  ;;  %v5603_v6 = vmax.f32 %v5097_v24, 0.0  ;;  %v8041_v29 = vpop.f32.mrf.mxu0  ;;  %v8241_v18 = vpop.f32.mrf.mxu1 }
 0x21a   : > { %5986 = vst.msk [vmem:[%s9924_s8 + $0xf8] sm:$0xff] %vm5954_vm2, %v5857_v26  ;;  %v4256_v9 = vmax.f32 %v3746_v11, 0.0  ;;  %v5602_v50 = vmax.f32 %v5092_v55, 0.0  ;;  %v3761_v34 = vadd.f32 %v9999_v39, %v8041_v29  ;;  %v5107_v49 = vadd.f32 %v9999_v39, %v8241_v18 }
 0x21b   : > { %v5856_v62 = vmax.f32 %v9128_v19, %v5728_v59  ;;  %v5731_v33 = vmax.f32 %v4257_v8, %v5603_v6  ;;  %v3755_v14 = vpop.f32.mrf.mxu0  ;;  %v5101_v22 = vpop.f32.mrf.mxu1 }
 0x21c   : > { %v5730_v54 = vmax.f32 %v4256_v9, %v5602_v50  ;;  %v4259_v38 = vmax.f32 %v3761_v34, 0.0  ;;  %v5605_v53 = vmax.f32 %v5107_v49, 0.0  ;;  %v3756_v48 = vadd.f32 %v9999_v39, %v3755_v14 }
 0x21d   : > { %5985 = vst.msk [vmem:[%s9924_s8 + $0xf0] sm:$0xff] %vm5954_vm2, %v5856_v62  ;;  %v5859_v60 = vmax.f32 %v9140_v41, %v5731_v33  ;;  %v5102_v56 = vadd.f32 %v9999_v39, %v5101_v22  ;;  %v8044_v42 = vpop.f32.mrf.mxu0  ;;  %v8244_v45 = vpop.f32.mrf.mxu1 }
 0x21e   : > { %v5858_v19 = vmax.f32 %v9144_v52, %v5730_v54  ;;  %v5733_v28 = vmax.f32 %v4259_v38, %v5605_v53  ;;  %v4258_v32 = vmax.f32 %v3756_v48, 0.0  ;;  %v3771_v61 = vadd.f32 %v9999_v39, %v8044_v42 }
 0x21f   : > { %5988 = vst.msk [vmem:[%s9924_s8 + $0x108] sm:$0xff] %vm5954_vm2, %v5859_v60  ;;  %v5604_v21 = vmax.f32 %v5102_v56, 0.0  ;;  %v5117_v16 = vadd.f32 %v9999_v39, %v8244_v45  ;;  %v3765_v7 = vpop.f32.mrf.mxu0  ;;  %v5111_v58 = vpop.f32.mrf.mxu1 }
 0x220   : > { %5987 = vst.msk [vmem:[%s9924_s8 + $0x100] sm:$0xff] %vm5954_vm2, %v5858_v19  ;;  %v5861_v41 = vmax.f32 %v9150_v3, %v5733_v28  ;;  %v4261_v23 = vmax.f32 %v3771_v61, 0.0  ;;  %v3766_v63 = vadd.f32 %v9999_v39, %v3765_v7  ;;  %v5112_v52 = vadd.f32 %v9999_v39, %v5111_v58 }
 0x221   : > { %v5732_v51 = vmax.f32 %v4258_v32, %v5604_v21  ;;  %v5607_v12 = vmax.f32 %v5117_v16, 0.0  ;;  %v8047_v57 = vpop.f32.mrf.mxu0  ;;  %v8247_v5 = vpop.f32.mrf.mxu1 }
 0x222   : > { %5990 = vst.msk [vmem:[%s9924_s8 + $0x118] sm:$0xff] %vm5954_vm2, %v5861_v41  ;;  %v4260_v43 = vmax.f32 %v3766_v63, 0.0  ;;  %v5606_v37 = vmax.f32 %v5112_v52, 0.0  ;;  %v3781_v20 = vadd.f32 %v9999_v39, %v8047_v57  ;;  %v5127_v30 = vadd.f32 %v9999_v39, %v8247_v5 }
 0x223   : > { %v5860_v3 = vmax.f32 %v9162_v36, %v5732_v51  ;;  %v5735_v13 = vmax.f32 %v4261_v23, %v5607_v12  ;;  %v3775_v0 = vpop.f32.mrf.mxu0  ;;  %v5121_v17 = vpop.f32.mrf.mxu1 }
 0x224   : > { %v5734_v15 = vmax.f32 %v4260_v43, %v5606_v37  ;;  %v4263_v25 = vmax.f32 %v3781_v20, 0.0  ;;  %v5609_v27 = vmax.f32 %v5127_v30, 0.0  ;;  %v3776_v31 = vadd.f32 %v9999_v39, %v3775_v0 }
 0x225   : > { %5989 = vst.msk [vmem:[%s9924_s8 + $0x110] sm:$0xff] %vm5954_vm2, %v5860_v3  ;;  %v5863_v24 = vmax.f32 %v9166_v40, %v5735_v13  ;;  %v5122_v44 = vadd.f32 %v9999_v39, %v5121_v17  ;;  %v8050_v10 = vpop.f32.mrf.mxu0  ;;  %v8250_v26 = vpop.f32.mrf.mxu1  ;;  %v10772_v17 = vld [vmem:[#allocation3_spill] sm:$0xff] }
 0x226   : > { %v5862_v36 = vmax.f32 %v9176_v4, %v5734_v15  ;;  %v5737_v8 = vmax.f32 %v4263_v25, %v5609_v27  ;;  %v4262_v11 = vmax.f32 %v3776_v31, 0.0  ;;  %v3791_v55 = vadd.f32 %v9999_v39, %v8050_v10 }
 0x227   : > { %5992 = vst.msk [vmem:[%s9924_s8 + $0x128] sm:$0xff] %vm5954_vm2, %v5863_v24  ;;  %v5608_v59 = vmax.f32 %v5122_v44, 0.0  ;;  %v5137_v6 = vadd.f32 %v9999_v39, %v8250_v26  ;;  %v3785_v29 = vpop.f32.mrf.mxu0  ;;  %v5131_v18 = vpop.f32.mrf.mxu1 }
 0x228   : > { %5991 = vst.msk [vmem:[%s9924_s8 + $0x120] sm:$0xff] %vm5954_vm2, %v5862_v36  ;;  %v5865_v40 = vmax.f32 %v9188_v35, %v5737_v8  ;;  %v4265_v9 = vmax.f32 %v3791_v55, 0.0  ;;  %v3786_v50 = vadd.f32 %v9999_v39, %v3785_v29  ;;  %v5132_v4 = vadd.f32 %v9999_v39, %v5131_v18  ;;  %v10773_v36 = vld [vmem:[#allocation4_spill] sm:$0xff] }
 0x229   : > { %v5736_v34 = vmax.f32 %v4262_v11, %v5608_v59  ;;  %v5611_v49 = vmax.f32 %v5137_v6, 0.0  ;;  %v8053_v62 = vpop.f32.mrf.mxu0  ;;  %v8253_v33 = vpop.f32.mrf.mxu1  ;;  %v10774_v6 = vld [vmem:[#allocation5_spill] sm:$0xff] }
 0x22a   : > { %5994 = vst.msk [vmem:[%s9924_s8 + $0x138] sm:$0xff] %vm5954_vm2, %v5865_v40  ;;  %v4264_v14 = vmax.f32 %v3786_v50, 0.0  ;;  %v5610_v22 = vmax.f32 %v5132_v4, 0.0  ;;  %v3801_v54 = vadd.f32 %v9999_v39, %v8053_v62  ;;  %v5147_v38 = vadd.f32 %v9999_v39, %v8253_v33  ;;  %v10775_v62 = vld [vmem:[#allocation6_spill] sm:$0xff] }
 0x22b   : > { %v5864_v35 = vmax.f32 %v9192_v46, %v5736_v34  ;;  %v5739_v53 = vmax.f32 %v4265_v9, %v5611_v49  ;;  %v3795_v48 = vpop.f32.mrf.mxu0  ;;  %v5141_v60 = vpop.f32.mrf.mxu1 }
 0x22c   : > { %v5738_v56 = vmax.f32 %v4264_v14, %v5610_v22  ;;  %v4267_v42 = vmax.f32 %v3801_v54, 0.0  ;;  %v5613_v45 = vmax.f32 %v5147_v38, 0.0  ;;  %v3796_v19 = vadd.f32 %v9999_v39, %v3795_v48 }
 0x22d   : > { %5993 = vst.msk [vmem:[%s9924_s8 + $0x130] sm:$0xff] %vm5954_vm2, %v5864_v35  ;;  %v5867_v28 = vmax.f32 %v9198_v2, %v5739_v53  ;;  %v5142_v32 = vadd.f32 %v9999_v39, %v5141_v60  ;;  %v8056_v61 = vpop.f32.mrf.mxu0  ;;  %v8256_v21 = vpop.f32.mrf.mxu1  ;;  %v10771_v2 = vld [vmem:[#allocation2_spill] sm:$0xff] }
 0x22e   : > { %v5866_v46 = vmax.f32 %v9210_v47, %v5738_v56  ;;  %v5741_v16 = vmax.f32 %v4267_v42, %v5613_v45  ;;  %v4266_v7 = vmax.f32 %v3796_v19, 0.0  ;;  %v3811_v58 = vadd.f32 %v9999_v39, %v8056_v61  ;;  %v10776_v19 = vld [vmem:[#allocation7_spill] sm:$0xff] }
 0x22f   : > { %5996 = vst.msk [vmem:[%s9924_s8 + $0x148] sm:$0xff] %vm5954_vm2, %v5867_v28  ;;  %v5612_v41 = vmax.f32 %v5142_v32, 0.0  ;;  %v5157_v23 = vadd.f32 %v9999_v39, %v8256_v21  ;;  %v3805_v63 = vpop.f32.mrf.mxu0  ;;  %v5151_v52 = vpop.f32.mrf.mxu1 }
 0x230   : > { %5995 = vst.msk [vmem:[%s9924_s8 + $0x140] sm:$0xff] %vm5954_vm2, %v5866_v46  ;;  %v5869_v51 = vmax.f32 %v10771_v2, %v5741_v16  ;;  %v4269_v12 = vmax.f32 %v3811_v58, 0.0  ;;  %v3806_v57 = vadd.f32 %v9999_v39, %v3805_v63  ;;  %v5152_v47 = vadd.f32 %v9999_v39, %v5151_v52 }
 0x231   : > { %v5740_v5 = vmax.f32 %v4266_v7, %v5612_v41  ;;  %v5615_v43 = vmax.f32 %v5157_v23, 0.0  ;;  %v8059_v37 = vpop.f32.mrf.mxu0  ;;  %v8259_v20 = vpop.f32.mrf.mxu1  ;;  %v10777_v41 = vld [vmem:[#allocation8_spill] sm:$0xff] }
 0x232   : > { %5998 = vst.msk [vmem:[%s9924_s8 + $0x158] sm:$0xff] %vm5954_vm2, %v5869_v51  ;;  %v4268_v30 = vmax.f32 %v3806_v57, 0.0  ;;  %v5614_v3 = vmax.f32 %v5152_v47, 0.0  ;;  %v3821_v13 = vadd.f32 %v9999_v39, %v8059_v37  ;;  %v5167_v0 = vadd.f32 %v9999_v39, %v8259_v20  ;;  %v10778_v51 = vld [vmem:[#allocation9_spill] sm:$0xff] }
 0x233   : > { %v5868_v15 = vmax.f32 %v10772_v17, %v5740_v5  ;;  %v5743_v25 = vmax.f32 %v4269_v12, %v5615_v43  ;;  %v3815_v27 = vpop.f32.mrf.mxu0  ;;  %v5161_v31 = vpop.f32.mrf.mxu1 }
 0x234   : > { %v5742_v24 = vmax.f32 %v4268_v30, %v5614_v3  ;;  %v4271_v44 = vmax.f32 %v3821_v13, 0.0  ;;  %v5617_v10 = vmax.f32 %v5167_v0, 0.0  ;;  %v3816_v26 = vadd.f32 %v9999_v39, %v3815_v27  ;;  %v10779_v3 = vld [vmem:[#allocation10_spill] sm:$0xff] }
 0x235   : > { %5997 = vst.msk [vmem:[%s9924_s8 + $0x150] sm:$0xff] %vm5954_vm2, %v5868_v15  ;;  %v5871_v8 = vmax.f32 %v10773_v36, %v5743_v25  ;;  %v5162_v11 = vadd.f32 %v9999_v39, %v5161_v31  ;;  %v8062_v55 = vpop.f32.mrf.mxu0  ;;  %v8262_v59 = vpop.f32.mrf.mxu1 }
 0x236   : > { %v5870_v29 = vmax.f32 %v10774_v6, %v5742_v24  ;;  %v5745_v18 = vmax.f32 %v4271_v44, %v5617_v10  ;;  %v4270_v40 = vmax.f32 %v3816_v26, 0.0  ;;  %v3831_v9 = vadd.f32 %v9999_v39, %v8062_v55 }
 0x237   : > { %6000 = vst.msk [vmem:[%s9924_s8 + $0x168] sm:$0xff] %vm5954_vm2, %v5871_v8  ;;  %v5616_v50 = vmax.f32 %v5162_v11, 0.0  ;;  %v5177_v4 = vadd.f32 %v9999_v39, %v8262_v59  ;;  %v3825_v34 = vpop.f32.mrf.mxu0  ;;  %v5171_v49 = vpop.f32.mrf.mxu1  ;;  %v10780_v8 = vld [vmem:[#allocation11_spill] sm:$0xff] }
 0x238   : > { %5999 = vst.msk [vmem:[%s9924_s8 + $0x160] sm:$0xff] %vm5954_vm2, %v5870_v29  ;;  %v5873_v33 = vmax.f32 %v10775_v62, %v5745_v18  ;;  %v4273_v14 = vmax.f32 %v3831_v9, 0.0  ;;  %v3826_v22 = vadd.f32 %v9999_v39, %v3825_v34  ;;  %v5172_v54 = vadd.f32 %v9999_v39, %v5171_v49 }
 0x239   : > { %v5744_v38 = vmax.f32 %v4270_v40, %v5616_v50  ;;  %v5619_v35 = vmax.f32 %v5177_v4, 0.0  ;;  %v8065_v53 = vpop.f32.mrf.mxu0  ;;  %v8265_v48 = vpop.f32.mrf.mxu1  ;;  %v10781_v50 = vld [vmem:[#allocation12_spill] sm:$0xff] }
 0x23a   : > { %6002 = vst.msk [vmem:[%s9924_s8 + $0x178] sm:$0xff] %vm5954_vm2, %v5873_v33  ;;  %v4272_v60 = vmax.f32 %v3826_v22, 0.0  ;;  %v5618_v56 = vmax.f32 %v5172_v54, 0.0  ;;  %v3841_v42 = vadd.f32 %v9999_v39, %v8065_v53  ;;  %v5187_v45 = vadd.f32 %v9999_v39, %v8265_v48  ;;  %v10782_v33 = vld [vmem:[#allocation13_spill] sm:$0xff] }
 0x23b   : > { %v5872_v28 = vmax.f32 %v10776_v19, %v5744_v38  ;;  %v5747_v32 = vmax.f32 %v4273_v14, %v5619_v35  ;;  %v3835_v61 = vpop.f32.mrf.mxu0  ;;  %v5181_v21 = vpop.f32.mrf.mxu1 }
 0x23c   : > { %v5746_v46 = vmax.f32 %v4272_v60, %v5618_v56  ;;  %v4275_v16 = vmax.f32 %v3841_v42, 0.0  ;;  %v5621_v7 = vmax.f32 %v5187_v45, 0.0  ;;  %v3836_v58 = vadd.f32 %v9999_v39, %v3835_v61  ;;  %v10783_v56 = vld [vmem:[#allocation14_spill] sm:$0xff] }
 0x23d   : > { %6001 = vst.msk [vmem:[%s9924_s8 + $0x170] sm:$0xff] %vm5954_vm2, %v5872_v28  ;;  %v5875_v23 = vmax.f32 %v10777_v41, %v5747_v32  ;;  %v5182_v63 = vadd.f32 %v9999_v39, %v5181_v21  ;;  %v8068_v52 = vpop.f32.mrf.mxu0  ;;  %v8268_v2 = vpop.f32.mrf.mxu1 }
 0x23e   : > { %v5874_v12 = vmax.f32 %v10778_v51, %v5746_v46  ;;  %v5749_v57 = vmax.f32 %v4275_v16, %v5621_v7  ;;  %v4274_v47 = vmax.f32 %v3836_v58, 0.0  ;;  %v3851_v5 = vadd.f32 %v9999_v39, %v8068_v52 }
 0x23f   : > { %6004 = vst.msk [vmem:[%s9924_s8 + $0x188] sm:$0xff] %vm5954_vm2, %v5875_v23  ;;  %v5620_v43 = vmax.f32 %v5182_v63, 0.0  ;;  %v5197_v37 = vadd.f32 %v9999_v39, %v8268_v2  ;;  %v3845_v20 = vpop.f32.mrf.mxu0  ;;  %v5191_v30 = vpop.f32.mrf.mxu1  ;;  %v10784_v23 = vld [vmem:[#allocation15_spill] sm:$0xff] }
 0x240   : > { %6003 = vst.msk [vmem:[%s9924_s8 + $0x180] sm:$0xff] %vm5954_vm2, %v5874_v12  ;;  %v5877_v13 = vmax.f32 %v10779_v3, %v5749_v57  ;;  %v4277_v0 = vmax.f32 %v3851_v5, 0.0  ;;  %v3846_v17 = vadd.f32 %v9999_v39, %v3845_v20  ;;  %v5192_v15 = vadd.f32 %v9999_v39, %v5191_v30 }
 0x241   : > { %v5748_v25 = vmax.f32 %v4274_v47, %v5620_v43  ;;  %v5623_v27 = vmax.f32 %v5197_v37, 0.0  ;;  %v8071_v31 = vpop.f32.mrf.mxu0  ;;  %v8271_v24 = vpop.f32.mrf.mxu1  ;;  %v10785_v43 = vld [vmem:[#allocation16_spill] sm:$0xff] }
 0x242   : > { %6006 = vst.msk [vmem:[%s9924_s8 + $0x198] sm:$0xff] %vm5954_vm2, %v5877_v13  ;;  %v4276_v44 = vmax.f32 %v3846_v17, 0.0  ;;  %v5622_v10 = vmax.f32 %v5192_v15, 0.0  ;;  %v3861_v26 = vadd.f32 %v9999_v39, %v8071_v31  ;;  %v5207_v36 = vadd.f32 %v9999_v39, %v8271_v24  ;;  %v10786_v13 = vld [vmem:[#allocation17_spill] sm:$0xff] }
 0x243   : > { %v5876_v11 = vmax.f32 %v10780_v8, %v5748_v25  ;;  %v5751_v55 = vmax.f32 %v4277_v0, %v5623_v27  ;;  %v3855_v59 = vpop.f32.mrf.mxu0  ;;  %v5201_v6 = vpop.f32.mrf.mxu1  ;;  %v10322_v25 = vld [vmem:[%s10684_s2] ss:$0 sm:$0xff] }
 0x244   : > { %v5750_v29 = vmax.f32 %v4276_v44, %v5622_v10  ;;  %v4279_v18 = vmax.f32 %v3861_v26, 0.0  ;;  %v5625_v40 = vmax.f32 %v5207_v36, 0.0  ;;  %v3856_v9 = vadd.f32 %v9999_v39, %v3855_v59  ;;  %v10787_v10 = vld [vmem:[#allocation18_spill] sm:$0xff] }
 0x245   : > { %6005 = vst.msk [vmem:[%s9924_s8 + $0x190] sm:$0xff] %vm5954_vm2, %v5876_v11  ;;  %v5879_v4 = vmax.f32 %v10781_v50, %v5751_v55  ;;  %v5202_v34 = vadd.f32 %v9999_v39, %v5201_v6  ;;  %v8074_v49 = vpop.f32.mrf.mxu0  ;;  %v8274_v62 = vpop.f32.mrf.mxu1 }
 0x246   : > { %v5878_v14 = vmax.f32 %v10782_v33, %v5750_v29  ;;  %v5753_v22 = vmax.f32 %v4279_v18, %v5625_v40  ;;  %v4278_v54 = vmax.f32 %v3856_v9, 0.0  ;;  %v3871_v38 = vadd.f32 %v9999_v39, %v8074_v49 }
 0x247   : > { %6008 = vst.msk [vmem:[%s9924_s8 + $0x1a8] sm:$0xff] %vm5954_vm2, %v5879_v4  ;;  %v5624_v35 = vmax.f32 %v5202_v34, 0.0  ;;  %v5217_v53 = vadd.f32 %v9999_v39, %v8274_v62  ;;  %v3865_v48 = vpop.f32.mrf.mxu0  ;;  %v5211_v60 = vpop.f32.mrf.mxu1  ;;  %v10788_v4 = vld [vmem:[#allocation19_spill] sm:$0xff] }
 0x248   : > { %6007 = vst.msk [vmem:[%s9924_s8 + $0x1a0] sm:$0xff] %vm5954_vm2, %v5878_v14  ;;  %v5881_v42 = vmax.f32 %v10783_v56, %v5753_v22  ;;  %v4281_v45 = vmax.f32 %v3871_v38, 0.0  ;;  %v3866_v19 = vadd.f32 %v9999_v39, %v3865_v48  ;;  %v5212_v28 = vadd.f32 %v9999_v39, %v5211_v60 }
 0x249   : > { %v5752_v32 = vmax.f32 %v4278_v54, %v5624_v35  ;;  %v5627_v61 = vmax.f32 %v5217_v53, 0.0  ;;  %v8077_v21 = vpop.f32.mrf.mxu0  ;;  %v8277_v46 = vpop.f32.mrf.mxu1  ;;  %v10789_v35 = vld [vmem:[#allocation20_spill] sm:$0xff] }
 0x24a   : > { %6010 = vst.msk [vmem:[%s9924_s8 + $0x1b8] sm:$0xff] %vm5954_vm2, %v5881_v42  ;;  %v4280_v16 = vmax.f32 %v3866_v19, 0.0  ;;  %v5626_v7 = vmax.f32 %v5212_v28, 0.0  ;;  %v3881_v58 = vadd.f32 %v9999_v39, %v8077_v21  ;;  %v5227_v41 = vadd.f32 %v9999_v39, %v8277_v46  ;;  %v10790_v42 = vld [vmem:[#allocation21_spill] sm:$0xff] }
 0x24b   : > { %v5880_v63 = vmax.f32 %v10784_v23, %v5752_v32  ;;  %v5755_v52 = vmax.f32 %v4281_v45, %v5627_v61  ;;  %v3875_v2 = vpop.f32.mrf.mxu0  ;;  %v5221_v51 = vpop.f32.mrf.mxu1 }
 0x24c   : > { %v5754_v12 = vmax.f32 %v4280_v16, %v5626_v7  ;;  %v4283_v57 = vmax.f32 %v3881_v58, 0.0  ;;  %v5629_v47 = vmax.f32 %v5227_v41, 0.0  ;;  %v3876_v5 = vadd.f32 %v9999_v39, %v3875_v2  ;;  %v10791_v7 = vld [vmem:[#allocation22_spill] sm:$0xff] }
 0x24d   : > { %6009 = vst.msk [vmem:[%s9924_s8 + $0x1b0] sm:$0xff] %vm5954_vm2, %v5880_v63  ;;  %v5883_v37 = vmax.f32 %v10785_v43, %v5755_v52  ;;  %v5222_v20 = vadd.f32 %v9999_v39, %v5221_v51  ;;  %v8080_v30 = vpop.f32.mrf.mxu0  ;;  %v8280_v3 = vpop.f32.mrf.mxu1 }
 0x24e   : > { %v5882_v0 = vmax.f32 %v10786_v13, %v5754_v12  ;;  %v5757_v17 = vmax.f32 %v4283_v57, %v5629_v47  ;;  %v4282_v15 = vmax.f32 %v3876_v5, 0.0  ;;  %v3891_v27 = vadd.f32 %v10322_v25, %v8080_v30 }
 0x24f   : > { %6012 = vst.msk [vmem:[%s9924_s8 + $0x1c8] sm:$0xff] %vm5954_vm2, %v5883_v37  ;;  %v5628_v31 = vmax.f32 %v5222_v20, 0.0  ;;  %v5237_v24 = vadd.f32 %v10322_v25, %v8280_v3  ;;  %v3885_v39 = vpop.f32.mrf.mxu0  ;;  %v5231_v44 = vpop.f32.mrf.mxu1  ;;  %v10792_v37 = vld [vmem:[#allocation23_spill] sm:$0xff] }
 0x250   : > { %6011 = vst.msk [vmem:[%s9924_s8 + $0x1c0] sm:$0xff] %vm5954_vm2, %v5882_v0  ;;  %v5885_v26 = vmax.f32 %v10787_v10, %v5757_v17  ;;  %v4285_v36 = vmax.f32 %v3891_v27, 0.0  ;;  %v3886_v8 = vadd.f32 %v10322_v25, %v3885_v39  ;;  %v5232_v11 = vadd.f32 %v10322_v25, %v5231_v44 }
 0x251   : > { %v5756_v55 = vmax.f32 %v4282_v15, %v5628_v31  ;;  %v5631_v59 = vmax.f32 %v5237_v24, 0.0  ;;  %v8083_v6 = vpop.f32.mrf.mxu0  ;;  %v8283_v29 = vpop.f32.mrf.mxu1  ;;  %v10793_v31 = vld [vmem:[#allocation24_spill] sm:$0xff] }
 0x252   : > { %6014 = vst.msk [vmem:[%s9924_s8 + $0x1d8] sm:$0xff] %vm5954_vm2, %v5885_v26  ;;  %v4284_v18 = vmax.f32 %v3886_v8, 0.0  ;;  %v5630_v40 = vmax.f32 %v5232_v11, 0.0  ;;  %v3901_v9 = vadd.f32 %v10322_v25, %v8083_v6  ;;  %v5247_v50 = vadd.f32 %v10322_v25, %v8283_v29  ;;  %v10794_v26 = vld [vmem:[#allocation25_spill] sm:$0xff] }
 0x253   : > { %v5884_v34 = vmax.f32 %v10788_v4, %v5756_v55  ;;  %v5759_v49 = vmax.f32 %v4285_v36, %v5631_v59  ;;  %v3895_v62 = vpop.f32.mrf.mxu0  ;;  %v5241_v33 = vpop.f32.mrf.mxu1 }
 0x254   : > { %v5758_v14 = vmax.f32 %v4284_v18, %v5630_v40  ;;  %v4287_v22 = vmax.f32 %v3901_v9, 0.0  ;;  %v5633_v54 = vmax.f32 %v5247_v50, 0.0  ;;  %v3896_v38 = vadd.f32 %v10322_v25, %v3895_v62  ;;  %v10795_v40 = vld [vmem:[#allocation26_spill] sm:$0xff] }
 0x255   : > { %6013 = vst.msk [vmem:[%s9924_s8 + $0x1d0] sm:$0xff] %vm5954_vm2, %v5884_v34  ;;  %v5887_v53 = vmax.f32 %v10789_v35, %v5759_v49  ;;  %v5242_v48 = vadd.f32 %v10322_v25, %v5241_v33  ;;  %v8086_v60 = vpop.f32.mrf.mxu0  ;;  %v8286_v56 = vpop.f32.mrf.mxu1 }
 0x256   : > { %v5886_v45 = vmax.f32 %v10790_v42, %v5758_v14  ;;  %v5761_v19 = vmax.f32 %v4287_v22, %v5633_v54  ;;  %v4286_v28 = vmax.f32 %v3896_v38, 0.0  ;;  %v3911_v32 = vadd.f32 %v10322_v25, %v8086_v60 }
 0x257   : > { %6016 = vst.msk [vmem:[%s9924_s8 + $0x1e8] sm:$0xff] %vm5954_vm2, %v5887_v53  ;;  %v5632_v61 = vmax.f32 %v5242_v48, 0.0  ;;  %v5257_v21 = vadd.f32 %v10322_v25, %v8286_v56  ;;  %v3905_v46 = vpop.f32.mrf.mxu0  ;;  %v5251_v16 = vpop.f32.mrf.mxu1  ;;  %v10796_v53 = vld [vmem:[#allocation27_spill] sm:$0xff] }
 0x258   : > { %6015 = vst.msk [vmem:[%s9924_s8 + $0x1e0] sm:$0xff] %vm5954_vm2, %v5886_v45  ;;  %v5889_v58 = vmax.f32 %v10791_v7, %v5761_v19  ;;  %v4289_v41 = vmax.f32 %v3911_v32, 0.0  ;;  %v3906_v23 = vadd.f32 %v10322_v25, %v3905_v46  ;;  %v5252_v63 = vadd.f32 %v10322_v25, %v5251_v16 }
 0x259   : > { %v5760_v52 = vmax.f32 %v4286_v28, %v5632_v61  ;;  %v5635_v2 = vmax.f32 %v5257_v21, 0.0  ;;  %v8089_v51 = vpop.f32.mrf.mxu0  ;;  %v8289_v12 = vpop.f32.mrf.mxu1  ;;  %v10797_v61 = vld [vmem:[#allocation28_spill] sm:$0xff] }
 0x25a   : > { %6018 = vst.msk [vmem:[%s9924_s8 + $0x1f8] sm:$0xff] %vm5954_vm2, %v5889_v58  ;;  %v4288_v57 = vmax.f32 %v3906_v23, 0.0  ;;  %v5634_v47 = vmax.f32 %v5252_v63, 0.0  ;;  %v3921_v5 = vadd.f32 %v10322_v25, %v8089_v51  ;;  %v5267_v43 = vadd.f32 %v10322_v25, %v8289_v12  ;;  %v10798_v58 = vld [vmem:[#allocation29_spill] sm:$0xff] }
 0x25b   : > { %v5888_v20 = vmax.f32 %v10792_v37, %v5760_v52  ;;  %v5763_v30 = vmax.f32 %v4289_v41, %v5635_v2  ;;  %v3915_v3 = vpop.f32.mrf.mxu0  ;;  %v5261_v13 = vpop.f32.mrf.mxu1 }
 0x25c   : > { %v5762_v0 = vmax.f32 %v4288_v57, %v5634_v47  ;;  %v4291_v17 = vmax.f32 %v3921_v5, 0.0  ;;  %v5637_v15 = vmax.f32 %v5267_v43, 0.0  ;;  %v3916_v27 = vadd.f32 %v10322_v25, %v3915_v3  ;;  %v10799_v47 = vld [vmem:[#allocation30_spill] sm:$0xff] }
 0x25d   : > { %6017 = vst.msk [vmem:[%s9924_s8 + $0x1f0] sm:$0xff] %vm5954_vm2, %v5888_v20  ;;  %v5891_v24 = vmax.f32 %v10793_v31, %v5763_v30  ;;  %v5262_v39 = vadd.f32 %v10322_v25, %v5261_v13  ;;  %v8092_v44 = vpop.f32.mrf.mxu0  ;;  %v8292_v10 = vpop.f32.mrf.mxu1 }
 0x25e   : > { %v5890_v36 = vmax.f32 %v10794_v26, %v5762_v0  ;;  %v5765_v8 = vmax.f32 %v4291_v17, %v5637_v15  ;;  %v4290_v11 = vmax.f32 %v3916_v27, 0.0  ;;  %v3931_v55 = vadd.f32 %v10322_v25, %v8092_v44 }
 0x25f   : > { %6020 = vst.msk [vmem:[%s9924_s8 + $0x208] sm:$0xff] %vm5954_vm2, %v5891_v24  ;;  %v5636_v59 = vmax.f32 %v5262_v39, 0.0  ;;  %v5277_v6 = vadd.f32 %v10322_v25, %v8292_v10  ;;  %v3925_v29 = vpop.f32.mrf.mxu0  ;;  %v5271_v18 = vpop.f32.mrf.mxu1  ;;  %v10800_v24 = vld [vmem:[#allocation31_spill] sm:$0xff] }
 0x260   : > { %6019 = vst.msk [vmem:[%s9924_s8 + $0x200] sm:$0xff] %vm5954_vm2, %v5890_v36  ;;  %v5893_v9 = vmax.f32 %v10795_v40, %v5765_v8  ;;  %v4293_v50 = vmax.f32 %v3931_v55, 0.0  ;;  %v3926_v4 = vadd.f32 %v10322_v25, %v3925_v29  ;;  %v5272_v34 = vadd.f32 %v10322_v25, %v5271_v18 }
 0x261   : > { %v5764_v49 = vmax.f32 %v4290_v11, %v5636_v59  ;;  %v5639_v62 = vmax.f32 %v5277_v6, 0.0  ;;  %v8095_v33 = vpop.f32.mrf.mxu0  ;;  %v8295_v14 = vpop.f32.mrf.mxu1  ;;  %v10801_v59 = vld [vmem:[#allocation32_spill] sm:$0xff] }
 0x262   : > { %6022 = vst.msk [vmem:[%s9924_s8 + $0x218] sm:$0xff] %vm5954_vm2, %v5893_v9  ;;  %v4292_v22 = vmax.f32 %v3926_v4, 0.0  ;;  %v5638_v54 = vmax.f32 %v5272_v34, 0.0  ;;  %v3941_v38 = vadd.f32 %v10322_v25, %v8095_v33  ;;  %v5287_v35 = vadd.f32 %v10322_v25, %v8295_v14  ;;  %v10802_v9 = vld [vmem:[#allocation33_spill] sm:$0xff] }
 0x263   : > { %v5892_v48 = vmax.f32 %v10796_v53, %v5764_v49  ;;  %v5767_v60 = vmax.f32 %v4293_v50, %v5639_v62  ;;  %v3935_v56 = vpop.f32.mrf.mxu0  ;;  %v5281_v42 = vpop.f32.mrf.mxu1 }
 0x264   : > { %v5766_v45 = vmax.f32 %v4292_v22, %v5638_v54  ;;  %v4295_v19 = vmax.f32 %v3941_v38, 0.0  ;;  %v5641_v28 = vmax.f32 %v5287_v35, 0.0  ;;  %v3936_v32 = vadd.f32 %v10322_v25, %v3935_v56  ;;  %v10803_v54 = vld [vmem:[#allocation34_spill] sm:$0xff] }
 0x265   : > { %6021 = vst.msk [vmem:[%s9924_s8 + $0x210] sm:$0xff] %vm5954_vm2, %v5892_v48  ;;  %v5895_v21 = vmax.f32 %v10797_v61, %v5767_v60  ;;  %v5282_v46 = vadd.f32 %v10322_v25, %v5281_v42  ;;  %v8098_v16 = vpop.f32.mrf.mxu0  ;;  %v8298_v7 = vpop.f32.mrf.mxu1 }
 0x266   : > { %v5894_v41 = vmax.f32 %v10798_v58, %v5766_v45  ;;  %v5769_v23 = vmax.f32 %v4295_v19, %v5641_v28  ;;  %v4294_v63 = vmax.f32 %v3936_v32, 0.0  ;;  %v3951_v52 = vadd.f32 %v10322_v25, %v8098_v16 }
 0x267   : > { %6024 = vst.msk [vmem:[%s9924_s8 + $0x228] sm:$0xff] %vm5954_vm2, %v5895_v21  ;;  %v5640_v2 = vmax.f32 %v5282_v46, 0.0  ;;  %v5297_v51 = vadd.f32 %v10322_v25, %v8298_v7  ;;  %v3945_v12 = vpop.f32.mrf.mxu0  ;;  %v5291_v57 = vpop.f32.mrf.mxu1  ;;  %v10804_v21 = vld [vmem:[#allocation35_spill] sm:$0xff] }
 0x268   : > { %6023 = vst.msk [vmem:[%s9924_s8 + $0x220] sm:$0xff] %vm5954_vm2, %v5894_v41  ;;  %v5897_v5 = vmax.f32 %v10799_v47, %v5769_v23  ;;  %v4297_v43 = vmax.f32 %v3951_v52, 0.0  ;;  %v3946_v37 = vadd.f32 %v10322_v25, %v3945_v12  ;;  %v5292_v20 = vadd.f32 %v10322_v25, %v5291_v57 }
 0x269   : > { %v5768_v30 = vmax.f32 %v4294_v63, %v5640_v2  ;;  %v5643_v3 = vmax.f32 %v5297_v51, 0.0  ;;  %v8101_v13 = vpop.f32.mrf.mxu0  ;;  %v8301_v0 = vpop.f32.mrf.mxu1  ;;  %v10805_v2 = vld [vmem:[#allocation36_spill] sm:$0xff] }
 0x26a   : > { %6026 = vst.msk [vmem:[%s9924_s8 + $0x238] sm:$0xff] %vm5954_vm2, %v5897_v5  ;;  %v4296_v17 = vmax.f32 %v3946_v37, 0.0  ;;  %v5642_v15 = vmax.f32 %v5292_v20, 0.0  ;;  %v3961_v27 = vadd.f32 %v10322_v25, %v8101_v13  ;;  %v5307_v31 = vadd.f32 %v10322_v25, %v8301_v0  ;;  %v10806_v5 = vld [vmem:[#allocation37_spill] sm:$0xff] }
 0x26b   : > { %v5896_v39 = vmax.f32 %v10800_v24, %v5768_v30  ;;  %v5771_v44 = vmax.f32 %v4297_v43, %v5643_v3  ;;  %v3955_v10 = vpop.f32.mrf.mxu0  ;;  %v5301_v26 = vpop.f32.mrf.mxu1 }
 0x26c   : > { %v5770_v36 = vmax.f32 %v4296_v17, %v5642_v15  ;;  %v4299_v8 = vmax.f32 %v3961_v27, 0.0  ;;  %v5645_v11 = vmax.f32 %v5307_v31, 0.0  ;;  %v3956_v55 = vadd.f32 %v10322_v25, %v3955_v10  ;;  %v10807_v15 = vld [vmem:[#allocation38_spill] sm:$0xff] }
 0x26d   : > { %6025 = vst.msk [vmem:[%s9924_s8 + $0x230] sm:$0xff] %vm5954_vm2, %v5896_v39  ;;  %v5899_v6 = vmax.f32 %v10801_v59, %v5771_v44  ;;  %v5302_v29 = vadd.f32 %v10322_v25, %v5301_v26  ;;  %v8104_v18 = vpop.f32.mrf.mxu0  ;;  %v8304_v40 = vpop.f32.mrf.mxu1 }
 0x26e   : > { %v5898_v50 = vmax.f32 %v10802_v9, %v5770_v36  ;;  %v5773_v4 = vmax.f32 %v4299_v8, %v5645_v11  ;;  %v4298_v34 = vmax.f32 %v3956_v55, 0.0  ;;  %v3971_v49 = vadd.f32 %v10322_v25, %v8104_v18 }
 0x26f   : > { %6028 = vst.msk [vmem:[%s9924_s8 + $0x248] sm:$0xff] %vm5954_vm2, %v5899_v6  ;;  %v5644_v62 = vmax.f32 %v5302_v29, 0.0  ;;  %v5317_v33 = vadd.f32 %v10322_v25, %v8304_v40  ;;  %v3965_v14 = vpop.f32.mrf.mxu0  ;;  %v5311_v22 = vpop.f32.mrf.mxu1  ;;  %v10808_v6 = vld [vmem:[#allocation39_spill] sm:$0xff] }
 0x270   : > { %6027 = vst.msk [vmem:[%s9924_s8 + $0x240] sm:$0xff] %vm5954_vm2, %v5898_v50  ;;  %v5901_v38 = vmax.f32 %v10803_v54, %v5773_v4  ;;  %v4301_v35 = vmax.f32 %v3971_v49, 0.0  ;;  %v3966_v53 = vadd.f32 %v10322_v25, %v3965_v14  ;;  %v5312_v48 = vadd.f32 %v10322_v25, %v5311_v22 }
 0x271   : > { %v5772_v60 = vmax.f32 %v4298_v34, %v5644_v62  ;;  %v5647_v56 = vmax.f32 %v5317_v33, 0.0  ;;  %v8107_v42 = vpop.f32.mrf.mxu0  ;;  %v8307_v45 = vpop.f32.mrf.mxu1  ;;  %v10809_v62 = vld [vmem:[#allocation40_spill] sm:$0xff] }
 0x272   : > { %6030 = vst.msk [vmem:[%s9924_s8 + $0x258] sm:$0xff] %vm5954_vm2, %v5901_v38  ;;  %v4300_v19 = vmax.f32 %v3966_v53, 0.0  ;;  %v5646_v28 = vmax.f32 %v5312_v48, 0.0  ;;  %v3981_v32 = vadd.f32 %v10322_v25, %v8107_v42  ;;  %v5327_v61 = vadd.f32 %v10322_v25, %v8307_v45  ;;  %v10810_v38 = vld [vmem:[#allocation41_spill] sm:$0xff] }
 0x273   : > { %v5900_v46 = vmax.f32 %v10804_v21, %v5772_v60  ;;  %v5775_v16 = vmax.f32 %v4301_v35, %v5647_v56  ;;  %v3975_v7 = vpop.f32.mrf.mxu0  ;;  %v5321_v58 = vpop.f32.mrf.mxu1 }
 0x274   : > { %v5774_v41 = vmax.f32 %v4300_v19, %v5646_v28  ;;  %v4303_v23 = vmax.f32 %v3981_v32, 0.0  ;;  %v5649_v63 = vmax.f32 %v5327_v61, 0.0  ;;  %v3976_v52 = vadd.f32 %v10322_v25, %v3975_v7  ;;  %v10811_v28 = vld [vmem:[#allocation42_spill] sm:$0xff] }
 0x275   : > { %6029 = vst.msk [vmem:[%s9924_s8 + $0x250] sm:$0xff] %vm5954_vm2, %v5900_v46  ;;  %v5903_v51 = vmax.f32 %v10805_v2, %v5775_v16  ;;  %v5322_v12 = vadd.f32 %v10322_v25, %v5321_v58  ;;  %v8110_v57 = vpop.f32.mrf.mxu0  ;;  %v8310_v47 = vpop.f32.mrf.mxu1 }
 0x276   : > { %v5902_v43 = vmax.f32 %v10806_v5, %v5774_v41  ;;  %v5777_v37 = vmax.f32 %v4303_v23, %v5649_v63  ;;  %v4302_v20 = vmax.f32 %v3976_v52, 0.0  ;;  %v3991_v30 = vadd.f32 %v10322_v25, %v8110_v57 }
 0x277   : > { %6032 = vst.msk [vmem:[%s9924_s8 + $0x268] sm:$0xff] %vm5954_vm2, %v5903_v51  ;;  %v5648_v3 = vmax.f32 %v5322_v12, 0.0  ;;  %v5337_v13 = vadd.f32 %v10322_v25, %v8310_v47  ;;  %v3985_v0 = vpop.f32.mrf.mxu0  ;;  %v5331_v17 = vpop.f32.mrf.mxu1  ;;  %v10812_v51 = vld [vmem:[#allocation43_spill] sm:$0xff] }
 0x278   : > { %6031 = vst.msk [vmem:[%s9924_s8 + $0x260] sm:$0xff] %vm5954_vm2, %v5902_v43  ;;  %v5905_v27 = vmax.f32 %v10807_v15, %v5777_v37  ;;  %v4305_v31 = vmax.f32 %v3991_v30, 0.0  ;;  %v3986_v24 = vadd.f32 %v10322_v25, %v3985_v0  ;;  %v5332_v39 = vadd.f32 %v10322_v25, %v5331_v17 }
 0x279   : > { %v5776_v44 = vmax.f32 %v4302_v20, %v5648_v3  ;;  %v5651_v10 = vmax.f32 %v5337_v13, 0.0  ;;  %v8113_v26 = vpop.f32.mrf.mxu0  ;;  %v8313_v36 = vpop.f32.mrf.mxu1  ;;  %v10813_v3 = vld [vmem:[#allocation44_spill] sm:$0xff] }
 0x27a   : > { %6034 = vst.msk [vmem:[%s9924_s8 + $0x278] sm:$0xff] %vm5954_vm2, %v5905_v27  ;;  %v4304_v8 = vmax.f32 %v3986_v24, 0.0  ;;  %v5650_v11 = vmax.f32 %v5332_v39, 0.0  ;;  %v4001_v55 = vadd.f32 %v10322_v25, %v8113_v26  ;;  %v5347_v59 = vadd.f32 %v10322_v25, %v8313_v36  ;;  %v10814_v27 = vld [vmem:[#allocation45_spill] sm:$0xff] }
 0x27b   : > { %v5904_v29 = vmax.f32 %v10808_v6, %v5776_v44  ;;  %v5779_v18 = vmax.f32 %v4305_v31, %v5651_v10  ;;  %v3995_v40 = vpop.f32.mrf.mxu0  ;;  %v5341_v9 = vpop.f32.mrf.mxu1 }
 0x27c   : > { %v5778_v50 = vmax.f32 %v4304_v8, %v5650_v11  ;;  %v4307_v4 = vmax.f32 %v4001_v55, 0.0  ;;  %v5653_v34 = vmax.f32 %v5347_v59, 0.0  ;;  %v3996_v49 = vadd.f32 %v10322_v25, %v3995_v40  ;;  %v10815_v11 = vld [vmem:[#allocation46_spill] sm:$0xff] }
 0x27d   : > { %6033 = vst.msk [vmem:[%s9924_s8 + $0x270] sm:$0xff] %vm5954_vm2, %v5904_v29  ;;  %v5907_v33 = vmax.f32 %v10809_v62, %v5779_v18  ;;  %v5342_v14 = vadd.f32 %v10322_v25, %v5341_v9  ;;  %v8116_v22 = vpop.f32.mrf.mxu0  ;;  %v8316_v54 = vpop.f32.mrf.mxu1 }
 0x27e   : > { %v5906_v35 = vmax.f32 %v10810_v38, %v5778_v50  ;;  %v5781_v53 = vmax.f32 %v4307_v4, %v5653_v34  ;;  %v4306_v48 = vmax.f32 %v3996_v49, 0.0  ;;  %v4011_v60 = vadd.f32 %v10322_v25, %v8116_v22 }
 0x27f   : > { %6036 = vst.msk [vmem:[%s9924_s8 + $0x288] sm:$0xff] %vm5954_vm2, %v5907_v33  ;;  %v5652_v56 = vmax.f32 %v5342_v14, 0.0  ;;  %v5357_v42 = vadd.f32 %v10322_v25, %v8316_v54  ;;  %v4005_v45 = vpop.f32.mrf.mxu0  ;;  %v5351_v19 = vpop.f32.mrf.mxu1  ;;  %v10816_v33 = vld [vmem:[#allocation47_spill] sm:$0xff] }
 0x280   : > { %6035 = vst.msk [vmem:[%s9924_s8 + $0x280] sm:$0xff] %vm5954_vm2, %v5906_v35  ;;  %v5909_v32 = vmax.f32 %v10811_v28, %v5781_v53  ;;  %v4309_v61 = vmax.f32 %v4011_v60, 0.0  ;;  %v4006_v21 = vadd.f32 %v10322_v25, %v4005_v45  ;;  %v5352_v46 = vadd.f32 %v10322_v25, %v5351_v19 }
 0x281   : > { %v5780_v16 = vmax.f32 %v4306_v48, %v5652_v56  ;;  %v5655_v7 = vmax.f32 %v5357_v42, 0.0  ;;  %v8119_v58 = vpop.f32.mrf.mxu0  ;;  %v8319_v41 = vpop.f32.mrf.mxu1  ;;  %v10817_v56 = vld [vmem:[#allocation48_spill] sm:$0xff] }
 0x282   : > { %6038 = vst.msk [vmem:[%s9924_s8 + $0x298] sm:$0xff] %vm5954_vm2, %v5909_v32  ;;  %v4308_v23 = vmax.f32 %v4006_v21, 0.0  ;;  %v5654_v63 = vmax.f32 %v5352_v46, 0.0  ;;  %v4021_v52 = vadd.f32 %v10322_v25, %v8119_v58  ;;  %v5367_v2 = vadd.f32 %v10322_v25, %v8319_v41  ;;  %v10818_v32 = vld [vmem:[#allocation49_spill] sm:$0xff] }
 0x283   : > { %v5908_v12 = vmax.f32 %v10812_v51, %v5780_v16  ;;  %v5783_v57 = vmax.f32 %v4309_v61, %v5655_v7  ;;  %v4015_v47 = vpop.f32.mrf.mxu0  ;;  %v5361_v5 = vpop.f32.mrf.mxu1 }
 0x284   : > { %v5782_v43 = vmax.f32 %v4308_v23, %v5654_v63  ;;  %v4311_v37 = vmax.f32 %v4021_v52, 0.0  ;;  %v5657_v20 = vmax.f32 %v5367_v2, 0.0  ;;  %v4016_v30 = vadd.f32 %v10322_v25, %v4015_v47 }
 0x285   : > { %6037 = vst.msk [vmem:[%s9924_s8 + $0x290] sm:$0xff] %vm5954_vm2, %v5908_v12  ;;  %v5911_v13 = vmax.f32 %v10813_v3, %v5783_v57  ;;  %v5362_v0 = vadd.f32 %v10322_v25, %v5361_v5  ;;  %v8122_v17 = vpop.f32.mrf.mxu0  ;;  %v8322_v15 = vpop.f32.mrf.mxu1  ;;  %v10819_v3 = vld [vmem:[#allocation50_spill] sm:$0xff] }
 0x286   : > { %v5910_v31 = vmax.f32 %v10814_v27, %v5782_v43  ;;  %v5785_v24 = vmax.f32 %v4311_v37, %v5657_v20  ;;  %v4310_v39 = vmax.f32 %v4016_v30, 0.0  ;;  %v4031_v44 = vadd.f32 %v10322_v25, %v8122_v17 }
 0x287   : > { %6040 = vst.msk [vmem:[%s9924_s8 + $0x2a8] sm:$0xff] %vm5954_vm2, %v5911_v13  ;;  %v5656_v10 = vmax.f32 %v5362_v0, 0.0  ;;  %v5377_v26 = vadd.f32 %v10322_v25, %v8322_v15  ;;  %v4025_v36 = vpop.f32.mrf.mxu0  ;;  %v5371_v8 = vpop.f32.mrf.mxu1 }
 0x288   : > { %6039 = vst.msk [vmem:[%s9924_s8 + $0x2a0] sm:$0xff] %vm5954_vm2, %v5910_v31  ;;  %v5913_v55 = vmax.f32 %v10815_v11, %v5785_v24  ;;  %v4313_v59 = vmax.f32 %v4031_v44, 0.0  ;;  %v4026_v6 = vadd.f32 %v10322_v25, %v4025_v36  ;;  %v5372_v29 = vadd.f32 %v10322_v25, %v5371_v8  ;;  %v10821_v8 = vld [vmem:[#allocation52_spill] sm:$0xff] }
 0x289   : > { %v5784_v18 = vmax.f32 %v4310_v39, %v5656_v10  ;;  %v5659_v40 = vmax.f32 %v5377_v26, 0.0  ;;  %v8125_v9 = vpop.f32.mrf.mxu0  ;;  %v8325_v50 = vpop.f32.mrf.mxu1  ;;  %v10820_v39 = vld [vmem:[#allocation51_spill] sm:$0xff] }
 0x28a   : > { %6042 = vst.msk [vmem:[%s9924_s8 + $0x2b8] sm:$0xff] %vm5954_vm2, %v5913_v55  ;;  %v4312_v4 = vmax.f32 %v4026_v6, 0.0  ;;  %v5658_v34 = vmax.f32 %v5372_v29, 0.0  ;;  %v4041_v49 = vadd.f32 %v10322_v25, %v8125_v9  ;;  %v5387_v62 = vadd.f32 %v10322_v25, %v8325_v50  ;;  %v10822_v50 = vld [vmem:[#allocation53_spill] sm:$0xff] }
 0x28b   : > { %v5912_v14 = vmax.f32 %v10816_v33, %v5784_v18  ;;  %v5787_v22 = vmax.f32 %v4313_v59, %v5659_v40  ;;  %v4035_v54 = vpop.f32.mrf.mxu0  ;;  %v5381_v38 = vpop.f32.mrf.mxu1 }
 0x28c   : > { %v5786_v35 = vmax.f32 %v4312_v4, %v5658_v34  ;;  %v4315_v53 = vmax.f32 %v4041_v49, 0.0  ;;  %v5661_v48 = vmax.f32 %v5387_v62, 0.0  ;;  %v4036_v60 = vadd.f32 %v10322_v25, %v4035_v54 }
 0x28d   : > { %6041 = vst.msk [vmem:[%s9924_s8 + $0x2b0] sm:$0xff] %vm5954_vm2, %v5912_v14  ;;  %v5915_v42 = vmax.f32 %v10817_v56, %v5787_v22  ;;  %v5382_v45 = vadd.f32 %v10322_v25, %v5381_v38  ;;  %v8128_v19 = vpop.f32.mrf.mxu0  ;;  %v8328_v28 = vpop.f32.mrf.mxu1 }
 0x28e   : > { %v5914_v61 = vmax.f32 %v10818_v32, %v5786_v35  ;;  %v5789_v21 = vmax.f32 %v4315_v53, %v5661_v48  ;;  %v4314_v46 = vmax.f32 %v4036_v60, 0.0  ;;  %v4051_v16 = vadd.f32 %v10322_v25, %v8128_v19  ;;  %v10823_v60 = vld [vmem:[#allocation54_spill] sm:$0xff] }
 0x28f   : > { %6044 = vst.msk [vmem:[%s9924_s8 + $0x2c8] sm:$0xff] %vm5954_vm2, %v5915_v42  ;;  %v5660_v7 = vmax.f32 %v5382_v45, 0.0  ;;  %v5397_v58 = vadd.f32 %v10322_v25, %v8328_v28  ;;  %v4045_v41 = vpop.f32.mrf.mxu0  ;;  %v5391_v23 = vpop.f32.mrf.mxu1 }
 0x290   : > { %6043 = vst.msk [vmem:[%s9924_s8 + $0x2c0] sm:$0xff] %vm5954_vm2, %v5914_v61  ;;  %v5917_v63 = vmax.f32 %v9603_v1, %v5789_v21  ;;  %v4317_v52 = vmax.f32 %v4051_v16, 0.0  ;;  %v4046_v2 = vadd.f32 %v10322_v25, %v4045_v41  ;;  %v5392_v51 = vadd.f32 %v10322_v25, %v5391_v23  ;;  %v10825_v23 = vld [vmem:[#allocation56_spill] sm:$0xff] }
 0x291   : > { %v5788_v12 = vmax.f32 %v4314_v46, %v5660_v7  ;;  %v5663_v57 = vmax.f32 %v5397_v58, 0.0  ;;  %v8131_v47 = vpop.f32.mrf.mxu0  ;;  %v8331_v5 = vpop.f32.mrf.mxu1  ;;  %v10824_v46 = vld [vmem:[#allocation55_spill] sm:$0xff] }
 0x292   : > { %6046 = vst.msk [vmem:[%s9924_s8 + $0x2d8] sm:$0xff] %vm5954_vm2, %v5917_v63  ;;  %v4316_v43 = vmax.f32 %v4046_v2, 0.0  ;;  %v5662_v37 = vmax.f32 %v5392_v51, 0.0  ;;  %v4061_v20 = vadd.f32 %v10322_v25, %v8131_v47  ;;  %v5407_v30 = vadd.f32 %v10322_v25, %v8331_v5 }
 0x293   : > { %v5916_v1 = vmax.f32 %v10819_v3, %v5788_v12  ;;  %v5791_v13 = vmax.f32 %v4317_v52, %v5663_v57  ;;  %v4055_v0 = vpop.f32.mrf.mxu0  ;;  %v5401_v17 = vpop.f32.mrf.mxu1 }
 0x294   : > { %v5790_v15 = vmax.f32 %v4316_v43, %v5662_v37  ;;  %v4319_v27 = vmax.f32 %v4061_v20, 0.0  ;;  %v5665_v31 = vmax.f32 %v5407_v30, 0.0  ;;  %v4056_v24 = vadd.f32 %v10322_v25, %v4055_v0  ;;  %v10826_v43 = vld [vmem:[#allocation57_spill] sm:$0xff] }
 0x295   : > { %6045 = vst.msk [vmem:[%s9924_s8 + $0x2d0] sm:$0xff] %vm5954_vm2, %v5916_v1  ;;  %v5919_v44 = vmax.f32 %v10820_v39, %v5791_v13  ;;  %v5402_v10 = vadd.f32 %v10322_v25, %v5401_v17  ;;  %v8134_v26 = vpop.f32.mrf.mxu0  ;;  %v8334_v36 = vpop.f32.mrf.mxu1  ;;  %v10827_v39 = vld [vmem:[#allocation58_spill] sm:$0xff] }
 0x296   : > { %v5918_v11 = vmax.f32 %v10821_v8, %v5790_v15  ;;  %v5793_v55 = vmax.f32 %v4319_v27, %v5665_v31  ;;  %v4318_v59 = vmax.f32 %v4056_v24, 0.0  ;;  %v4071_v6 = vadd.f32 %v10322_v25, %v8134_v26 }
 0x297   : > { %6048 = vst.msk [vmem:[%s9924_s8 + $0x2e8] sm:$0xff] %vm5954_vm2, %v5919_v44  ;;  %v5664_v29 = vmax.f32 %v5402_v10, 0.0  ;;  %v5417_v18 = vadd.f32 %v10322_v25, %v8334_v36  ;;  %v4065_v40 = vpop.f32.mrf.mxu0  ;;  %v5411_v9 = vpop.f32.mrf.mxu1 }
 0x298   : > { %6047 = vst.msk [vmem:[%s9924_s8 + $0x2e0] sm:$0xff] %vm5954_vm2, %v5918_v11  ;;  %v5921_v4 = vmax.f32 %v10822_v50, %v5793_v55  ;;  %v4321_v34 = vmax.f32 %v4071_v6, 0.0  ;;  %v4066_v49 = vadd.f32 %v10322_v25, %v4065_v40  ;;  %v5412_v62 = vadd.f32 %v10322_v25, %v5411_v9  ;;  %v10828_v6 = vld [vmem:[#allocation59_spill] sm:$0xff]  ;;  %v10829_v50 = vld [vmem:[#allocation60_spill] sm:$0xff] }
 0x299   : > { %v5792_v33 = vmax.f32 %v4318_v59, %v5664_v29  ;;  %v5667_v14 = vmax.f32 %v5417_v18, 0.0  ;;  %v8137_v22 = vpop.f32.mrf.mxu0  ;;  %v8337_v54 = vpop.f32.mrf.mxu1 }
 0x29a   : > { %6050 = vst.msk [vmem:[%s9924_s8 + $0x2f8] sm:$0xff] %vm5954_vm2, %v5921_v4  ;;  %v4320_v38 = vmax.f32 %v4066_v49, 0.0  ;;  %v5666_v35 = vmax.f32 %v5412_v62, 0.0  ;;  %v4081_v53 = vadd.f32 %v10322_v25, %v8137_v22  ;;  %v5427_v48 = vadd.f32 %v10322_v25, %v8337_v54 }
 0x29b   : > { %v5920_v56 = vmax.f32 %v10823_v60, %v5792_v33  ;;  %v5795_v42 = vmax.f32 %v4321_v34, %v5667_v14  ;;  %v4075_v45 = vpop.f32.mrf.mxu0  ;;  %v5421_v19 = vpop.f32.mrf.mxu1 }
 0x29c   : > { %v5794_v28 = vmax.f32 %v4320_v38, %v5666_v35  ;;  %v4323_v32 = vmax.f32 %v4081_v53, 0.0  ;;  %v5669_v61 = vmax.f32 %v5427_v48, 0.0  ;;  %v4076_v21 = vadd.f32 %v10322_v25, %v4075_v45  ;;  %v10830_v38 = vld [vmem:[#allocation61_spill] sm:$0xff] }
 0x29d   : > { %6049 = vst.msk [vmem:[%s9924_s8 + $0x2f0] sm:$0xff] %vm5954_vm2, %v5920_v56  ;;  %v5923_v16 = vmax.f32 %v10824_v46, %v5795_v42  ;;  %v5422_v7 = vadd.f32 %v10322_v25, %v5421_v19  ;;  %v8140_v58 = vpop.f32.mrf.mxu0  ;;  %v8340_v41 = vpop.f32.mrf.mxu1  ;;  %v10831_v46 = vld [vmem:[#allocation62_spill] sm:$0xff] }
 0x29e   : > { %v5922_v63 = vmax.f32 %v10825_v23, %v5794_v28  ;;  %v5797_v52 = vmax.f32 %v4323_v32, %v5669_v61  ;;  %v4322_v2 = vmax.f32 %v4076_v21, 0.0  ;;  %v4091_v51 = vadd.f32 %v10322_v25, %v8140_v58 }
 0x29f   : > { %6052 = vst.msk [vmem:[%s9924_s8 + $0x308] sm:$0xff] %vm5954_vm2, %v5923_v16  ;;  %v5668_v12 = vmax.f32 %v5422_v7, 0.0  ;;  %v5437_v57 = vadd.f32 %v10322_v25, %v8340_v41  ;;  %v4085_v47 = vpop.f32.mrf.mxu0  ;;  %v5431_v5 = vpop.f32.mrf.mxu1 }
 0x2a0   : > { %6051 = vst.msk [vmem:[%s9924_s8 + $0x300] sm:$0xff] %vm5954_vm2, %v5922_v63  ;;  %v5925_v37 = vmax.f32 %v10826_v43, %v5797_v52  ;;  %v4325_v20 = vmax.f32 %v4091_v51, 0.0  ;;  %v4086_v30 = vadd.f32 %v10322_v25, %v4085_v47  ;;  %v5432_v3 = vadd.f32 %v10322_v25, %v5431_v5  ;;  %v10832_v51 = vld [vmem:[#allocation63_spill] sm:$0xff]  ;;  %v10833_v43 = vld [vmem:[#allocation64_spill] sm:$0xff] }
 0x2a1   : > { %v5796_v1 = vmax.f32 %v4322_v2, %v5668_v12  ;;  %v5671_v13 = vmax.f32 %v5437_v57, 0.0  ;;  %v8143_v0 = vpop.f32.mrf.mxu0  ;;  %v8343_v17 = vpop.f32.mrf.mxu1 }
 0x2a2   : > { %6054 = vst.msk [vmem:[%s9924_s8 + $0x318] sm:$0xff] %vm5954_vm2, %v5925_v37  ;;  %v4324_v15 = vmax.f32 %v4086_v30, 0.0  ;;  %v5670_v27 = vmax.f32 %v5432_v3, 0.0  ;;  %v4101_v31 = vadd.f32 %v10322_v25, %v8143_v0  ;;  %v5447_v24 = vadd.f32 %v10322_v25, %v8343_v17 }
 0x2a3   : > { %v5924_v44 = vmax.f32 %v10827_v39, %v5796_v1  ;;  %v5799_v10 = vmax.f32 %v4325_v20, %v5671_v13  ;;  %v4095_v26 = vpop.f32.mrf.mxu0  ;;  %v5441_v36 = vpop.f32.mrf.mxu1 }
 0x2a4   : > { %v5798_v8 = vmax.f32 %v4324_v15, %v5670_v27  ;;  %v4327_v11 = vmax.f32 %v4101_v31, 0.0  ;;  %v5673_v55 = vmax.f32 %v5447_v24, 0.0  ;;  %v4096_v59 = vadd.f32 %v10322_v25, %v4095_v26  ;;  %v10834_v15 = vld [vmem:[#allocation65_spill] sm:$0xff] }
 0x2a5   : > { %6053 = vst.msk [vmem:[%s9924_s8 + $0x310] sm:$0xff] %vm5954_vm2, %v5924_v44  ;;  %v5927_v29 = vmax.f32 %v10828_v6, %v5799_v10  ;;  %v5442_v18 = vadd.f32 %v10322_v25, %v5441_v36  ;;  %v8146_v40 = vpop.f32.mrf.mxu0  ;;  %v8346_v9 = vpop.f32.mrf.mxu1  ;;  %v10835_v6 = vld [vmem:[#allocation66_spill] sm:$0xff] }
 0x2a6   : > { %v5926_v4 = vmax.f32 %v10829_v50, %v5798_v8  ;;  %v5801_v34 = vmax.f32 %v4327_v11, %v5673_v55  ;;  %v4326_v49 = vmax.f32 %v4096_v59, 0.0  ;;  %v4111_v62 = vadd.f32 %v10322_v25, %v8146_v40 }
 0x2a7   : > { %6056 = vst.msk [vmem:[%s9924_s8 + $0x328] sm:$0xff] %vm5954_vm2, %v5927_v29  ;;  %v5672_v33 = vmax.f32 %v5442_v18, 0.0  ;;  %v5457_v14 = vadd.f32 %v10322_v25, %v8346_v9  ;;  %v4105_v22 = vpop.f32.mrf.mxu0  ;;  %v5451_v54 = vpop.f32.mrf.mxu1 }
 0x2a8   : > { %6055 = vst.msk [vmem:[%s9924_s8 + $0x320] sm:$0xff] %vm5954_vm2, %v5926_v4  ;;  %v5929_v35 = vmax.f32 %v10830_v38, %v5801_v34  ;;  %v4329_v53 = vmax.f32 %v4111_v62, 0.0  ;;  %v4106_v48 = vadd.f32 %v10322_v25, %v4105_v22  ;;  %v5452_v60 = vadd.f32 %v10322_v25, %v5451_v54  ;;  %v10836_v62 = vld [vmem:[#allocation67_spill] sm:$0xff]  ;;  %v10837_v38 = vld [vmem:[#allocation68_spill] sm:$0xff] }
 0x2a9   : > { %v5800_v56 = vmax.f32 %v4326_v49, %v5672_v33  ;;  %v5675_v42 = vmax.f32 %v5457_v14, 0.0  ;;  %v8149_v45 = vpop.f32.mrf.mxu0  ;;  %v8349_v19 = vpop.f32.mrf.mxu1 }
 0x2aa   : > { %6058 = vst.msk [vmem:[%s9924_s8 + $0x338] sm:$0xff] %vm5954_vm2, %v5929_v35  ;;  %v4328_v28 = vmax.f32 %v4106_v48, 0.0  ;;  %v5674_v32 = vmax.f32 %v5452_v60, 0.0  ;;  %v4121_v61 = vadd.f32 %v10322_v25, %v8149_v45  ;;  %v5467_v21 = vadd.f32 %v10322_v25, %v8349_v19 }
 0x2ab   : > { %v5928_v16 = vmax.f32 %v10831_v46, %v5800_v56  ;;  %v5803_v7 = vmax.f32 %v4329_v53, %v5675_v42  ;;  %v4115_v58 = vpop.f32.mrf.mxu0  ;;  %v5461_v41 = vpop.f32.mrf.mxu1 }
 0x2ac   : > { %v5802_v23 = vmax.f32 %v4328_v28, %v5674_v32  ;;  %v4331_v63 = vmax.f32 %v4121_v61, 0.0  ;;  %v5677_v52 = vmax.f32 %v5467_v21, 0.0  ;;  %v4116_v2 = vadd.f32 %v10322_v25, %v4115_v58  ;;  %v10838_v28 = vld [vmem:[#allocation69_spill] sm:$0xff] }
 0x2ad   : > { %6057 = vst.msk [vmem:[%s9924_s8 + $0x330] sm:$0xff] %vm5954_vm2, %v5928_v16  ;;  %v5931_v12 = vmax.f32 %v10832_v51, %v5803_v7  ;;  %v5462_v57 = vadd.f32 %v10322_v25, %v5461_v41  ;;  %v8152_v47 = vpop.f32.mrf.mxu0  ;;  %v8352_v5 = vpop.f32.mrf.mxu1  ;;  %v10839_v51 = vld [vmem:[#allocation70_spill] sm:$0xff] }
 0x2ae   : > { %v5930_v37 = vmax.f32 %v10833_v43, %v5802_v23  ;;  %v5805_v20 = vmax.f32 %v4331_v63, %v5677_v52  ;;  %v4330_v30 = vmax.f32 %v4116_v2, 0.0  ;;  %v4131_v3 = vadd.f32 %v10322_v25, %v8152_v47 }
 0x2af   : > { %6060 = vst.msk [vmem:[%s9924_s8 + $0x348] sm:$0xff] %vm5954_vm2, %v5931_v12  ;;  %v5676_v1 = vmax.f32 %v5462_v57, 0.0  ;;  %v5477_v13 = vadd.f32 %v10322_v25, %v8352_v5  ;;  %v4125_v0 = vpop.f32.mrf.mxu0  ;;  %v5471_v17 = vpop.f32.mrf.mxu1 }
 0x2b0   : > { %6059 = vst.msk [vmem:[%s9924_s8 + $0x340] sm:$0xff] %vm5954_vm2, %v5930_v37  ;;  %v5933_v27 = vmax.f32 %v10834_v15, %v5805_v20  ;;  %v4333_v31 = vmax.f32 %v4131_v3, 0.0  ;;  %v4126_v24 = vadd.f32 %v10322_v25, %v4125_v0  ;;  %v5472_v39 = vadd.f32 %v10322_v25, %v5471_v17  ;;  %v10840_v3 = vld [vmem:[#allocation71_spill] sm:$0xff]  ;;  %v10841_v15 = vld [vmem:[#allocation72_spill] sm:$0xff] }
 0x2b1   : > { %v5804_v44 = vmax.f32 %v4330_v30, %v5676_v1  ;;  %v5679_v10 = vmax.f32 %v5477_v13, 0.0  ;;  %v8155_v26 = vpop.f32.mrf.mxu0  ;;  %v8355_v36 = vpop.f32.mrf.mxu1 }
 0x2b2   : > { %6062 = vst.msk [vmem:[%s9924_s8 + $0x358] sm:$0xff] %vm5954_vm2, %v5933_v27  ;;  %v4332_v8 = vmax.f32 %v4126_v24, 0.0  ;;  %v5678_v11 = vmax.f32 %v5472_v39, 0.0  ;;  %v4141_v55 = vadd.f32 %v10322_v25, %v8155_v26  ;;  %v5487_v59 = vadd.f32 %v10322_v25, %v8355_v36 }
 0x2b3   : > { %v5932_v29 = vmax.f32 %v10835_v6, %v5804_v44  ;;  %v5807_v18 = vmax.f32 %v4333_v31, %v5679_v10  ;;  %v4135_v40 = vpop.f32.mrf.mxu0  ;;  %v5481_v9 = vpop.f32.mrf.mxu1 }
 0x2b4   : > { %v5806_v50 = vmax.f32 %v4332_v8, %v5678_v11  ;;  %v4335_v4 = vmax.f32 %v4141_v55, 0.0  ;;  %v5681_v34 = vmax.f32 %v5487_v59, 0.0  ;;  %v4136_v49 = vadd.f32 %v10322_v25, %v4135_v40  ;;  %v10842_v8 = vld [vmem:[#allocation73_spill] sm:$0xff]  ;;  %v10614_v59 = vld [vmem:[%s10684_s2] ss:$0 sm:$0xff] }
 0x2b5   : > { %6061 = vst.msk [vmem:[%s9924_s8 + $0x350] sm:$0xff] %vm5954_vm2, %v5932_v29  ;;  %v5935_v33 = vmax.f32 %v10836_v62, %v5807_v18  ;;  %v5482_v14 = vadd.f32 %v10322_v25, %v5481_v9  ;;  %v8158_v22 = vpop.f32.mrf.mxu0  ;;  %v8358_v54 = vpop.f32.mrf.mxu1  ;;  %v10843_v62 = vld [vmem:[#allocation74_spill] sm:$0xff] }
 0x2b6   : > { %v5934_v35 = vmax.f32 %v10837_v38, %v5806_v50  ;;  %v5809_v53 = vmax.f32 %v4335_v4, %v5681_v34  ;;  %v4334_v48 = vmax.f32 %v4136_v49, 0.0  ;;  %v4151_v60 = vadd.f32 %v10322_v25, %v8158_v22 }
 0x2b7   : > { %6064 = vst.msk [vmem:[%s9924_s8 + $0x368] sm:$0xff] %vm5954_vm2, %v5935_v33  ;;  %v5680_v56 = vmax.f32 %v5482_v14, 0.0  ;;  %v5497_v42 = vadd.f32 %v10322_v25, %v8358_v54  ;;  %v4145_v45 = vpop.f32.mrf.mxu0  ;;  %v5491_v19 = vpop.f32.mrf.mxu1 }
 0x2b8   : > { %6063 = vst.msk [vmem:[%s9924_s8 + $0x360] sm:$0xff] %vm5954_vm2, %v5934_v35  ;;  %v5937_v32 = vmax.f32 %v10838_v28, %v5809_v53  ;;  %v4337_v61 = vmax.f32 %v4151_v60, 0.0  ;;  %v4146_v21 = vadd.f32 %v10322_v25, %v4145_v45  ;;  %v5492_v46 = vadd.f32 %v10322_v25, %v5491_v19  ;;  %v10844_v60 = vld [vmem:[#allocation75_spill] sm:$0xff]  ;;  %v10845_v28 = vld [vmem:[#allocation76_spill] sm:$0xff] }
 0x2b9   : > { %v5808_v16 = vmax.f32 %v4334_v48, %v5680_v56  ;;  %v5683_v7 = vmax.f32 %v5497_v42, 0.0  ;;  %v8161_v58 = vpop.f32.mrf.mxu0  ;;  %v8361_v41 = vpop.f32.mrf.mxu1 }
 0x2ba   : > { %6066 = vst.msk [vmem:[%s9924_s8 + $0x378] sm:$0xff] %vm5954_vm2, %v5937_v32  ;;  %v4336_v23 = vmax.f32 %v4146_v21, 0.0  ;;  %v5682_v63 = vmax.f32 %v5492_v46, 0.0  ;;  %v4161_v52 = vadd.f32 %v10322_v25, %v8161_v58  ;;  %v5507_v2 = vadd.f32 %v10322_v25, %v8361_v41 }
 0x2bb   : > { %v5936_v12 = vmax.f32 %v10839_v51, %v5808_v16  ;;  %v5811_v57 = vmax.f32 %v4337_v61, %v5683_v7  ;;  %v4155_v47 = vpop.f32.mrf.mxu0  ;;  %v5501_v5 = vpop.f32.mrf.mxu1 }
 0x2bc   : > { %v5810_v43 = vmax.f32 %v4336_v23, %v5682_v63  ;;  %v4339_v37 = vmax.f32 %v4161_v52, 0.0  ;;  %v5685_v20 = vmax.f32 %v5507_v2, 0.0  ;;  %v4156_v30 = vadd.f32 %v10322_v25, %v4155_v47  ;;  %v10846_v23 = vld [vmem:[#allocation77_spill] sm:$0xff] }
 0x2bd   : > { %6065 = vst.msk [vmem:[%s9924_s8 + $0x370] sm:$0xff] %vm5954_vm2, %v5936_v12  ;;  %v5939_v1 = vmax.f32 %v10840_v3, %v5811_v57  ;;  %v5502_v13 = vadd.f32 %v10322_v25, %v5501_v5  ;;  %v8164_v0 = vpop.f32.mrf.mxu0  ;;  %v8364_v17 = vpop.f32.mrf.mxu1  ;;  %v10847_v3 = vld [vmem:[#allocation78_spill] sm:$0xff] }
 0x2be   : > { %v5938_v27 = vmax.f32 %v10841_v15, %v5810_v43  ;;  %v5813_v31 = vmax.f32 %v4339_v37, %v5685_v20  ;;  %v4338_v24 = vmax.f32 %v4156_v30, 0.0  ;;  %v4171_v39 = vadd.f32 %v10322_v25, %v8164_v0 }
 0x2bf   : > { %6068 = vst.msk [vmem:[%s9924_s8 + $0x388] sm:$0xff] %vm5954_vm2, %v5939_v1  ;;  %v5684_v44 = vmax.f32 %v5502_v13, 0.0  ;;  %v5517_v10 = vadd.f32 %v10322_v25, %v8364_v17  ;;  %v4165_v26 = vpop.f32.mrf.mxu0  ;;  %v5511_v36 = vpop.f32.mrf.mxu1 }
 0x2c0   : > { %6067 = vst.msk [vmem:[%s9924_s8 + $0x380] sm:$0xff] %vm5954_vm2, %v5938_v27  ;;  %v5941_v11 = vmax.f32 %v10842_v8, %v5813_v31  ;;  %v4341_v55 = vmax.f32 %v4171_v39, 0.0  ;;  %v4166_v6 = vadd.f32 %v10614_v59, %v4165_v26  ;;  %v5512_v29 = vadd.f32 %v10614_v59, %v5511_v36  ;;  %v10848_v39 = vld [vmem:[#allocation79_spill] sm:$0xff]  ;;  %v10849_v8 = vld [vmem:[#allocation80_spill] sm:$0xff] }
 0x2c1   : > { %v5812_v18 = vmax.f32 %v4338_v24, %v5684_v44  ;;  %v5687_v40 = vmax.f32 %v5517_v10, 0.0  ;;  %v8167_v25 = vpop.f32.mrf.mxu0  ;;  %v8367_v9 = vpop.f32.mrf.mxu1 }
 0x2c2   : > { %6070 = vst.msk [vmem:[%s9924_s8 + $0x398] sm:$0xff] %vm5954_vm2, %v5941_v11  ;;  %v4340_v50 = vmax.f32 %v4166_v6, 0.0  ;;  %v5686_v4 = vmax.f32 %v5512_v29, 0.0  ;;  %v4181_v34 = vadd.f32 %v10614_v59, %v8167_v25  ;;  %v5527_v49 = vadd.f32 %v10614_v59, %v8367_v9 }
 0x2c3   : > { %v5940_v33 = vmax.f32 %v10843_v62, %v5812_v18  ;;  %v5815_v14 = vmax.f32 %v4341_v55, %v5687_v40  ;;  %v4175_v22 = vpop.f32.mrf.mxu0  ;;  %v5521_v54 = vpop.f32.mrf.mxu1 }
 0x2c4   : > { %v5814_v38 = vmax.f32 %v4340_v50, %v5686_v4  ;;  %v4343_v35 = vmax.f32 %v4181_v34, 0.0  ;;  %v5689_v53 = vmax.f32 %v5527_v49, 0.0  ;;  %v4176_v48 = vadd.f32 %v10614_v59, %v4175_v22  ;;  %v10850_v50 = vld [vmem:[#allocation81_spill] sm:$0xff] }
 0x2c5   : > { %6069 = vst.msk [vmem:[%s9924_s8 + $0x390] sm:$0xff] %vm5954_vm2, %v5940_v33  ;;  %v5943_v56 = vmax.f32 %v10844_v60, %v5815_v14  ;;  %v5522_v42 = vadd.f32 %v10614_v59, %v5521_v54  ;;  %v8170_v45 = vpop.f32.mrf.mxu0  ;;  %v8370_v19 = vpop.f32.mrf.mxu1  ;;  %v10851_v60 = vld [vmem:[#allocation82_spill] sm:$0xff] }
 0x2c6   : > { %v5942_v32 = vmax.f32 %v10845_v28, %v5814_v38  ;;  %v5817_v61 = vmax.f32 %v4343_v35, %v5689_v53  ;;  %v4342_v21 = vmax.f32 %v4176_v48, 0.0  ;;  %v4191_v46 = vadd.f32 %v10614_v59, %v8170_v45 }
 0x2c7   : > { %6072 = vst.msk [vmem:[%s9924_s8 + $0x3a8] sm:$0xff] %vm5954_vm2, %v5943_v56  ;;  %v5688_v16 = vmax.f32 %v5522_v42, 0.0  ;;  %v5537_v7 = vadd.f32 %v10614_v59, %v8370_v19  ;;  %v4185_v58 = vpop.f32.mrf.mxu0  ;;  %v5531_v41 = vpop.f32.mrf.mxu1 }
 0x2c8   : > { %6071 = vst.msk [vmem:[%s9924_s8 + $0x3a0] sm:$0xff] %vm5954_vm2, %v5942_v32  ;;  %v5945_v63 = vmax.f32 %v10846_v23, %v5817_v61  ;;  %v4345_v52 = vmax.f32 %v4191_v46, 0.0  ;;  %v4186_v2 = vadd.f32 %v10614_v59, %v4185_v58  ;;  %v5532_v51 = vadd.f32 %v10614_v59, %v5531_v41  ;;  %v10852_v46 = vld [vmem:[#allocation83_spill] sm:$0xff]  ;;  %v10853_v58 = vld [vmem:[#allocation84_spill] sm:$0xff] }
 0x2c9   : > { %v5816_v12 = vmax.f32 %v4342_v21, %v5688_v16  ;;  %v5691_v57 = vmax.f32 %v5537_v7, 0.0  ;;  %v8173_v47 = vpop.f32.mrf.mxu0  ;;  %v8373_v5 = vpop.f32.mrf.mxu1 }
 0x2ca   : > { %6074 = vst.msk [vmem:[%s9924_s8 + $0x3b8] sm:$0xff] %vm5954_vm2, %v5945_v63  ;;  %v4344_v43 = vmax.f32 %v4186_v2, 0.0  ;;  %v5690_v37 = vmax.f32 %v5532_v51, 0.0  ;;  %v4201_v20 = vadd.f32 %v10614_v59, %v8173_v47  ;;  %v5547_v30 = vadd.f32 %v10614_v59, %v8373_v5  ;;  %v10854_v2 = vld [vmem:[#allocation85_spill] sm:$0xff] }
 0x2cb   : > { %v5944_v1 = vmax.f32 %v10847_v3, %v5816_v12  ;;  %v5819_v13 = vmax.f32 %v4345_v52, %v5691_v57  ;;  %v4195_v0 = vpop.f32.mrf.mxu0  ;;  %v5541_v17 = vpop.f32.mrf.mxu1  ;;  %v10855_v57 = vld [vmem:[#allocation86_spill] sm:$0xff] }
 0x2cc   : > { %v5818_v15 = vmax.f32 %v4344_v43, %v5690_v37  ;;  %v4347_v27 = vmax.f32 %v4201_v20, 0.0  ;;  %v5693_v31 = vmax.f32 %v5547_v30, 0.0  ;;  %v4196_v24 = vadd.f32 %v10614_v59, %v4195_v0 }
 0x2cd   : > { %6073 = vst.msk [vmem:[%s9924_s8 + $0x3b0] sm:$0xff] %vm5954_vm2, %v5944_v1  ;;  %v5947_v44 = vmax.f32 %v10848_v39, %v5819_v13  ;;  %v5542_v10 = vadd.f32 %v10614_v59, %v5541_v17  ;;  %v8176_v26 = vpop.f32.mrf.mxu0  ;;  %v8376_v36 = vpop.f32.mrf.mxu1 }
 0x2ce   : > { %v5946_v11 = vmax.f32 %v10849_v8, %v5818_v15  ;;  %v5821_v55 = vmax.f32 %v4347_v27, %v5693_v31  ;;  %v4346_v6 = vmax.f32 %v4196_v24, 0.0  ;;  %v4211_v29 = vadd.f32 %v10614_v59, %v8176_v26 }
 0x2cf   : > { %6076 = vst.msk [vmem:[%s9924_s8 + $0x3c8] sm:$0xff] %vm5954_vm2, %v5947_v44  ;;  %v5692_v18 = vmax.f32 %v5542_v10, 0.0  ;;  %v5557_v40 = vadd.f32 %v10614_v59, %v8376_v36  ;;  %v4205_v25 = vpop.f32.mrf.mxu0  ;;  %v5551_v9 = vpop.f32.mrf.mxu1 }
 0x2d0   : > { %6075 = vst.msk [vmem:[%s9924_s8 + $0x3c0] sm:$0xff] %vm5954_vm2, %v5946_v11  ;;  %v5949_v4 = vmax.f32 %v10850_v50, %v5821_v55  ;;  %v4349_v34 = vmax.f32 %v4211_v29, 0.0  ;;  %v4206_v49 = vadd.f32 %v10614_v59, %v4205_v25  ;;  %v5552_v62 = vadd.f32 %v10614_v59, %v5551_v9 }
 0x2d1   : > { %v5820_v33 = vmax.f32 %v4346_v6, %v5692_v18  ;;  %v5695_v14 = vmax.f32 %v5557_v40, 0.0  ;;  %v8179_v22 = vpop.f32.mrf.mxu0  ;;  %v8379_v54 = vpop.f32.mrf.mxu1 }
 0x2d2   : > { %6078 = vst.msk [vmem:[%s9924_s8 + $0x3d8] sm:$0xff] %vm5954_vm2, %v5949_v4  ;;  %v4348_v38 = vmax.f32 %v4206_v49, 0.0  ;;  %v5694_v35 = vmax.f32 %v5552_v62, 0.0  ;;  %v4221_v53 = vadd.f32 %v10614_v59, %v8179_v22  ;;  %v5567_v48 = vadd.f32 %v10614_v59, %v8379_v54 }
 0x2d3   : > { %v5948_v56 = vmax.f32 %v10851_v60, %v5820_v33  ;;  %v5823_v42 = vmax.f32 %v4349_v34, %v5695_v14  ;;  %v4215_v45 = vpop.f32.mrf.mxu0  ;;  %v5561_v19 = vpop.f32.mrf.mxu1 }
 0x2d4   : > { %v5822_v28 = vmax.f32 %v4348_v38, %v5694_v35  ;;  %v4351_v32 = vmax.f32 %v4221_v53, 0.0  ;;  %v5697_v61 = vmax.f32 %v5567_v48, 0.0  ;;  %v4216_v21 = vadd.f32 %v10614_v59, %v4215_v45 }
 0x2d5   : > { %6077 = vst.msk [vmem:[%s9924_s8 + $0x3d0] sm:$0xff] %vm5954_vm2, %v5948_v56  ;;  %v5951_v16 = vmax.f32 %v10852_v46, %v5823_v42  ;;  %v5562_v7 = vadd.f32 %v10614_v59, %v5561_v19 }
 0x2d6   : > { %v5950_v41 = vmax.f32 %v10853_v58, %v5822_v28  ;;  %v5825_v23 = vmax.f32 %v4351_v32, %v5697_v61  ;;  %v4350_v63 = vmax.f32 %v4216_v21, 0.0 }
 0x2d7   : > { %6080 = vst.msk [vmem:[%s9924_s8 + $0x3e8] sm:$0xff] %vm5954_vm2, %v5951_v16  ;;  %v5696_v52 = vmax.f32 %v5562_v7, 0.0 }
 0x2d8   : > { %6079 = vst.msk [vmem:[%s9924_s8 + $0x3e0] sm:$0xff] %vm5954_vm2, %v5950_v41  ;;  %v5953_v51 = vmax.f32 %v10854_v2, %v5825_v23 }
 0x2d9   : > { %v5824_v12 = vmax.f32 %v4350_v63, %v5696_v52 }
 0x2da   : > { %6082 = vst.msk [vmem:[%s9924_s8 + $0x3f8] sm:$0xff] %vm5954_vm2, %v5953_v51 }
 0x2db   : > { %v5952_v47 = vmax.f32 %v10855_v57, %v5824_v12 }
 0x2dd   : > { %6081 = vst.msk [vmem:[%s9924_s8 + $0x3f0] sm:$0xff] %vm5954_vm2, %v5952_v47 }
 0x2de PF: > { %s13_s12 = sadd.s32 1, %s8399_s12  }
 0x2df   : > { %p10_p4 = scmp.ge.s32.totalorder %s13_s12, 4  }
 0x2e1   :  { %12 = sbr.rel (!%p10_p4) target bundleno = 1 (0x1), region = 65 }

// kernel: cnn_classifier_forward.5
= control target key start
LH: loop header
LB: loop body
LE: loop exit
PB: predicated region body
PF: predicated region fallthrough
CT: control target
= control target key end

     0   :  { %s2077_s12 = smov 0   ;;  %s2972_s0 = inlined_call_operand.vmem [shape: f32[2048,144], index: 0, kind: input, shape index: {}]   ;;  %s2973_s1 = inlined_call_operand.vmem [shape: f32[144,16], index: 1, kind: input, shape index: {}]   ;;  %s2974_s2 = inlined_call_operand.vmem [shape: f32[1,16], index: 2, kind: input, shape index: {}]   ;;  %s2975_s3 = inlined_call_operand.vmem [shape: f32[2048,16], index: 3, kind: output, shape index: {}]  }
   0x1 LB: > { %s1860_s13 = sadd.s32 4294967295, %s2054_s12   ;;  %p1864_p0 = scmp.ge.s32.totalorder %s2054_s12, 1  ;;  %s2054_s12 = sphi %s2077_s12, %s13_s12  }
   0x2   : > { %p139_p1 = scmp.lt.s32.totalorder %s2054_s12, 3 }
   0x4   : > { %p140_p2 = pnand %p1864_p0, %p139_p1 }
   0x5   : > { %s1865_s7 = sshll.u32 (!%p140_p2), %s1860_s13, 7 }
   0x6   : > { %143 = sbr.rel (%p140_p2) target bundleno = 499 (0x1f3), region = 32  ;;  %p165_p3 = scmp.lt.s32.totalorder (!%p140_p2), %s1865_s7, 255 }
   0xb   : > { %v448_v0 = vld [vmem:[%s2973_s1 + $0x78] sm:$0xff]  ;;  %v2056_v1 = vmov 0.0   ;;  %v447_v2 = vld [vmem:[%s2973_s1 + $0x70] sm:$0xff]  ;;  %v446_v3 = vld [vmem:[%s2973_s1 + $0x68] sm:$0xff]  ;;  %s2977_s7 = smov (!%p165_p3, %s1865_s7), 255  ;;  %vm458_vm0 = vcmask 130048  }
   0xc   : > { %843 = vmatprep.subr.mxu0 %v2056_v1  ;;  %2002 = vmatprep.subr.mxu1 %v2056_v1  ;;  %v445_v4 = vld [vmem:[%s2973_s1 + $0x60] sm:$0xff]  ;;  %v444_v5 = vld [vmem:[%s2973_s1 + $0x58] sm:$0xff]  ;;  %v443_v6 = vld [vmem:[%s2973_s1 + $0x50] sm:$0xff]  ;;  %s2001_s19 = sshll.u32 %s2977_s7, 4  ;;  %s1869_s4 = sshll.u32 %s2977_s7, 3 }
   0xd   : > { %844 = vmatpush1.msra.mxu0 %v448_v0  ;;  %2020 = vmatpush1.msra.mxu1 %v448_v0  ;;  %v442_v7 = vld [vmem:[%s2973_s1 + $0x48] sm:$0xff]  ;;  %v441_v8 = vld [vmem:[%s2973_s1 + $0x40] sm:$0xff]  ;;  %v440_v9 = vld [vmem:[%s2973_s1 + $0x38] sm:$0xff]  ;;  %s2176_s26 = scalar_lea.vmem %s2972_s0, %s2001_s19  ;;  %s2496_s8 = scalar_lea.vmem %s2975_s3, %s1869_s4 }
   0xe   : > { %845 = vmatprep.subr.mxu0 %v2056_v1  ;;  %2003 = vmatprep.subr.mxu1 %v2056_v1  ;;  %v439_v10 = vld [vmem:[%s2973_s1 + $0x30] sm:$0xff]  ;;  %v438_v11 = vld [vmem:[%s2973_s1 + $0x28] sm:$0xff]  ;;  %v437_v12 = vld [vmem:[%s2973_s1 + $0x20] sm:$0xff] }
   0xf   : > { %846 = vmatpush1.msra.mxu0 %v447_v2  ;;  %2021 = vmatpush1.msra.mxu1 %v447_v2  ;;  %v436_v13 = vld [vmem:[%s2973_s1 + $0x18] sm:$0xff]  ;;  %v435_v14 = vld [vmem:[%s2973_s1 + $0x10] sm:$0xff]  ;;  %v434_v15 = vld [vmem:[%s2973_s1 + $0x8] sm:$0xff] }
  0x10   : > { %847 = vmatprep.subr.mxu0 %v2056_v1  ;;  %2004 = vmatprep.subr.mxu1 %v2056_v1  ;;  %v433_v16 = vld [vmem:[%s2973_s1] sm:$0xff]  ;;  %v450_v17 = vld [vmem:[%s2973_s1 + $0x88] sm:$0xff]  ;;  %v180_v23 = vld [vmem:[%s2176_s26 + $0x18] sm:$0xff] }
  0x11   : > { %848 = vmatpush1.msra.mxu0 %v446_v3  ;;  %2022 = vmatpush1.msra.mxu1 %v446_v3  ;;  %v449_v18 = vld [vmem:[%s2973_s1 + $0x80] sm:$0xff]  ;;  %v178_v19 = vld [vmem:[%s2176_s26 + $0x8] sm:$0xff]  ;;  %v308_v24 = vld [vmem:[%s2176_s26 + $0x418] sm:$0xff] }
  0x12   : > { %849 = vmatprep.subr.mxu0 %v2056_v1  ;;  %2005 = vmatprep.subr.mxu1 %v2056_v1  ;;  %v306_v20 = vld [vmem:[%s2176_s26 + $0x408] sm:$0xff]  ;;  %v177_v21 = vld [vmem:[%s2176_s26] sm:$0xff]  ;;  %v179_v25 = vld [vmem:[%s2176_s26 + $0x10] sm:$0xff] }
  0x13   : > { %850 = vmatpush1.msra.mxu0 %v445_v4  ;;  %2023 = vmatpush1.msra.mxu1 %v445_v4  ;;  %v305_v22 = vld [vmem:[%s2176_s26 + $0x400] sm:$0xff]  ;;  %v307_v26 = vld [vmem:[%s2176_s26 + $0x410] sm:$0xff]  ;;  %v182_v27 = vld [vmem:[%s2176_s26 + $0x28] sm:$0xff] }
  0x14   : > { %851 = vmatprep.subr.mxu0 %v2056_v1  ;;  %2006 = vmatprep.subr.mxu1 %v2056_v1  ;;  %v310_v28 = vld [vmem:[%s2176_s26 + $0x428] sm:$0xff]  ;;  %v181_v29 = vld [vmem:[%s2176_s26 + $0x20] sm:$0xff]  ;;  %v184_v31 = vld [vmem:[%s2176_s26 + $0x38] sm:$0xff] }
  0x15   : > { %852 = vmatpush1.msra.mxu0 %v444_v5  ;;  %2024 = vmatpush1.msra.mxu1 %v444_v5  ;;  %v309_v30 = vld [vmem:[%s2176_s26 + $0x420] sm:$0xff]  ;;  %v312_v32 = vld [vmem:[%s2176_s26 + $0x438] sm:$0xff]  ;;  %v183_v33 = vld [vmem:[%s2176_s26 + $0x30] sm:$0xff] }
  0x16   : > { %853 = vmatprep.subr.mxu0 %v2056_v1  ;;  %2007 = vmatprep.subr.mxu1 %v2056_v1  ;;  %v311_v34 = vld [vmem:[%s2176_s26 + $0x430] sm:$0xff]  ;;  %v186_v35 = vld [vmem:[%s2176_s26 + $0x48] sm:$0xff]  ;;  %v185_v37 = vld [vmem:[%s2176_s26 + $0x40] sm:$0xff] }
  0x17   : > { %854 = vmatpush1.msra.mxu0 %v443_v6  ;;  %2025 = vmatpush1.msra.mxu1 %v443_v6  ;;  %v314_v36 = vld [vmem:[%s2176_s26 + $0x448] sm:$0xff]  ;;  %v313_v38 = vld [vmem:[%s2176_s26 + $0x440] sm:$0xff]  ;;  %v188_v39 = vld [vmem:[%s2176_s26 + $0x58] sm:$0xff] }
  0x18   : > { %855 = vmatprep.subr.mxu0 %v2056_v1  ;;  %2008 = vmatprep.subr.mxu1 %v2056_v1  ;;  %v316_v40 = vld [vmem:[%s2176_s26 + $0x458] sm:$0xff]  ;;  %v187_v41 = vld [vmem:[%s2176_s26 + $0x50] sm:$0xff]  ;;  %v190_v43 = vld [vmem:[%s2176_s26 + $0x68] sm:$0xff] }
  0x19   : > { %856 = vmatpush1.msra.mxu0 %v442_v7  ;;  %2026 = vmatpush1.msra.mxu1 %v442_v7  ;;  %v315_v42 = vld [vmem:[%s2176_s26 + $0x450] sm:$0xff]  ;;  %v318_v44 = vld [vmem:[%s2176_s26 + $0x468] sm:$0xff]  ;;  %v189_v45 = vld [vmem:[%s2176_s26 + $0x60] sm:$0xff] }
  0x1a   : > { %857 = vmatprep.subr.mxu0 %v2056_v1  ;;  %2009 = vmatprep.subr.mxu1 %v2056_v1  ;;  %v317_v46 = vld [vmem:[%s2176_s26 + $0x460] sm:$0xff]  ;;  %v192_v47 = vld [vmem:[%s2176_s26 + $0x78] sm:$0xff]  ;;  %v191_v49 = vld [vmem:[%s2176_s26 + $0x70] sm:$0xff] }
  0x1b   : > { %858 = vmatpush1.msra.mxu0 %v441_v8  ;;  %2027 = vmatpush1.msra.mxu1 %v441_v8  ;;  %v320_v48 = vld [vmem:[%s2176_s26 + $0x478] sm:$0xff]  ;;  %v319_v50 = vld [vmem:[%s2176_s26 + $0x470] sm:$0xff]  ;;  %v194_v51 = vld [vmem:[%s2176_s26 + $0x88] sm:$0xff] }
  0x1c   : > { %859 = vmatprep.subr.mxu0 %v2056_v1  ;;  %2010 = vmatprep.subr.mxu1 %v2056_v1  ;;  %v322_v52 = vld [vmem:[%s2176_s26 + $0x488] sm:$0xff]  ;;  %v193_v53 = vld [vmem:[%s2176_s26 + $0x80] sm:$0xff]  ;;  %v196_v55 = vld [vmem:[%s2176_s26 + $0x98] sm:$0xff] }
  0x1d   : > { %860 = vmatpush1.msra.mxu0 %v440_v9  ;;  %2028 = vmatpush1.msra.mxu1 %v440_v9  ;;  %v321_v54 = vld [vmem:[%s2176_s26 + $0x480] sm:$0xff]  ;;  %v324_v56 = vld [vmem:[%s2176_s26 + $0x498] sm:$0xff]  ;;  %v195_v57 = vld [vmem:[%s2176_s26 + $0x90] sm:$0xff] }
  0x1e   : > { %861 = vmatprep.subr.mxu0 %v2056_v1  ;;  %2011 = vmatprep.subr.mxu1 %v2056_v1  ;;  %v323_v58 = vld [vmem:[%s2176_s26 + $0x490] sm:$0xff]  ;;  %v198_v59 = vld [vmem:[%s2176_s26 + $0xa8] sm:$0xff]  ;;  %v197_v61 = vld [vmem:[%s2176_s26 + $0xa0] sm:$0xff] }
  0x1f   : > { %862 = vmatpush1.msra.mxu0 %v439_v10  ;;  %2029 = vmatpush1.msra.mxu1 %v439_v10  ;;  %v326_v60 = vld [vmem:[%s2176_s26 + $0x4a8] sm:$0xff]  ;;  %v325_v62 = vld [vmem:[%s2176_s26 + $0x4a0] sm:$0xff]  ;;  %v200_v63 = vld [vmem:[%s2176_s26 + $0xb8] sm:$0xff] }
  0x20   : > { %863 = vmatprep.subr.mxu0 %v2056_v1  ;;  %2012 = vmatprep.subr.mxu1 %v2056_v1  ;;  %v328_v0 = vld [vmem:[%s2176_s26 + $0x4b8] sm:$0xff]  ;;  %v327_v2 = vld [vmem:[%s2176_s26 + $0x4b0] sm:$0xff]  ;;  %v202_v3 = vld [vmem:[%s2176_s26 + $0xc8] sm:$0xff] }
  0x21   : > { %864 = vmatpush1.msra.mxu0 %v438_v11  ;;  %2030 = vmatpush1.msra.mxu1 %v438_v11  ;;  %v330_v4 = vld [vmem:[%s2176_s26 + $0x4c8] sm:$0xff]  ;;  %v201_v5 = vld [vmem:[%s2176_s26 + $0xc0] sm:$0xff]  ;;  %v204_v7 = vld [vmem:[%s2176_s26 + $0xd8] sm:$0xff] }
  0x22   : > { %865 = vmatprep.subr.mxu0 %v2056_v1  ;;  %2013 = vmatprep.subr.mxu1 %v2056_v1  ;;  %v329_v6 = vld [vmem:[%s2176_s26 + $0x4c0] sm:$0xff]  ;;  %v332_v8 = vld [vmem:[%s2176_s26 + $0x4d8] sm:$0xff]  ;;  %v203_v9 = vld [vmem:[%s2176_s26 + $0xd0] sm:$0xff] }
  0x23   : > { %866 = vmatpush1.msra.mxu0 %v437_v12  ;;  %2031 = vmatpush1.msra.mxu1 %v437_v12  ;;  %v331_v10 = vld [vmem:[%s2176_s26 + $0x4d0] sm:$0xff]  ;;  %v206_v11 = vld [vmem:[%s2176_s26 + $0xe8] sm:$0xff] }
  0x24   : > { %867 = vmatprep.subr.mxu0 %v2056_v1  ;;  %2014 = vmatprep.subr.mxu1 %v2056_v1  ;;  %v334_v12 = vld [vmem:[%s2176_s26 + $0x4e8] sm:$0xff] }
  0x25   : > { %868 = vmatpush1.msra.mxu0 %v436_v13  ;;  %2032 = vmatpush1.msra.mxu1 %v436_v13  ;;  %v205_v13 = vld [vmem:[%s2176_s26 + $0xe0] sm:$0xff] }
  0x26   : > { %869 = vmatprep.subr.mxu0 %v2056_v1  ;;  %2015 = vmatprep.subr.mxu1 %v2056_v1 }
  0x27   : > { %870 = vmatpush1.msra.mxu0 %v435_v14  ;;  %2033 = vmatpush1.msra.mxu1 %v435_v14  ;;  %v333_v14 = vld [vmem:[%s2176_s26 + $0x4e0] sm:$0xff] }
  0x28   : > { %871 = vmatprep.subr.mxu0 %v2056_v1  ;;  %2016 = vmatprep.subr.mxu1 %v2056_v1 }
  0x29   : > { %872 = vmatpush1.msra.mxu0 %v434_v15  ;;  %2034 = vmatpush1.msra.mxu1 %v434_v15  ;;  %v208_v15 = vld [vmem:[%s2176_s26 + $0xf8] sm:$0xff] }
  0x2a   : > { %873 = vmatprep.subr.mxu0 %v2056_v1  ;;  %2017 = vmatprep.subr.mxu1 %v2056_v1 }
  0x2b   : > { %874 = vmatpush1.msra.mxu0 %v433_v16  ;;  %2035 = vmatpush1.msra.mxu1 %v433_v16  ;;  %v336_v16 = vld [vmem:[%s2176_s26 + $0x4f8] sm:$0xff] }
  0x2c   : > { %903 = vmatprep.subr.mxu0 %v2056_v1  ;;  %2018 = vmatprep.subr.mxu1 %v2056_v1 }
  0x2d   : > { %904 = vmatpush2.msra.mxu0 %v450_v17  ;;  %2036 = vmatpush2.msra.mxu1 %v450_v17  ;;  %v207_v17 = vld [vmem:[%s2176_s26 + $0xf0] sm:$0xff] }
  0x2e   : > { %905 = vmatprep.subr.mxu0 %v2056_v1  ;;  %2019 = vmatprep.subr.mxu1 %v2056_v1  ;;  %v199_v1 = vld [vmem:[%s2176_s26 + $0xb0] sm:$0xff] }
  0x2f   : > { %906 = vmatpush2.msra.mxu0 %v449_v18  ;;  %2037 = vmatpush2.msra.mxu1 %v449_v18  ;;  %v335_v18 = vld [vmem:[%s2176_s26 + $0x4f0] sm:$0xff] }
  0x30   : > { %1871 = vmatprep.mubr.msk.f32.mxu0 %vm458_vm0, %v178_v19  ;;  %1935 = vmatprep.mubr.msk.f32.mxu1 %vm458_vm0, %v306_v20  ;;  %v210_v19 = vld [vmem:[%s2176_s26 + $0x108] sm:$0xff] }
  0x31   : > { %908 = vmatmul.mubr.f32.vlgmr.msra.gmra.mxu0 %v177_v21  ;;  %1228 = vmatmul.mubr.f32.vlgmr.msra.gmra.mxu1 %v305_v22  ;;  %v338_v20 = vld [vmem:[%s2176_s26 + $0x508] sm:$0xff]  ;;  %v209_v21 = vld [vmem:[%s2176_s26 + $0x100] sm:$0xff] }
  0x32   : > { %1872 = vmatprep.mubr.msk.f32.mxu0 %vm458_vm0, %v180_v23  ;;  %1936 = vmatprep.mubr.msk.f32.mxu1 %vm458_vm0, %v308_v24  ;;  %v337_v22 = vld [vmem:[%s2176_s26 + $0x500] sm:$0xff]  ;;  %v212_v23 = vld [vmem:[%s2176_s26 + $0x118] sm:$0xff] }
  0x33   : > { %v340_v24 = vld [vmem:[%s2176_s26 + $0x518] sm:$0xff] }
  0x35   : > { %913 = vmatmul.mubr.f32.gmra.mxu0 %v179_v25  ;;  %1233 = vmatmul.mubr.f32.gmra.mxu1 %v307_v26  ;;  %v211_v25 = vld [vmem:[%s2176_s26 + $0x110] sm:$0xff] }
  0x36   : > { %1873 = vmatprep.mubr.msk.f32.mxu0 %vm458_vm0, %v182_v27  ;;  %1937 = vmatprep.mubr.msk.f32.mxu1 %vm458_vm0, %v310_v28  ;;  %v339_v26 = vld [vmem:[%s2176_s26 + $0x510] sm:$0xff]  ;;  %v214_v27 = vld [vmem:[%s2176_s26 + $0x128] sm:$0xff] }
  0x37   : > { %v342_v28 = vld [vmem:[%s2176_s26 + $0x528] sm:$0xff] }
  0x39   : > { %918 = vmatmul.mubr.f32.gmra.mxu0 %v181_v29  ;;  %1238 = vmatmul.mubr.f32.gmra.mxu1 %v309_v30  ;;  %v213_v29 = vld [vmem:[%s2176_s26 + $0x120] sm:$0xff] }
  0x3a   : > { %1874 = vmatprep.mubr.msk.f32.mxu0 %vm458_vm0, %v184_v31  ;;  %1938 = vmatprep.mubr.msk.f32.mxu1 %vm458_vm0, %v312_v32  ;;  %v341_v30 = vld [vmem:[%s2176_s26 + $0x520] sm:$0xff]  ;;  %v216_v31 = vld [vmem:[%s2176_s26 + $0x138] sm:$0xff] }
  0x3b   : > { %v344_v32 = vld [vmem:[%s2176_s26 + $0x538] sm:$0xff] }
  0x3d   : > { %923 = vmatmul.mubr.f32.gmra.mxu0 %v183_v33  ;;  %1243 = vmatmul.mubr.f32.gmra.mxu1 %v311_v34  ;;  %v215_v33 = vld [vmem:[%s2176_s26 + $0x130] sm:$0xff] }
  0x3e   : > { %1875 = vmatprep.mubr.msk.f32.mxu0 %vm458_vm0, %v186_v35  ;;  %1939 = vmatprep.mubr.msk.f32.mxu1 %vm458_vm0, %v314_v36  ;;  %v343_v34 = vld [vmem:[%s2176_s26 + $0x530] sm:$0xff]  ;;  %v218_v35 = vld [vmem:[%s2176_s26 + $0x148] sm:$0xff] }
  0x3f   : > { %v346_v36 = vld [vmem:[%s2176_s26 + $0x548] sm:$0xff] }
  0x41   : > { %928 = vmatmul.mubr.f32.gmra.mxu0 %v185_v37  ;;  %1248 = vmatmul.mubr.f32.gmra.mxu1 %v313_v38  ;;  %v217_v37 = vld [vmem:[%s2176_s26 + $0x140] sm:$0xff] }
  0x42   : > { %1876 = vmatprep.mubr.msk.f32.mxu0 %vm458_vm0, %v188_v39  ;;  %1940 = vmatprep.mubr.msk.f32.mxu1 %vm458_vm0, %v316_v40  ;;  %v345_v38 = vld [vmem:[%s2176_s26 + $0x540] sm:$0xff]  ;;  %v220_v39 = vld [vmem:[%s2176_s26 + $0x158] sm:$0xff] }
  0x43   : > { %v348_v40 = vld [vmem:[%s2176_s26 + $0x558] sm:$0xff] }
  0x45   : > { %933 = vmatmul.mubr.f32.gmra.mxu0 %v187_v41  ;;  %1253 = vmatmul.mubr.f32.gmra.mxu1 %v315_v42  ;;  %v219_v41 = vld [vmem:[%s2176_s26 + $0x150] sm:$0xff] }
  0x46   : > { %1877 = vmatprep.mubr.msk.f32.mxu0 %vm458_vm0, %v190_v43  ;;  %1941 = vmatprep.mubr.msk.f32.mxu1 %vm458_vm0, %v318_v44  ;;  %v347_v42 = vld [vmem:[%s2176_s26 + $0x550] sm:$0xff]  ;;  %v222_v43 = vld [vmem:[%s2176_s26 + $0x168] sm:$0xff] }
  0x47   : > { %v350_v44 = vld [vmem:[%s2176_s26 + $0x568] sm:$0xff] }
  0x49   : > { %938 = vmatmul.mubr.f32.gmra.mxu0 %v189_v45  ;;  %1258 = vmatmul.mubr.f32.gmra.mxu1 %v317_v46  ;;  %v221_v45 = vld [vmem:[%s2176_s26 + $0x160] sm:$0xff] }
  0x4a   : > { %1878 = vmatprep.mubr.msk.f32.mxu0 %vm458_vm0, %v192_v47  ;;  %1942 = vmatprep.mubr.msk.f32.mxu1 %vm458_vm0, %v320_v48  ;;  %v349_v46 = vld [vmem:[%s2176_s26 + $0x560] sm:$0xff]  ;;  %v224_v47 = vld [vmem:[%s2176_s26 + $0x178] sm:$0xff] }
  0x4b   : > { %v352_v48 = vld [vmem:[%s2176_s26 + $0x578] sm:$0xff] }
  0x4d   : > { %943 = vmatmul.mubr.f32.gmra.mxu0 %v191_v49  ;;  %1263 = vmatmul.mubr.f32.gmra.mxu1 %v319_v50  ;;  %v223_v49 = vld [vmem:[%s2176_s26 + $0x170] sm:$0xff] }
  0x4e   : > { %1879 = vmatprep.mubr.msk.f32.mxu0 %vm458_vm0, %v194_v51  ;;  %1943 = vmatprep.mubr.msk.f32.mxu1 %vm458_vm0, %v322_v52  ;;  %v351_v50 = vld [vmem:[%s2176_s26 + $0x570] sm:$0xff]  ;;  %v226_v51 = vld [vmem:[%s2176_s26 + $0x188] sm:$0xff] }
  0x4f   : > { %v354_v52 = vld [vmem:[%s2176_s26 + $0x588] sm:$0xff] }
  0x51   : > { %948 = vmatmul.mubr.f32.gmra.mxu0 %v193_v53  ;;  %1268 = vmatmul.mubr.f32.gmra.mxu1 %v321_v54  ;;  %v225_v53 = vld [vmem:[%s2176_s26 + $0x180] sm:$0xff] }
  0x52   : > { %1880 = vmatprep.mubr.msk.f32.mxu0 %vm458_vm0, %v196_v55  ;;  %1944 = vmatprep.mubr.msk.f32.mxu1 %vm458_vm0, %v324_v56  ;;  %v353_v54 = vld [vmem:[%s2176_s26 + $0x580] sm:$0xff]  ;;  %v228_v55 = vld [vmem:[%s2176_s26 + $0x198] sm:$0xff] }
  0x53   : > { %v356_v56 = vld [vmem:[%s2176_s26 + $0x598] sm:$0xff] }
  0x55   : > { %953 = vmatmul.mubr.f32.gmra.mxu0 %v195_v57  ;;  %1273 = vmatmul.mubr.f32.gmra.mxu1 %v323_v58  ;;  %v227_v57 = vld [vmem:[%s2176_s26 + $0x190] sm:$0xff] }
  0x56   : > { %1881 = vmatprep.mubr.msk.f32.mxu0 %vm458_vm0, %v198_v59  ;;  %1945 = vmatprep.mubr.msk.f32.mxu1 %vm458_vm0, %v326_v60  ;;  %v355_v58 = vld [vmem:[%s2176_s26 + $0x590] sm:$0xff]  ;;  %v230_v59 = vld [vmem:[%s2176_s26 + $0x1a8] sm:$0xff] }
  0x57   : > { %v358_v60 = vld [vmem:[%s2176_s26 + $0x5a8] sm:$0xff] }
  0x59   : > { %958 = vmatmul.mubr.f32.gmra.mxu0 %v197_v61  ;;  %1278 = vmatmul.mubr.f32.gmra.mxu1 %v325_v62  ;;  %v229_v61 = vld [vmem:[%s2176_s26 + $0x1a0] sm:$0xff] }
  0x5a   : > { %1882 = vmatprep.mubr.msk.f32.mxu0 %vm458_vm0, %v200_v63  ;;  %1946 = vmatprep.mubr.msk.f32.mxu1 %vm458_vm0, %v328_v0  ;;  %v357_v62 = vld [vmem:[%s2176_s26 + $0x5a0] sm:$0xff]  ;;  %v232_v63 = vld [vmem:[%s2176_s26 + $0x1b8] sm:$0xff] }
  0x5b   : > { %v360_v0 = vld [vmem:[%s2176_s26 + $0x5b8] sm:$0xff] }
  0x5d   : > { %963 = vmatmul.mubr.f32.gmra.mxu0 %v199_v1  ;;  %1283 = vmatmul.mubr.f32.gmra.mxu1 %v327_v2  ;;  %v231_v1 = vld [vmem:[%s2176_s26 + $0x1b0] sm:$0xff] }
  0x5e   : > { %1883 = vmatprep.mubr.msk.f32.mxu0 %vm458_vm0, %v202_v3  ;;  %1947 = vmatprep.mubr.msk.f32.mxu1 %vm458_vm0, %v330_v4  ;;  %v359_v2 = vld [vmem:[%s2176_s26 + $0x5b0] sm:$0xff]  ;;  %v234_v3 = vld [vmem:[%s2176_s26 + $0x1c8] sm:$0xff] }
  0x5f   : > { %v362_v4 = vld [vmem:[%s2176_s26 + $0x5c8] sm:$0xff] }
  0x61   : > { %968 = vmatmul.mubr.f32.gmra.mxu0 %v201_v5  ;;  %1288 = vmatmul.mubr.f32.gmra.mxu1 %v329_v6  ;;  %v233_v5 = vld [vmem:[%s2176_s26 + $0x1c0] sm:$0xff] }
  0x62   : > { %1884 = vmatprep.mubr.msk.f32.mxu0 %vm458_vm0, %v204_v7  ;;  %1948 = vmatprep.mubr.msk.f32.mxu1 %vm458_vm0, %v332_v8  ;;  %v361_v6 = vld [vmem:[%s2176_s26 + $0x5c0] sm:$0xff]  ;;  %v236_v7 = vld [vmem:[%s2176_s26 + $0x1d8] sm:$0xff] }
  0x63   : > { %v364_v8 = vld [vmem:[%s2176_s26 + $0x5d8] sm:$0xff] }
  0x65   : > { %973 = vmatmul.mubr.f32.gmra.mxu0 %v203_v9  ;;  %1293 = vmatmul.mubr.f32.gmra.mxu1 %v331_v10  ;;  %v235_v9 = vld [vmem:[%s2176_s26 + $0x1d0] sm:$0xff] }
  0x66   : > { %1885 = vmatprep.mubr.msk.f32.mxu0 %vm458_vm0, %v206_v11  ;;  %1949 = vmatprep.mubr.msk.f32.mxu1 %vm458_vm0, %v334_v12  ;;  %v363_v10 = vld [vmem:[%s2176_s26 + $0x5d0] sm:$0xff]  ;;  %v238_v11 = vld [vmem:[%s2176_s26 + $0x1e8] sm:$0xff] }
  0x67   : > { %v366_v12 = vld [vmem:[%s2176_s26 + $0x5e8] sm:$0xff] }
  0x69   : > { %978 = vmatmul.mubr.f32.gmra.mxu0 %v205_v13  ;;  %1298 = vmatmul.mubr.f32.gmra.mxu1 %v333_v14  ;;  %v237_v13 = vld [vmem:[%s2176_s26 + $0x1e0] sm:$0xff] }
  0x6a   : > { %1886 = vmatprep.mubr.msk.f32.mxu0 %vm458_vm0, %v208_v15  ;;  %1950 = vmatprep.mubr.msk.f32.mxu1 %vm458_vm0, %v336_v16  ;;  %v365_v14 = vld [vmem:[%s2176_s26 + $0x5e0] sm:$0xff]  ;;  %v240_v15 = vld [vmem:[%s2176_s26 + $0x1f8] sm:$0xff] }
  0x6b   : > { %v368_v16 = vld [vmem:[%s2176_s26 + $0x5f8] sm:$0xff] }
  0x6d   : > { %983 = vmatmul.mubr.f32.gmra.mxu0 %v207_v17  ;;  %1303 = vmatmul.mubr.f32.gmra.mxu1 %v335_v18  ;;  %v239_v17 = vld [vmem:[%s2176_s26 + $0x1f0] sm:$0xff] }
  0x6e   : > { %1887 = vmatprep.mubr.msk.f32.mxu0 %vm458_vm0, %v210_v19  ;;  %1951 = vmatprep.mubr.msk.f32.mxu1 %vm458_vm0, %v338_v20  ;;  %v367_v18 = vld [vmem:[%s2176_s26 + $0x5f0] sm:$0xff]  ;;  %v242_v19 = vld [vmem:[%s2176_s26 + $0x208] sm:$0xff] }
  0x6f   : > { %v370_v20 = vld [vmem:[%s2176_s26 + $0x608] sm:$0xff] }
  0x71   : > { %988 = vmatmul.mubr.f32.gmra.mxu0 %v209_v21  ;;  %1308 = vmatmul.mubr.f32.gmra.mxu1 %v337_v22  ;;  %v241_v21 = vld [vmem:[%s2176_s26 + $0x200] sm:$0xff] }
  0x72   : > { %1888 = vmatprep.mubr.msk.f32.mxu0 %vm458_vm0, %v212_v23  ;;  %1952 = vmatprep.mubr.msk.f32.mxu1 %vm458_vm0, %v340_v24  ;;  %v369_v22 = vld [vmem:[%s2176_s26 + $0x600] sm:$0xff]  ;;  %v244_v23 = vld [vmem:[%s2176_s26 + $0x218] sm:$0xff] }
  0x73   : > { %v372_v24 = vld [vmem:[%s2176_s26 + $0x618] sm:$0xff] }
  0x75   : > { %993 = vmatmul.mubr.f32.gmra.mxu0 %v211_v25  ;;  %1313 = vmatmul.mubr.f32.gmra.mxu1 %v339_v26  ;;  %v243_v25 = vld [vmem:[%s2176_s26 + $0x210] sm:$0xff] }
  0x76   : > { %1889 = vmatprep.mubr.msk.f32.mxu0 %vm458_vm0, %v214_v27  ;;  %1953 = vmatprep.mubr.msk.f32.mxu1 %vm458_vm0, %v342_v28  ;;  %v371_v26 = vld [vmem:[%s2176_s26 + $0x610] sm:$0xff]  ;;  %v246_v27 = vld [vmem:[%s2176_s26 + $0x228] sm:$0xff] }
  0x77   : > { %v374_v28 = vld [vmem:[%s2176_s26 + $0x628] sm:$0xff] }
  0x79   : > { %998 = vmatmul.mubr.f32.gmra.mxu0 %v213_v29  ;;  %1318 = vmatmul.mubr.f32.gmra.mxu1 %v341_v30  ;;  %v245_v29 = vld [vmem:[%s2176_s26 + $0x220] sm:$0xff] }
  0x7a   : > { %1890 = vmatprep.mubr.msk.f32.mxu0 %vm458_vm0, %v216_v31  ;;  %1954 = vmatprep.mubr.msk.f32.mxu1 %vm458_vm0, %v344_v32  ;;  %v373_v30 = vld [vmem:[%s2176_s26 + $0x620] sm:$0xff]  ;;  %v248_v31 = vld [vmem:[%s2176_s26 + $0x238] sm:$0xff] }
  0x7b   : > { %v376_v32 = vld [vmem:[%s2176_s26 + $0x638] sm:$0xff] }
  0x7d   : > { %1003 = vmatmul.mubr.f32.gmra.mxu0 %v215_v33  ;;  %1323 = vmatmul.mubr.f32.gmra.mxu1 %v343_v34  ;;  %v247_v33 = vld [vmem:[%s2176_s26 + $0x230] sm:$0xff] }
  0x7e   : > { %1891 = vmatprep.mubr.msk.f32.mxu0 %vm458_vm0, %v218_v35  ;;  %1955 = vmatprep.mubr.msk.f32.mxu1 %vm458_vm0, %v346_v36  ;;  %v375_v34 = vld [vmem:[%s2176_s26 + $0x630] sm:$0xff]  ;;  %v250_v35 = vld [vmem:[%s2176_s26 + $0x248] sm:$0xff] }
  0x7f   : > { %v378_v36 = vld [vmem:[%s2176_s26 + $0x648] sm:$0xff] }
  0x81   : > { %1008 = vmatmul.mubr.f32.gmra.mxu0 %v217_v37  ;;  %1328 = vmatmul.mubr.f32.gmra.mxu1 %v345_v38  ;;  %v249_v37 = vld [vmem:[%s2176_s26 + $0x240] sm:$0xff] }
  0x82   : > { %1892 = vmatprep.mubr.msk.f32.mxu0 %vm458_vm0, %v220_v39  ;;  %1956 = vmatprep.mubr.msk.f32.mxu1 %vm458_vm0, %v348_v40  ;;  %v377_v38 = vld [vmem:[%s2176_s26 + $0x640] sm:$0xff]  ;;  %v252_v39 = vld [vmem:[%s2176_s26 + $0x258] sm:$0xff] }
  0x83   : > { %v380_v40 = vld [vmem:[%s2176_s26 + $0x658] sm:$0xff] }
  0x85   : > { %1013 = vmatmul.mubr.f32.gmra.mxu0 %v219_v41  ;;  %1333 = vmatmul.mubr.f32.gmra.mxu1 %v347_v42  ;;  %v251_v41 = vld [vmem:[%s2176_s26 + $0x250] sm:$0xff] }
  0x86   : > { %1893 = vmatprep.mubr.msk.f32.mxu0 %vm458_vm0, %v222_v43  ;;  %1957 = vmatprep.mubr.msk.f32.mxu1 %vm458_vm0, %v350_v44  ;;  %v379_v42 = vld [vmem:[%s2176_s26 + $0x650] sm:$0xff]  ;;  %v254_v43 = vld [vmem:[%s2176_s26 + $0x268] sm:$0xff] }
  0x87   : > { %v382_v44 = vld [vmem:[%s2176_s26 + $0x668] sm:$0xff] }
  0x89   : > { %1018 = vmatmul.mubr.f32.gmra.mxu0 %v221_v45  ;;  %1338 = vmatmul.mubr.f32.gmra.mxu1 %v349_v46  ;;  %v253_v45 = vld [vmem:[%s2176_s26 + $0x260] sm:$0xff] }
  0x8a   : > { %1894 = vmatprep.mubr.msk.f32.mxu0 %vm458_vm0, %v224_v47  ;;  %1958 = vmatprep.mubr.msk.f32.mxu1 %vm458_vm0, %v352_v48  ;;  %v381_v46 = vld [vmem:[%s2176_s26 + $0x660] sm:$0xff]  ;;  %v256_v47 = vld [vmem:[%s2176_s26 + $0x278] sm:$0xff] }
  0x8b   : > { %v384_v48 = vld [vmem:[%s2176_s26 + $0x678] sm:$0xff] }
  0x8d   : > { %1023 = vmatmul.mubr.f32.gmra.mxu0 %v223_v49  ;;  %1343 = vmatmul.mubr.f32.gmra.mxu1 %v351_v50  ;;  %v255_v49 = vld [vmem:[%s2176_s26 + $0x270] sm:$0xff] }
  0x8e   : > { %1895 = vmatprep.mubr.msk.f32.mxu0 %vm458_vm0, %v226_v51  ;;  %1959 = vmatprep.mubr.msk.f32.mxu1 %vm458_vm0, %v354_v52  ;;  %v383_v50 = vld [vmem:[%s2176_s26 + $0x670] sm:$0xff]  ;;  %v258_v51 = vld [vmem:[%s2176_s26 + $0x288] sm:$0xff] }
  0x8f   : > { %v386_v52 = vld [vmem:[%s2176_s26 + $0x688] sm:$0xff] }
  0x91   : > { %1028 = vmatmul.mubr.f32.gmra.mxu0 %v225_v53  ;;  %1348 = vmatmul.mubr.f32.gmra.mxu1 %v353_v54  ;;  %v257_v53 = vld [vmem:[%s2176_s26 + $0x280] sm:$0xff] }
  0x92   : > { %1896 = vmatprep.mubr.msk.f32.mxu0 %vm458_vm0, %v228_v55  ;;  %1960 = vmatprep.mubr.msk.f32.mxu1 %vm458_vm0, %v356_v56  ;;  %v385_v54 = vld [vmem:[%s2176_s26 + $0x680] sm:$0xff]  ;;  %v260_v55 = vld [vmem:[%s2176_s26 + $0x298] sm:$0xff] }
  0x93   : > { %v388_v56 = vld [vmem:[%s2176_s26 + $0x698] sm:$0xff] }
  0x95   : > { %1033 = vmatmul.mubr.f32.gmra.mxu0 %v227_v57  ;;  %1353 = vmatmul.mubr.f32.gmra.mxu1 %v355_v58  ;;  %v259_v57 = vld [vmem:[%s2176_s26 + $0x290] sm:$0xff] }
  0x96   : > { %1897 = vmatprep.mubr.msk.f32.mxu0 %vm458_vm0, %v230_v59  ;;  %1961 = vmatprep.mubr.msk.f32.mxu1 %vm458_vm0, %v358_v60  ;;  %v387_v58 = vld [vmem:[%s2176_s26 + $0x690] sm:$0xff]  ;;  %v262_v59 = vld [vmem:[%s2176_s26 + $0x2a8] sm:$0xff] }
  0x97   : > { %v390_v60 = vld [vmem:[%s2176_s26 + $0x6a8] sm:$0xff] }
  0x99   : > { %1038 = vmatmul.mubr.f32.gmra.mxu0 %v229_v61  ;;  %1358 = vmatmul.mubr.f32.gmra.mxu1 %v357_v62  ;;  %v261_v61 = vld [vmem:[%s2176_s26 + $0x2a0] sm:$0xff] }
  0x9a   : > { %1898 = vmatprep.mubr.msk.f32.mxu0 %vm458_vm0, %v232_v63  ;;  %1962 = vmatprep.mubr.msk.f32.mxu1 %vm458_vm0, %v360_v0  ;;  %v389_v62 = vld [vmem:[%s2176_s26 + $0x6a0] sm:$0xff]  ;;  %v264_v63 = vld [vmem:[%s2176_s26 + $0x2b8] sm:$0xff] }
  0x9b   : > { %v392_v0 = vld [vmem:[%s2176_s26 + $0x6b8] sm:$0xff] }
  0x9d   : > { %1043 = vmatmul.mubr.f32.gmra.mxu0 %v231_v1  ;;  %1363 = vmatmul.mubr.f32.gmra.mxu1 %v359_v2  ;;  %v263_v1 = vld [vmem:[%s2176_s26 + $0x2b0] sm:$0xff] }
  0x9e   : > { %1899 = vmatprep.mubr.msk.f32.mxu0 %vm458_vm0, %v234_v3  ;;  %1963 = vmatprep.mubr.msk.f32.mxu1 %vm458_vm0, %v362_v4  ;;  %v391_v2 = vld [vmem:[%s2176_s26 + $0x6b0] sm:$0xff]  ;;  %v266_v3 = vld [vmem:[%s2176_s26 + $0x2c8] sm:$0xff] }
  0x9f   : > { %v394_v4 = vld [vmem:[%s2176_s26 + $0x6c8] sm:$0xff] }
  0xa1   : > { %1048 = vmatmul.mubr.f32.gmra.mxu0 %v233_v5  ;;  %1368 = vmatmul.mubr.f32.gmra.mxu1 %v361_v6  ;;  %v265_v5 = vld [vmem:[%s2176_s26 + $0x2c0] sm:$0xff] }
  0xa2   : > { %1900 = vmatprep.mubr.msk.f32.mxu0 %vm458_vm0, %v236_v7  ;;  %1964 = vmatprep.mubr.msk.f32.mxu1 %vm458_vm0, %v364_v8  ;;  %v393_v6 = vld [vmem:[%s2176_s26 + $0x6c0] sm:$0xff]  ;;  %v268_v7 = vld [vmem:[%s2176_s26 + $0x2d8] sm:$0xff] }
  0xa3   : > { %v396_v8 = vld [vmem:[%s2176_s26 + $0x6d8] sm:$0xff] }
  0xa5   : > { %1053 = vmatmul.mubr.f32.gmra.mxu0 %v235_v9  ;;  %1373 = vmatmul.mubr.f32.gmra.mxu1 %v363_v10  ;;  %v267_v9 = vld [vmem:[%s2176_s26 + $0x2d0] sm:$0xff] }
  0xa6   : > { %1901 = vmatprep.mubr.msk.f32.mxu0 %vm458_vm0, %v238_v11  ;;  %1965 = vmatprep.mubr.msk.f32.mxu1 %vm458_vm0, %v366_v12  ;;  %v395_v10 = vld [vmem:[%s2176_s26 + $0x6d0] sm:$0xff]  ;;  %v270_v11 = vld [vmem:[%s2176_s26 + $0x2e8] sm:$0xff] }
  0xa7   : > { %v398_v12 = vld [vmem:[%s2176_s26 + $0x6e8] sm:$0xff] }
  0xa9   : > { %1058 = vmatmul.mubr.f32.gmra.mxu0 %v237_v13  ;;  %1378 = vmatmul.mubr.f32.gmra.mxu1 %v365_v14  ;;  %v269_v13 = vld [vmem:[%s2176_s26 + $0x2e0] sm:$0xff] }
  0xaa   : > { %1902 = vmatprep.mubr.msk.f32.mxu0 %vm458_vm0, %v240_v15  ;;  %1966 = vmatprep.mubr.msk.f32.mxu1 %vm458_vm0, %v368_v16  ;;  %v397_v14 = vld [vmem:[%s2176_s26 + $0x6e0] sm:$0xff]  ;;  %v272_v15 = vld [vmem:[%s2176_s26 + $0x2f8] sm:$0xff] }
  0xab   : > { %v400_v16 = vld [vmem:[%s2176_s26 + $0x6f8] sm:$0xff] }
  0xad   : > { %1063 = vmatmul.mubr.f32.gmra.mxu0 %v239_v17  ;;  %1383 = vmatmul.mubr.f32.gmra.mxu1 %v367_v18  ;;  %v271_v17 = vld [vmem:[%s2176_s26 + $0x2f0] sm:$0xff] }
  0xae   : > { %1903 = vmatprep.mubr.msk.f32.mxu0 %vm458_vm0, %v242_v19  ;;  %1967 = vmatprep.mubr.msk.f32.mxu1 %vm458_vm0, %v370_v20  ;;  %v399_v18 = vld [vmem:[%s2176_s26 + $0x6f0] sm:$0xff]  ;;  %v274_v19 = vld [vmem:[%s2176_s26 + $0x308] sm:$0xff] }
  0xaf   : > { %v402_v20 = vld [vmem:[%s2176_s26 + $0x708] sm:$0xff] }
  0xb1   : > { %1068 = vmatmul.mubr.f32.gmra.mxu0 %v241_v21  ;;  %1388 = vmatmul.mubr.f32.gmra.mxu1 %v369_v22  ;;  %v273_v21 = vld [vmem:[%s2176_s26 + $0x300] sm:$0xff] }
  0xb2   : > { %1904 = vmatprep.mubr.msk.f32.mxu0 %vm458_vm0, %v244_v23  ;;  %1968 = vmatprep.mubr.msk.f32.mxu1 %vm458_vm0, %v372_v24  ;;  %v401_v22 = vld [vmem:[%s2176_s26 + $0x700] sm:$0xff]  ;;  %v276_v24 = vld [vmem:[%s2176_s26 + $0x318] sm:$0xff] }
  0xb3   : > { %v2482_v23 = vld [vmem:[%s2974_s2] ss:$0 sm:$0xff] }
  0xb5   : > { %1073 = vmatmul.mubr.f32.gmra.mxu0 %v243_v25  ;;  %1393 = vmatmul.mubr.f32.gmra.mxu1 %v371_v26  ;;  %v404_v25 = vld [vmem:[%s2176_s26 + $0x718] sm:$0xff] }
  0xb6   : > { %1905 = vmatprep.mubr.msk.f32.mxu0 %vm458_vm0, %v246_v27  ;;  %1969 = vmatprep.mubr.msk.f32.mxu1 %vm458_vm0, %v374_v28 }
  0xb9   : > { %1078 = vmatmul.mubr.f32.gmra.mxu0 %v245_v29  ;;  %1398 = vmatmul.mubr.f32.gmra.mxu1 %v373_v30  ;;  %v275_v30 = vld [vmem:[%s2176_s26 + $0x310] sm:$0xff] }
  0xba   : > { %1906 = vmatprep.mubr.msk.f32.mxu0 %vm458_vm0, %v248_v31  ;;  %1970 = vmatprep.mubr.msk.f32.mxu1 %vm458_vm0, %v376_v32  ;;  %v403_v31 = vld [vmem:[%s2176_s26 + $0x710] sm:$0xff] }
  0xbd   : > { %1083 = vmatmul.mubr.f32.gmra.mxu0 %v247_v33  ;;  %1403 = vmatmul.mubr.f32.gmra.mxu1 %v375_v34  ;;  %v278_v34 = vld [vmem:[%s2176_s26 + $0x328] sm:$0xff] }
  0xbe   : > { %1907 = vmatprep.mubr.msk.f32.mxu0 %vm458_vm0, %v250_v35  ;;  %1971 = vmatprep.mubr.msk.f32.mxu1 %vm458_vm0, %v378_v36  ;;  %v406_v35 = vld [vmem:[%s2176_s26 + $0x728] sm:$0xff] }
  0xc1   : > { %1088 = vmatmul.mubr.f32.gmra.mxu0 %v249_v37  ;;  %1408 = vmatmul.mubr.f32.gmra.mxu1 %v377_v38 }
  0xc2   : > { %1908 = vmatprep.mubr.msk.f32.mxu0 %vm458_vm0, %v252_v39  ;;  %1972 = vmatprep.mubr.msk.f32.mxu1 %vm458_vm0, %v380_v40 }
  0xc5   : > { %1093 = vmatmul.mubr.f32.gmra.mxu0 %v251_v41  ;;  %1413 = vmatmul.mubr.f32.gmra.mxu1 %v379_v42  ;;  %v277_v42 = vld [vmem:[%s2176_s26 + $0x320] sm:$0xff] }
  0xc6   : > { %1909 = vmatprep.mubr.msk.f32.mxu0 %vm458_vm0, %v254_v43  ;;  %1973 = vmatprep.mubr.msk.f32.mxu1 %vm458_vm0, %v382_v44  ;;  %v405_v43 = vld [vmem:[%s2176_s26 + $0x720] sm:$0xff] }
  0xc9   : > { %1098 = vmatmul.mubr.f32.gmra.mxu0 %v253_v45  ;;  %1418 = vmatmul.mubr.f32.gmra.mxu1 %v381_v46  ;;  %v280_v46 = vld [vmem:[%s2176_s26 + $0x338] sm:$0xff] }
  0xca   : > { %1910 = vmatprep.mubr.msk.f32.mxu0 %vm458_vm0, %v256_v47  ;;  %1974 = vmatprep.mubr.msk.f32.mxu1 %vm458_vm0, %v384_v48  ;;  %v408_v47 = vld [vmem:[%s2176_s26 + $0x738] sm:$0xff] }
  0xcd   : > { %1103 = vmatmul.mubr.f32.gmra.mxu0 %v255_v49  ;;  %1423 = vmatmul.mubr.f32.gmra.mxu1 %v383_v50 }
  0xce   : > { %1911 = vmatprep.mubr.msk.f32.mxu0 %vm458_vm0, %v258_v51  ;;  %1975 = vmatprep.mubr.msk.f32.mxu1 %vm458_vm0, %v386_v52 }
  0xd1   : > { %1108 = vmatmul.mubr.f32.gmra.mxu0 %v257_v53  ;;  %1428 = vmatmul.mubr.f32.gmra.mxu1 %v385_v54  ;;  %v279_v54 = vld [vmem:[%s2176_s26 + $0x330] sm:$0xff] }
  0xd2   : > { %1912 = vmatprep.mubr.msk.f32.mxu0 %vm458_vm0, %v260_v55  ;;  %1976 = vmatprep.mubr.msk.f32.mxu1 %vm458_vm0, %v388_v56  ;;  %v407_v55 = vld [vmem:[%s2176_s26 + $0x730] sm:$0xff] }
  0xd5   : > { %1113 = vmatmul.mubr.f32.gmra.mxu0 %v259_v57  ;;  %1433 = vmatmul.mubr.f32.gmra.mxu1 %v387_v58  ;;  %v282_v58 = vld [vmem:[%s2176_s26 + $0x348] sm:$0xff] }
  0xd6   : > { %1913 = vmatprep.mubr.msk.f32.mxu0 %vm458_vm0, %v262_v59  ;;  %1977 = vmatprep.mubr.msk.f32.mxu1 %vm458_vm0, %v390_v60  ;;  %v410_v59 = vld [vmem:[%s2176_s26 + $0x748] sm:$0xff] }
  0xd9   : > { %1118 = vmatmul.mubr.f32.gmra.mxu0 %v261_v61  ;;  %1438 = vmatmul.mubr.f32.gmra.mxu1 %v389_v62 }
  0xda   : > { %1914 = vmatprep.mubr.msk.f32.mxu0 %vm458_vm0, %v264_v63  ;;  %1978 = vmatprep.mubr.msk.f32.mxu1 %vm458_vm0, %v392_v0 }
  0xdd   : > { %1123 = vmatmul.mubr.f32.gmra.mxu0 %v263_v1  ;;  %1443 = vmatmul.mubr.f32.gmra.mxu1 %v391_v2  ;;  %v281_v2 = vld [vmem:[%s2176_s26 + $0x340] sm:$0xff] }
  0xde   : > { %1915 = vmatprep.mubr.msk.f32.mxu0 %vm458_vm0, %v266_v3  ;;  %1979 = vmatprep.mubr.msk.f32.mxu1 %vm458_vm0, %v394_v4  ;;  %v409_v3 = vld [vmem:[%s2176_s26 + $0x740] sm:$0xff] }
  0xe1   : > { %1128 = vmatmul.mubr.f32.gmra.mxu0 %v265_v5  ;;  %1448 = vmatmul.mubr.f32.gmra.mxu1 %v393_v6  ;;  %v284_v6 = vld [vmem:[%s2176_s26 + $0x358] sm:$0xff] }
  0xe2   : > { %1916 = vmatprep.mubr.msk.f32.mxu0 %vm458_vm0, %v268_v7  ;;  %1980 = vmatprep.mubr.msk.f32.mxu1 %vm458_vm0, %v396_v8  ;;  %v412_v7 = vld [vmem:[%s2176_s26 + $0x758] sm:$0xff] }
  0xe5   : > { %1133 = vmatmul.mubr.f32.gmra.mxu0 %v267_v9  ;;  %1453 = vmatmul.mubr.f32.gmra.mxu1 %v395_v10 }
  0xe6   : > { %1917 = vmatprep.mubr.msk.f32.mxu0 %vm458_vm0, %v270_v11  ;;  %1981 = vmatprep.mubr.msk.f32.mxu1 %vm458_vm0, %v398_v12 }
  0xe9   : > { %1138 = vmatmul.mubr.f32.gmra.mxu0 %v269_v13  ;;  %1458 = vmatmul.mubr.f32.gmra.mxu1 %v397_v14  ;;  %v283_v14 = vld [vmem:[%s2176_s26 + $0x350] sm:$0xff] }
  0xea   : > { %1918 = vmatprep.mubr.msk.f32.mxu0 %vm458_vm0, %v272_v15  ;;  %1982 = vmatprep.mubr.msk.f32.mxu1 %vm458_vm0, %v400_v16  ;;  %v411_v15 = vld [vmem:[%s2176_s26 + $0x750] sm:$0xff] }
  0xed   : > { %1143 = vmatmul.mubr.f32.gmra.mxu0 %v271_v17  ;;  %1463 = vmatmul.mubr.f32.gmra.mxu1 %v399_v18  ;;  %v286_v18 = vld [vmem:[%s2176_s26 + $0x368] sm:$0xff] }
  0xee   : > { %1919 = vmatprep.mubr.msk.f32.mxu0 %vm458_vm0, %v274_v19  ;;  %1983 = vmatprep.mubr.msk.f32.mxu1 %vm458_vm0, %v402_v20  ;;  %v414_v19 = vld [vmem:[%s2176_s26 + $0x768] sm:$0xff] }
  0xf1   : > { %v909_v26 = vpop.f32.mrf.mxu0  ;;  %1148 = vmatmul.mubr.f32.gmra.mxu0 %v273_v21  ;;  %v1229_v27 = vpop.f32.mrf.mxu1  ;;  %1468 = vmatmul.mubr.f32.gmra.mxu1 %v401_v22 }
  0xf2   : > { %v910_v28 = vadd.f32 %v2482_v23, %v909_v26  ;;  %v1230_v29 = vadd.f32 %v2482_v23, %v1229_v27  ;;  %1920 = vmatprep.mubr.msk.f32.mxu0 %vm458_vm0, %v276_v24  ;;  %1984 = vmatprep.mubr.msk.f32.mxu1 %vm458_vm0, %v404_v25  ;;  %v285_v27 = vld [vmem:[%s2176_s26 + $0x360] sm:$0xff] }
  0xf3   : > { %v911_v32 = vpop.f32.mrf.mxu0  ;;  %v1231_v33 = vpop.f32.mrf.mxu1 }
  0xf4   : > { %v1548_v36 = vmax.f32 %v910_v28, 0.0  ;;  %v1612_v37 = vmax.f32 %v1230_v29, 0.0  ;;  %v413_v28 = vld [vmem:[%s2176_s26 + $0x760] sm:$0xff]  ;;  %v416_v32 = vld [vmem:[%s2176_s26 + $0x778] sm:$0xff] }
  0xf5   : > { %v914_v38 = vpop.f32.mrf.mxu0  ;;  %1153 = vmatmul.mubr.f32.gmra.mxu0 %v275_v30  ;;  %v1234_v39 = vpop.f32.mrf.mxu1  ;;  %1473 = vmatmul.mubr.f32.gmra.mxu1 %v403_v31  ;;  %v288_v31 = vld [vmem:[%s2176_s26 + $0x378] sm:$0xff] }
  0xf6   : > { %1676 = vst.msk [vmem:[%s2496_s8] sm:$0xff] %vm458_vm0, %v1548_v36  ;;  %1740 = vst.msk [vmem:[%s2496_s8 + $0x200] sm:$0xff] %vm458_vm0, %v1612_v37  ;;  %v915_v40 = vadd.f32 %v2482_v23, %v914_v38  ;;  %v1235_v41 = vadd.f32 %v2482_v23, %v1234_v39  ;;  %1921 = vmatprep.mubr.msk.f32.mxu0 %vm458_vm0, %v278_v34  ;;  %1985 = vmatprep.mubr.msk.f32.mxu1 %vm458_vm0, %v406_v35  ;;  %v287_v39 = vld [vmem:[%s2176_s26 + $0x370] sm:$0xff] }
  0xf7   : > { %v916_v44 = vpop.f32.mrf.mxu0  ;;  %v1236_v45 = vpop.f32.mrf.mxu1 }
  0xf8   : > { %v1549_v48 = vmax.f32 %v915_v40, 0.0  ;;  %v1613_v49 = vmax.f32 %v1235_v41, 0.0  ;;  %v415_v40 = vld [vmem:[%s2176_s26 + $0x770] sm:$0xff]  ;;  %v418_v44 = vld [vmem:[%s2176_s26 + $0x788] sm:$0xff] }
  0xf9   : > { %v919_v50 = vpop.f32.mrf.mxu0  ;;  %1158 = vmatmul.mubr.f32.gmra.mxu0 %v277_v42  ;;  %v1239_v51 = vpop.f32.mrf.mxu1  ;;  %1478 = vmatmul.mubr.f32.gmra.mxu1 %v405_v43  ;;  %v290_v43 = vld [vmem:[%s2176_s26 + $0x388] sm:$0xff] }
  0xfa   : > { %1677 = vst.msk [vmem:[%s2496_s8 + $0x8] sm:$0xff] %vm458_vm0, %v1549_v48  ;;  %1741 = vst.msk [vmem:[%s2496_s8 + $0x208] sm:$0xff] %vm458_vm0, %v1613_v49  ;;  %v920_v52 = vadd.f32 %v2482_v23, %v919_v50  ;;  %v1240_v53 = vadd.f32 %v2482_v23, %v1239_v51  ;;  %1922 = vmatprep.mubr.msk.f32.mxu0 %vm458_vm0, %v280_v46  ;;  %1986 = vmatprep.mubr.msk.f32.mxu1 %vm458_vm0, %v408_v47  ;;  %v289_v51 = vld [vmem:[%s2176_s26 + $0x380] sm:$0xff] }
  0xfb   : > { %v921_v56 = vpop.f32.mrf.mxu0  ;;  %v1241_v57 = vpop.f32.mrf.mxu1 }
  0xfc   : > { %v1550_v60 = vmax.f32 %v920_v52, 0.0  ;;  %v1614_v61 = vmax.f32 %v1240_v53, 0.0  ;;  %v417_v52 = vld [vmem:[%s2176_s26 + $0x780] sm:$0xff]  ;;  %v420_v56 = vld [vmem:[%s2176_s26 + $0x798] sm:$0xff] }
  0xfd   : > { %v924_v62 = vpop.f32.mrf.mxu0  ;;  %1163 = vmatmul.mubr.f32.gmra.mxu0 %v279_v54  ;;  %v1244_v63 = vpop.f32.mrf.mxu1  ;;  %1483 = vmatmul.mubr.f32.gmra.mxu1 %v407_v55  ;;  %v292_v55 = vld [vmem:[%s2176_s26 + $0x398] sm:$0xff] }
  0xfe   : > { %1678 = vst.msk [vmem:[%s2496_s8 + $0x10] sm:$0xff] %vm458_vm0, %v1550_v60  ;;  %1742 = vst.msk [vmem:[%s2496_s8 + $0x210] sm:$0xff] %vm458_vm0, %v1614_v61  ;;  %v925_v0 = vadd.f32 %v2482_v23, %v924_v62  ;;  %v1245_v1 = vadd.f32 %v2482_v23, %v1244_v63  ;;  %1923 = vmatprep.mubr.msk.f32.mxu0 %vm458_vm0, %v282_v58  ;;  %1987 = vmatprep.mubr.msk.f32.mxu1 %vm458_vm0, %v410_v59  ;;  %v291_v63 = vld [vmem:[%s2176_s26 + $0x390] sm:$0xff] }
  0xff   : > { %v926_v4 = vpop.f32.mrf.mxu0  ;;  %v1246_v5 = vpop.f32.mrf.mxu1 }
 0x100   : > { %v1551_v8 = vmax.f32 %v925_v0, 0.0  ;;  %v1615_v9 = vmax.f32 %v1245_v1, 0.0  ;;  %v419_v0 = vld [vmem:[%s2176_s26 + $0x790] sm:$0xff]  ;;  %v422_v4 = vld [vmem:[%s2176_s26 + $0x7a8] sm:$0xff] }
 0x101   : > { %v929_v10 = vpop.f32.mrf.mxu0  ;;  %1168 = vmatmul.mubr.f32.gmra.mxu0 %v281_v2  ;;  %v1249_v11 = vpop.f32.mrf.mxu1  ;;  %1488 = vmatmul.mubr.f32.gmra.mxu1 %v409_v3  ;;  %v294_v3 = vld [vmem:[%s2176_s26 + $0x3a8] sm:$0xff] }
 0x102   : > { %1679 = vst.msk [vmem:[%s2496_s8 + $0x18] sm:$0xff] %vm458_vm0, %v1551_v8  ;;  %1743 = vst.msk [vmem:[%s2496_s8 + $0x218] sm:$0xff] %vm458_vm0, %v1615_v9  ;;  %v930_v12 = vadd.f32 %v2482_v23, %v929_v10  ;;  %v1250_v13 = vadd.f32 %v2482_v23, %v1249_v11  ;;  %1924 = vmatprep.mubr.msk.f32.mxu0 %vm458_vm0, %v284_v6  ;;  %1988 = vmatprep.mubr.msk.f32.mxu1 %vm458_vm0, %v412_v7  ;;  %v293_v11 = vld [vmem:[%s2176_s26 + $0x3a0] sm:$0xff] }
 0x103   : > { %v931_v16 = vpop.f32.mrf.mxu0  ;;  %v1251_v17 = vpop.f32.mrf.mxu1 }
 0x104   : > { %v1552_v20 = vmax.f32 %v930_v12, 0.0  ;;  %v1616_v21 = vmax.f32 %v1250_v13, 0.0  ;;  %v421_v12 = vld [vmem:[%s2176_s26 + $0x7a0] sm:$0xff]  ;;  %v424_v16 = vld [vmem:[%s2176_s26 + $0x7b8] sm:$0xff] }
 0x105   : > { %v934_v22 = vpop.f32.mrf.mxu0  ;;  %1173 = vmatmul.mubr.f32.gmra.mxu0 %v283_v14  ;;  %v1254_v24 = vpop.f32.mrf.mxu1  ;;  %1493 = vmatmul.mubr.f32.gmra.mxu1 %v411_v15  ;;  %v296_v15 = vld [vmem:[%s2176_s26 + $0x3b8] sm:$0xff] }
 0x106   : > { %1680 = vst.msk [vmem:[%s2496_s8 + $0x20] sm:$0xff] %vm458_vm0, %v1552_v20  ;;  %1744 = vst.msk [vmem:[%s2496_s8 + $0x220] sm:$0xff] %vm458_vm0, %v1616_v21  ;;  %v935_v25 = vadd.f32 %v2482_v23, %v934_v22  ;;  %v1255_v26 = vadd.f32 %v2482_v23, %v1254_v24  ;;  %1925 = vmatprep.mubr.msk.f32.mxu0 %vm458_vm0, %v286_v18  ;;  %1989 = vmatprep.mubr.msk.f32.mxu1 %vm458_vm0, %v414_v19  ;;  %v295_v24 = vld [vmem:[%s2176_s26 + $0x3b0] sm:$0xff] }
 0x107   : > { %v936_v29 = vpop.f32.mrf.mxu0  ;;  %v1256_v30 = vpop.f32.mrf.mxu1 }
 0x108   : > { %v1553_v33 = vmax.f32 %v935_v25, 0.0  ;;  %v1617_v34 = vmax.f32 %v1255_v26, 0.0  ;;  %v423_v25 = vld [vmem:[%s2176_s26 + $0x7b0] sm:$0xff]  ;;  %v426_v29 = vld [vmem:[%s2176_s26 + $0x7c8] sm:$0xff] }
 0x109   : > { %v939_v35 = vpop.f32.mrf.mxu0  ;;  %1178 = vmatmul.mubr.f32.gmra.mxu0 %v285_v27  ;;  %v1259_v36 = vpop.f32.mrf.mxu1  ;;  %1498 = vmatmul.mubr.f32.gmra.mxu1 %v413_v28  ;;  %v298_v28 = vld [vmem:[%s2176_s26 + $0x3c8] sm:$0xff] }
 0x10a   : > { %1681 = vst.msk [vmem:[%s2496_s8 + $0x28] sm:$0xff] %vm458_vm0, %v1553_v33  ;;  %1745 = vst.msk [vmem:[%s2496_s8 + $0x228] sm:$0xff] %vm458_vm0, %v1617_v34  ;;  %v940_v37 = vadd.f32 %v2482_v23, %v939_v35  ;;  %v1260_v38 = vadd.f32 %v2482_v23, %v1259_v36  ;;  %1926 = vmatprep.mubr.msk.f32.mxu0 %vm458_vm0, %v288_v31  ;;  %1990 = vmatprep.mubr.msk.f32.mxu1 %vm458_vm0, %v416_v32  ;;  %v297_v36 = vld [vmem:[%s2176_s26 + $0x3c0] sm:$0xff] }
 0x10b   : > { %v941_v41 = vpop.f32.mrf.mxu0  ;;  %v1261_v42 = vpop.f32.mrf.mxu1 }
 0x10c   : > { %v1554_v45 = vmax.f32 %v940_v37, 0.0  ;;  %v1618_v46 = vmax.f32 %v1260_v38, 0.0  ;;  %v425_v37 = vld [vmem:[%s2176_s26 + $0x7c0] sm:$0xff]  ;;  %v428_v41 = vld [vmem:[%s2176_s26 + $0x7d8] sm:$0xff] }
 0x10d   : > { %v944_v47 = vpop.f32.mrf.mxu0  ;;  %1183 = vmatmul.mubr.f32.gmra.mxu0 %v287_v39  ;;  %v1264_v48 = vpop.f32.mrf.mxu1  ;;  %1503 = vmatmul.mubr.f32.gmra.mxu1 %v415_v40  ;;  %v300_v40 = vld [vmem:[%s2176_s26 + $0x3d8] sm:$0xff] }
 0x10e   : > { %1682 = vst.msk [vmem:[%s2496_s8 + $0x30] sm:$0xff] %vm458_vm0, %v1554_v45  ;;  %1746 = vst.msk [vmem:[%s2496_s8 + $0x230] sm:$0xff] %vm458_vm0, %v1618_v46  ;;  %v945_v49 = vadd.f32 %v2482_v23, %v944_v47  ;;  %v1265_v50 = vadd.f32 %v2482_v23, %v1264_v48  ;;  %1927 = vmatprep.mubr.msk.f32.mxu0 %vm458_vm0, %v290_v43  ;;  %1991 = vmatprep.mubr.msk.f32.mxu1 %vm458_vm0, %v418_v44  ;;  %v299_v48 = vld [vmem:[%s2176_s26 + $0x3d0] sm:$0xff] }
 0x10f   : > { %v946_v53 = vpop.f32.mrf.mxu0  ;;  %v1266_v54 = vpop.f32.mrf.mxu1 }
 0x110   : > { %v1555_v57 = vmax.f32 %v945_v49, 0.0  ;;  %v1619_v58 = vmax.f32 %v1265_v50, 0.0  ;;  %v427_v49 = vld [vmem:[%s2176_s26 + $0x7d0] sm:$0xff]  ;;  %v430_v53 = vld [vmem:[%s2176_s26 + $0x7e8] sm:$0xff] }
 0x111   : > { %v949_v59 = vpop.f32.mrf.mxu0  ;;  %1188 = vmatmul.mubr.f32.gmra.mxu0 %v289_v51  ;;  %v1269_v60 = vpop.f32.mrf.mxu1  ;;  %1508 = vmatmul.mubr.f32.gmra.mxu1 %v417_v52  ;;  %v302_v52 = vld [vmem:[%s2176_s26 + $0x3e8] sm:$0xff] }
 0x112   : > { %1683 = vst.msk [vmem:[%s2496_s8 + $0x38] sm:$0xff] %vm458_vm0, %v1555_v57  ;;  %1747 = vst.msk [vmem:[%s2496_s8 + $0x238] sm:$0xff] %vm458_vm0, %v1619_v58  ;;  %v950_v61 = vadd.f32 %v2482_v23, %v949_v59  ;;  %v1270_v62 = vadd.f32 %v2482_v23, %v1269_v60  ;;  %1928 = vmatprep.mubr.msk.f32.mxu0 %vm458_vm0, %v292_v55  ;;  %1992 = vmatprep.mubr.msk.f32.mxu1 %vm458_vm0, %v420_v56  ;;  %v301_v60 = vld [vmem:[%s2176_s26 + $0x3e0] sm:$0xff] }
 0x113   : > { %v951_v1 = vpop.f32.mrf.mxu0  ;;  %v1271_v2 = vpop.f32.mrf.mxu1 }
 0x114   : > { %v1556_v5 = vmax.f32 %v950_v61, 0.0  ;;  %v1620_v6 = vmax.f32 %v1270_v62, 0.0  ;;  %v429_v61 = vld [vmem:[%s2176_s26 + $0x7e0] sm:$0xff]  ;;  %v432_v1 = vld [vmem:[%s2176_s26 + $0x7f8] sm:$0xff] }
 0x115   : > { %v954_v7 = vpop.f32.mrf.mxu0  ;;  %1193 = vmatmul.mubr.f32.gmra.mxu0 %v291_v63  ;;  %v1274_v8 = vpop.f32.mrf.mxu1  ;;  %1513 = vmatmul.mubr.f32.gmra.mxu1 %v419_v0  ;;  %v304_v0 = vld [vmem:[%s2176_s26 + $0x3f8] sm:$0xff] }
 0x116   : > { %1684 = vst.msk [vmem:[%s2496_s8 + $0x40] sm:$0xff] %vm458_vm0, %v1556_v5  ;;  %1748 = vst.msk [vmem:[%s2496_s8 + $0x240] sm:$0xff] %vm458_vm0, %v1620_v6  ;;  %v955_v9 = vadd.f32 %v2482_v23, %v954_v7  ;;  %v1275_v10 = vadd.f32 %v2482_v23, %v1274_v8  ;;  %1929 = vmatprep.mubr.msk.f32.mxu0 %vm458_vm0, %v294_v3  ;;  %1993 = vmatprep.mubr.msk.f32.mxu1 %vm458_vm0, %v422_v4  ;;  %v303_v8 = vld [vmem:[%s2176_s26 + $0x3f0] sm:$0xff] }
 0x117   : > { %v956_v13 = vpop.f32.mrf.mxu0  ;;  %v1276_v14 = vpop.f32.mrf.mxu1 }
 0x118   : > { %v1557_v17 = vmax.f32 %v955_v9, 0.0  ;;  %v1621_v18 = vmax.f32 %v1275_v10, 0.0  ;;  %v431_v9 = vld [vmem:[%s2176_s26 + $0x7f0] sm:$0xff] }
 0x119   : > { %v959_v19 = vpop.f32.mrf.mxu0  ;;  %1198 = vmatmul.mubr.f32.gmra.mxu0 %v293_v11  ;;  %v1279_v20 = vpop.f32.mrf.mxu1  ;;  %1518 = vmatmul.mubr.f32.gmra.mxu1 %v421_v12 }
 0x11a   : > { %1685 = vst.msk [vmem:[%s2496_s8 + $0x48] sm:$0xff] %vm458_vm0, %v1557_v17  ;;  %1749 = vst.msk [vmem:[%s2496_s8 + $0x248] sm:$0xff] %vm458_vm0, %v1621_v18  ;;  %v960_v21 = vadd.f32 %v2482_v23, %v959_v19  ;;  %v1280_v22 = vadd.f32 %v2482_v23, %v1279_v20  ;;  %1930 = vmatprep.mubr.msk.f32.mxu0 %vm458_vm0, %v296_v15  ;;  %1994 = vmatprep.mubr.msk.f32.mxu1 %vm458_vm0, %v424_v16 }
 0x11b   : > { %v961_v26 = vpop.f32.mrf.mxu0  ;;  %v1281_v27 = vpop.f32.mrf.mxu1 }
 0x11c   : > { %v1558_v30 = vmax.f32 %v960_v21, 0.0  ;;  %v1622_v31 = vmax.f32 %v1280_v22, 0.0 }
 0x11d   : > { %v964_v32 = vpop.f32.mrf.mxu0  ;;  %1203 = vmatmul.mubr.f32.gmra.mxu0 %v295_v24  ;;  %v1284_v33 = vpop.f32.mrf.mxu1  ;;  %1523 = vmatmul.mubr.f32.gmra.mxu1 %v423_v25 }
 0x11e   : > { %1686 = vst.msk [vmem:[%s2496_s8 + $0x50] sm:$0xff] %vm458_vm0, %v1558_v30  ;;  %1750 = vst.msk [vmem:[%s2496_s8 + $0x250] sm:$0xff] %vm458_vm0, %v1622_v31  ;;  %v965_v34 = vadd.f32 %v2482_v23, %v964_v32  ;;  %v1285_v35 = vadd.f32 %v2482_v23, %v1284_v33  ;;  %1931 = vmatprep.mubr.msk.f32.mxu0 %vm458_vm0, %v298_v28  ;;  %1995 = vmatprep.mubr.msk.f32.mxu1 %vm458_vm0, %v426_v29 }
 0x11f   : > { %v966_v38 = vpop.f32.mrf.mxu0  ;;  %v1286_v39 = vpop.f32.mrf.mxu1 }
 0x120   : > { %v1559_v42 = vmax.f32 %v965_v34, 0.0  ;;  %v1623_v43 = vmax.f32 %v1285_v35, 0.0 }
 0x121   : > { %v969_v44 = vpop.f32.mrf.mxu0  ;;  %1208 = vmatmul.mubr.f32.gmra.mxu0 %v297_v36  ;;  %v1289_v45 = vpop.f32.mrf.mxu1  ;;  %1528 = vmatmul.mubr.f32.gmra.mxu1 %v425_v37 }
 0x122   : > { %1687 = vst.msk [vmem:[%s2496_s8 + $0x58] sm:$0xff] %vm458_vm0, %v1559_v42  ;;  %1751 = vst.msk [vmem:[%s2496_s8 + $0x258] sm:$0xff] %vm458_vm0, %v1623_v43  ;;  %v970_v46 = vadd.f32 %v2482_v23, %v969_v44  ;;  %v1290_v47 = vadd.f32 %v2482_v23, %v1289_v45  ;;  %1932 = vmatprep.mubr.msk.f32.mxu0 %vm458_vm0, %v300_v40  ;;  %1996 = vmatprep.mubr.msk.f32.mxu1 %vm458_vm0, %v428_v41 }
 0x123   : > { %v971_v50 = vpop.f32.mrf.mxu0  ;;  %v1291_v51 = vpop.f32.mrf.mxu1 }
 0x124   : > { %v1560_v54 = vmax.f32 %v970_v46, 0.0  ;;  %v1624_v55 = vmax.f32 %v1290_v47, 0.0 }
 0x125   : > { %v974_v56 = vpop.f32.mrf.mxu0  ;;  %1213 = vmatmul.mubr.f32.gmra.mxu0 %v299_v48  ;;  %v1294_v57 = vpop.f32.mrf.mxu1  ;;  %1533 = vmatmul.mubr.f32.gmra.mxu1 %v427_v49 }
 0x126   : > { %1688 = vst.msk [vmem:[%s2496_s8 + $0x60] sm:$0xff] %vm458_vm0, %v1560_v54  ;;  %1752 = vst.msk [vmem:[%s2496_s8 + $0x260] sm:$0xff] %vm458_vm0, %v1624_v55  ;;  %v975_v58 = vadd.f32 %v2482_v23, %v974_v56  ;;  %v1295_v59 = vadd.f32 %v2482_v23, %v1294_v57  ;;  %1933 = vmatprep.mubr.msk.f32.mxu0 %vm458_vm0, %v302_v52  ;;  %1997 = vmatprep.mubr.msk.f32.mxu1 %vm458_vm0, %v430_v53 }
 0x127   : > { %v976_v62 = vpop.f32.mrf.mxu0  ;;  %v1296_v63 = vpop.f32.mrf.mxu1 }
 0x128   : > { %v1561_v2 = vmax.f32 %v975_v58, 0.0  ;;  %v1625_v3 = vmax.f32 %v1295_v59, 0.0 }
 0x129   : > { %v979_v4 = vpop.f32.mrf.mxu0  ;;  %1218 = vmatmul.mubr.f32.gmra.mxu0 %v301_v60  ;;  %v1299_v5 = vpop.f32.mrf.mxu1  ;;  %1538 = vmatmul.mubr.f32.gmra.mxu1 %v429_v61 }
 0x12a   : > { %1689 = vst.msk [vmem:[%s2496_s8 + $0x68] sm:$0xff] %vm458_vm0, %v1561_v2  ;;  %1753 = vst.msk [vmem:[%s2496_s8 + $0x268] sm:$0xff] %vm458_vm0, %v1625_v3  ;;  %v980_v6 = vadd.f32 %v2482_v23, %v979_v4  ;;  %v1300_v7 = vadd.f32 %v2482_v23, %v1299_v5  ;;  %1934 = vmatprep.mubr.msk.f32.mxu0 %vm458_vm0, %v304_v0  ;;  %1998 = vmatprep.mubr.msk.f32.mxu1 %vm458_vm0, %v432_v1 }
 0x12b   : > { %v981_v10 = vpop.f32.mrf.mxu0  ;;  %v1301_v11 = vpop.f32.mrf.mxu1 }
 0x12c   : > { %v1562_v12 = vmax.f32 %v980_v6, 0.0  ;;  %v1626_v13 = vmax.f32 %v1300_v7, 0.0 }
 0x12d   : > { %v984_v14 = vpop.f32.mrf.mxu0  ;;  %1223 = vmatmul.mubr.f32.gmra.mxu0 %v303_v8  ;;  %v1304_v15 = vpop.f32.mrf.mxu1  ;;  %1543 = vmatmul.mubr.f32.gmra.mxu1 %v431_v9 }
 0x12e   : > { %1690 = vst.msk [vmem:[%s2496_s8 + $0x70] sm:$0xff] %vm458_vm0, %v1562_v12  ;;  %1754 = vst.msk [vmem:[%s2496_s8 + $0x270] sm:$0xff] %vm458_vm0, %v1626_v13  ;;  %v985_v16 = vadd.f32 %v2482_v23, %v984_v14  ;;  %v1305_v17 = vadd.f32 %v2482_v23, %v1304_v15 }
 0x12f   : > { %v986_v18 = vpop.f32.mrf.mxu0  ;;  %v1306_v19 = vpop.f32.mrf.mxu1 }
 0x130   : > { %v1563_v20 = vmax.f32 %v985_v16, 0.0  ;;  %v1627_v21 = vmax.f32 %v1305_v17, 0.0 }
 0x131   : > { %v989_v22 = vpop.f32.mrf.mxu0  ;;  %v1309_v24 = vpop.f32.mrf.mxu1 }
 0x132   : > { %1691 = vst.msk [vmem:[%s2496_s8 + $0x78] sm:$0xff] %vm458_vm0, %v1563_v20  ;;  %1755 = vst.msk [vmem:[%s2496_s8 + $0x278] sm:$0xff] %vm458_vm0, %v1627_v21  ;;  %v990_v25 = vadd.f32 %v2482_v23, %v989_v22  ;;  %v1310_v26 = vadd.f32 %v2482_v23, %v1309_v24 }
 0x133   : > { %v991_v27 = vpop.f32.mrf.mxu0  ;;  %v1311_v28 = vpop.f32.mrf.mxu1 }
 0x134   : > { %v1564_v29 = vmax.f32 %v990_v25, 0.0  ;;  %v1628_v30 = vmax.f32 %v1310_v26, 0.0 }
 0x135   : > { %v994_v31 = vpop.f32.mrf.mxu0  ;;  %v1314_v32 = vpop.f32.mrf.mxu1 }
 0x136   : > { %1692 = vst.msk [vmem:[%s2496_s8 + $0x80] sm:$0xff] %vm458_vm0, %v1564_v29  ;;  %1756 = vst.msk [vmem:[%s2496_s8 + $0x280] sm:$0xff] %vm458_vm0, %v1628_v30  ;;  %v995_v33 = vadd.f32 %v2482_v23, %v994_v31  ;;  %v1315_v34 = vadd.f32 %v2482_v23, %v1314_v32 }
 0x137   : > { %v996_v35 = vpop.f32.mrf.mxu0  ;;  %v1316_v36 = vpop.f32.mrf.mxu1 }
 0x138   : > { %v1565_v37 = vmax.f32 %v995_v33, 0.0  ;;  %v1629_v38 = vmax.f32 %v1315_v34, 0.0 }
 0x139   : > { %v999_v39 = vpop.f32.mrf.mxu0  ;;  %v1319_v40 = vpop.f32.mrf.mxu1 }
 0x13a   : > { %1693 = vst.msk [vmem:[%s2496_s8 + $0x88] sm:$0xff] %vm458_vm0, %v1565_v37  ;;  %1757 = vst.msk [vmem:[%s2496_s8 + $0x288] sm:$0xff] %vm458_vm0, %v1629_v38  ;;  %v1000_v41 = vadd.f32 %v2482_v23, %v999_v39  ;;  %v1320_v42 = vadd.f32 %v2482_v23, %v1319_v40 }
 0x13b   : > { %v1001_v43 = vpop.f32.mrf.mxu0  ;;  %v1321_v44 = vpop.f32.mrf.mxu1 }
 0x13c   : > { %v1566_v45 = vmax.f32 %v1000_v41, 0.0  ;;  %v1630_v46 = vmax.f32 %v1320_v42, 0.0 }
 0x13d   : > { %v1004_v47 = vpop.f32.mrf.mxu0  ;;  %v1324_v48 = vpop.f32.mrf.mxu1 }
 0x13e   : > { %1694 = vst.msk [vmem:[%s2496_s8 + $0x90] sm:$0xff] %vm458_vm0, %v1566_v45  ;;  %1758 = vst.msk [vmem:[%s2496_s8 + $0x290] sm:$0xff] %vm458_vm0, %v1630_v46  ;;  %v1005_v49 = vadd.f32 %v2482_v23, %v1004_v47  ;;  %v1325_v50 = vadd.f32 %v2482_v23, %v1324_v48 }
 0x13f   : > { %v1006_v51 = vpop.f32.mrf.mxu0  ;;  %v1326_v52 = vpop.f32.mrf.mxu1 }
 0x140   : > { %v1567_v53 = vmax.f32 %v1005_v49, 0.0  ;;  %v1631_v54 = vmax.f32 %v1325_v50, 0.0 }
 0x141   : > { %v1009_v55 = vpop.f32.mrf.mxu0  ;;  %v1329_v56 = vpop.f32.mrf.mxu1 }
 0x142   : > { %1695 = vst.msk [vmem:[%s2496_s8 + $0x98] sm:$0xff] %vm458_vm0, %v1567_v53  ;;  %1759 = vst.msk [vmem:[%s2496_s8 + $0x298] sm:$0xff] %vm458_vm0, %v1631_v54  ;;  %v1010_v57 = vadd.f32 %v2482_v23, %v1009_v55  ;;  %v1330_v58 = vadd.f32 %v2482_v23, %v1329_v56 }
 0x143   : > { %v1011_v59 = vpop.f32.mrf.mxu0  ;;  %v1331_v60 = vpop.f32.mrf.mxu1 }
 0x144   : > { %v1568_v61 = vmax.f32 %v1010_v57, 0.0  ;;  %v1632_v62 = vmax.f32 %v1330_v58, 0.0 }
 0x145   : > { %v1014_v63 = vpop.f32.mrf.mxu0  ;;  %v1334_v0 = vpop.f32.mrf.mxu1 }
 0x146   : > { %1696 = vst.msk [vmem:[%s2496_s8 + $0xa0] sm:$0xff] %vm458_vm0, %v1568_v61  ;;  %1760 = vst.msk [vmem:[%s2496_s8 + $0x2a0] sm:$0xff] %vm458_vm0, %v1632_v62  ;;  %v1015_v1 = vadd.f32 %v2482_v23, %v1014_v63  ;;  %v1335_v2 = vadd.f32 %v2482_v23, %v1334_v0 }
 0x147   : > { %v1016_v3 = vpop.f32.mrf.mxu0  ;;  %v1336_v4 = vpop.f32.mrf.mxu1 }
 0x148   : > { %v1569_v5 = vmax.f32 %v1015_v1, 0.0  ;;  %v1633_v6 = vmax.f32 %v1335_v2, 0.0 }
 0x149   : > { %v1019_v7 = vpop.f32.mrf.mxu0  ;;  %v1339_v8 = vpop.f32.mrf.mxu1 }
 0x14a   : > { %1697 = vst.msk [vmem:[%s2496_s8 + $0xa8] sm:$0xff] %vm458_vm0, %v1569_v5  ;;  %1761 = vst.msk [vmem:[%s2496_s8 + $0x2a8] sm:$0xff] %vm458_vm0, %v1633_v6  ;;  %v1020_v9 = vadd.f32 %v2482_v23, %v1019_v7  ;;  %v1340_v10 = vadd.f32 %v2482_v23, %v1339_v8 }
 0x14b   : > { %v1021_v11 = vpop.f32.mrf.mxu0  ;;  %v1341_v12 = vpop.f32.mrf.mxu1 }
 0x14c   : > { %v1570_v13 = vmax.f32 %v1020_v9, 0.0  ;;  %v1634_v14 = vmax.f32 %v1340_v10, 0.0 }
 0x14d   : > { %v1024_v15 = vpop.f32.mrf.mxu0  ;;  %v1344_v16 = vpop.f32.mrf.mxu1 }
 0x14e   : > { %1698 = vst.msk [vmem:[%s2496_s8 + $0xb0] sm:$0xff] %vm458_vm0, %v1570_v13  ;;  %1762 = vst.msk [vmem:[%s2496_s8 + $0x2b0] sm:$0xff] %vm458_vm0, %v1634_v14  ;;  %v1025_v17 = vadd.f32 %v2482_v23, %v1024_v15  ;;  %v1345_v18 = vadd.f32 %v2482_v23, %v1344_v16 }
 0x14f   : > { %v1026_v19 = vpop.f32.mrf.mxu0  ;;  %v1346_v20 = vpop.f32.mrf.mxu1 }
 0x150   : > { %v1571_v21 = vmax.f32 %v1025_v17, 0.0  ;;  %v1635_v22 = vmax.f32 %v1345_v18, 0.0 }
 0x151   : > { %v1029_v24 = vpop.f32.mrf.mxu0  ;;  %v1349_v25 = vpop.f32.mrf.mxu1 }
 0x152   : > { %1699 = vst.msk [vmem:[%s2496_s8 + $0xb8] sm:$0xff] %vm458_vm0, %v1571_v21  ;;  %1763 = vst.msk [vmem:[%s2496_s8 + $0x2b8] sm:$0xff] %vm458_vm0, %v1635_v22  ;;  %v1030_v26 = vadd.f32 %v2482_v23, %v1029_v24  ;;  %v1350_v27 = vadd.f32 %v2482_v23, %v1349_v25 }
 0x153   : > { %v1031_v28 = vpop.f32.mrf.mxu0  ;;  %v1351_v29 = vpop.f32.mrf.mxu1 }
 0x154   : > { %v1572_v30 = vmax.f32 %v1030_v26, 0.0  ;;  %v1636_v31 = vmax.f32 %v1350_v27, 0.0 }
 0x155   : > { %v1034_v32 = vpop.f32.mrf.mxu0  ;;  %v1354_v33 = vpop.f32.mrf.mxu1 }
 0x156   : > { %1700 = vst.msk [vmem:[%s2496_s8 + $0xc0] sm:$0xff] %vm458_vm0, %v1572_v30  ;;  %1764 = vst.msk [vmem:[%s2496_s8 + $0x2c0] sm:$0xff] %vm458_vm0, %v1636_v31  ;;  %v1035_v34 = vadd.f32 %v2482_v23, %v1034_v32  ;;  %v1355_v35 = vadd.f32 %v2482_v23, %v1354_v33 }
 0x157   : > { %v1036_v36 = vpop.f32.mrf.mxu0  ;;  %v1356_v37 = vpop.f32.mrf.mxu1 }
 0x158   : > { %v1573_v38 = vmax.f32 %v1035_v34, 0.0  ;;  %v1637_v39 = vmax.f32 %v1355_v35, 0.0 }
 0x159   : > { %v1039_v40 = vpop.f32.mrf.mxu0  ;;  %v1359_v41 = vpop.f32.mrf.mxu1 }
 0x15a   : > { %1701 = vst.msk [vmem:[%s2496_s8 + $0xc8] sm:$0xff] %vm458_vm0, %v1573_v38  ;;  %1765 = vst.msk [vmem:[%s2496_s8 + $0x2c8] sm:$0xff] %vm458_vm0, %v1637_v39  ;;  %v1040_v42 = vadd.f32 %v2482_v23, %v1039_v40  ;;  %v1360_v43 = vadd.f32 %v2482_v23, %v1359_v41 }
 0x15b   : > { %v1041_v44 = vpop.f32.mrf.mxu0  ;;  %v1361_v45 = vpop.f32.mrf.mxu1 }
 0x15c   : > { %v1574_v46 = vmax.f32 %v1040_v42, 0.0  ;;  %v1638_v47 = vmax.f32 %v1360_v43, 0.0 }
 0x15d   : > { %v1044_v48 = vpop.f32.mrf.mxu0  ;;  %v1364_v49 = vpop.f32.mrf.mxu1 }
 0x15e   : > { %1702 = vst.msk [vmem:[%s2496_s8 + $0xd0] sm:$0xff] %vm458_vm0, %v1574_v46  ;;  %1766 = vst.msk [vmem:[%s2496_s8 + $0x2d0] sm:$0xff] %vm458_vm0, %v1638_v47  ;;  %v1045_v50 = vadd.f32 %v2482_v23, %v1044_v48  ;;  %v1365_v51 = vadd.f32 %v2482_v23, %v1364_v49 }
 0x15f   : > { %v1046_v52 = vpop.f32.mrf.mxu0  ;;  %v1366_v53 = vpop.f32.mrf.mxu1 }
 0x160   : > { %v1575_v54 = vmax.f32 %v1045_v50, 0.0  ;;  %v1639_v55 = vmax.f32 %v1365_v51, 0.0 }
 0x161   : > { %v1049_v56 = vpop.f32.mrf.mxu0  ;;  %v1369_v57 = vpop.f32.mrf.mxu1 }
 0x162   : > { %1703 = vst.msk [vmem:[%s2496_s8 + $0xd8] sm:$0xff] %vm458_vm0, %v1575_v54  ;;  %1767 = vst.msk [vmem:[%s2496_s8 + $0x2d8] sm:$0xff] %vm458_vm0, %v1639_v55  ;;  %v1050_v58 = vadd.f32 %v2482_v23, %v1049_v56  ;;  %v1370_v59 = vadd.f32 %v2482_v23, %v1369_v57 }
 0x163   : > { %v1051_v60 = vpop.f32.mrf.mxu0  ;;  %v1371_v61 = vpop.f32.mrf.mxu1 }
 0x164   : > { %v1576_v62 = vmax.f32 %v1050_v58, 0.0  ;;  %v1640_v63 = vmax.f32 %v1370_v59, 0.0 }
 0x165   : > { %v1054_v0 = vpop.f32.mrf.mxu0  ;;  %v1374_v1 = vpop.f32.mrf.mxu1 }
 0x166   : > { %1704 = vst.msk [vmem:[%s2496_s8 + $0xe0] sm:$0xff] %vm458_vm0, %v1576_v62  ;;  %1768 = vst.msk [vmem:[%s2496_s8 + $0x2e0] sm:$0xff] %vm458_vm0, %v1640_v63  ;;  %v1055_v2 = vadd.f32 %v2482_v23, %v1054_v0  ;;  %v1375_v3 = vadd.f32 %v2482_v23, %v1374_v1 }
 0x167   : > { %v1056_v4 = vpop.f32.mrf.mxu0  ;;  %v1376_v5 = vpop.f32.mrf.mxu1 }
 0x168   : > { %v1577_v6 = vmax.f32 %v1055_v2, 0.0  ;;  %v1641_v7 = vmax.f32 %v1375_v3, 0.0 }
 0x169   : > { %v1059_v8 = vpop.f32.mrf.mxu0  ;;  %v1379_v9 = vpop.f32.mrf.mxu1 }
 0x16a   : > { %1705 = vst.msk [vmem:[%s2496_s8 + $0xe8] sm:$0xff] %vm458_vm0, %v1577_v6  ;;  %1769 = vst.msk [vmem:[%s2496_s8 + $0x2e8] sm:$0xff] %vm458_vm0, %v1641_v7  ;;  %v1060_v10 = vadd.f32 %v2482_v23, %v1059_v8  ;;  %v1380_v11 = vadd.f32 %v2482_v23, %v1379_v9 }
 0x16b   : > { %v1061_v12 = vpop.f32.mrf.mxu0  ;;  %v1381_v13 = vpop.f32.mrf.mxu1 }
 0x16c   : > { %v1578_v14 = vmax.f32 %v1060_v10, 0.0  ;;  %v1642_v15 = vmax.f32 %v1380_v11, 0.0 }
 0x16d   : > { %v1064_v16 = vpop.f32.mrf.mxu0  ;;  %v1384_v17 = vpop.f32.mrf.mxu1 }
 0x16e   : > { %1706 = vst.msk [vmem:[%s2496_s8 + $0xf0] sm:$0xff] %vm458_vm0, %v1578_v14  ;;  %1770 = vst.msk [vmem:[%s2496_s8 + $0x2f0] sm:$0xff] %vm458_vm0, %v1642_v15  ;;  %v1065_v18 = vadd.f32 %v2482_v23, %v1064_v16  ;;  %v1385_v19 = vadd.f32 %v2482_v23, %v1384_v17 }
 0x16f   : > { %v1066_v20 = vpop.f32.mrf.mxu0  ;;  %v1386_v21 = vpop.f32.mrf.mxu1 }
 0x170   : > { %v1579_v22 = vmax.f32 %v1065_v18, 0.0  ;;  %v1643_v24 = vmax.f32 %v1385_v19, 0.0  ;;  %v2817_v19 = vld [vmem:[%s2974_s2] ss:$0 sm:$0xff] }
 0x171   : > { %v1069_v25 = vpop.f32.mrf.mxu0  ;;  %v1389_v26 = vpop.f32.mrf.mxu1 }
 0x172   : > { %1707 = vst.msk [vmem:[%s2496_s8 + $0xf8] sm:$0xff] %vm458_vm0, %v1579_v22  ;;  %1771 = vst.msk [vmem:[%s2496_s8 + $0x2f8] sm:$0xff] %vm458_vm0, %v1643_v24  ;;  %v1070_v27 = vadd.f32 %v2482_v23, %v1069_v25  ;;  %v1390_v28 = vadd.f32 %v2482_v23, %v1389_v26 }
 0x173   : > { %v1071_v29 = vpop.f32.mrf.mxu0  ;;  %v1391_v30 = vpop.f32.mrf.mxu1 }
 0x174   : > { %v1580_v31 = vmax.f32 %v1070_v27, 0.0  ;;  %v1644_v32 = vmax.f32 %v1390_v28, 0.0 }
 0x175   : > { %v1074_v33 = vpop.f32.mrf.mxu0  ;;  %v1394_v34 = vpop.f32.mrf.mxu1 }
 0x176   : > { %1708 = vst.msk [vmem:[%s2496_s8 + $0x100] sm:$0xff] %vm458_vm0, %v1580_v31  ;;  %1772 = vst.msk [vmem:[%s2496_s8 + $0x300] sm:$0xff] %vm458_vm0, %v1644_v32  ;;  %v1075_v35 = vadd.f32 %v2482_v23, %v1074_v33  ;;  %v1395_v36 = vadd.f32 %v2482_v23, %v1394_v34 }
 0x177   : > { %v1076_v37 = vpop.f32.mrf.mxu0  ;;  %v1396_v38 = vpop.f32.mrf.mxu1 }
 0x178   : > { %v1581_v39 = vmax.f32 %v1075_v35, 0.0  ;;  %v1645_v40 = vmax.f32 %v1395_v36, 0.0 }
 0x179   : > { %v1079_v41 = vpop.f32.mrf.mxu0  ;;  %v1399_v42 = vpop.f32.mrf.mxu1 }
 0x17a   : > { %1709 = vst.msk [vmem:[%s2496_s8 + $0x108] sm:$0xff] %vm458_vm0, %v1581_v39  ;;  %1773 = vst.msk [vmem:[%s2496_s8 + $0x308] sm:$0xff] %vm458_vm0, %v1645_v40  ;;  %v1080_v43 = vadd.f32 %v2482_v23, %v1079_v41  ;;  %v1400_v44 = vadd.f32 %v2482_v23, %v1399_v42 }
 0x17b   : > { %v1081_v45 = vpop.f32.mrf.mxu0  ;;  %v1401_v46 = vpop.f32.mrf.mxu1 }
 0x17c   : > { %v1582_v47 = vmax.f32 %v1080_v43, 0.0  ;;  %v1646_v48 = vmax.f32 %v1400_v44, 0.0 }
 0x17d   : > { %v1084_v49 = vpop.f32.mrf.mxu0  ;;  %v1404_v50 = vpop.f32.mrf.mxu1 }
 0x17e   : > { %1710 = vst.msk [vmem:[%s2496_s8 + $0x110] sm:$0xff] %vm458_vm0, %v1582_v47  ;;  %1774 = vst.msk [vmem:[%s2496_s8 + $0x310] sm:$0xff] %vm458_vm0, %v1646_v48  ;;  %v1085_v51 = vadd.f32 %v2482_v23, %v1084_v49  ;;  %v1405_v52 = vadd.f32 %v2482_v23, %v1404_v50 }
 0x17f   : > { %v1086_v53 = vpop.f32.mrf.mxu0  ;;  %v1406_v54 = vpop.f32.mrf.mxu1 }
 0x180   : > { %v1583_v55 = vmax.f32 %v1085_v51, 0.0  ;;  %v1647_v56 = vmax.f32 %v1405_v52, 0.0 }
 0x181   : > { %v1089_v57 = vpop.f32.mrf.mxu0  ;;  %v1409_v58 = vpop.f32.mrf.mxu1 }
 0x182   : > { %1711 = vst.msk [vmem:[%s2496_s8 + $0x118] sm:$0xff] %vm458_vm0, %v1583_v55  ;;  %1775 = vst.msk [vmem:[%s2496_s8 + $0x318] sm:$0xff] %vm458_vm0, %v1647_v56  ;;  %v1090_v59 = vadd.f32 %v2482_v23, %v1089_v57  ;;  %v1410_v60 = vadd.f32 %v2482_v23, %v1409_v58 }
 0x183   : > { %v1091_v61 = vpop.f32.mrf.mxu0  ;;  %v1411_v62 = vpop.f32.mrf.mxu1 }
 0x184   : > { %v1584_v63 = vmax.f32 %v1090_v59, 0.0  ;;  %v1648_v0 = vmax.f32 %v1410_v60, 0.0 }
 0x185   : > { %v1094_v1 = vpop.f32.mrf.mxu0  ;;  %v1414_v2 = vpop.f32.mrf.mxu1 }
 0x186   : > { %1712 = vst.msk [vmem:[%s2496_s8 + $0x120] sm:$0xff] %vm458_vm0, %v1584_v63  ;;  %1776 = vst.msk [vmem:[%s2496_s8 + $0x320] sm:$0xff] %vm458_vm0, %v1648_v0  ;;  %v1095_v3 = vadd.f32 %v2482_v23, %v1094_v1  ;;  %v1415_v4 = vadd.f32 %v2482_v23, %v1414_v2 }
 0x187   : > { %v1096_v5 = vpop.f32.mrf.mxu0  ;;  %v1416_v6 = vpop.f32.mrf.mxu1 }
 0x188   : > { %v1585_v7 = vmax.f32 %v1095_v3, 0.0  ;;  %v1649_v8 = vmax.f32 %v1415_v4, 0.0 }
 0x189   : > { %v1099_v9 = vpop.f32.mrf.mxu0  ;;  %v1419_v10 = vpop.f32.mrf.mxu1 }
 0x18a   : > { %1713 = vst.msk [vmem:[%s2496_s8 + $0x128] sm:$0xff] %vm458_vm0, %v1585_v7  ;;  %1777 = vst.msk [vmem:[%s2496_s8 + $0x328] sm:$0xff] %vm458_vm0, %v1649_v8  ;;  %v1100_v11 = vadd.f32 %v2482_v23, %v1099_v9  ;;  %v1420_v12 = vadd.f32 %v2482_v23, %v1419_v10 }
 0x18b   : > { %v1101_v13 = vpop.f32.mrf.mxu0  ;;  %v1421_v14 = vpop.f32.mrf.mxu1 }
 0x18c   : > { %v1586_v15 = vmax.f32 %v1100_v11, 0.0  ;;  %v1650_v16 = vmax.f32 %v1420_v12, 0.0 }
 0x18d   : > { %v1104_v17 = vpop.f32.mrf.mxu0  ;;  %v1424_v18 = vpop.f32.mrf.mxu1 }
 0x18e   : > { %1714 = vst.msk [vmem:[%s2496_s8 + $0x130] sm:$0xff] %vm458_vm0, %v1586_v15  ;;  %1778 = vst.msk [vmem:[%s2496_s8 + $0x330] sm:$0xff] %vm458_vm0, %v1650_v16  ;;  %v1105_v20 = vadd.f32 %v2817_v19, %v1104_v17  ;;  %v1425_v23 = vadd.f32 %v2817_v19, %v1424_v18 }
 0x18f   : > { %v1106_v21 = vpop.f32.mrf.mxu0  ;;  %v1426_v22 = vpop.f32.mrf.mxu1 }
 0x190   : > { %v1587_v24 = vmax.f32 %v1105_v20, 0.0  ;;  %v1651_v25 = vmax.f32 %v1425_v23, 0.0 }
 0x191   : > { %v1109_v26 = vpop.f32.mrf.mxu0  ;;  %v1429_v27 = vpop.f32.mrf.mxu1 }
 0x192   : > { %1715 = vst.msk [vmem:[%s2496_s8 + $0x138] sm:$0xff] %vm458_vm0, %v1587_v24  ;;  %1779 = vst.msk [vmem:[%s2496_s8 + $0x338] sm:$0xff] %vm458_vm0, %v1651_v25  ;;  %v1110_v28 = vadd.f32 %v2817_v19, %v1109_v26  ;;  %v1430_v29 = vadd.f32 %v2817_v19, %v1429_v27 }
 0x193   : > { %v1111_v30 = vpop.f32.mrf.mxu0  ;;  %v1431_v31 = vpop.f32.mrf.mxu1 }
 0x194   : > { %v1588_v32 = vmax.f32 %v1110_v28, 0.0  ;;  %v1652_v33 = vmax.f32 %v1430_v29, 0.0 }
 0x195   : > { %v1114_v34 = vpop.f32.mrf.mxu0  ;;  %v1434_v35 = vpop.f32.mrf.mxu1 }
 0x196   : > { %1716 = vst.msk [vmem:[%s2496_s8 + $0x140] sm:$0xff] %vm458_vm0, %v1588_v32  ;;  %1780 = vst.msk [vmem:[%s2496_s8 + $0x340] sm:$0xff] %vm458_vm0, %v1652_v33  ;;  %v1115_v36 = vadd.f32 %v2817_v19, %v1114_v34  ;;  %v1435_v37 = vadd.f32 %v2817_v19, %v1434_v35 }
 0x197   : > { %v1116_v38 = vpop.f32.mrf.mxu0  ;;  %v1436_v39 = vpop.f32.mrf.mxu1 }
 0x198   : > { %v1589_v40 = vmax.f32 %v1115_v36, 0.0  ;;  %v1653_v41 = vmax.f32 %v1435_v37, 0.0 }
 0x199   : > { %v1119_v42 = vpop.f32.mrf.mxu0  ;;  %v1439_v43 = vpop.f32.mrf.mxu1 }
 0x19a   : > { %1717 = vst.msk [vmem:[%s2496_s8 + $0x148] sm:$0xff] %vm458_vm0, %v1589_v40  ;;  %1781 = vst.msk [vmem:[%s2496_s8 + $0x348] sm:$0xff] %vm458_vm0, %v1653_v41  ;;  %v1120_v44 = vadd.f32 %v2817_v19, %v1119_v42  ;;  %v1440_v45 = vadd.f32 %v2817_v19, %v1439_v43 }
 0x19b   : > { %v1121_v46 = vpop.f32.mrf.mxu0  ;;  %v1441_v47 = vpop.f32.mrf.mxu1 }
 0x19c   : > { %v1590_v48 = vmax.f32 %v1120_v44, 0.0  ;;  %v1654_v49 = vmax.f32 %v1440_v45, 0.0 }
 0x19d   : > { %v1124_v50 = vpop.f32.mrf.mxu0  ;;  %v1444_v51 = vpop.f32.mrf.mxu1 }
 0x19e   : > { %1718 = vst.msk [vmem:[%s2496_s8 + $0x150] sm:$0xff] %vm458_vm0, %v1590_v48  ;;  %1782 = vst.msk [vmem:[%s2496_s8 + $0x350] sm:$0xff] %vm458_vm0, %v1654_v49  ;;  %v1125_v52 = vadd.f32 %v2817_v19, %v1124_v50  ;;  %v1445_v53 = vadd.f32 %v2817_v19, %v1444_v51 }
 0x19f   : > { %v1126_v54 = vpop.f32.mrf.mxu0  ;;  %v1446_v55 = vpop.f32.mrf.mxu1 }
 0x1a0   : > { %v1591_v56 = vmax.f32 %v1125_v52, 0.0  ;;  %v1655_v57 = vmax.f32 %v1445_v53, 0.0 }
 0x1a1   : > { %v1129_v58 = vpop.f32.mrf.mxu0  ;;  %v1449_v59 = vpop.f32.mrf.mxu1 }
 0x1a2   : > { %1719 = vst.msk [vmem:[%s2496_s8 + $0x158] sm:$0xff] %vm458_vm0, %v1591_v56  ;;  %1783 = vst.msk [vmem:[%s2496_s8 + $0x358] sm:$0xff] %vm458_vm0, %v1655_v57  ;;  %v1130_v60 = vadd.f32 %v2817_v19, %v1129_v58  ;;  %v1450_v61 = vadd.f32 %v2817_v19, %v1449_v59 }
 0x1a3   : > { %v1131_v62 = vpop.f32.mrf.mxu0  ;;  %v1451_v63 = vpop.f32.mrf.mxu1 }
 0x1a4   : > { %v1592_v0 = vmax.f32 %v1130_v60, 0.0  ;;  %v1656_v1 = vmax.f32 %v1450_v61, 0.0 }
 0x1a5   : > { %v1134_v2 = vpop.f32.mrf.mxu0  ;;  %v1454_v3 = vpop.f32.mrf.mxu1 }
 0x1a6   : > { %1720 = vst.msk [vmem:[%s2496_s8 + $0x160] sm:$0xff] %vm458_vm0, %v1592_v0  ;;  %1784 = vst.msk [vmem:[%s2496_s8 + $0x360] sm:$0xff] %vm458_vm0, %v1656_v1  ;;  %v1135_v4 = vadd.f32 %v2817_v19, %v1134_v2  ;;  %v1455_v5 = vadd.f32 %v2817_v19, %v1454_v3 }
 0x1a7   : > { %v1136_v6 = vpop.f32.mrf.mxu0  ;;  %v1456_v7 = vpop.f32.mrf.mxu1 }
 0x1a8   : > { %v1593_v8 = vmax.f32 %v1135_v4, 0.0  ;;  %v1657_v9 = vmax.f32 %v1455_v5, 0.0 }
 0x1a9   : > { %v1139_v10 = vpop.f32.mrf.mxu0  ;;  %v1459_v11 = vpop.f32.mrf.mxu1 }
 0x1aa   : > { %1721 = vst.msk [vmem:[%s2496_s8 + $0x168] sm:$0xff] %vm458_vm0, %v1593_v8  ;;  %1785 = vst.msk [vmem:[%s2496_s8 + $0x368] sm:$0xff] %vm458_vm0, %v1657_v9  ;;  %v1140_v12 = vadd.f32 %v2817_v19, %v1139_v10  ;;  %v1460_v13 = vadd.f32 %v2817_v19, %v1459_v11 }
 0x1ab   : > { %v1141_v14 = vpop.f32.mrf.mxu0  ;;  %v1461_v15 = vpop.f32.mrf.mxu1 }
 0x1ac   : > { %v1594_v16 = vmax.f32 %v1140_v12, 0.0  ;;  %v1658_v17 = vmax.f32 %v1460_v13, 0.0 }
 0x1ad   : > { %v1144_v18 = vpop.f32.mrf.mxu0  ;;  %v1464_v20 = vpop.f32.mrf.mxu1 }
 0x1ae   : > { %1722 = vst.msk [vmem:[%s2496_s8 + $0x170] sm:$0xff] %vm458_vm0, %v1594_v16  ;;  %1786 = vst.msk [vmem:[%s2496_s8 + $0x370] sm:$0xff] %vm458_vm0, %v1658_v17  ;;  %v1145_v23 = vadd.f32 %v2817_v19, %v1144_v18  ;;  %v1465_v21 = vadd.f32 %v2817_v19, %v1464_v20 }
 0x1af   : > { %v1146_v22 = vpop.f32.mrf.mxu0  ;;  %v1466_v24 = vpop.f32.mrf.mxu1 }
 0x1b0   : > { %v1595_v25 = vmax.f32 %v1145_v23, 0.0  ;;  %v1659_v26 = vmax.f32 %v1465_v21, 0.0 }
 0x1b1   : > { %v1149_v27 = vpop.f32.mrf.mxu0  ;;  %v1469_v28 = vpop.f32.mrf.mxu1 }
 0x1b2   : > { %1723 = vst.msk [vmem:[%s2496_s8 + $0x178] sm:$0xff] %vm458_vm0, %v1595_v25  ;;  %1787 = vst.msk [vmem:[%s2496_s8 + $0x378] sm:$0xff] %vm458_vm0, %v1659_v26  ;;  %v1150_v29 = vadd.f32 %v2817_v19, %v1149_v27  ;;  %v1470_v30 = vadd.f32 %v2817_v19, %v1469_v28 }
 0x1b3   : > { %v1151_v31 = vpop.f32.mrf.mxu0  ;;  %v1471_v32 = vpop.f32.mrf.mxu1 }
 0x1b4   : > { %v1596_v33 = vmax.f32 %v1150_v29, 0.0  ;;  %v1660_v34 = vmax.f32 %v1470_v30, 0.0 }
 0x1b5   : > { %v1154_v35 = vpop.f32.mrf.mxu0  ;;  %v1474_v36 = vpop.f32.mrf.mxu1 }
 0x1b6   : > { %1724 = vst.msk [vmem:[%s2496_s8 + $0x180] sm:$0xff] %vm458_vm0, %v1596_v33  ;;  %1788 = vst.msk [vmem:[%s2496_s8 + $0x380] sm:$0xff] %vm458_vm0, %v1660_v34  ;;  %v1155_v37 = vadd.f32 %v2817_v19, %v1154_v35  ;;  %v1475_v38 = vadd.f32 %v2817_v19, %v1474_v36 }
 0x1b7   : > { %v1156_v39 = vpop.f32.mrf.mxu0  ;;  %v1476_v40 = vpop.f32.mrf.mxu1 }
 0x1b8   : > { %v1597_v41 = vmax.f32 %v1155_v37, 0.0  ;;  %v1661_v42 = vmax.f32 %v1475_v38, 0.0 }
 0x1b9   : > { %v1159_v43 = vpop.f32.mrf.mxu0  ;;  %v1479_v44 = vpop.f32.mrf.mxu1 }
 0x1ba   : > { %1725 = vst.msk [vmem:[%s2496_s8 + $0x188] sm:$0xff] %vm458_vm0, %v1597_v41  ;;  %1789 = vst.msk [vmem:[%s2496_s8 + $0x388] sm:$0xff] %vm458_vm0, %v1661_v42  ;;  %v1160_v45 = vadd.f32 %v2817_v19, %v1159_v43  ;;  %v1480_v46 = vadd.f32 %v2817_v19, %v1479_v44 }
 0x1bb   : > { %v1161_v47 = vpop.f32.mrf.mxu0  ;;  %v1481_v48 = vpop.f32.mrf.mxu1 }
 0x1bc   : > { %v1598_v49 = vmax.f32 %v1160_v45, 0.0  ;;  %v1662_v50 = vmax.f32 %v1480_v46, 0.0 }
 0x1bd   : > { %v1164_v51 = vpop.f32.mrf.mxu0  ;;  %v1484_v52 = vpop.f32.mrf.mxu1 }
 0x1be   : > { %1726 = vst.msk [vmem:[%s2496_s8 + $0x190] sm:$0xff] %vm458_vm0, %v1598_v49  ;;  %1790 = vst.msk [vmem:[%s2496_s8 + $0x390] sm:$0xff] %vm458_vm0, %v1662_v50  ;;  %v1165_v53 = vadd.f32 %v2817_v19, %v1164_v51  ;;  %v1485_v54 = vadd.f32 %v2817_v19, %v1484_v52 }
 0x1bf   : > { %v1166_v55 = vpop.f32.mrf.mxu0  ;;  %v1486_v56 = vpop.f32.mrf.mxu1 }
 0x1c0   : > { %v1599_v57 = vmax.f32 %v1165_v53, 0.0  ;;  %v1663_v58 = vmax.f32 %v1485_v54, 0.0 }
 0x1c1   : > { %v1169_v59 = vpop.f32.mrf.mxu0  ;;  %v1489_v60 = vpop.f32.mrf.mxu1 }
 0x1c2   : > { %1727 = vst.msk [vmem:[%s2496_s8 + $0x198] sm:$0xff] %vm458_vm0, %v1599_v57  ;;  %1791 = vst.msk [vmem:[%s2496_s8 + $0x398] sm:$0xff] %vm458_vm0, %v1663_v58  ;;  %v1170_v61 = vadd.f32 %v2817_v19, %v1169_v59  ;;  %v1490_v62 = vadd.f32 %v2817_v19, %v1489_v60 }
 0x1c3   : > { %v1171_v63 = vpop.f32.mrf.mxu0  ;;  %v1491_v0 = vpop.f32.mrf.mxu1 }
 0x1c4   : > { %v1600_v1 = vmax.f32 %v1170_v61, 0.0  ;;  %v1664_v2 = vmax.f32 %v1490_v62, 0.0 }
 0x1c5   : > { %v1174_v3 = vpop.f32.mrf.mxu0  ;;  %v1494_v4 = vpop.f32.mrf.mxu1 }
 0x1c6   : > { %1728 = vst.msk [vmem:[%s2496_s8 + $0x1a0] sm:$0xff] %vm458_vm0, %v1600_v1  ;;  %1792 = vst.msk [vmem:[%s2496_s8 + $0x3a0] sm:$0xff] %vm458_vm0, %v1664_v2  ;;  %v1175_v5 = vadd.f32 %v2817_v19, %v1174_v3  ;;  %v1495_v6 = vadd.f32 %v2817_v19, %v1494_v4 }
 0x1c7   : > { %v1176_v7 = vpop.f32.mrf.mxu0  ;;  %v1496_v8 = vpop.f32.mrf.mxu1 }
 0x1c8   : > { %v1601_v9 = vmax.f32 %v1175_v5, 0.0  ;;  %v1665_v10 = vmax.f32 %v1495_v6, 0.0 }
 0x1c9   : > { %v1179_v11 = vpop.f32.mrf.mxu0  ;;  %v1499_v12 = vpop.f32.mrf.mxu1 }
 0x1ca   : > { %1729 = vst.msk [vmem:[%s2496_s8 + $0x1a8] sm:$0xff] %vm458_vm0, %v1601_v9  ;;  %1793 = vst.msk [vmem:[%s2496_s8 + $0x3a8] sm:$0xff] %vm458_vm0, %v1665_v10  ;;  %v1180_v13 = vadd.f32 %v2817_v19, %v1179_v11  ;;  %v1500_v14 = vadd.f32 %v2817_v19, %v1499_v12 }
 0x1cb   : > { %v1181_v15 = vpop.f32.mrf.mxu0  ;;  %v1501_v16 = vpop.f32.mrf.mxu1 }
 0x1cc   : > { %v1602_v17 = vmax.f32 %v1180_v13, 0.0  ;;  %v1666_v18 = vmax.f32 %v1500_v14, 0.0 }
 0x1cd   : > { %v1184_v20 = vpop.f32.mrf.mxu0  ;;  %v1504_v23 = vpop.f32.mrf.mxu1 }
 0x1ce   : > { %1730 = vst.msk [vmem:[%s2496_s8 + $0x1b0] sm:$0xff] %vm458_vm0, %v1602_v17  ;;  %1794 = vst.msk [vmem:[%s2496_s8 + $0x3b0] sm:$0xff] %vm458_vm0, %v1666_v18  ;;  %v1185_v21 = vadd.f32 %v2817_v19, %v1184_v20  ;;  %v1505_v22 = vadd.f32 %v2817_v19, %v1504_v23 }
 0x1cf   : > { %v1186_v24 = vpop.f32.mrf.mxu0  ;;  %v1506_v25 = vpop.f32.mrf.mxu1 }
 0x1d0   : > { %v1603_v26 = vmax.f32 %v1185_v21, 0.0  ;;  %v1667_v27 = vmax.f32 %v1505_v22, 0.0 }
 0x1d1   : > { %v1189_v28 = vpop.f32.mrf.mxu0  ;;  %v1509_v29 = vpop.f32.mrf.mxu1 }
 0x1d2   : > { %1731 = vst.msk [vmem:[%s2496_s8 + $0x1b8] sm:$0xff] %vm458_vm0, %v1603_v26  ;;  %1795 = vst.msk [vmem:[%s2496_s8 + $0x3b8] sm:$0xff] %vm458_vm0, %v1667_v27  ;;  %v1190_v30 = vadd.f32 %v2817_v19, %v1189_v28  ;;  %v1510_v31 = vadd.f32 %v2817_v19, %v1509_v29 }
 0x1d3   : > { %v1191_v32 = vpop.f32.mrf.mxu0  ;;  %v1511_v33 = vpop.f32.mrf.mxu1 }
 0x1d4   : > { %v1604_v34 = vmax.f32 %v1190_v30, 0.0  ;;  %v1668_v35 = vmax.f32 %v1510_v31, 0.0 }
 0x1d5   : > { %v1194_v36 = vpop.f32.mrf.mxu0  ;;  %v1514_v37 = vpop.f32.mrf.mxu1 }
 0x1d6   : > { %1732 = vst.msk [vmem:[%s2496_s8 + $0x1c0] sm:$0xff] %vm458_vm0, %v1604_v34  ;;  %1796 = vst.msk [vmem:[%s2496_s8 + $0x3c0] sm:$0xff] %vm458_vm0, %v1668_v35  ;;  %v1195_v38 = vadd.f32 %v2817_v19, %v1194_v36  ;;  %v1515_v39 = vadd.f32 %v2817_v19, %v1514_v37 }
 0x1d7   : > { %v1196_v40 = vpop.f32.mrf.mxu0  ;;  %v1516_v41 = vpop.f32.mrf.mxu1 }
 0x1d8   : > { %v1605_v42 = vmax.f32 %v1195_v38, 0.0  ;;  %v1669_v43 = vmax.f32 %v1515_v39, 0.0 }
 0x1d9   : > { %v1199_v44 = vpop.f32.mrf.mxu0  ;;  %v1519_v45 = vpop.f32.mrf.mxu1 }
 0x1da   : > { %1733 = vst.msk [vmem:[%s2496_s8 + $0x1c8] sm:$0xff] %vm458_vm0, %v1605_v42  ;;  %1797 = vst.msk [vmem:[%s2496_s8 + $0x3c8] sm:$0xff] %vm458_vm0, %v1669_v43  ;;  %v1200_v46 = vadd.f32 %v2817_v19, %v1199_v44  ;;  %v1520_v47 = vadd.f32 %v2817_v19, %v1519_v45 }
 0x1db   : > { %v1201_v48 = vpop.f32.mrf.mxu0  ;;  %v1521_v49 = vpop.f32.mrf.mxu1 }
 0x1dc   : > { %v1606_v50 = vmax.f32 %v1200_v46, 0.0  ;;  %v1670_v51 = vmax.f32 %v1520_v47, 0.0 }
 0x1dd   : > { %v1204_v52 = vpop.f32.mrf.mxu0  ;;  %v1524_v53 = vpop.f32.mrf.mxu1 }
 0x1de   : > { %1734 = vst.msk [vmem:[%s2496_s8 + $0x1d0] sm:$0xff] %vm458_vm0, %v1606_v50  ;;  %1798 = vst.msk [vmem:[%s2496_s8 + $0x3d0] sm:$0xff] %vm458_vm0, %v1670_v51  ;;  %v1205_v54 = vadd.f32 %v2817_v19, %v1204_v52  ;;  %v1525_v55 = vadd.f32 %v2817_v19, %v1524_v53 }
 0x1df   : > { %v1206_v56 = vpop.f32.mrf.mxu0  ;;  %v1526_v57 = vpop.f32.mrf.mxu1 }
 0x1e0   : > { %v1607_v58 = vmax.f32 %v1205_v54, 0.0  ;;  %v1671_v59 = vmax.f32 %v1525_v55, 0.0 }
 0x1e1   : > { %v1209_v60 = vpop.f32.mrf.mxu0  ;;  %v1529_v61 = vpop.f32.mrf.mxu1 }
 0x1e2   : > { %1735 = vst.msk [vmem:[%s2496_s8 + $0x1d8] sm:$0xff] %vm458_vm0, %v1607_v58  ;;  %1799 = vst.msk [vmem:[%s2496_s8 + $0x3d8] sm:$0xff] %vm458_vm0, %v1671_v59  ;;  %v1210_v62 = vadd.f32 %v2817_v19, %v1209_v60  ;;  %v1530_v63 = vadd.f32 %v2817_v19, %v1529_v61 }
 0x1e3   : > { %v1211_v0 = vpop.f32.mrf.mxu0  ;;  %v1531_v1 = vpop.f32.mrf.mxu1 }
 0x1e4   : > { %v1608_v2 = vmax.f32 %v1210_v62, 0.0  ;;  %v1672_v3 = vmax.f32 %v1530_v63, 0.0 }
 0x1e5   : > { %v1214_v4 = vpop.f32.mrf.mxu0  ;;  %v1534_v5 = vpop.f32.mrf.mxu1 }
 0x1e6   : > { %1736 = vst.msk [vmem:[%s2496_s8 + $0x1e0] sm:$0xff] %vm458_vm0, %v1608_v2  ;;  %1800 = vst.msk [vmem:[%s2496_s8 + $0x3e0] sm:$0xff] %vm458_vm0, %v1672_v3  ;;  %v1215_v6 = vadd.f32 %v2817_v19, %v1214_v4  ;;  %v1535_v7 = vadd.f32 %v2817_v19, %v1534_v5 }
 0x1e7   : > { %v1216_v8 = vpop.f32.mrf.mxu0  ;;  %v1536_v9 = vpop.f32.mrf.mxu1 }
 0x1e8   : > { %v1609_v10 = vmax.f32 %v1215_v6, 0.0  ;;  %v1673_v11 = vmax.f32 %v1535_v7, 0.0 }
 0x1e9   : > { %v1219_v12 = vpop.f32.mrf.mxu0  ;;  %v1539_v13 = vpop.f32.mrf.mxu1 }
 0x1ea   : > { %1737 = vst.msk [vmem:[%s2496_s8 + $0x1e8] sm:$0xff] %vm458_vm0, %v1609_v10  ;;  %1801 = vst.msk [vmem:[%s2496_s8 + $0x3e8] sm:$0xff] %vm458_vm0, %v1673_v11  ;;  %v1220_v14 = vadd.f32 %v2817_v19, %v1219_v12  ;;  %v1540_v15 = vadd.f32 %v2817_v19, %v1539_v13 }
 0x1eb   : > { %v1221_v16 = vpop.f32.mrf.mxu0  ;;  %v1541_v17 = vpop.f32.mrf.mxu1 }
 0x1ec   : > { %v1610_v18 = vmax.f32 %v1220_v14, 0.0  ;;  %v1674_v20 = vmax.f32 %v1540_v15, 0.0 }
 0x1ed   : > { %v1224_v23 = vpop.f32.mrf.mxu0  ;;  %v1544_v21 = vpop.f32.mrf.mxu1 }
 0x1ee   : > { %1738 = vst.msk [vmem:[%s2496_s8 + $0x1f0] sm:$0xff] %vm458_vm0, %v1610_v18  ;;  %1802 = vst.msk [vmem:[%s2496_s8 + $0x3f0] sm:$0xff] %vm458_vm0, %v1674_v20  ;;  %v1225_v22 = vadd.f32 %v2817_v19, %v1224_v23  ;;  %v1545_v24 = vadd.f32 %v2817_v19, %v1544_v21 }
 0x1ef   : > { %v1226_v25 = vpop.f32.mrf.mxu0  ;;  %v1546_v26 = vpop.f32.mrf.mxu1 }
 0x1f0   : > { %v1611_v27 = vmax.f32 %v1225_v22, 0.0  ;;  %v1675_v28 = vmax.f32 %v1545_v24, 0.0 }
 0x1f2   : > { %1739 = vst.msk [vmem:[%s2496_s8 + $0x1f8] sm:$0xff] %vm458_vm0, %v1611_v27  ;;  %1803 = vst.msk [vmem:[%s2496_s8 + $0x3f8] sm:$0xff] %vm458_vm0, %v1675_v28 }
 0x1f3 PF: > { %s13_s12 = sadd.s32 1, %s2054_s12  }
 0x1f4   : > { %p10_p4 = scmp.ge.s32.totalorder %s13_s12, 4  }
 0x1f6   :  { %12 = sbr.rel (!%p10_p4) target bundleno = 1 (0x1), region = 62 }

// kernel: cnn_classifier_forward.6
= control target key start
LH: loop header
LB: loop body
LE: loop exit
PB: predicated region body
PF: predicated region fallthrough
CT: control target
= control target key end

     0   :  { %s1949_s12 = smov 0   ;;  %s2844_s0 = inlined_call_operand.vmem [shape: f32[2048,144], index: 0, kind: input, shape index: {}]   ;;  %s2845_s1 = inlined_call_operand.vmem [shape: f32[144,16], index: 1, kind: input, shape index: {}]   ;;  %s2846_s2 = inlined_call_operand.vmem [shape: f32[1,16], index: 2, kind: input, shape index: {}]   ;;  %s2847_s3 = inlined_call_operand.vmem [shape: f32[2048,16], index: 3, kind: output, shape index: {}]  }
   0x1 LB: > { %s1732_s13 = sadd.s32 4294967295, %s1926_s12   ;;  %p1736_p0 = scmp.ge.s32.totalorder %s1926_s12, 1  ;;  %s1926_s12 = sphi %s1949_s12, %s13_s12  }
   0x2   : > { %p139_p1 = scmp.lt.s32.totalorder %s1926_s12, 3 }
   0x4   : > { %p140_p2 = pnand %p1736_p0, %p139_p1 }
   0x5   : > { %s1737_s7 = sshll.u32 (!%p140_p2), %s1732_s13, 7 }
   0x6   : > { %143 = sbr.rel (%p140_p2) target bundleno = 497 (0x1f1), region = 32  ;;  %p165_p3 = scmp.lt.s32.totalorder (!%p140_p2), %s1737_s7, 255 }
   0xb   : > { %v448_v0 = vld [vmem:[%s2845_s1 + $0x78] sm:$0xff]  ;;  %v1928_v1 = vmov 0.0   ;;  %v447_v2 = vld [vmem:[%s2845_s1 + $0x70] sm:$0xff]  ;;  %v446_v3 = vld [vmem:[%s2845_s1 + $0x68] sm:$0xff]  ;;  %s2849_s7 = smov (!%p165_p3, %s1737_s7), 255  ;;  %vm458_vm0 = vcmask 130048  }
   0xc   : > { %843 = vmatprep.subr.mxu0 %v1928_v1  ;;  %1874 = vmatprep.subr.mxu1 %v1928_v1  ;;  %v445_v4 = vld [vmem:[%s2845_s1 + $0x60] sm:$0xff]  ;;  %v444_v5 = vld [vmem:[%s2845_s1 + $0x58] sm:$0xff]  ;;  %v443_v6 = vld [vmem:[%s2845_s1 + $0x50] sm:$0xff]  ;;  %s1873_s19 = sshll.u32 %s2849_s7, 4  ;;  %s1741_s29 = sshll.u32 %s2849_s7, 3 }
   0xd   : > { %844 = vmatpush1.msra.mxu0 %v448_v0  ;;  %1892 = vmatpush1.msra.mxu1 %v448_v0  ;;  %v442_v7 = vld [vmem:[%s2845_s1 + $0x48] sm:$0xff]  ;;  %v441_v8 = vld [vmem:[%s2845_s1 + $0x40] sm:$0xff]  ;;  %v440_v9 = vld [vmem:[%s2845_s1 + $0x38] sm:$0xff]  ;;  %s2048_s26 = scalar_lea.vmem %s2844_s0, %s1873_s19  ;;  %s2362_s8 = scalar_lea.vmem %s2847_s3, %s1741_s29 }
   0xe   : > { %845 = vmatprep.subr.mxu0 %v1928_v1  ;;  %1875 = vmatprep.subr.mxu1 %v1928_v1  ;;  %v439_v10 = vld [vmem:[%s2845_s1 + $0x30] sm:$0xff]  ;;  %v438_v11 = vld [vmem:[%s2845_s1 + $0x28] sm:$0xff]  ;;  %v437_v12 = vld [vmem:[%s2845_s1 + $0x20] sm:$0xff] }
   0xf   : > { %846 = vmatpush1.msra.mxu0 %v447_v2  ;;  %1893 = vmatpush1.msra.mxu1 %v447_v2  ;;  %v436_v13 = vld [vmem:[%s2845_s1 + $0x18] sm:$0xff]  ;;  %v435_v14 = vld [vmem:[%s2845_s1 + $0x10] sm:$0xff]  ;;  %v434_v15 = vld [vmem:[%s2845_s1 + $0x8] sm:$0xff] }
  0x10   : > { %847 = vmatprep.subr.mxu0 %v1928_v1  ;;  %1876 = vmatprep.subr.mxu1 %v1928_v1  ;;  %v433_v16 = vld [vmem:[%s2845_s1] sm:$0xff]  ;;  %v450_v17 = vld [vmem:[%s2845_s1 + $0x88] sm:$0xff]  ;;  %v180_v23 = vld [vmem:[%s2048_s26 + $0x18] sm:$0xff] }
  0x11   : > { %848 = vmatpush1.msra.mxu0 %v446_v3  ;;  %1894 = vmatpush1.msra.mxu1 %v446_v3  ;;  %v449_v18 = vld [vmem:[%s2845_s1 + $0x80] sm:$0xff]  ;;  %v178_v19 = vld [vmem:[%s2048_s26 + $0x8] sm:$0xff]  ;;  %v308_v24 = vld [vmem:[%s2048_s26 + $0x418] sm:$0xff] }
  0x12   : > { %849 = vmatprep.subr.mxu0 %v1928_v1  ;;  %1877 = vmatprep.subr.mxu1 %v1928_v1  ;;  %v306_v20 = vld [vmem:[%s2048_s26 + $0x408] sm:$0xff]  ;;  %v177_v21 = vld [vmem:[%s2048_s26] sm:$0xff]  ;;  %v179_v25 = vld [vmem:[%s2048_s26 + $0x10] sm:$0xff] }
  0x13   : > { %850 = vmatpush1.msra.mxu0 %v445_v4  ;;  %1895 = vmatpush1.msra.mxu1 %v445_v4  ;;  %v305_v22 = vld [vmem:[%s2048_s26 + $0x400] sm:$0xff]  ;;  %v307_v26 = vld [vmem:[%s2048_s26 + $0x410] sm:$0xff]  ;;  %v182_v27 = vld [vmem:[%s2048_s26 + $0x28] sm:$0xff] }
  0x14   : > { %851 = vmatprep.subr.mxu0 %v1928_v1  ;;  %1878 = vmatprep.subr.mxu1 %v1928_v1  ;;  %v310_v28 = vld [vmem:[%s2048_s26 + $0x428] sm:$0xff]  ;;  %v181_v29 = vld [vmem:[%s2048_s26 + $0x20] sm:$0xff]  ;;  %v184_v31 = vld [vmem:[%s2048_s26 + $0x38] sm:$0xff] }
  0x15   : > { %852 = vmatpush1.msra.mxu0 %v444_v5  ;;  %1896 = vmatpush1.msra.mxu1 %v444_v5  ;;  %v309_v30 = vld [vmem:[%s2048_s26 + $0x420] sm:$0xff]  ;;  %v312_v32 = vld [vmem:[%s2048_s26 + $0x438] sm:$0xff]  ;;  %v183_v33 = vld [vmem:[%s2048_s26 + $0x30] sm:$0xff] }
  0x16   : > { %853 = vmatprep.subr.mxu0 %v1928_v1  ;;  %1879 = vmatprep.subr.mxu1 %v1928_v1  ;;  %v311_v34 = vld [vmem:[%s2048_s26 + $0x430] sm:$0xff]  ;;  %v186_v35 = vld [vmem:[%s2048_s26 + $0x48] sm:$0xff]  ;;  %v185_v37 = vld [vmem:[%s2048_s26 + $0x40] sm:$0xff] }
  0x17   : > { %854 = vmatpush1.msra.mxu0 %v443_v6  ;;  %1897 = vmatpush1.msra.mxu1 %v443_v6  ;;  %v314_v36 = vld [vmem:[%s2048_s26 + $0x448] sm:$0xff]  ;;  %v313_v38 = vld [vmem:[%s2048_s26 + $0x440] sm:$0xff]  ;;  %v188_v39 = vld [vmem:[%s2048_s26 + $0x58] sm:$0xff] }
  0x18   : > { %855 = vmatprep.subr.mxu0 %v1928_v1  ;;  %1880 = vmatprep.subr.mxu1 %v1928_v1  ;;  %v316_v40 = vld [vmem:[%s2048_s26 + $0x458] sm:$0xff]  ;;  %v187_v41 = vld [vmem:[%s2048_s26 + $0x50] sm:$0xff]  ;;  %v190_v43 = vld [vmem:[%s2048_s26 + $0x68] sm:$0xff] }
  0x19   : > { %856 = vmatpush1.msra.mxu0 %v442_v7  ;;  %1898 = vmatpush1.msra.mxu1 %v442_v7  ;;  %v315_v42 = vld [vmem:[%s2048_s26 + $0x450] sm:$0xff]  ;;  %v318_v44 = vld [vmem:[%s2048_s26 + $0x468] sm:$0xff]  ;;  %v189_v45 = vld [vmem:[%s2048_s26 + $0x60] sm:$0xff] }
  0x1a   : > { %857 = vmatprep.subr.mxu0 %v1928_v1  ;;  %1881 = vmatprep.subr.mxu1 %v1928_v1  ;;  %v317_v46 = vld [vmem:[%s2048_s26 + $0x460] sm:$0xff]  ;;  %v192_v47 = vld [vmem:[%s2048_s26 + $0x78] sm:$0xff]  ;;  %v191_v49 = vld [vmem:[%s2048_s26 + $0x70] sm:$0xff] }
  0x1b   : > { %858 = vmatpush1.msra.mxu0 %v441_v8  ;;  %1899 = vmatpush1.msra.mxu1 %v441_v8  ;;  %v320_v48 = vld [vmem:[%s2048_s26 + $0x478] sm:$0xff]  ;;  %v319_v50 = vld [vmem:[%s2048_s26 + $0x470] sm:$0xff]  ;;  %v194_v51 = vld [vmem:[%s2048_s26 + $0x88] sm:$0xff] }
  0x1c   : > { %859 = vmatprep.subr.mxu0 %v1928_v1  ;;  %1882 = vmatprep.subr.mxu1 %v1928_v1  ;;  %v322_v52 = vld [vmem:[%s2048_s26 + $0x488] sm:$0xff]  ;;  %v193_v53 = vld [vmem:[%s2048_s26 + $0x80] sm:$0xff]  ;;  %v196_v55 = vld [vmem:[%s2048_s26 + $0x98] sm:$0xff] }
  0x1d   : > { %860 = vmatpush1.msra.mxu0 %v440_v9  ;;  %1900 = vmatpush1.msra.mxu1 %v440_v9  ;;  %v321_v54 = vld [vmem:[%s2048_s26 + $0x480] sm:$0xff]  ;;  %v324_v56 = vld [vmem:[%s2048_s26 + $0x498] sm:$0xff]  ;;  %v195_v57 = vld [vmem:[%s2048_s26 + $0x90] sm:$0xff] }
  0x1e   : > { %861 = vmatprep.subr.mxu0 %v1928_v1  ;;  %1883 = vmatprep.subr.mxu1 %v1928_v1  ;;  %v323_v58 = vld [vmem:[%s2048_s26 + $0x490] sm:$0xff]  ;;  %v198_v59 = vld [vmem:[%s2048_s26 + $0xa8] sm:$0xff]  ;;  %v197_v61 = vld [vmem:[%s2048_s26 + $0xa0] sm:$0xff] }
  0x1f   : > { %862 = vmatpush1.msra.mxu0 %v439_v10  ;;  %1901 = vmatpush1.msra.mxu1 %v439_v10  ;;  %v326_v60 = vld [vmem:[%s2048_s26 + $0x4a8] sm:$0xff]  ;;  %v325_v62 = vld [vmem:[%s2048_s26 + $0x4a0] sm:$0xff]  ;;  %v200_v63 = vld [vmem:[%s2048_s26 + $0xb8] sm:$0xff] }
  0x20   : > { %863 = vmatprep.subr.mxu0 %v1928_v1  ;;  %1884 = vmatprep.subr.mxu1 %v1928_v1  ;;  %v328_v0 = vld [vmem:[%s2048_s26 + $0x4b8] sm:$0xff]  ;;  %v327_v2 = vld [vmem:[%s2048_s26 + $0x4b0] sm:$0xff]  ;;  %v202_v3 = vld [vmem:[%s2048_s26 + $0xc8] sm:$0xff] }
  0x21   : > { %864 = vmatpush1.msra.mxu0 %v438_v11  ;;  %1902 = vmatpush1.msra.mxu1 %v438_v11  ;;  %v330_v4 = vld [vmem:[%s2048_s26 + $0x4c8] sm:$0xff]  ;;  %v201_v5 = vld [vmem:[%s2048_s26 + $0xc0] sm:$0xff]  ;;  %v204_v7 = vld [vmem:[%s2048_s26 + $0xd8] sm:$0xff] }
  0x22   : > { %865 = vmatprep.subr.mxu0 %v1928_v1  ;;  %1885 = vmatprep.subr.mxu1 %v1928_v1  ;;  %v329_v6 = vld [vmem:[%s2048_s26 + $0x4c0] sm:$0xff]  ;;  %v332_v8 = vld [vmem:[%s2048_s26 + $0x4d8] sm:$0xff]  ;;  %v203_v9 = vld [vmem:[%s2048_s26 + $0xd0] sm:$0xff] }
  0x23   : > { %866 = vmatpush1.msra.mxu0 %v437_v12  ;;  %1903 = vmatpush1.msra.mxu1 %v437_v12  ;;  %v331_v10 = vld [vmem:[%s2048_s26 + $0x4d0] sm:$0xff]  ;;  %v206_v11 = vld [vmem:[%s2048_s26 + $0xe8] sm:$0xff] }
  0x24   : > { %867 = vmatprep.subr.mxu0 %v1928_v1  ;;  %1886 = vmatprep.subr.mxu1 %v1928_v1  ;;  %v334_v12 = vld [vmem:[%s2048_s26 + $0x4e8] sm:$0xff] }
  0x25   : > { %868 = vmatpush1.msra.mxu0 %v436_v13  ;;  %1904 = vmatpush1.msra.mxu1 %v436_v13  ;;  %v205_v13 = vld [vmem:[%s2048_s26 + $0xe0] sm:$0xff] }
  0x26   : > { %869 = vmatprep.subr.mxu0 %v1928_v1  ;;  %1887 = vmatprep.subr.mxu1 %v1928_v1 }
  0x27   : > { %870 = vmatpush1.msra.mxu0 %v435_v14  ;;  %1905 = vmatpush1.msra.mxu1 %v435_v14  ;;  %v333_v14 = vld [vmem:[%s2048_s26 + $0x4e0] sm:$0xff] }
  0x28   : > { %871 = vmatprep.subr.mxu0 %v1928_v1  ;;  %1888 = vmatprep.subr.mxu1 %v1928_v1 }
  0x29   : > { %872 = vmatpush1.msra.mxu0 %v434_v15  ;;  %1906 = vmatpush1.msra.mxu1 %v434_v15  ;;  %v208_v15 = vld [vmem:[%s2048_s26 + $0xf8] sm:$0xff] }
  0x2a   : > { %873 = vmatprep.subr.mxu0 %v1928_v1  ;;  %1889 = vmatprep.subr.mxu1 %v1928_v1 }
  0x2b   : > { %874 = vmatpush1.msra.mxu0 %v433_v16  ;;  %1907 = vmatpush1.msra.mxu1 %v433_v16  ;;  %v336_v16 = vld [vmem:[%s2048_s26 + $0x4f8] sm:$0xff] }
  0x2c   : > { %903 = vmatprep.subr.mxu0 %v1928_v1  ;;  %1890 = vmatprep.subr.mxu1 %v1928_v1 }
  0x2d   : > { %904 = vmatpush2.msra.mxu0 %v450_v17  ;;  %1908 = vmatpush2.msra.mxu1 %v450_v17  ;;  %v207_v17 = vld [vmem:[%s2048_s26 + $0xf0] sm:$0xff] }
  0x2e   : > { %905 = vmatprep.subr.mxu0 %v1928_v1  ;;  %1891 = vmatprep.subr.mxu1 %v1928_v1  ;;  %v199_v1 = vld [vmem:[%s2048_s26 + $0xb0] sm:$0xff] }
  0x2f   : > { %906 = vmatpush2.msra.mxu0 %v449_v18  ;;  %1909 = vmatpush2.msra.mxu1 %v449_v18  ;;  %v335_v18 = vld [vmem:[%s2048_s26 + $0x4f0] sm:$0xff] }
  0x30   : > { %1743 = vmatprep.mubr.msk.f32.mxu0 %vm458_vm0, %v178_v19  ;;  %1807 = vmatprep.mubr.msk.f32.mxu1 %vm458_vm0, %v306_v20  ;;  %v210_v19 = vld [vmem:[%s2048_s26 + $0x108] sm:$0xff] }
  0x31   : > { %908 = vmatmul.mubr.f32.vlgmr.msra.gmra.mxu0 %v177_v21  ;;  %1228 = vmatmul.mubr.f32.vlgmr.msra.gmra.mxu1 %v305_v22  ;;  %v338_v20 = vld [vmem:[%s2048_s26 + $0x508] sm:$0xff]  ;;  %v209_v21 = vld [vmem:[%s2048_s26 + $0x100] sm:$0xff] }
  0x32   : > { %1744 = vmatprep.mubr.msk.f32.mxu0 %vm458_vm0, %v180_v23  ;;  %1808 = vmatprep.mubr.msk.f32.mxu1 %vm458_vm0, %v308_v24  ;;  %v337_v22 = vld [vmem:[%s2048_s26 + $0x500] sm:$0xff]  ;;  %v212_v23 = vld [vmem:[%s2048_s26 + $0x118] sm:$0xff] }
  0x33   : > { %v340_v24 = vld [vmem:[%s2048_s26 + $0x518] sm:$0xff] }
  0x35   : > { %913 = vmatmul.mubr.f32.gmra.mxu0 %v179_v25  ;;  %1233 = vmatmul.mubr.f32.gmra.mxu1 %v307_v26  ;;  %v211_v25 = vld [vmem:[%s2048_s26 + $0x110] sm:$0xff] }
  0x36   : > { %1745 = vmatprep.mubr.msk.f32.mxu0 %vm458_vm0, %v182_v27  ;;  %1809 = vmatprep.mubr.msk.f32.mxu1 %vm458_vm0, %v310_v28  ;;  %v339_v26 = vld [vmem:[%s2048_s26 + $0x510] sm:$0xff]  ;;  %v214_v27 = vld [vmem:[%s2048_s26 + $0x128] sm:$0xff] }
  0x37   : > { %v342_v28 = vld [vmem:[%s2048_s26 + $0x528] sm:$0xff] }
  0x39   : > { %918 = vmatmul.mubr.f32.gmra.mxu0 %v181_v29  ;;  %1238 = vmatmul.mubr.f32.gmra.mxu1 %v309_v30  ;;  %v213_v29 = vld [vmem:[%s2048_s26 + $0x120] sm:$0xff] }
  0x3a   : > { %1746 = vmatprep.mubr.msk.f32.mxu0 %vm458_vm0, %v184_v31  ;;  %1810 = vmatprep.mubr.msk.f32.mxu1 %vm458_vm0, %v312_v32  ;;  %v341_v30 = vld [vmem:[%s2048_s26 + $0x520] sm:$0xff]  ;;  %v216_v31 = vld [vmem:[%s2048_s26 + $0x138] sm:$0xff] }
  0x3b   : > { %v344_v32 = vld [vmem:[%s2048_s26 + $0x538] sm:$0xff] }
  0x3d   : > { %923 = vmatmul.mubr.f32.gmra.mxu0 %v183_v33  ;;  %1243 = vmatmul.mubr.f32.gmra.mxu1 %v311_v34  ;;  %v215_v33 = vld [vmem:[%s2048_s26 + $0x130] sm:$0xff] }
  0x3e   : > { %1747 = vmatprep.mubr.msk.f32.mxu0 %vm458_vm0, %v186_v35  ;;  %1811 = vmatprep.mubr.msk.f32.mxu1 %vm458_vm0, %v314_v36  ;;  %v343_v34 = vld [vmem:[%s2048_s26 + $0x530] sm:$0xff]  ;;  %v218_v35 = vld [vmem:[%s2048_s26 + $0x148] sm:$0xff] }
  0x3f   : > { %v346_v36 = vld [vmem:[%s2048_s26 + $0x548] sm:$0xff] }
  0x41   : > { %928 = vmatmul.mubr.f32.gmra.mxu0 %v185_v37  ;;  %1248 = vmatmul.mubr.f32.gmra.mxu1 %v313_v38  ;;  %v217_v37 = vld [vmem:[%s2048_s26 + $0x140] sm:$0xff] }
  0x42   : > { %1748 = vmatprep.mubr.msk.f32.mxu0 %vm458_vm0, %v188_v39  ;;  %1812 = vmatprep.mubr.msk.f32.mxu1 %vm458_vm0, %v316_v40  ;;  %v345_v38 = vld [vmem:[%s2048_s26 + $0x540] sm:$0xff]  ;;  %v220_v39 = vld [vmem:[%s2048_s26 + $0x158] sm:$0xff] }
  0x43   : > { %v348_v40 = vld [vmem:[%s2048_s26 + $0x558] sm:$0xff] }
  0x45   : > { %933 = vmatmul.mubr.f32.gmra.mxu0 %v187_v41  ;;  %1253 = vmatmul.mubr.f32.gmra.mxu1 %v315_v42  ;;  %v219_v41 = vld [vmem:[%s2048_s26 + $0x150] sm:$0xff] }
  0x46   : > { %1749 = vmatprep.mubr.msk.f32.mxu0 %vm458_vm0, %v190_v43  ;;  %1813 = vmatprep.mubr.msk.f32.mxu1 %vm458_vm0, %v318_v44  ;;  %v347_v42 = vld [vmem:[%s2048_s26 + $0x550] sm:$0xff]  ;;  %v222_v43 = vld [vmem:[%s2048_s26 + $0x168] sm:$0xff] }
  0x47   : > { %v350_v44 = vld [vmem:[%s2048_s26 + $0x568] sm:$0xff] }
  0x49   : > { %938 = vmatmul.mubr.f32.gmra.mxu0 %v189_v45  ;;  %1258 = vmatmul.mubr.f32.gmra.mxu1 %v317_v46  ;;  %v221_v45 = vld [vmem:[%s2048_s26 + $0x160] sm:$0xff] }
  0x4a   : > { %1750 = vmatprep.mubr.msk.f32.mxu0 %vm458_vm0, %v192_v47  ;;  %1814 = vmatprep.mubr.msk.f32.mxu1 %vm458_vm0, %v320_v48  ;;  %v349_v46 = vld [vmem:[%s2048_s26 + $0x560] sm:$0xff]  ;;  %v224_v47 = vld [vmem:[%s2048_s26 + $0x178] sm:$0xff] }
  0x4b   : > { %v352_v48 = vld [vmem:[%s2048_s26 + $0x578] sm:$0xff] }
  0x4d   : > { %943 = vmatmul.mubr.f32.gmra.mxu0 %v191_v49  ;;  %1263 = vmatmul.mubr.f32.gmra.mxu1 %v319_v50  ;;  %v223_v49 = vld [vmem:[%s2048_s26 + $0x170] sm:$0xff] }
  0x4e   : > { %1751 = vmatprep.mubr.msk.f32.mxu0 %vm458_vm0, %v194_v51  ;;  %1815 = vmatprep.mubr.msk.f32.mxu1 %vm458_vm0, %v322_v52  ;;  %v351_v50 = vld [vmem:[%s2048_s26 + $0x570] sm:$0xff]  ;;  %v226_v51 = vld [vmem:[%s2048_s26 + $0x188] sm:$0xff] }
  0x4f   : > { %v354_v52 = vld [vmem:[%s2048_s26 + $0x588] sm:$0xff] }
  0x51   : > { %948 = vmatmul.mubr.f32.gmra.mxu0 %v193_v53  ;;  %1268 = vmatmul.mubr.f32.gmra.mxu1 %v321_v54  ;;  %v225_v53 = vld [vmem:[%s2048_s26 + $0x180] sm:$0xff] }
  0x52   : > { %1752 = vmatprep.mubr.msk.f32.mxu0 %vm458_vm0, %v196_v55  ;;  %1816 = vmatprep.mubr.msk.f32.mxu1 %vm458_vm0, %v324_v56  ;;  %v353_v54 = vld [vmem:[%s2048_s26 + $0x580] sm:$0xff]  ;;  %v228_v55 = vld [vmem:[%s2048_s26 + $0x198] sm:$0xff] }
  0x53   : > { %v356_v56 = vld [vmem:[%s2048_s26 + $0x598] sm:$0xff] }
  0x55   : > { %953 = vmatmul.mubr.f32.gmra.mxu0 %v195_v57  ;;  %1273 = vmatmul.mubr.f32.gmra.mxu1 %v323_v58  ;;  %v227_v57 = vld [vmem:[%s2048_s26 + $0x190] sm:$0xff] }
  0x56   : > { %1753 = vmatprep.mubr.msk.f32.mxu0 %vm458_vm0, %v198_v59  ;;  %1817 = vmatprep.mubr.msk.f32.mxu1 %vm458_vm0, %v326_v60  ;;  %v355_v58 = vld [vmem:[%s2048_s26 + $0x590] sm:$0xff]  ;;  %v230_v59 = vld [vmem:[%s2048_s26 + $0x1a8] sm:$0xff] }
  0x57   : > { %v358_v60 = vld [vmem:[%s2048_s26 + $0x5a8] sm:$0xff] }
  0x59   : > { %958 = vmatmul.mubr.f32.gmra.mxu0 %v197_v61  ;;  %1278 = vmatmul.mubr.f32.gmra.mxu1 %v325_v62  ;;  %v229_v61 = vld [vmem:[%s2048_s26 + $0x1a0] sm:$0xff] }
  0x5a   : > { %1754 = vmatprep.mubr.msk.f32.mxu0 %vm458_vm0, %v200_v63  ;;  %1818 = vmatprep.mubr.msk.f32.mxu1 %vm458_vm0, %v328_v0  ;;  %v357_v62 = vld [vmem:[%s2048_s26 + $0x5a0] sm:$0xff]  ;;  %v232_v63 = vld [vmem:[%s2048_s26 + $0x1b8] sm:$0xff] }
  0x5b   : > { %v360_v0 = vld [vmem:[%s2048_s26 + $0x5b8] sm:$0xff] }
  0x5d   : > { %963 = vmatmul.mubr.f32.gmra.mxu0 %v199_v1  ;;  %1283 = vmatmul.mubr.f32.gmra.mxu1 %v327_v2  ;;  %v231_v1 = vld [vmem:[%s2048_s26 + $0x1b0] sm:$0xff] }
  0x5e   : > { %1755 = vmatprep.mubr.msk.f32.mxu0 %vm458_vm0, %v202_v3  ;;  %1819 = vmatprep.mubr.msk.f32.mxu1 %vm458_vm0, %v330_v4  ;;  %v359_v2 = vld [vmem:[%s2048_s26 + $0x5b0] sm:$0xff]  ;;  %v234_v3 = vld [vmem:[%s2048_s26 + $0x1c8] sm:$0xff] }
  0x5f   : > { %v362_v4 = vld [vmem:[%s2048_s26 + $0x5c8] sm:$0xff] }
  0x61   : > { %968 = vmatmul.mubr.f32.gmra.mxu0 %v201_v5  ;;  %1288 = vmatmul.mubr.f32.gmra.mxu1 %v329_v6  ;;  %v233_v5 = vld [vmem:[%s2048_s26 + $0x1c0] sm:$0xff] }
  0x62   : > { %1756 = vmatprep.mubr.msk.f32.mxu0 %vm458_vm0, %v204_v7  ;;  %1820 = vmatprep.mubr.msk.f32.mxu1 %vm458_vm0, %v332_v8  ;;  %v361_v6 = vld [vmem:[%s2048_s26 + $0x5c0] sm:$0xff]  ;;  %v236_v7 = vld [vmem:[%s2048_s26 + $0x1d8] sm:$0xff] }
  0x63   : > { %v364_v8 = vld [vmem:[%s2048_s26 + $0x5d8] sm:$0xff] }
  0x65   : > { %973 = vmatmul.mubr.f32.gmra.mxu0 %v203_v9  ;;  %1293 = vmatmul.mubr.f32.gmra.mxu1 %v331_v10  ;;  %v235_v9 = vld [vmem:[%s2048_s26 + $0x1d0] sm:$0xff] }
  0x66   : > { %1757 = vmatprep.mubr.msk.f32.mxu0 %vm458_vm0, %v206_v11  ;;  %1821 = vmatprep.mubr.msk.f32.mxu1 %vm458_vm0, %v334_v12  ;;  %v363_v10 = vld [vmem:[%s2048_s26 + $0x5d0] sm:$0xff]  ;;  %v238_v11 = vld [vmem:[%s2048_s26 + $0x1e8] sm:$0xff] }
  0x67   : > { %v366_v12 = vld [vmem:[%s2048_s26 + $0x5e8] sm:$0xff] }
  0x69   : > { %978 = vmatmul.mubr.f32.gmra.mxu0 %v205_v13  ;;  %1298 = vmatmul.mubr.f32.gmra.mxu1 %v333_v14  ;;  %v237_v13 = vld [vmem:[%s2048_s26 + $0x1e0] sm:$0xff] }
  0x6a   : > { %1758 = vmatprep.mubr.msk.f32.mxu0 %vm458_vm0, %v208_v15  ;;  %1822 = vmatprep.mubr.msk.f32.mxu1 %vm458_vm0, %v336_v16  ;;  %v365_v14 = vld [vmem:[%s2048_s26 + $0x5e0] sm:$0xff]  ;;  %v240_v15 = vld [vmem:[%s2048_s26 + $0x1f8] sm:$0xff] }
  0x6b   : > { %v368_v16 = vld [vmem:[%s2048_s26 + $0x5f8] sm:$0xff] }
  0x6d   : > { %983 = vmatmul.mubr.f32.gmra.mxu0 %v207_v17  ;;  %1303 = vmatmul.mubr.f32.gmra.mxu1 %v335_v18  ;;  %v239_v17 = vld [vmem:[%s2048_s26 + $0x1f0] sm:$0xff] }
  0x6e   : > { %1759 = vmatprep.mubr.msk.f32.mxu0 %vm458_vm0, %v210_v19  ;;  %1823 = vmatprep.mubr.msk.f32.mxu1 %vm458_vm0, %v338_v20  ;;  %v367_v18 = vld [vmem:[%s2048_s26 + $0x5f0] sm:$0xff]  ;;  %v242_v19 = vld [vmem:[%s2048_s26 + $0x208] sm:$0xff] }
  0x6f   : > { %v370_v20 = vld [vmem:[%s2048_s26 + $0x608] sm:$0xff] }
  0x71   : > { %988 = vmatmul.mubr.f32.gmra.mxu0 %v209_v21  ;;  %1308 = vmatmul.mubr.f32.gmra.mxu1 %v337_v22  ;;  %v241_v21 = vld [vmem:[%s2048_s26 + $0x200] sm:$0xff] }
  0x72   : > { %1760 = vmatprep.mubr.msk.f32.mxu0 %vm458_vm0, %v212_v23  ;;  %1824 = vmatprep.mubr.msk.f32.mxu1 %vm458_vm0, %v340_v24  ;;  %v369_v22 = vld [vmem:[%s2048_s26 + $0x600] sm:$0xff]  ;;  %v244_v23 = vld [vmem:[%s2048_s26 + $0x218] sm:$0xff] }
  0x73   : > { %v372_v24 = vld [vmem:[%s2048_s26 + $0x618] sm:$0xff] }
  0x75   : > { %993 = vmatmul.mubr.f32.gmra.mxu0 %v211_v25  ;;  %1313 = vmatmul.mubr.f32.gmra.mxu1 %v339_v26  ;;  %v243_v25 = vld [vmem:[%s2048_s26 + $0x210] sm:$0xff] }
  0x76   : > { %1761 = vmatprep.mubr.msk.f32.mxu0 %vm458_vm0, %v214_v27  ;;  %1825 = vmatprep.mubr.msk.f32.mxu1 %vm458_vm0, %v342_v28  ;;  %v371_v26 = vld [vmem:[%s2048_s26 + $0x610] sm:$0xff]  ;;  %v246_v27 = vld [vmem:[%s2048_s26 + $0x228] sm:$0xff] }
  0x77   : > { %v374_v28 = vld [vmem:[%s2048_s26 + $0x628] sm:$0xff] }
  0x79   : > { %998 = vmatmul.mubr.f32.gmra.mxu0 %v213_v29  ;;  %1318 = vmatmul.mubr.f32.gmra.mxu1 %v341_v30  ;;  %v245_v29 = vld [vmem:[%s2048_s26 + $0x220] sm:$0xff] }
  0x7a   : > { %1762 = vmatprep.mubr.msk.f32.mxu0 %vm458_vm0, %v216_v31  ;;  %1826 = vmatprep.mubr.msk.f32.mxu1 %vm458_vm0, %v344_v32  ;;  %v373_v30 = vld [vmem:[%s2048_s26 + $0x620] sm:$0xff]  ;;  %v248_v31 = vld [vmem:[%s2048_s26 + $0x238] sm:$0xff] }
  0x7b   : > { %v376_v32 = vld [vmem:[%s2048_s26 + $0x638] sm:$0xff] }
  0x7d   : > { %1003 = vmatmul.mubr.f32.gmra.mxu0 %v215_v33  ;;  %1323 = vmatmul.mubr.f32.gmra.mxu1 %v343_v34  ;;  %v247_v33 = vld [vmem:[%s2048_s26 + $0x230] sm:$0xff] }
  0x7e   : > { %1763 = vmatprep.mubr.msk.f32.mxu0 %vm458_vm0, %v218_v35  ;;  %1827 = vmatprep.mubr.msk.f32.mxu1 %vm458_vm0, %v346_v36  ;;  %v375_v34 = vld [vmem:[%s2048_s26 + $0x630] sm:$0xff]  ;;  %v250_v35 = vld [vmem:[%s2048_s26 + $0x248] sm:$0xff] }
  0x7f   : > { %v378_v36 = vld [vmem:[%s2048_s26 + $0x648] sm:$0xff] }
  0x81   : > { %1008 = vmatmul.mubr.f32.gmra.mxu0 %v217_v37  ;;  %1328 = vmatmul.mubr.f32.gmra.mxu1 %v345_v38  ;;  %v249_v37 = vld [vmem:[%s2048_s26 + $0x240] sm:$0xff] }
  0x82   : > { %1764 = vmatprep.mubr.msk.f32.mxu0 %vm458_vm0, %v220_v39  ;;  %1828 = vmatprep.mubr.msk.f32.mxu1 %vm458_vm0, %v348_v40  ;;  %v377_v38 = vld [vmem:[%s2048_s26 + $0x640] sm:$0xff]  ;;  %v252_v39 = vld [vmem:[%s2048_s26 + $0x258] sm:$0xff] }
  0x83   : > { %v380_v40 = vld [vmem:[%s2048_s26 + $0x658] sm:$0xff] }
  0x85   : > { %1013 = vmatmul.mubr.f32.gmra.mxu0 %v219_v41  ;;  %1333 = vmatmul.mubr.f32.gmra.mxu1 %v347_v42  ;;  %v251_v41 = vld [vmem:[%s2048_s26 + $0x250] sm:$0xff] }
  0x86   : > { %1765 = vmatprep.mubr.msk.f32.mxu0 %vm458_vm0, %v222_v43  ;;  %1829 = vmatprep.mubr.msk.f32.mxu1 %vm458_vm0, %v350_v44  ;;  %v379_v42 = vld [vmem:[%s2048_s26 + $0x650] sm:$0xff]  ;;  %v254_v43 = vld [vmem:[%s2048_s26 + $0x268] sm:$0xff] }
  0x87   : > { %v382_v44 = vld [vmem:[%s2048_s26 + $0x668] sm:$0xff] }
  0x89   : > { %1018 = vmatmul.mubr.f32.gmra.mxu0 %v221_v45  ;;  %1338 = vmatmul.mubr.f32.gmra.mxu1 %v349_v46  ;;  %v253_v45 = vld [vmem:[%s2048_s26 + $0x260] sm:$0xff] }
  0x8a   : > { %1766 = vmatprep.mubr.msk.f32.mxu0 %vm458_vm0, %v224_v47  ;;  %1830 = vmatprep.mubr.msk.f32.mxu1 %vm458_vm0, %v352_v48  ;;  %v381_v46 = vld [vmem:[%s2048_s26 + $0x660] sm:$0xff]  ;;  %v256_v47 = vld [vmem:[%s2048_s26 + $0x278] sm:$0xff] }
  0x8b   : > { %v384_v48 = vld [vmem:[%s2048_s26 + $0x678] sm:$0xff] }
  0x8d   : > { %1023 = vmatmul.mubr.f32.gmra.mxu0 %v223_v49  ;;  %1343 = vmatmul.mubr.f32.gmra.mxu1 %v351_v50  ;;  %v255_v49 = vld [vmem:[%s2048_s26 + $0x270] sm:$0xff] }
  0x8e   : > { %1767 = vmatprep.mubr.msk.f32.mxu0 %vm458_vm0, %v226_v51  ;;  %1831 = vmatprep.mubr.msk.f32.mxu1 %vm458_vm0, %v354_v52  ;;  %v383_v50 = vld [vmem:[%s2048_s26 + $0x670] sm:$0xff]  ;;  %v258_v51 = vld [vmem:[%s2048_s26 + $0x288] sm:$0xff] }
  0x8f   : > { %v386_v52 = vld [vmem:[%s2048_s26 + $0x688] sm:$0xff] }
  0x91   : > { %1028 = vmatmul.mubr.f32.gmra.mxu0 %v225_v53  ;;  %1348 = vmatmul.mubr.f32.gmra.mxu1 %v353_v54  ;;  %v257_v53 = vld [vmem:[%s2048_s26 + $0x280] sm:$0xff] }
  0x92   : > { %1768 = vmatprep.mubr.msk.f32.mxu0 %vm458_vm0, %v228_v55  ;;  %1832 = vmatprep.mubr.msk.f32.mxu1 %vm458_vm0, %v356_v56  ;;  %v385_v54 = vld [vmem:[%s2048_s26 + $0x680] sm:$0xff]  ;;  %v260_v55 = vld [vmem:[%s2048_s26 + $0x298] sm:$0xff] }
  0x93   : > { %v388_v56 = vld [vmem:[%s2048_s26 + $0x698] sm:$0xff] }
  0x95   : > { %1033 = vmatmul.mubr.f32.gmra.mxu0 %v227_v57  ;;  %1353 = vmatmul.mubr.f32.gmra.mxu1 %v355_v58  ;;  %v259_v57 = vld [vmem:[%s2048_s26 + $0x290] sm:$0xff] }
  0x96   : > { %1769 = vmatprep.mubr.msk.f32.mxu0 %vm458_vm0, %v230_v59  ;;  %1833 = vmatprep.mubr.msk.f32.mxu1 %vm458_vm0, %v358_v60  ;;  %v387_v58 = vld [vmem:[%s2048_s26 + $0x690] sm:$0xff]  ;;  %v262_v59 = vld [vmem:[%s2048_s26 + $0x2a8] sm:$0xff] }
  0x97   : > { %v390_v60 = vld [vmem:[%s2048_s26 + $0x6a8] sm:$0xff] }
  0x99   : > { %1038 = vmatmul.mubr.f32.gmra.mxu0 %v229_v61  ;;  %1358 = vmatmul.mubr.f32.gmra.mxu1 %v357_v62  ;;  %v261_v61 = vld [vmem:[%s2048_s26 + $0x2a0] sm:$0xff] }
  0x9a   : > { %1770 = vmatprep.mubr.msk.f32.mxu0 %vm458_vm0, %v232_v63  ;;  %1834 = vmatprep.mubr.msk.f32.mxu1 %vm458_vm0, %v360_v0  ;;  %v389_v62 = vld [vmem:[%s2048_s26 + $0x6a0] sm:$0xff]  ;;  %v264_v63 = vld [vmem:[%s2048_s26 + $0x2b8] sm:$0xff] }
  0x9b   : > { %v392_v0 = vld [vmem:[%s2048_s26 + $0x6b8] sm:$0xff] }
  0x9d   : > { %1043 = vmatmul.mubr.f32.gmra.mxu0 %v231_v1  ;;  %1363 = vmatmul.mubr.f32.gmra.mxu1 %v359_v2  ;;  %v263_v1 = vld [vmem:[%s2048_s26 + $0x2b0] sm:$0xff] }
  0x9e   : > { %1771 = vmatprep.mubr.msk.f32.mxu0 %vm458_vm0, %v234_v3  ;;  %1835 = vmatprep.mubr.msk.f32.mxu1 %vm458_vm0, %v362_v4  ;;  %v391_v2 = vld [vmem:[%s2048_s26 + $0x6b0] sm:$0xff]  ;;  %v266_v3 = vld [vmem:[%s2048_s26 + $0x2c8] sm:$0xff] }
  0x9f   : > { %v394_v4 = vld [vmem:[%s2048_s26 + $0x6c8] sm:$0xff] }
  0xa1   : > { %1048 = vmatmul.mubr.f32.gmra.mxu0 %v233_v5  ;;  %1368 = vmatmul.mubr.f32.gmra.mxu1 %v361_v6  ;;  %v265_v5 = vld [vmem:[%s2048_s26 + $0x2c0] sm:$0xff] }
  0xa2   : > { %1772 = vmatprep.mubr.msk.f32.mxu0 %vm458_vm0, %v236_v7  ;;  %1836 = vmatprep.mubr.msk.f32.mxu1 %vm458_vm0, %v364_v8  ;;  %v393_v6 = vld [vmem:[%s2048_s26 + $0x6c0] sm:$0xff]  ;;  %v268_v7 = vld [vmem:[%s2048_s26 + $0x2d8] sm:$0xff] }
  0xa3   : > { %v396_v8 = vld [vmem:[%s2048_s26 + $0x6d8] sm:$0xff] }
  0xa5   : > { %1053 = vmatmul.mubr.f32.gmra.mxu0 %v235_v9  ;;  %1373 = vmatmul.mubr.f32.gmra.mxu1 %v363_v10  ;;  %v267_v9 = vld [vmem:[%s2048_s26 + $0x2d0] sm:$0xff] }
  0xa6   : > { %1773 = vmatprep.mubr.msk.f32.mxu0 %vm458_vm0, %v238_v11  ;;  %1837 = vmatprep.mubr.msk.f32.mxu1 %vm458_vm0, %v366_v12  ;;  %v395_v10 = vld [vmem:[%s2048_s26 + $0x6d0] sm:$0xff]  ;;  %v270_v11 = vld [vmem:[%s2048_s26 + $0x2e8] sm:$0xff] }
  0xa7   : > { %v398_v12 = vld [vmem:[%s2048_s26 + $0x6e8] sm:$0xff] }
  0xa9   : > { %1058 = vmatmul.mubr.f32.gmra.mxu0 %v237_v13  ;;  %1378 = vmatmul.mubr.f32.gmra.mxu1 %v365_v14  ;;  %v269_v13 = vld [vmem:[%s2048_s26 + $0x2e0] sm:$0xff] }
  0xaa   : > { %1774 = vmatprep.mubr.msk.f32.mxu0 %vm458_vm0, %v240_v15  ;;  %1838 = vmatprep.mubr.msk.f32.mxu1 %vm458_vm0, %v368_v16  ;;  %v397_v14 = vld [vmem:[%s2048_s26 + $0x6e0] sm:$0xff]  ;;  %v272_v15 = vld [vmem:[%s2048_s26 + $0x2f8] sm:$0xff] }
  0xab   : > { %v400_v16 = vld [vmem:[%s2048_s26 + $0x6f8] sm:$0xff] }
  0xad   : > { %1063 = vmatmul.mubr.f32.gmra.mxu0 %v239_v17  ;;  %1383 = vmatmul.mubr.f32.gmra.mxu1 %v367_v18  ;;  %v271_v17 = vld [vmem:[%s2048_s26 + $0x2f0] sm:$0xff] }
  0xae   : > { %1775 = vmatprep.mubr.msk.f32.mxu0 %vm458_vm0, %v242_v19  ;;  %1839 = vmatprep.mubr.msk.f32.mxu1 %vm458_vm0, %v370_v20  ;;  %v399_v18 = vld [vmem:[%s2048_s26 + $0x6f0] sm:$0xff]  ;;  %v274_v19 = vld [vmem:[%s2048_s26 + $0x308] sm:$0xff] }
  0xaf   : > { %v402_v20 = vld [vmem:[%s2048_s26 + $0x708] sm:$0xff] }
  0xb1   : > { %1068 = vmatmul.mubr.f32.gmra.mxu0 %v241_v21  ;;  %1388 = vmatmul.mubr.f32.gmra.mxu1 %v369_v22  ;;  %v273_v21 = vld [vmem:[%s2048_s26 + $0x300] sm:$0xff] }
  0xb2   : > { %1776 = vmatprep.mubr.msk.f32.mxu0 %vm458_vm0, %v244_v23  ;;  %1840 = vmatprep.mubr.msk.f32.mxu1 %vm458_vm0, %v372_v24  ;;  %v401_v22 = vld [vmem:[%s2048_s26 + $0x700] sm:$0xff]  ;;  %v276_v24 = vld [vmem:[%s2048_s26 + $0x318] sm:$0xff] }
  0xb3   : > { %v2355_v23 = vld [vmem:[%s2846_s2] ss:$0 sm:$0xff] }
  0xb5   : > { %1073 = vmatmul.mubr.f32.gmra.mxu0 %v243_v25  ;;  %1393 = vmatmul.mubr.f32.gmra.mxu1 %v371_v26  ;;  %v404_v25 = vld [vmem:[%s2048_s26 + $0x718] sm:$0xff] }
  0xb6   : > { %1777 = vmatprep.mubr.msk.f32.mxu0 %vm458_vm0, %v246_v27  ;;  %1841 = vmatprep.mubr.msk.f32.mxu1 %vm458_vm0, %v374_v28 }
  0xb9   : > { %1078 = vmatmul.mubr.f32.gmra.mxu0 %v245_v29  ;;  %1398 = vmatmul.mubr.f32.gmra.mxu1 %v373_v30  ;;  %v275_v30 = vld [vmem:[%s2048_s26 + $0x310] sm:$0xff] }
  0xba   : > { %1778 = vmatprep.mubr.msk.f32.mxu0 %vm458_vm0, %v248_v31  ;;  %1842 = vmatprep.mubr.msk.f32.mxu1 %vm458_vm0, %v376_v32  ;;  %v403_v31 = vld [vmem:[%s2048_s26 + $0x710] sm:$0xff] }
  0xbd   : > { %1083 = vmatmul.mubr.f32.gmra.mxu0 %v247_v33  ;;  %1403 = vmatmul.mubr.f32.gmra.mxu1 %v375_v34  ;;  %v278_v34 = vld [vmem:[%s2048_s26 + $0x328] sm:$0xff] }
  0xbe   : > { %1779 = vmatprep.mubr.msk.f32.mxu0 %vm458_vm0, %v250_v35  ;;  %1843 = vmatprep.mubr.msk.f32.mxu1 %vm458_vm0, %v378_v36  ;;  %v406_v35 = vld [vmem:[%s2048_s26 + $0x728] sm:$0xff] }
  0xc1   : > { %1088 = vmatmul.mubr.f32.gmra.mxu0 %v249_v37  ;;  %1408 = vmatmul.mubr.f32.gmra.mxu1 %v377_v38 }
  0xc2   : > { %1780 = vmatprep.mubr.msk.f32.mxu0 %vm458_vm0, %v252_v39  ;;  %1844 = vmatprep.mubr.msk.f32.mxu1 %vm458_vm0, %v380_v40  ;;  %v277_v40 = vld [vmem:[%s2048_s26 + $0x320] sm:$0xff] }
  0xc5   : > { %1093 = vmatmul.mubr.f32.gmra.mxu0 %v251_v41  ;;  %1413 = vmatmul.mubr.f32.gmra.mxu1 %v379_v42  ;;  %v405_v41 = vld [vmem:[%s2048_s26 + $0x720] sm:$0xff] }
  0xc6   : > { %1781 = vmatprep.mubr.msk.f32.mxu0 %vm458_vm0, %v254_v43  ;;  %1845 = vmatprep.mubr.msk.f32.mxu1 %vm458_vm0, %v382_v44  ;;  %v280_v44 = vld [vmem:[%s2048_s26 + $0x338] sm:$0xff] }
  0xc9   : > { %1098 = vmatmul.mubr.f32.gmra.mxu0 %v253_v45  ;;  %1418 = vmatmul.mubr.f32.gmra.mxu1 %v381_v46  ;;  %v408_v45 = vld [vmem:[%s2048_s26 + $0x738] sm:$0xff] }
  0xca   : > { %1782 = vmatprep.mubr.msk.f32.mxu0 %vm458_vm0, %v256_v47  ;;  %1846 = vmatprep.mubr.msk.f32.mxu1 %vm458_vm0, %v384_v48 }
  0xcd   : > { %1103 = vmatmul.mubr.f32.gmra.mxu0 %v255_v49  ;;  %1423 = vmatmul.mubr.f32.gmra.mxu1 %v383_v50  ;;  %v279_v50 = vld [vmem:[%s2048_s26 + $0x330] sm:$0xff] }
  0xce   : > { %1783 = vmatprep.mubr.msk.f32.mxu0 %vm458_vm0, %v258_v51  ;;  %1847 = vmatprep.mubr.msk.f32.mxu1 %vm458_vm0, %v386_v52  ;;  %v407_v51 = vld [vmem:[%s2048_s26 + $0x730] sm:$0xff] }
  0xd1   : > { %1108 = vmatmul.mubr.f32.gmra.mxu0 %v257_v53  ;;  %1428 = vmatmul.mubr.f32.gmra.mxu1 %v385_v54  ;;  %v282_v54 = vld [vmem:[%s2048_s26 + $0x348] sm:$0xff] }
  0xd2   : > { %1784 = vmatprep.mubr.msk.f32.mxu0 %vm458_vm0, %v260_v55  ;;  %1848 = vmatprep.mubr.msk.f32.mxu1 %vm458_vm0, %v388_v56  ;;  %v410_v55 = vld [vmem:[%s2048_s26 + $0x748] sm:$0xff] }
  0xd5   : > { %1113 = vmatmul.mubr.f32.gmra.mxu0 %v259_v57  ;;  %1433 = vmatmul.mubr.f32.gmra.mxu1 %v387_v58 }
  0xd6   : > { %1785 = vmatprep.mubr.msk.f32.mxu0 %vm458_vm0, %v262_v59  ;;  %1849 = vmatprep.mubr.msk.f32.mxu1 %vm458_vm0, %v390_v60  ;;  %v281_v60 = vld [vmem:[%s2048_s26 + $0x340] sm:$0xff] }
  0xd9   : > { %1118 = vmatmul.mubr.f32.gmra.mxu0 %v261_v61  ;;  %1438 = vmatmul.mubr.f32.gmra.mxu1 %v389_v62  ;;  %v409_v61 = vld [vmem:[%s2048_s26 + $0x740] sm:$0xff] }
  0xda   : > { %1786 = vmatprep.mubr.msk.f32.mxu0 %vm458_vm0, %v264_v63  ;;  %1850 = vmatprep.mubr.msk.f32.mxu1 %vm458_vm0, %v392_v0  ;;  %v284_v0 = vld [vmem:[%s2048_s26 + $0x358] sm:$0xff] }
  0xdd   : > { %1123 = vmatmul.mubr.f32.gmra.mxu0 %v263_v1  ;;  %1443 = vmatmul.mubr.f32.gmra.mxu1 %v391_v2  ;;  %v412_v1 = vld [vmem:[%s2048_s26 + $0x758] sm:$0xff] }
  0xde   : > { %1787 = vmatprep.mubr.msk.f32.mxu0 %vm458_vm0, %v266_v3  ;;  %1851 = vmatprep.mubr.msk.f32.mxu1 %vm458_vm0, %v394_v4 }
  0xe1   : > { %1128 = vmatmul.mubr.f32.gmra.mxu0 %v265_v5  ;;  %1448 = vmatmul.mubr.f32.gmra.mxu1 %v393_v6  ;;  %v283_v6 = vld [vmem:[%s2048_s26 + $0x350] sm:$0xff] }
  0xe2   : > { %1788 = vmatprep.mubr.msk.f32.mxu0 %vm458_vm0, %v268_v7  ;;  %1852 = vmatprep.mubr.msk.f32.mxu1 %vm458_vm0, %v396_v8  ;;  %v411_v7 = vld [vmem:[%s2048_s26 + $0x750] sm:$0xff] }
  0xe5   : > { %1133 = vmatmul.mubr.f32.gmra.mxu0 %v267_v9  ;;  %1453 = vmatmul.mubr.f32.gmra.mxu1 %v395_v10  ;;  %v286_v10 = vld [vmem:[%s2048_s26 + $0x368] sm:$0xff] }
  0xe6   : > { %1789 = vmatprep.mubr.msk.f32.mxu0 %vm458_vm0, %v270_v11  ;;  %1853 = vmatprep.mubr.msk.f32.mxu1 %vm458_vm0, %v398_v12  ;;  %v414_v11 = vld [vmem:[%s2048_s26 + $0x768] sm:$0xff] }
  0xe9   : > { %1138 = vmatmul.mubr.f32.gmra.mxu0 %v269_v13  ;;  %1458 = vmatmul.mubr.f32.gmra.mxu1 %v397_v14 }
  0xea   : > { %1790 = vmatprep.mubr.msk.f32.mxu0 %vm458_vm0, %v272_v15  ;;  %1854 = vmatprep.mubr.msk.f32.mxu1 %vm458_vm0, %v400_v16  ;;  %v285_v16 = vld [vmem:[%s2048_s26 + $0x360] sm:$0xff] }
  0xed   : > { %1143 = vmatmul.mubr.f32.gmra.mxu0 %v271_v17  ;;  %1463 = vmatmul.mubr.f32.gmra.mxu1 %v399_v18  ;;  %v413_v17 = vld [vmem:[%s2048_s26 + $0x760] sm:$0xff] }
  0xee   : > { %1791 = vmatprep.mubr.msk.f32.mxu0 %vm458_vm0, %v274_v19  ;;  %1855 = vmatprep.mubr.msk.f32.mxu1 %vm458_vm0, %v402_v20  ;;  %v288_v20 = vld [vmem:[%s2048_s26 + $0x378] sm:$0xff] }
  0xf1   : > { %v909_v26 = vpop.f32.mrf.mxu0  ;;  %1148 = vmatmul.mubr.f32.gmra.mxu0 %v273_v21  ;;  %v1229_v27 = vpop.f32.mrf.mxu1  ;;  %1468 = vmatmul.mubr.f32.gmra.mxu1 %v401_v22  ;;  %v416_v21 = vld [vmem:[%s2048_s26 + $0x778] sm:$0xff] }
  0xf2   : > { %v910_v28 = vadd.f32 %v2355_v23, %v909_v26  ;;  %v1230_v29 = vadd.f32 %v2355_v23, %v1229_v27  ;;  %1792 = vmatprep.mubr.msk.f32.mxu0 %vm458_vm0, %v276_v24  ;;  %1856 = vmatprep.mubr.msk.f32.mxu1 %vm458_vm0, %v404_v25  ;;  %v287_v27 = vld [vmem:[%s2048_s26 + $0x370] sm:$0xff] }
  0xf3   : > { %v911_v32 = vpop.f32.mrf.mxu0  ;;  %v1231_v33 = vpop.f32.mrf.mxu1 }
  0xf4   : > { %1548 = vst.msk [vmem:[%s2362_s8] sm:$0xff] %vm458_vm0, %v910_v28  ;;  %1612 = vst.msk [vmem:[%s2362_s8 + $0x200] sm:$0xff] %vm458_vm0, %v1230_v29  ;;  %v415_v28 = vld [vmem:[%s2048_s26 + $0x770] sm:$0xff]  ;;  %v418_v32 = vld [vmem:[%s2048_s26 + $0x788] sm:$0xff] }
  0xf5   : > { %v914_v36 = vpop.f32.mrf.mxu0  ;;  %1153 = vmatmul.mubr.f32.gmra.mxu0 %v275_v30  ;;  %v1234_v37 = vpop.f32.mrf.mxu1  ;;  %1473 = vmatmul.mubr.f32.gmra.mxu1 %v403_v31  ;;  %v290_v31 = vld [vmem:[%s2048_s26 + $0x388] sm:$0xff] }
  0xf6   : > { %v915_v38 = vadd.f32 %v2355_v23, %v914_v36  ;;  %v1235_v39 = vadd.f32 %v2355_v23, %v1234_v37  ;;  %1793 = vmatprep.mubr.msk.f32.mxu0 %vm458_vm0, %v278_v34  ;;  %1857 = vmatprep.mubr.msk.f32.mxu1 %vm458_vm0, %v406_v35  ;;  %v289_v37 = vld [vmem:[%s2048_s26 + $0x380] sm:$0xff] }
  0xf7   : > { %v916_v42 = vpop.f32.mrf.mxu0  ;;  %v1236_v43 = vpop.f32.mrf.mxu1 }
  0xf8   : > { %1549 = vst.msk [vmem:[%s2362_s8 + $0x8] sm:$0xff] %vm458_vm0, %v915_v38  ;;  %1613 = vst.msk [vmem:[%s2362_s8 + $0x208] sm:$0xff] %vm458_vm0, %v1235_v39  ;;  %v417_v38 = vld [vmem:[%s2048_s26 + $0x780] sm:$0xff]  ;;  %v420_v42 = vld [vmem:[%s2048_s26 + $0x798] sm:$0xff] }
  0xf9   : > { %v919_v46 = vpop.f32.mrf.mxu0  ;;  %1158 = vmatmul.mubr.f32.gmra.mxu0 %v277_v40  ;;  %v1239_v47 = vpop.f32.mrf.mxu1  ;;  %1478 = vmatmul.mubr.f32.gmra.mxu1 %v405_v41  ;;  %v292_v41 = vld [vmem:[%s2048_s26 + $0x398] sm:$0xff] }
  0xfa   : > { %v920_v48 = vadd.f32 %v2355_v23, %v919_v46  ;;  %v1240_v49 = vadd.f32 %v2355_v23, %v1239_v47  ;;  %1794 = vmatprep.mubr.msk.f32.mxu0 %vm458_vm0, %v280_v44  ;;  %1858 = vmatprep.mubr.msk.f32.mxu1 %vm458_vm0, %v408_v45  ;;  %v291_v47 = vld [vmem:[%s2048_s26 + $0x390] sm:$0xff] }
  0xfb   : > { %v921_v52 = vpop.f32.mrf.mxu0  ;;  %v1241_v53 = vpop.f32.mrf.mxu1 }
  0xfc   : > { %1550 = vst.msk [vmem:[%s2362_s8 + $0x10] sm:$0xff] %vm458_vm0, %v920_v48  ;;  %1614 = vst.msk [vmem:[%s2362_s8 + $0x210] sm:$0xff] %vm458_vm0, %v1240_v49  ;;  %v419_v48 = vld [vmem:[%s2048_s26 + $0x790] sm:$0xff]  ;;  %v422_v52 = vld [vmem:[%s2048_s26 + $0x7a8] sm:$0xff] }
  0xfd   : > { %v924_v56 = vpop.f32.mrf.mxu0  ;;  %1163 = vmatmul.mubr.f32.gmra.mxu0 %v279_v50  ;;  %v1244_v57 = vpop.f32.mrf.mxu1  ;;  %1483 = vmatmul.mubr.f32.gmra.mxu1 %v407_v51  ;;  %v294_v51 = vld [vmem:[%s2048_s26 + $0x3a8] sm:$0xff] }
  0xfe   : > { %v925_v58 = vadd.f32 %v2355_v23, %v924_v56  ;;  %v1245_v59 = vadd.f32 %v2355_v23, %v1244_v57  ;;  %1795 = vmatprep.mubr.msk.f32.mxu0 %vm458_vm0, %v282_v54  ;;  %1859 = vmatprep.mubr.msk.f32.mxu1 %vm458_vm0, %v410_v55  ;;  %v293_v57 = vld [vmem:[%s2048_s26 + $0x3a0] sm:$0xff] }
  0xff   : > { %v926_v62 = vpop.f32.mrf.mxu0  ;;  %v1246_v63 = vpop.f32.mrf.mxu1 }
 0x100   : > { %1551 = vst.msk [vmem:[%s2362_s8 + $0x18] sm:$0xff] %vm458_vm0, %v925_v58  ;;  %1615 = vst.msk [vmem:[%s2362_s8 + $0x218] sm:$0xff] %vm458_vm0, %v1245_v59  ;;  %v421_v58 = vld [vmem:[%s2048_s26 + $0x7a0] sm:$0xff]  ;;  %v424_v62 = vld [vmem:[%s2048_s26 + $0x7b8] sm:$0xff] }
 0x101   : > { %v929_v2 = vpop.f32.mrf.mxu0  ;;  %1168 = vmatmul.mubr.f32.gmra.mxu0 %v281_v60  ;;  %v1249_v3 = vpop.f32.mrf.mxu1  ;;  %1488 = vmatmul.mubr.f32.gmra.mxu1 %v409_v61  ;;  %v296_v61 = vld [vmem:[%s2048_s26 + $0x3b8] sm:$0xff] }
 0x102   : > { %v930_v4 = vadd.f32 %v2355_v23, %v929_v2  ;;  %v1250_v5 = vadd.f32 %v2355_v23, %v1249_v3  ;;  %1796 = vmatprep.mubr.msk.f32.mxu0 %vm458_vm0, %v284_v0  ;;  %1860 = vmatprep.mubr.msk.f32.mxu1 %vm458_vm0, %v412_v1  ;;  %v295_v3 = vld [vmem:[%s2048_s26 + $0x3b0] sm:$0xff] }
 0x103   : > { %v931_v8 = vpop.f32.mrf.mxu0  ;;  %v1251_v9 = vpop.f32.mrf.mxu1 }
 0x104   : > { %1552 = vst.msk [vmem:[%s2362_s8 + $0x20] sm:$0xff] %vm458_vm0, %v930_v4  ;;  %1616 = vst.msk [vmem:[%s2362_s8 + $0x220] sm:$0xff] %vm458_vm0, %v1250_v5  ;;  %v423_v4 = vld [vmem:[%s2048_s26 + $0x7b0] sm:$0xff]  ;;  %v426_v8 = vld [vmem:[%s2048_s26 + $0x7c8] sm:$0xff] }
 0x105   : > { %v934_v12 = vpop.f32.mrf.mxu0  ;;  %1173 = vmatmul.mubr.f32.gmra.mxu0 %v283_v6  ;;  %v1254_v13 = vpop.f32.mrf.mxu1  ;;  %1493 = vmatmul.mubr.f32.gmra.mxu1 %v411_v7  ;;  %v298_v7 = vld [vmem:[%s2048_s26 + $0x3c8] sm:$0xff] }
 0x106   : > { %v935_v14 = vadd.f32 %v2355_v23, %v934_v12  ;;  %v1255_v15 = vadd.f32 %v2355_v23, %v1254_v13  ;;  %1797 = vmatprep.mubr.msk.f32.mxu0 %vm458_vm0, %v286_v10  ;;  %1861 = vmatprep.mubr.msk.f32.mxu1 %vm458_vm0, %v414_v11  ;;  %v297_v13 = vld [vmem:[%s2048_s26 + $0x3c0] sm:$0xff] }
 0x107   : > { %v936_v18 = vpop.f32.mrf.mxu0  ;;  %v1256_v19 = vpop.f32.mrf.mxu1 }
 0x108   : > { %1553 = vst.msk [vmem:[%s2362_s8 + $0x28] sm:$0xff] %vm458_vm0, %v935_v14  ;;  %1617 = vst.msk [vmem:[%s2362_s8 + $0x228] sm:$0xff] %vm458_vm0, %v1255_v15  ;;  %v425_v14 = vld [vmem:[%s2048_s26 + $0x7c0] sm:$0xff]  ;;  %v428_v18 = vld [vmem:[%s2048_s26 + $0x7d8] sm:$0xff] }
 0x109   : > { %v939_v22 = vpop.f32.mrf.mxu0  ;;  %1178 = vmatmul.mubr.f32.gmra.mxu0 %v285_v16  ;;  %v1259_v24 = vpop.f32.mrf.mxu1  ;;  %1498 = vmatmul.mubr.f32.gmra.mxu1 %v413_v17  ;;  %v300_v17 = vld [vmem:[%s2048_s26 + $0x3d8] sm:$0xff] }
 0x10a   : > { %v940_v25 = vadd.f32 %v2355_v23, %v939_v22  ;;  %v1260_v26 = vadd.f32 %v2355_v23, %v1259_v24  ;;  %1798 = vmatprep.mubr.msk.f32.mxu0 %vm458_vm0, %v288_v20  ;;  %1862 = vmatprep.mubr.msk.f32.mxu1 %vm458_vm0, %v416_v21  ;;  %v299_v24 = vld [vmem:[%s2048_s26 + $0x3d0] sm:$0xff] }
 0x10b   : > { %v941_v29 = vpop.f32.mrf.mxu0  ;;  %v1261_v30 = vpop.f32.mrf.mxu1 }
 0x10c   : > { %1554 = vst.msk [vmem:[%s2362_s8 + $0x30] sm:$0xff] %vm458_vm0, %v940_v25  ;;  %1618 = vst.msk [vmem:[%s2362_s8 + $0x230] sm:$0xff] %vm458_vm0, %v1260_v26  ;;  %v427_v25 = vld [vmem:[%s2048_s26 + $0x7d0] sm:$0xff]  ;;  %v430_v29 = vld [vmem:[%s2048_s26 + $0x7e8] sm:$0xff] }
 0x10d   : > { %v944_v33 = vpop.f32.mrf.mxu0  ;;  %1183 = vmatmul.mubr.f32.gmra.mxu0 %v287_v27  ;;  %v1264_v34 = vpop.f32.mrf.mxu1  ;;  %1503 = vmatmul.mubr.f32.gmra.mxu1 %v415_v28  ;;  %v302_v28 = vld [vmem:[%s2048_s26 + $0x3e8] sm:$0xff] }
 0x10e   : > { %v945_v35 = vadd.f32 %v2355_v23, %v944_v33  ;;  %v1265_v36 = vadd.f32 %v2355_v23, %v1264_v34  ;;  %1799 = vmatprep.mubr.msk.f32.mxu0 %vm458_vm0, %v290_v31  ;;  %1863 = vmatprep.mubr.msk.f32.mxu1 %vm458_vm0, %v418_v32  ;;  %v301_v34 = vld [vmem:[%s2048_s26 + $0x3e0] sm:$0xff] }
 0x10f   : > { %v946_v39 = vpop.f32.mrf.mxu0  ;;  %v1266_v40 = vpop.f32.mrf.mxu1 }
 0x110   : > { %1555 = vst.msk [vmem:[%s2362_s8 + $0x38] sm:$0xff] %vm458_vm0, %v945_v35  ;;  %1619 = vst.msk [vmem:[%s2362_s8 + $0x238] sm:$0xff] %vm458_vm0, %v1265_v36  ;;  %v429_v35 = vld [vmem:[%s2048_s26 + $0x7e0] sm:$0xff]  ;;  %v432_v39 = vld [vmem:[%s2048_s26 + $0x7f8] sm:$0xff] }
 0x111   : > { %v949_v43 = vpop.f32.mrf.mxu0  ;;  %1188 = vmatmul.mubr.f32.gmra.mxu0 %v289_v37  ;;  %v1269_v44 = vpop.f32.mrf.mxu1  ;;  %1508 = vmatmul.mubr.f32.gmra.mxu1 %v417_v38  ;;  %v304_v38 = vld [vmem:[%s2048_s26 + $0x3f8] sm:$0xff] }
 0x112   : > { %v950_v45 = vadd.f32 %v2355_v23, %v949_v43  ;;  %v1270_v46 = vadd.f32 %v2355_v23, %v1269_v44  ;;  %1800 = vmatprep.mubr.msk.f32.mxu0 %vm458_vm0, %v292_v41  ;;  %1864 = vmatprep.mubr.msk.f32.mxu1 %vm458_vm0, %v420_v42  ;;  %v303_v44 = vld [vmem:[%s2048_s26 + $0x3f0] sm:$0xff] }
 0x113   : > { %v951_v49 = vpop.f32.mrf.mxu0  ;;  %v1271_v50 = vpop.f32.mrf.mxu1 }
 0x114   : > { %1556 = vst.msk [vmem:[%s2362_s8 + $0x40] sm:$0xff] %vm458_vm0, %v950_v45  ;;  %1620 = vst.msk [vmem:[%s2362_s8 + $0x240] sm:$0xff] %vm458_vm0, %v1270_v46  ;;  %v431_v45 = vld [vmem:[%s2048_s26 + $0x7f0] sm:$0xff] }
 0x115   : > { %v954_v53 = vpop.f32.mrf.mxu0  ;;  %1193 = vmatmul.mubr.f32.gmra.mxu0 %v291_v47  ;;  %v1274_v54 = vpop.f32.mrf.mxu1  ;;  %1513 = vmatmul.mubr.f32.gmra.mxu1 %v419_v48 }
 0x116   : > { %v955_v55 = vadd.f32 %v2355_v23, %v954_v53  ;;  %v1275_v56 = vadd.f32 %v2355_v23, %v1274_v54  ;;  %1801 = vmatprep.mubr.msk.f32.mxu0 %vm458_vm0, %v294_v51  ;;  %1865 = vmatprep.mubr.msk.f32.mxu1 %vm458_vm0, %v422_v52 }
 0x117   : > { %v956_v59 = vpop.f32.mrf.mxu0  ;;  %v1276_v60 = vpop.f32.mrf.mxu1 }
 0x118   : > { %1557 = vst.msk [vmem:[%s2362_s8 + $0x48] sm:$0xff] %vm458_vm0, %v955_v55  ;;  %1621 = vst.msk [vmem:[%s2362_s8 + $0x248] sm:$0xff] %vm458_vm0, %v1275_v56 }
 0x119   : > { %v959_v63 = vpop.f32.mrf.mxu0  ;;  %1198 = vmatmul.mubr.f32.gmra.mxu0 %v293_v57  ;;  %v1279_v0 = vpop.f32.mrf.mxu1  ;;  %1518 = vmatmul.mubr.f32.gmra.mxu1 %v421_v58 }
 0x11a   : > { %v960_v1 = vadd.f32 %v2355_v23, %v959_v63  ;;  %v1280_v2 = vadd.f32 %v2355_v23, %v1279_v0  ;;  %1802 = vmatprep.mubr.msk.f32.mxu0 %vm458_vm0, %v296_v61  ;;  %1866 = vmatprep.mubr.msk.f32.mxu1 %vm458_vm0, %v424_v62 }
 0x11b   : > { %v961_v5 = vpop.f32.mrf.mxu0  ;;  %v1281_v6 = vpop.f32.mrf.mxu1 }
 0x11c   : > { %1558 = vst.msk [vmem:[%s2362_s8 + $0x50] sm:$0xff] %vm458_vm0, %v960_v1  ;;  %1622 = vst.msk [vmem:[%s2362_s8 + $0x250] sm:$0xff] %vm458_vm0, %v1280_v2 }
 0x11d   : > { %v964_v9 = vpop.f32.mrf.mxu0  ;;  %1203 = vmatmul.mubr.f32.gmra.mxu0 %v295_v3  ;;  %v1284_v10 = vpop.f32.mrf.mxu1  ;;  %1523 = vmatmul.mubr.f32.gmra.mxu1 %v423_v4 }
 0x11e   : > { %v965_v11 = vadd.f32 %v2355_v23, %v964_v9  ;;  %v1285_v12 = vadd.f32 %v2355_v23, %v1284_v10  ;;  %1803 = vmatprep.mubr.msk.f32.mxu0 %vm458_vm0, %v298_v7  ;;  %1867 = vmatprep.mubr.msk.f32.mxu1 %vm458_vm0, %v426_v8 }
 0x11f   : > { %v966_v15 = vpop.f32.mrf.mxu0  ;;  %v1286_v16 = vpop.f32.mrf.mxu1 }
 0x120   : > { %1559 = vst.msk [vmem:[%s2362_s8 + $0x58] sm:$0xff] %vm458_vm0, %v965_v11  ;;  %1623 = vst.msk [vmem:[%s2362_s8 + $0x258] sm:$0xff] %vm458_vm0, %v1285_v12 }
 0x121   : > { %v969_v19 = vpop.f32.mrf.mxu0  ;;  %1208 = vmatmul.mubr.f32.gmra.mxu0 %v297_v13  ;;  %v1289_v20 = vpop.f32.mrf.mxu1  ;;  %1528 = vmatmul.mubr.f32.gmra.mxu1 %v425_v14 }
 0x122   : > { %v970_v21 = vadd.f32 %v2355_v23, %v969_v19  ;;  %v1290_v22 = vadd.f32 %v2355_v23, %v1289_v20  ;;  %1804 = vmatprep.mubr.msk.f32.mxu0 %vm458_vm0, %v300_v17  ;;  %1868 = vmatprep.mubr.msk.f32.mxu1 %vm458_vm0, %v428_v18 }
 0x123   : > { %v971_v26 = vpop.f32.mrf.mxu0  ;;  %v1291_v27 = vpop.f32.mrf.mxu1 }
 0x124   : > { %1560 = vst.msk [vmem:[%s2362_s8 + $0x60] sm:$0xff] %vm458_vm0, %v970_v21  ;;  %1624 = vst.msk [vmem:[%s2362_s8 + $0x260] sm:$0xff] %vm458_vm0, %v1290_v22 }
 0x125   : > { %v974_v30 = vpop.f32.mrf.mxu0  ;;  %1213 = vmatmul.mubr.f32.gmra.mxu0 %v299_v24  ;;  %v1294_v31 = vpop.f32.mrf.mxu1  ;;  %1533 = vmatmul.mubr.f32.gmra.mxu1 %v427_v25 }
 0x126   : > { %v975_v32 = vadd.f32 %v2355_v23, %v974_v30  ;;  %v1295_v33 = vadd.f32 %v2355_v23, %v1294_v31  ;;  %1805 = vmatprep.mubr.msk.f32.mxu0 %vm458_vm0, %v302_v28  ;;  %1869 = vmatprep.mubr.msk.f32.mxu1 %vm458_vm0, %v430_v29 }
 0x127   : > { %v976_v36 = vpop.f32.mrf.mxu0  ;;  %v1296_v37 = vpop.f32.mrf.mxu1 }
 0x128   : > { %1561 = vst.msk [vmem:[%s2362_s8 + $0x68] sm:$0xff] %vm458_vm0, %v975_v32  ;;  %1625 = vst.msk [vmem:[%s2362_s8 + $0x268] sm:$0xff] %vm458_vm0, %v1295_v33 }
 0x129   : > { %v979_v40 = vpop.f32.mrf.mxu0  ;;  %1218 = vmatmul.mubr.f32.gmra.mxu0 %v301_v34  ;;  %v1299_v41 = vpop.f32.mrf.mxu1  ;;  %1538 = vmatmul.mubr.f32.gmra.mxu1 %v429_v35 }
 0x12a   : > { %v980_v42 = vadd.f32 %v2355_v23, %v979_v40  ;;  %v1300_v43 = vadd.f32 %v2355_v23, %v1299_v41  ;;  %1806 = vmatprep.mubr.msk.f32.mxu0 %vm458_vm0, %v304_v38  ;;  %1870 = vmatprep.mubr.msk.f32.mxu1 %vm458_vm0, %v432_v39 }
 0x12b   : > { %v981_v46 = vpop.f32.mrf.mxu0  ;;  %v1301_v47 = vpop.f32.mrf.mxu1 }
 0x12c   : > { %1562 = vst.msk [vmem:[%s2362_s8 + $0x70] sm:$0xff] %vm458_vm0, %v980_v42  ;;  %1626 = vst.msk [vmem:[%s2362_s8 + $0x270] sm:$0xff] %vm458_vm0, %v1300_v43 }
 0x12d   : > { %v984_v48 = vpop.f32.mrf.mxu0  ;;  %1223 = vmatmul.mubr.f32.gmra.mxu0 %v303_v44  ;;  %v1304_v49 = vpop.f32.mrf.mxu1  ;;  %1543 = vmatmul.mubr.f32.gmra.mxu1 %v431_v45 }
 0x12e   : > { %v985_v50 = vadd.f32 %v2355_v23, %v984_v48  ;;  %v1305_v51 = vadd.f32 %v2355_v23, %v1304_v49 }
 0x12f   : > { %v986_v52 = vpop.f32.mrf.mxu0  ;;  %v1306_v53 = vpop.f32.mrf.mxu1 }
 0x130   : > { %1563 = vst.msk [vmem:[%s2362_s8 + $0x78] sm:$0xff] %vm458_vm0, %v985_v50  ;;  %1627 = vst.msk [vmem:[%s2362_s8 + $0x278] sm:$0xff] %vm458_vm0, %v1305_v51 }
 0x131   : > { %v989_v54 = vpop.f32.mrf.mxu0  ;;  %v1309_v55 = vpop.f32.mrf.mxu1 }
 0x132   : > { %v990_v56 = vadd.f32 %v2355_v23, %v989_v54  ;;  %v1310_v57 = vadd.f32 %v2355_v23, %v1309_v55 }
 0x133   : > { %v991_v58 = vpop.f32.mrf.mxu0  ;;  %v1311_v59 = vpop.f32.mrf.mxu1 }
 0x134   : > { %1564 = vst.msk [vmem:[%s2362_s8 + $0x80] sm:$0xff] %vm458_vm0, %v990_v56  ;;  %1628 = vst.msk [vmem:[%s2362_s8 + $0x280] sm:$0xff] %vm458_vm0, %v1310_v57 }
 0x135   : > { %v994_v60 = vpop.f32.mrf.mxu0  ;;  %v1314_v61 = vpop.f32.mrf.mxu1 }
 0x136   : > { %v995_v62 = vadd.f32 %v2355_v23, %v994_v60  ;;  %v1315_v63 = vadd.f32 %v2355_v23, %v1314_v61 }
 0x137   : > { %v996_v0 = vpop.f32.mrf.mxu0  ;;  %v1316_v1 = vpop.f32.mrf.mxu1 }
 0x138   : > { %1565 = vst.msk [vmem:[%s2362_s8 + $0x88] sm:$0xff] %vm458_vm0, %v995_v62  ;;  %1629 = vst.msk [vmem:[%s2362_s8 + $0x288] sm:$0xff] %vm458_vm0, %v1315_v63 }
 0x139   : > { %v999_v2 = vpop.f32.mrf.mxu0  ;;  %v1319_v3 = vpop.f32.mrf.mxu1 }
 0x13a   : > { %v1000_v4 = vadd.f32 %v2355_v23, %v999_v2  ;;  %v1320_v5 = vadd.f32 %v2355_v23, %v1319_v3 }
 0x13b   : > { %v1001_v6 = vpop.f32.mrf.mxu0  ;;  %v1321_v7 = vpop.f32.mrf.mxu1 }
 0x13c   : > { %1566 = vst.msk [vmem:[%s2362_s8 + $0x90] sm:$0xff] %vm458_vm0, %v1000_v4  ;;  %1630 = vst.msk [vmem:[%s2362_s8 + $0x290] sm:$0xff] %vm458_vm0, %v1320_v5 }
 0x13d   : > { %v1004_v8 = vpop.f32.mrf.mxu0  ;;  %v1324_v9 = vpop.f32.mrf.mxu1 }
 0x13e   : > { %v1005_v10 = vadd.f32 %v2355_v23, %v1004_v8  ;;  %v1325_v11 = vadd.f32 %v2355_v23, %v1324_v9 }
 0x13f   : > { %v1006_v12 = vpop.f32.mrf.mxu0  ;;  %v1326_v13 = vpop.f32.mrf.mxu1 }
 0x140   : > { %1567 = vst.msk [vmem:[%s2362_s8 + $0x98] sm:$0xff] %vm458_vm0, %v1005_v10  ;;  %1631 = vst.msk [vmem:[%s2362_s8 + $0x298] sm:$0xff] %vm458_vm0, %v1325_v11 }
 0x141   : > { %v1009_v14 = vpop.f32.mrf.mxu0  ;;  %v1329_v15 = vpop.f32.mrf.mxu1 }
 0x142   : > { %v1010_v16 = vadd.f32 %v2355_v23, %v1009_v14  ;;  %v1330_v17 = vadd.f32 %v2355_v23, %v1329_v15 }
 0x143   : > { %v1011_v18 = vpop.f32.mrf.mxu0  ;;  %v1331_v19 = vpop.f32.mrf.mxu1 }
 0x144   : > { %1568 = vst.msk [vmem:[%s2362_s8 + $0xa0] sm:$0xff] %vm458_vm0, %v1010_v16  ;;  %1632 = vst.msk [vmem:[%s2362_s8 + $0x2a0] sm:$0xff] %vm458_vm0, %v1330_v17 }
 0x145   : > { %v1014_v20 = vpop.f32.mrf.mxu0  ;;  %v1334_v21 = vpop.f32.mrf.mxu1 }
 0x146   : > { %v1015_v22 = vadd.f32 %v2355_v23, %v1014_v20  ;;  %v1335_v24 = vadd.f32 %v2355_v23, %v1334_v21 }
 0x147   : > { %v1016_v25 = vpop.f32.mrf.mxu0  ;;  %v1336_v26 = vpop.f32.mrf.mxu1 }
 0x148   : > { %1569 = vst.msk [vmem:[%s2362_s8 + $0xa8] sm:$0xff] %vm458_vm0, %v1015_v22  ;;  %1633 = vst.msk [vmem:[%s2362_s8 + $0x2a8] sm:$0xff] %vm458_vm0, %v1335_v24 }
 0x149   : > { %v1019_v27 = vpop.f32.mrf.mxu0  ;;  %v1339_v28 = vpop.f32.mrf.mxu1 }
 0x14a   : > { %v1020_v29 = vadd.f32 %v2355_v23, %v1019_v27  ;;  %v1340_v30 = vadd.f32 %v2355_v23, %v1339_v28 }
 0x14b   : > { %v1021_v31 = vpop.f32.mrf.mxu0  ;;  %v1341_v32 = vpop.f32.mrf.mxu1 }
 0x14c   : > { %1570 = vst.msk [vmem:[%s2362_s8 + $0xb0] sm:$0xff] %vm458_vm0, %v1020_v29  ;;  %1634 = vst.msk [vmem:[%s2362_s8 + $0x2b0] sm:$0xff] %vm458_vm0, %v1340_v30 }
 0x14d   : > { %v1024_v33 = vpop.f32.mrf.mxu0  ;;  %v1344_v34 = vpop.f32.mrf.mxu1 }
 0x14e   : > { %v1025_v35 = vadd.f32 %v2355_v23, %v1024_v33  ;;  %v1345_v36 = vadd.f32 %v2355_v23, %v1344_v34 }
 0x14f   : > { %v1026_v37 = vpop.f32.mrf.mxu0  ;;  %v1346_v38 = vpop.f32.mrf.mxu1 }
 0x150   : > { %1571 = vst.msk [vmem:[%s2362_s8 + $0xb8] sm:$0xff] %vm458_vm0, %v1025_v35  ;;  %1635 = vst.msk [vmem:[%s2362_s8 + $0x2b8] sm:$0xff] %vm458_vm0, %v1345_v36 }
 0x151   : > { %v1029_v39 = vpop.f32.mrf.mxu0  ;;  %v1349_v40 = vpop.f32.mrf.mxu1 }
 0x152   : > { %v1030_v41 = vadd.f32 %v2355_v23, %v1029_v39  ;;  %v1350_v42 = vadd.f32 %v2355_v23, %v1349_v40 }
 0x153   : > { %v1031_v43 = vpop.f32.mrf.mxu0  ;;  %v1351_v44 = vpop.f32.mrf.mxu1 }
 0x154   : > { %1572 = vst.msk [vmem:[%s2362_s8 + $0xc0] sm:$0xff] %vm458_vm0, %v1030_v41  ;;  %1636 = vst.msk [vmem:[%s2362_s8 + $0x2c0] sm:$0xff] %vm458_vm0, %v1350_v42 }
 0x155   : > { %v1034_v45 = vpop.f32.mrf.mxu0  ;;  %v1354_v46 = vpop.f32.mrf.mxu1 }
 0x156   : > { %v1035_v47 = vadd.f32 %v2355_v23, %v1034_v45  ;;  %v1355_v48 = vadd.f32 %v2355_v23, %v1354_v46 }
 0x157   : > { %v1036_v49 = vpop.f32.mrf.mxu0  ;;  %v1356_v50 = vpop.f32.mrf.mxu1 }
 0x158   : > { %1573 = vst.msk [vmem:[%s2362_s8 + $0xc8] sm:$0xff] %vm458_vm0, %v1035_v47  ;;  %1637 = vst.msk [vmem:[%s2362_s8 + $0x2c8] sm:$0xff] %vm458_vm0, %v1355_v48 }
 0x159   : > { %v1039_v51 = vpop.f32.mrf.mxu0  ;;  %v1359_v52 = vpop.f32.mrf.mxu1 }
 0x15a   : > { %v1040_v53 = vadd.f32 %v2355_v23, %v1039_v51  ;;  %v1360_v54 = vadd.f32 %v2355_v23, %v1359_v52 }
 0x15b   : > { %v1041_v55 = vpop.f32.mrf.mxu0  ;;  %v1361_v56 = vpop.f32.mrf.mxu1 }
 0x15c   : > { %1574 = vst.msk [vmem:[%s2362_s8 + $0xd0] sm:$0xff] %vm458_vm0, %v1040_v53  ;;  %1638 = vst.msk [vmem:[%s2362_s8 + $0x2d0] sm:$0xff] %vm458_vm0, %v1360_v54 }
 0x15d   : > { %v1044_v57 = vpop.f32.mrf.mxu0  ;;  %v1364_v58 = vpop.f32.mrf.mxu1 }
 0x15e   : > { %v1045_v59 = vadd.f32 %v2355_v23, %v1044_v57  ;;  %v1365_v60 = vadd.f32 %v2355_v23, %v1364_v58 }
 0x15f   : > { %v1046_v61 = vpop.f32.mrf.mxu0  ;;  %v1366_v62 = vpop.f32.mrf.mxu1 }
 0x160   : > { %1575 = vst.msk [vmem:[%s2362_s8 + $0xd8] sm:$0xff] %vm458_vm0, %v1045_v59  ;;  %1639 = vst.msk [vmem:[%s2362_s8 + $0x2d8] sm:$0xff] %vm458_vm0, %v1365_v60 }
 0x161   : > { %v1049_v63 = vpop.f32.mrf.mxu0  ;;  %v1369_v0 = vpop.f32.mrf.mxu1 }
 0x162   : > { %v1050_v1 = vadd.f32 %v2355_v23, %v1049_v63  ;;  %v1370_v2 = vadd.f32 %v2355_v23, %v1369_v0 }
 0x163   : > { %v1051_v3 = vpop.f32.mrf.mxu0  ;;  %v1371_v4 = vpop.f32.mrf.mxu1 }
 0x164   : > { %1576 = vst.msk [vmem:[%s2362_s8 + $0xe0] sm:$0xff] %vm458_vm0, %v1050_v1  ;;  %1640 = vst.msk [vmem:[%s2362_s8 + $0x2e0] sm:$0xff] %vm458_vm0, %v1370_v2 }
 0x165   : > { %v1054_v5 = vpop.f32.mrf.mxu0  ;;  %v1374_v6 = vpop.f32.mrf.mxu1 }
 0x166   : > { %v1055_v7 = vadd.f32 %v2355_v23, %v1054_v5  ;;  %v1375_v8 = vadd.f32 %v2355_v23, %v1374_v6 }
 0x167   : > { %v1056_v9 = vpop.f32.mrf.mxu0  ;;  %v1376_v10 = vpop.f32.mrf.mxu1 }
 0x168   : > { %1577 = vst.msk [vmem:[%s2362_s8 + $0xe8] sm:$0xff] %vm458_vm0, %v1055_v7  ;;  %1641 = vst.msk [vmem:[%s2362_s8 + $0x2e8] sm:$0xff] %vm458_vm0, %v1375_v8 }
 0x169   : > { %v1059_v11 = vpop.f32.mrf.mxu0  ;;  %v1379_v12 = vpop.f32.mrf.mxu1 }
 0x16a   : > { %v1060_v13 = vadd.f32 %v2355_v23, %v1059_v11  ;;  %v1380_v14 = vadd.f32 %v2355_v23, %v1379_v12 }
 0x16b   : > { %v1061_v15 = vpop.f32.mrf.mxu0  ;;  %v1381_v16 = vpop.f32.mrf.mxu1 }
 0x16c   : > { %1578 = vst.msk [vmem:[%s2362_s8 + $0xf0] sm:$0xff] %vm458_vm0, %v1060_v13  ;;  %1642 = vst.msk [vmem:[%s2362_s8 + $0x2f0] sm:$0xff] %vm458_vm0, %v1380_v14 }
 0x16d   : > { %v1064_v17 = vpop.f32.mrf.mxu0  ;;  %v1384_v18 = vpop.f32.mrf.mxu1 }
 0x16e   : > { %v1065_v19 = vadd.f32 %v2355_v23, %v1064_v17  ;;  %v1385_v20 = vadd.f32 %v2355_v23, %v1384_v18 }
 0x16f   : > { %v1066_v21 = vpop.f32.mrf.mxu0  ;;  %v1386_v22 = vpop.f32.mrf.mxu1 }
 0x170   : > { %1579 = vst.msk [vmem:[%s2362_s8 + $0xf8] sm:$0xff] %vm458_vm0, %v1065_v19  ;;  %1643 = vst.msk [vmem:[%s2362_s8 + $0x2f8] sm:$0xff] %vm458_vm0, %v1385_v20 }
 0x171   : > { %v1069_v24 = vpop.f32.mrf.mxu0  ;;  %v1389_v25 = vpop.f32.mrf.mxu1 }
 0x172   : > { %v1070_v26 = vadd.f32 %v2355_v23, %v1069_v24  ;;  %v1390_v27 = vadd.f32 %v2355_v23, %v1389_v25 }
 0x173   : > { %v1071_v28 = vpop.f32.mrf.mxu0  ;;  %v1391_v29 = vpop.f32.mrf.mxu1 }
 0x174   : > { %1580 = vst.msk [vmem:[%s2362_s8 + $0x100] sm:$0xff] %vm458_vm0, %v1070_v26  ;;  %1644 = vst.msk [vmem:[%s2362_s8 + $0x300] sm:$0xff] %vm458_vm0, %v1390_v27 }
 0x175   : > { %v1074_v30 = vpop.f32.mrf.mxu0  ;;  %v1394_v31 = vpop.f32.mrf.mxu1 }
 0x176   : > { %v1075_v32 = vadd.f32 %v2355_v23, %v1074_v30  ;;  %v1395_v33 = vadd.f32 %v2355_v23, %v1394_v31 }
 0x177   : > { %v1076_v34 = vpop.f32.mrf.mxu0  ;;  %v1396_v35 = vpop.f32.mrf.mxu1 }
 0x178   : > { %1581 = vst.msk [vmem:[%s2362_s8 + $0x108] sm:$0xff] %vm458_vm0, %v1075_v32  ;;  %1645 = vst.msk [vmem:[%s2362_s8 + $0x308] sm:$0xff] %vm458_vm0, %v1395_v33 }
 0x179   : > { %v1079_v36 = vpop.f32.mrf.mxu0  ;;  %v1399_v37 = vpop.f32.mrf.mxu1 }
 0x17a   : > { %v1080_v38 = vadd.f32 %v2355_v23, %v1079_v36  ;;  %v1400_v39 = vadd.f32 %v2355_v23, %v1399_v37 }
 0x17b   : > { %v1081_v40 = vpop.f32.mrf.mxu0  ;;  %v1401_v41 = vpop.f32.mrf.mxu1 }
 0x17c   : > { %1582 = vst.msk [vmem:[%s2362_s8 + $0x110] sm:$0xff] %vm458_vm0, %v1080_v38  ;;  %1646 = vst.msk [vmem:[%s2362_s8 + $0x310] sm:$0xff] %vm458_vm0, %v1400_v39 }
 0x17d   : > { %v1084_v42 = vpop.f32.mrf.mxu0  ;;  %v1404_v43 = vpop.f32.mrf.mxu1 }
 0x17e   : > { %v1085_v44 = vadd.f32 %v2355_v23, %v1084_v42  ;;  %v1405_v45 = vadd.f32 %v2355_v23, %v1404_v43 }
 0x17f   : > { %v1086_v46 = vpop.f32.mrf.mxu0  ;;  %v1406_v47 = vpop.f32.mrf.mxu1 }
 0x180   : > { %1583 = vst.msk [vmem:[%s2362_s8 + $0x118] sm:$0xff] %vm458_vm0, %v1085_v44  ;;  %1647 = vst.msk [vmem:[%s2362_s8 + $0x318] sm:$0xff] %vm458_vm0, %v1405_v45 }
 0x181   : > { %v1089_v48 = vpop.f32.mrf.mxu0  ;;  %v1409_v49 = vpop.f32.mrf.mxu1 }
 0x182   : > { %v1090_v50 = vadd.f32 %v2355_v23, %v1089_v48  ;;  %v1410_v51 = vadd.f32 %v2355_v23, %v1409_v49 }
 0x183   : > { %v1091_v52 = vpop.f32.mrf.mxu0  ;;  %v1411_v53 = vpop.f32.mrf.mxu1 }
 0x184   : > { %1584 = vst.msk [vmem:[%s2362_s8 + $0x120] sm:$0xff] %vm458_vm0, %v1090_v50  ;;  %1648 = vst.msk [vmem:[%s2362_s8 + $0x320] sm:$0xff] %vm458_vm0, %v1410_v51 }
 0x185   : > { %v1094_v54 = vpop.f32.mrf.mxu0  ;;  %v1414_v55 = vpop.f32.mrf.mxu1 }
 0x186   : > { %v1095_v56 = vadd.f32 %v2355_v23, %v1094_v54  ;;  %v1415_v57 = vadd.f32 %v2355_v23, %v1414_v55 }
 0x187   : > { %v1096_v58 = vpop.f32.mrf.mxu0  ;;  %v1416_v59 = vpop.f32.mrf.mxu1 }
 0x188   : > { %1585 = vst.msk [vmem:[%s2362_s8 + $0x128] sm:$0xff] %vm458_vm0, %v1095_v56  ;;  %1649 = vst.msk [vmem:[%s2362_s8 + $0x328] sm:$0xff] %vm458_vm0, %v1415_v57 }
 0x189   : > { %v1099_v60 = vpop.f32.mrf.mxu0  ;;  %v1419_v61 = vpop.f32.mrf.mxu1 }
 0x18a   : > { %v1100_v62 = vadd.f32 %v2355_v23, %v1099_v60  ;;  %v1420_v63 = vadd.f32 %v2355_v23, %v1419_v61 }
 0x18b   : > { %v1101_v0 = vpop.f32.mrf.mxu0  ;;  %v1421_v1 = vpop.f32.mrf.mxu1 }
 0x18c   : > { %1586 = vst.msk [vmem:[%s2362_s8 + $0x130] sm:$0xff] %vm458_vm0, %v1100_v62  ;;  %1650 = vst.msk [vmem:[%s2362_s8 + $0x330] sm:$0xff] %vm458_vm0, %v1420_v63  ;;  %v2749_v1 = vld [vmem:[%s2846_s2] ss:$0 sm:$0xff] }
 0x18d   : > { %v1104_v2 = vpop.f32.mrf.mxu0  ;;  %v1424_v3 = vpop.f32.mrf.mxu1 }
 0x18e   : > { %v1105_v4 = vadd.f32 %v2355_v23, %v1104_v2  ;;  %v1425_v5 = vadd.f32 %v2355_v23, %v1424_v3 }
 0x18f   : > { %v1106_v6 = vpop.f32.mrf.mxu0  ;;  %v1426_v7 = vpop.f32.mrf.mxu1 }
 0x190   : > { %1587 = vst.msk [vmem:[%s2362_s8 + $0x138] sm:$0xff] %vm458_vm0, %v1105_v4  ;;  %1651 = vst.msk [vmem:[%s2362_s8 + $0x338] sm:$0xff] %vm458_vm0, %v1425_v5 }
 0x191   : > { %v1109_v8 = vpop.f32.mrf.mxu0  ;;  %v1429_v9 = vpop.f32.mrf.mxu1 }
 0x192   : > { %v1110_v10 = vadd.f32 %v2355_v23, %v1109_v8  ;;  %v1430_v11 = vadd.f32 %v2355_v23, %v1429_v9 }
 0x193   : > { %v1111_v12 = vpop.f32.mrf.mxu0  ;;  %v1431_v13 = vpop.f32.mrf.mxu1 }
 0x194   : > { %1588 = vst.msk [vmem:[%s2362_s8 + $0x140] sm:$0xff] %vm458_vm0, %v1110_v10  ;;  %1652 = vst.msk [vmem:[%s2362_s8 + $0x340] sm:$0xff] %vm458_vm0, %v1430_v11 }
 0x195   : > { %v1114_v14 = vpop.f32.mrf.mxu0  ;;  %v1434_v15 = vpop.f32.mrf.mxu1 }
 0x196   : > { %v1115_v16 = vadd.f32 %v2355_v23, %v1114_v14  ;;  %v1435_v17 = vadd.f32 %v2355_v23, %v1434_v15 }
 0x197   : > { %v1116_v18 = vpop.f32.mrf.mxu0  ;;  %v1436_v19 = vpop.f32.mrf.mxu1 }
 0x198   : > { %1589 = vst.msk [vmem:[%s2362_s8 + $0x148] sm:$0xff] %vm458_vm0, %v1115_v16  ;;  %1653 = vst.msk [vmem:[%s2362_s8 + $0x348] sm:$0xff] %vm458_vm0, %v1435_v17 }
 0x199   : > { %v1119_v20 = vpop.f32.mrf.mxu0  ;;  %v1439_v21 = vpop.f32.mrf.mxu1 }
 0x19a   : > { %v1120_v22 = vadd.f32 %v2355_v23, %v1119_v20  ;;  %v1440_v24 = vadd.f32 %v2355_v23, %v1439_v21 }
 0x19b   : > { %v1121_v25 = vpop.f32.mrf.mxu0  ;;  %v1441_v26 = vpop.f32.mrf.mxu1 }
 0x19c   : > { %1590 = vst.msk [vmem:[%s2362_s8 + $0x150] sm:$0xff] %vm458_vm0, %v1120_v22  ;;  %1654 = vst.msk [vmem:[%s2362_s8 + $0x350] sm:$0xff] %vm458_vm0, %v1440_v24 }
 0x19d   : > { %v1124_v27 = vpop.f32.mrf.mxu0  ;;  %v1444_v28 = vpop.f32.mrf.mxu1 }
 0x19e   : > { %v1125_v29 = vadd.f32 %v2355_v23, %v1124_v27  ;;  %v1445_v30 = vadd.f32 %v2355_v23, %v1444_v28 }
 0x19f   : > { %v1126_v31 = vpop.f32.mrf.mxu0  ;;  %v1446_v32 = vpop.f32.mrf.mxu1 }
 0x1a0   : > { %1591 = vst.msk [vmem:[%s2362_s8 + $0x158] sm:$0xff] %vm458_vm0, %v1125_v29  ;;  %1655 = vst.msk [vmem:[%s2362_s8 + $0x358] sm:$0xff] %vm458_vm0, %v1445_v30 }
 0x1a1   : > { %v1129_v33 = vpop.f32.mrf.mxu0  ;;  %v1449_v34 = vpop.f32.mrf.mxu1 }
 0x1a2   : > { %v1130_v35 = vadd.f32 %v2355_v23, %v1129_v33  ;;  %v1450_v36 = vadd.f32 %v2355_v23, %v1449_v34 }
 0x1a3   : > { %v1131_v37 = vpop.f32.mrf.mxu0  ;;  %v1451_v38 = vpop.f32.mrf.mxu1 }
 0x1a4   : > { %1592 = vst.msk [vmem:[%s2362_s8 + $0x160] sm:$0xff] %vm458_vm0, %v1130_v35  ;;  %1656 = vst.msk [vmem:[%s2362_s8 + $0x360] sm:$0xff] %vm458_vm0, %v1450_v36 }
 0x1a5   : > { %v1134_v39 = vpop.f32.mrf.mxu0  ;;  %v1454_v40 = vpop.f32.mrf.mxu1 }
 0x1a6   : > { %v1135_v41 = vadd.f32 %v2355_v23, %v1134_v39  ;;  %v1455_v42 = vadd.f32 %v2355_v23, %v1454_v40 }
 0x1a7   : > { %v1136_v43 = vpop.f32.mrf.mxu0  ;;  %v1456_v44 = vpop.f32.mrf.mxu1 }
 0x1a8   : > { %1593 = vst.msk [vmem:[%s2362_s8 + $0x168] sm:$0xff] %vm458_vm0, %v1135_v41  ;;  %1657 = vst.msk [vmem:[%s2362_s8 + $0x368] sm:$0xff] %vm458_vm0, %v1455_v42 }
 0x1a9   : > { %v1139_v45 = vpop.f32.mrf.mxu0  ;;  %v1459_v46 = vpop.f32.mrf.mxu1 }
 0x1aa   : > { %v1140_v47 = vadd.f32 %v2355_v23, %v1139_v45  ;;  %v1460_v48 = vadd.f32 %v2355_v23, %v1459_v46 }
 0x1ab   : > { %v1141_v49 = vpop.f32.mrf.mxu0  ;;  %v1461_v50 = vpop.f32.mrf.mxu1 }
 0x1ac   : > { %1594 = vst.msk [vmem:[%s2362_s8 + $0x170] sm:$0xff] %vm458_vm0, %v1140_v47  ;;  %1658 = vst.msk [vmem:[%s2362_s8 + $0x370] sm:$0xff] %vm458_vm0, %v1460_v48 }
 0x1ad   : > { %v1144_v51 = vpop.f32.mrf.mxu0  ;;  %v1464_v52 = vpop.f32.mrf.mxu1 }
 0x1ae   : > { %v1145_v53 = vadd.f32 %v2355_v23, %v1144_v51  ;;  %v1465_v54 = vadd.f32 %v2355_v23, %v1464_v52 }
 0x1af   : > { %v1146_v55 = vpop.f32.mrf.mxu0  ;;  %v1466_v56 = vpop.f32.mrf.mxu1 }
 0x1b0   : > { %1595 = vst.msk [vmem:[%s2362_s8 + $0x178] sm:$0xff] %vm458_vm0, %v1145_v53  ;;  %1659 = vst.msk [vmem:[%s2362_s8 + $0x378] sm:$0xff] %vm458_vm0, %v1465_v54 }
 0x1b1   : > { %v1149_v57 = vpop.f32.mrf.mxu0  ;;  %v1469_v58 = vpop.f32.mrf.mxu1 }
 0x1b2   : > { %v1150_v59 = vadd.f32 %v2355_v23, %v1149_v57  ;;  %v1470_v60 = vadd.f32 %v2355_v23, %v1469_v58 }
 0x1b3   : > { %v1151_v61 = vpop.f32.mrf.mxu0  ;;  %v1471_v62 = vpop.f32.mrf.mxu1 }
 0x1b4   : > { %1596 = vst.msk [vmem:[%s2362_s8 + $0x180] sm:$0xff] %vm458_vm0, %v1150_v59  ;;  %1660 = vst.msk [vmem:[%s2362_s8 + $0x380] sm:$0xff] %vm458_vm0, %v1470_v60 }
 0x1b5   : > { %v1154_v63 = vpop.f32.mrf.mxu0  ;;  %v1474_v0 = vpop.f32.mrf.mxu1 }
 0x1b6   : > { %v1155_v2 = vadd.f32 %v2749_v1, %v1154_v63  ;;  %v1475_v3 = vadd.f32 %v2749_v1, %v1474_v0 }
 0x1b7   : > { %v1156_v23 = vpop.f32.mrf.mxu0  ;;  %v1476_v4 = vpop.f32.mrf.mxu1 }
 0x1b8   : > { %1597 = vst.msk [vmem:[%s2362_s8 + $0x188] sm:$0xff] %vm458_vm0, %v1155_v2  ;;  %1661 = vst.msk [vmem:[%s2362_s8 + $0x388] sm:$0xff] %vm458_vm0, %v1475_v3 }
 0x1b9   : > { %v1159_v5 = vpop.f32.mrf.mxu0  ;;  %v1479_v6 = vpop.f32.mrf.mxu1 }
 0x1ba   : > { %v1160_v7 = vadd.f32 %v2749_v1, %v1159_v5  ;;  %v1480_v8 = vadd.f32 %v2749_v1, %v1479_v6 }
 0x1bb   : > { %v1161_v9 = vpop.f32.mrf.mxu0  ;;  %v1481_v10 = vpop.f32.mrf.mxu1 }
 0x1bc   : > { %1598 = vst.msk [vmem:[%s2362_s8 + $0x190] sm:$0xff] %vm458_vm0, %v1160_v7  ;;  %1662 = vst.msk [vmem:[%s2362_s8 + $0x390] sm:$0xff] %vm458_vm0, %v1480_v8 }
 0x1bd   : > { %v1164_v11 = vpop.f32.mrf.mxu0  ;;  %v1484_v12 = vpop.f32.mrf.mxu1 }
 0x1be   : > { %v1165_v13 = vadd.f32 %v2749_v1, %v1164_v11  ;;  %v1485_v14 = vadd.f32 %v2749_v1, %v1484_v12 }
 0x1bf   : > { %v1166_v15 = vpop.f32.mrf.mxu0  ;;  %v1486_v16 = vpop.f32.mrf.mxu1 }
 0x1c0   : > { %1599 = vst.msk [vmem:[%s2362_s8 + $0x198] sm:$0xff] %vm458_vm0, %v1165_v13  ;;  %1663 = vst.msk [vmem:[%s2362_s8 + $0x398] sm:$0xff] %vm458_vm0, %v1485_v14 }
 0x1c1   : > { %v1169_v17 = vpop.f32.mrf.mxu0  ;;  %v1489_v18 = vpop.f32.mrf.mxu1 }
 0x1c2   : > { %v1170_v19 = vadd.f32 %v2749_v1, %v1169_v17  ;;  %v1490_v20 = vadd.f32 %v2749_v1, %v1489_v18 }
 0x1c3   : > { %v1171_v21 = vpop.f32.mrf.mxu0  ;;  %v1491_v22 = vpop.f32.mrf.mxu1 }
 0x1c4   : > { %1600 = vst.msk [vmem:[%s2362_s8 + $0x1a0] sm:$0xff] %vm458_vm0, %v1170_v19  ;;  %1664 = vst.msk [vmem:[%s2362_s8 + $0x3a0] sm:$0xff] %vm458_vm0, %v1490_v20 }
 0x1c5   : > { %v1174_v24 = vpop.f32.mrf.mxu0  ;;  %v1494_v25 = vpop.f32.mrf.mxu1 }
 0x1c6   : > { %v1175_v26 = vadd.f32 %v2749_v1, %v1174_v24  ;;  %v1495_v27 = vadd.f32 %v2749_v1, %v1494_v25 }
 0x1c7   : > { %v1176_v28 = vpop.f32.mrf.mxu0  ;;  %v1496_v29 = vpop.f32.mrf.mxu1 }
 0x1c8   : > { %1601 = vst.msk [vmem:[%s2362_s8 + $0x1a8] sm:$0xff] %vm458_vm0, %v1175_v26  ;;  %1665 = vst.msk [vmem:[%s2362_s8 + $0x3a8] sm:$0xff] %vm458_vm0, %v1495_v27 }
 0x1c9   : > { %v1179_v30 = vpop.f32.mrf.mxu0  ;;  %v1499_v31 = vpop.f32.mrf.mxu1 }
 0x1ca   : > { %v1180_v32 = vadd.f32 %v2749_v1, %v1179_v30  ;;  %v1500_v33 = vadd.f32 %v2749_v1, %v1499_v31 }
 0x1cb   : > { %v1181_v34 = vpop.f32.mrf.mxu0  ;;  %v1501_v35 = vpop.f32.mrf.mxu1 }
 0x1cc   : > { %1602 = vst.msk [vmem:[%s2362_s8 + $0x1b0] sm:$0xff] %vm458_vm0, %v1180_v32  ;;  %1666 = vst.msk [vmem:[%s2362_s8 + $0x3b0] sm:$0xff] %vm458_vm0, %v1500_v33 }
 0x1cd   : > { %v1184_v36 = vpop.f32.mrf.mxu0  ;;  %v1504_v37 = vpop.f32.mrf.mxu1 }
 0x1ce   : > { %v1185_v38 = vadd.f32 %v2749_v1, %v1184_v36  ;;  %v1505_v39 = vadd.f32 %v2749_v1, %v1504_v37 }
 0x1cf   : > { %v1186_v40 = vpop.f32.mrf.mxu0  ;;  %v1506_v41 = vpop.f32.mrf.mxu1 }
 0x1d0   : > { %1603 = vst.msk [vmem:[%s2362_s8 + $0x1b8] sm:$0xff] %vm458_vm0, %v1185_v38  ;;  %1667 = vst.msk [vmem:[%s2362_s8 + $0x3b8] sm:$0xff] %vm458_vm0, %v1505_v39 }
 0x1d1   : > { %v1189_v42 = vpop.f32.mrf.mxu0  ;;  %v1509_v43 = vpop.f32.mrf.mxu1 }
 0x1d2   : > { %v1190_v44 = vadd.f32 %v2749_v1, %v1189_v42  ;;  %v1510_v45 = vadd.f32 %v2749_v1, %v1509_v43 }
 0x1d3   : > { %v1191_v46 = vpop.f32.mrf.mxu0  ;;  %v1511_v47 = vpop.f32.mrf.mxu1 }
 0x1d4   : > { %1604 = vst.msk [vmem:[%s2362_s8 + $0x1c0] sm:$0xff] %vm458_vm0, %v1190_v44  ;;  %1668 = vst.msk [vmem:[%s2362_s8 + $0x3c0] sm:$0xff] %vm458_vm0, %v1510_v45 }
 0x1d5   : > { %v1194_v48 = vpop.f32.mrf.mxu0  ;;  %v1514_v49 = vpop.f32.mrf.mxu1 }
 0x1d6   : > { %v1195_v50 = vadd.f32 %v2749_v1, %v1194_v48  ;;  %v1515_v51 = vadd.f32 %v2749_v1, %v1514_v49 }
 0x1d7   : > { %v1196_v52 = vpop.f32.mrf.mxu0  ;;  %v1516_v53 = vpop.f32.mrf.mxu1 }
 0x1d8   : > { %1605 = vst.msk [vmem:[%s2362_s8 + $0x1c8] sm:$0xff] %vm458_vm0, %v1195_v50  ;;  %1669 = vst.msk [vmem:[%s2362_s8 + $0x3c8] sm:$0xff] %vm458_vm0, %v1515_v51 }
 0x1d9   : > { %v1199_v54 = vpop.f32.mrf.mxu0  ;;  %v1519_v55 = vpop.f32.mrf.mxu1 }
 0x1da   : > { %v1200_v56 = vadd.f32 %v2749_v1, %v1199_v54  ;;  %v1520_v57 = vadd.f32 %v2749_v1, %v1519_v55 }
 0x1db   : > { %v1201_v58 = vpop.f32.mrf.mxu0  ;;  %v1521_v59 = vpop.f32.mrf.mxu1 }
 0x1dc   : > { %1606 = vst.msk [vmem:[%s2362_s8 + $0x1d0] sm:$0xff] %vm458_vm0, %v1200_v56  ;;  %1670 = vst.msk [vmem:[%s2362_s8 + $0x3d0] sm:$0xff] %vm458_vm0, %v1520_v57 }
 0x1dd   : > { %v1204_v60 = vpop.f32.mrf.mxu0  ;;  %v1524_v61 = vpop.f32.mrf.mxu1 }
 0x1de   : > { %v1205_v62 = vadd.f32 %v2749_v1, %v1204_v60  ;;  %v1525_v63 = vadd.f32 %v2749_v1, %v1524_v61 }
 0x1df   : > { %v1206_v0 = vpop.f32.mrf.mxu0  ;;  %v1526_v2 = vpop.f32.mrf.mxu1 }
 0x1e0   : > { %1607 = vst.msk [vmem:[%s2362_s8 + $0x1d8] sm:$0xff] %vm458_vm0, %v1205_v62  ;;  %1671 = vst.msk [vmem:[%s2362_s8 + $0x3d8] sm:$0xff] %vm458_vm0, %v1525_v63 }
 0x1e1   : > { %v1209_v3 = vpop.f32.mrf.mxu0  ;;  %v1529_v23 = vpop.f32.mrf.mxu1 }
 0x1e2   : > { %v1210_v4 = vadd.f32 %v2749_v1, %v1209_v3  ;;  %v1530_v5 = vadd.f32 %v2749_v1, %v1529_v23 }
 0x1e3   : > { %v1211_v6 = vpop.f32.mrf.mxu0  ;;  %v1531_v7 = vpop.f32.mrf.mxu1 }
 0x1e4   : > { %1608 = vst.msk [vmem:[%s2362_s8 + $0x1e0] sm:$0xff] %vm458_vm0, %v1210_v4  ;;  %1672 = vst.msk [vmem:[%s2362_s8 + $0x3e0] sm:$0xff] %vm458_vm0, %v1530_v5 }
 0x1e5   : > { %v1214_v8 = vpop.f32.mrf.mxu0  ;;  %v1534_v9 = vpop.f32.mrf.mxu1 }
 0x1e6   : > { %v1215_v10 = vadd.f32 %v2749_v1, %v1214_v8  ;;  %v1535_v11 = vadd.f32 %v2749_v1, %v1534_v9 }
 0x1e7   : > { %v1216_v12 = vpop.f32.mrf.mxu0  ;;  %v1536_v13 = vpop.f32.mrf.mxu1 }
 0x1e8   : > { %1609 = vst.msk [vmem:[%s2362_s8 + $0x1e8] sm:$0xff] %vm458_vm0, %v1215_v10  ;;  %1673 = vst.msk [vmem:[%s2362_s8 + $0x3e8] sm:$0xff] %vm458_vm0, %v1535_v11 }
 0x1e9   : > { %v1219_v14 = vpop.f32.mrf.mxu0  ;;  %v1539_v15 = vpop.f32.mrf.mxu1 }
 0x1ea   : > { %v1220_v16 = vadd.f32 %v2749_v1, %v1219_v14  ;;  %v1540_v17 = vadd.f32 %v2749_v1, %v1539_v15 }
 0x1eb   : > { %v1221_v18 = vpop.f32.mrf.mxu0  ;;  %v1541_v19 = vpop.f32.mrf.mxu1 }
 0x1ec   : > { %1610 = vst.msk [vmem:[%s2362_s8 + $0x1f0] sm:$0xff] %vm458_vm0, %v1220_v16  ;;  %1674 = vst.msk [vmem:[%s2362_s8 + $0x3f0] sm:$0xff] %vm458_vm0, %v1540_v17 }
 0x1ed   : > { %v1224_v20 = vpop.f32.mrf.mxu0  ;;  %v1544_v21 = vpop.f32.mrf.mxu1 }
 0x1ee   : > { %v1225_v22 = vadd.f32 %v2749_v1, %v1224_v20  ;;  %v1545_v24 = vadd.f32 %v2749_v1, %v1544_v21 }
 0x1ef   : > { %v1226_v25 = vpop.f32.mrf.mxu0  ;;  %v1546_v26 = vpop.f32.mrf.mxu1 }
 0x1f0   : > { %1611 = vst.msk [vmem:[%s2362_s8 + $0x1f8] sm:$0xff] %vm458_vm0, %v1225_v22  ;;  %1675 = vst.msk [vmem:[%s2362_s8 + $0x3f8] sm:$0xff] %vm458_vm0, %v1545_v24 }
 0x1f1 PF: > { %s13_s12 = sadd.s32 1, %s1926_s12  }
 0x1f2   : > { %p10_p4 = scmp.ge.s32.totalorder %s13_s12, 4  }
 0x1f4   :  { %12 = sbr.rel (!%p10_p4) target bundleno = 1 (0x1), region = 62 }

// kernel: cnn_classifier_forward.7
= control target key start
LH: loop header
LB: loop body
LE: loop exit
PB: predicated region body
PF: predicated region fallthrough
CT: control target
= control target key end

     0   :  { %10 = vsyncpa [#allocation4], 0  ;;  %s1760_s18 = smov 0   ;;  %s2123_s0 = inlined_call_operand.vmem [shape: f32[2,16384], index: 0, kind: input, shape index: {}]   ;;  %s2124_s1 = inlined_call_operand.vmem [shape: f32[16384,128], index: 1, kind: input, shape index: {}]   ;;  %s2125_s2 = inlined_call_operand.vmem [shape: f32[1,128], index: 2, kind: input, shape index: {}]   ;;  %s2126_s3 = inlined_call_operand.vmem [shape: f32[128,6], index: 3, kind: input, shape index: {}]   ;;  %s2127_s4 = inlined_call_operand.vmem [shape: f32[1,6], index: 4, kind: input, shape index: {}]   ;;  %s2128_s5 = inlined_call_operand.hbm [shape: f32[2,6], index: 5, kind: output, shape index: {}]  }
   0x1 LB: > { %s1766_s19 = sadd.s32 4294967295, %s1723_s18   ;;  %p1321_p0 = scmp.ge.s32.totalorder %s1723_s18, 1  ;;  %s1723_s18 = sphi %s1760_s18, %s16_s18  }
   0x2   : > { %p195_p1 = scmp.lt.s32.totalorder %s1723_s18, 9 }
   0x4   : > { %p196_p2 = pnand %p1321_p0, %p195_p1 }
   0x5   : > { %s1322_s20 = sshll.u32 (!%p196_p2), %s1766_s19, 4  ;;  %s1324_s21 = sshll.u32 (!%p196_p2), %s1766_s19, 8 }
   0x6   : > { %199 = sbr.rel (%p196_p2) target bundleno = 606 (0x25e), region = 40  ;;  %p224_p3 = scmp.lt.s32.totalorder (!%p196_p2), %s1322_s20, 127 }
   0x7   : > { %p230_p4 = scmp.lt.s32.totalorder (!%p196_p2), %s1324_s21, 2047  ;;  %p1326_p5 = scmp.ne.s32.totalorder (!%p196_p2), %s1766_s19, 0 }
   0xb   : > { %s2130_s20 = smov (!%p224_p3, %s1322_s20), 127  ;;  %s2132_s21 = smov (!%p230_p4, %s1324_s21), 2047 }
   0xc   : > { %s1323_s22 = sshll.u32 %s2130_s20, 1  ;;  %s1325_s26 = sshll.u32 %s2132_s21, 3 }
   0xd   : > { %s1775_s25 = scalar_lea.vmem %s2123_s0, %s1323_s22  ;;  %s1780_s29 = scalar_lea.vmem %s2124_s1, %s1325_s26 }
   0xe   : > { %238 = sbr.rel (%p1326_p5) target bundleno = 21 (0x15), region = 44 }
  0x13   : > { %v1725_v0 = vmov 0.0  }
  0x14   : > { %239 = vst [vmem:[#allocation2] sm:$0x3] %v1725_v0 }
  0x15 PF: > { %v276_v1 = vld [vmem:[%s1780_s29 + $0xf8] sm:$0xff]  ;;  %v275_v5 = vld [vmem:[%s1780_s29 + $0xf0] sm:$0xff]  ;;  %v274_v9 = vld [vmem:[%s1780_s29 + $0xe8] sm:$0xff]  ;;  %v1726_v31 = vmov 1983009808   ;;  %v509_v33 = vlaneseq  ;;  %p1327_p6 = scmp.ne.s32.totalorder %s1766_s19, 7 }
  0x16   : > { %v308_v2 = vld [vmem:[%s1780_s29 + $0x1f8] sm:$0xff]  ;;  %1334 = vmatprep.subr.mxu0 %v276_v1  ;;  %v307_v6 = vld [vmem:[%s1780_s29 + $0x1f0] sm:$0xff]  ;;  %v306_v10 = vld [vmem:[%s1780_s29 + $0x1e8] sm:$0xff]  ;;  %v507_v32 = vunpack.c.l.s4 %v1726_v31 }
  0x17   : > { %v260_v3 = vld [vmem:[%s1780_s29 + $0x78] sm:$0xff]  ;;  %1369 = vmatprep.subr.mxu1 %v308_v2  ;;  %v259_v7 = vld [vmem:[%s1780_s29 + $0x70] sm:$0xff]  ;;  %v258_v11 = vld [vmem:[%s1780_s29 + $0x68] sm:$0xff]  ;;  %v510_v43 = vshrl.u32 %v509_v33, 7 }
  0x18   : > { %v292_v4 = vld [vmem:[%s1780_s29 + $0x178] sm:$0xff]  ;;  %1335 = vmatpush3.msra.mxu0 %v260_v3  ;;  %v291_v8 = vld [vmem:[%s1780_s29 + $0x170] sm:$0xff]  ;;  %v290_v12 = vld [vmem:[%s1780_s29 + $0x168] sm:$0xff]  ;;  %v508_v42 = vunpack.c.0.s8 %v507_v32 }
  0x19   : > { %1370 = vmatpush3.msra.mxu1 %v292_v4  ;;  %1336 = vmatprep.subr.mxu0 %v275_v5  ;;  %v273_v13 = vld [vmem:[%s1780_s29 + $0xe0] sm:$0xff]  ;;  %v272_v17 = vld [vmem:[%s1780_s29 + $0xd8] sm:$0xff]  ;;  %v271_v21 = vld [vmem:[%s1780_s29 + $0xd0] sm:$0xff] }
  0x1a   : > { %1371 = vmatprep.subr.mxu1 %v307_v6  ;;  %1337 = vmatpush3.msra.mxu0 %v259_v7  ;;  %v305_v14 = vld [vmem:[%s1780_s29 + $0x1e0] sm:$0xff]  ;;  %v304_v18 = vld [vmem:[%s1780_s29 + $0x1d8] sm:$0xff]  ;;  %v303_v22 = vld [vmem:[%s1780_s29 + $0x1d0] sm:$0xff]  ;;  %v1829_v52 = vsub.s32 %v508_v42, %v510_v43 }
  0x1b   : > { %1372 = vmatpush3.msra.mxu1 %v291_v8  ;;  %1338 = vmatprep.subr.mxu0 %v274_v9  ;;  %v257_v15 = vld [vmem:[%s1780_s29 + $0x60] sm:$0xff]  ;;  %v256_v19 = vld [vmem:[%s1780_s29 + $0x58] sm:$0xff]  ;;  %v255_v23 = vld [vmem:[%s1780_s29 + $0x50] sm:$0xff] }
  0x1c   : > { %1373 = vmatprep.subr.mxu1 %v306_v10  ;;  %v289_v16 = vld [vmem:[%s1780_s29 + $0x160] sm:$0xff]  ;;  %1339 = vmatpush3.msra.mxu0 %v258_v11  ;;  %v288_v20 = vld [vmem:[%s1780_s29 + $0x158] sm:$0xff]  ;;  %v287_v24 = vld [vmem:[%s1780_s29 + $0x150] sm:$0xff] }
  0x1d   : > { %1374 = vmatpush3.msra.mxu1 %v290_v12  ;;  %1340 = vmatprep.subr.mxu0 %v273_v13  ;;  %v270_v25 = vld [vmem:[%s1780_s29 + $0xc8] sm:$0xff]  ;;  %v269_v29 = vld [vmem:[%s1780_s29 + $0xc0] sm:$0xff]  ;;  %v268_v36 = vld [vmem:[%s1780_s29 + $0xb8] sm:$0xff] }
  0x1e   : > { %1375 = vmatprep.subr.mxu1 %v305_v14  ;;  %1341 = vmatpush3.msra.mxu0 %v257_v15  ;;  %v302_v26 = vld [vmem:[%s1780_s29 + $0x1c8] sm:$0xff]  ;;  %v301_v30 = vld [vmem:[%s1780_s29 + $0x1c0] sm:$0xff]  ;;  %v300_v37 = vld [vmem:[%s1780_s29 + $0x1b8] sm:$0xff] }
  0x1f   : > { %1376 = vmatpush3.msra.mxu1 %v289_v16  ;;  %1342 = vmatprep.subr.mxu0 %v272_v17  ;;  %v254_v27 = vld [vmem:[%s1780_s29 + $0x48] sm:$0xff]  ;;  %v253_v34 = vld [vmem:[%s1780_s29 + $0x40] sm:$0xff]  ;;  %v252_v38 = vld [vmem:[%s1780_s29 + $0x38] sm:$0xff] }
  0x20   : > { %1377 = vmatprep.subr.mxu1 %v304_v18  ;;  %1343 = vmatpush3.msra.mxu0 %v256_v19  ;;  %v286_v28 = vld [vmem:[%s1780_s29 + $0x148] sm:$0xff]  ;;  %v285_v35 = vld [vmem:[%s1780_s29 + $0x140] sm:$0xff]  ;;  %v284_v39 = vld [vmem:[%s1780_s29 + $0x138] sm:$0xff] }
  0x21   : > { %1378 = vmatpush3.msra.mxu1 %v288_v20  ;;  %1344 = vmatprep.subr.mxu0 %v271_v21  ;;  %v267_v40 = vld [vmem:[%s1780_s29 + $0xb0] sm:$0xff]  ;;  %v266_v46 = vld [vmem:[%s1780_s29 + $0xa8] sm:$0xff]  ;;  %v265_v50 = vld [vmem:[%s1780_s29 + $0xa0] sm:$0xff] }
  0x22   : > { %1379 = vmatprep.subr.mxu1 %v303_v22  ;;  %1345 = vmatpush3.msra.mxu0 %v255_v23  ;;  %v299_v41 = vld [vmem:[%s1780_s29 + $0x1b0] sm:$0xff]  ;;  %v298_v47 = vld [vmem:[%s1780_s29 + $0x1a8] sm:$0xff]  ;;  %v297_v51 = vld [vmem:[%s1780_s29 + $0x1a0] sm:$0xff] }
  0x23   : > { %1380 = vmatpush3.msra.mxu1 %v287_v24  ;;  %1346 = vmatprep.subr.mxu0 %v270_v25  ;;  %v251_v44 = vld [vmem:[%s1780_s29 + $0x30] sm:$0xff]  ;;  %v250_v48 = vld [vmem:[%s1780_s29 + $0x28] sm:$0xff]  ;;  %v249_v53 = vld [vmem:[%s1780_s29 + $0x20] sm:$0xff] }
  0x24   : > { %1381 = vmatprep.subr.mxu1 %v302_v26  ;;  %1347 = vmatpush3.msra.mxu0 %v254_v27  ;;  %v283_v45 = vld [vmem:[%s1780_s29 + $0x130] sm:$0xff]  ;;  %v282_v49 = vld [vmem:[%s1780_s29 + $0x128] sm:$0xff]  ;;  %v281_v54 = vld [vmem:[%s1780_s29 + $0x120] sm:$0xff] }
  0x25   : > { %1382 = vmatpush3.msra.mxu1 %v286_v28  ;;  %1348 = vmatprep.subr.mxu0 %v269_v29  ;;  %v241_v55 = vld [vmem:[%s1775_s25] sm:$0xff]  ;;  %v264_v56 = vld [vmem:[%s1780_s29 + $0x98] sm:$0xff]  ;;  %v263_v61 = vld [vmem:[%s1780_s29 + $0x90] sm:$0xff] }
  0x26   : > { %1383 = vmatprep.subr.mxu1 %v301_v30  ;;  %1349 = vmatpush3.msra.mxu0 %v253_v34  ;;  %v296_v57 = vld [vmem:[%s1780_s29 + $0x198] sm:$0xff]  ;;  %v505_v58 = vcombine.high %v241_v55, %v241_v55  ;;  %v295_v62 = vld [vmem:[%s1780_s29 + $0x190] sm:$0xff]  ;;  %v512_v63 = vrot.slane %v241_v55, %v1829_v52  ;;  %v262_v3 = vld [vmem:[%s1780_s29 + $0x88] sm:$0xff] }
  0x27   : > { %1384 = vmatpush3.msra.mxu1 %v285_v35  ;;  %1350 = vmatprep.subr.mxu0 %v268_v36  ;;  %v248_v59 = vld [vmem:[%s1780_s29 + $0x18] sm:$0xff]  ;;  %v247_v0 = vld [vmem:[%s1780_s29 + $0x10] sm:$0xff]  ;;  %v294_v4 = vld [vmem:[%s1780_s29 + $0x188] sm:$0xff] }
  0x28   : > { %1385 = vmatprep.subr.mxu1 %v300_v37  ;;  %1351 = vmatpush3.msra.mxu0 %v252_v38  ;;  %v280_v60 = vld [vmem:[%s1780_s29 + $0x118] sm:$0xff]  ;;  %v279_v1 = vld [vmem:[%s1780_s29 + $0x110] sm:$0xff]  ;;  %v519_v2 = vrot.slane %v505_v58, %v1829_v52  ;;  %v246_v5 = vld [vmem:[%s1780_s29 + $0x8] sm:$0xff]  ;;  %v520_v9 = vcombine.high %v512_v63, %v512_v63 }
  0x29   : > { %1386 = vmatpush3.msra.mxu1 %v284_v39  ;;  %1352 = vmatprep.subr.mxu0 %v267_v40  ;;  %v278_v6 = vld [vmem:[%s1780_s29 + $0x108] sm:$0xff]  ;;  %v261_v7 = vld [vmem:[%s1780_s29 + $0x80] sm:$0xff]  ;;  %v340_v13 = vld [vmem:[%s1780_s29 + $0x2f8] sm:$0xff] }
  0x2a   : > { %1387 = vmatprep.subr.mxu1 %v299_v41  ;;  %1353 = vmatpush3.msra.mxu0 %v251_v44  ;;  %v293_v8 = vld [vmem:[%s1780_s29 + $0x180] sm:$0xff]  ;;  %v521_v11 = vcombine.high %v519_v2, %v519_v2  ;;  %v372_v14 = vld [vmem:[%s1780_s29 + $0x3f8] sm:$0xff]  ;;  %v339_v17 = vld [vmem:[%s1780_s29 + $0x2f0] sm:$0xff] }
  0x2b   : > { %1388 = vmatpush3.msra.mxu1 %v283_v45  ;;  %1354 = vmatprep.subr.mxu0 %v266_v46  ;;  %v245_v10 = vld [vmem:[%s1780_s29] sm:$0xff]  ;;  %v324_v15 = vld [vmem:[%s1780_s29 + $0x278] sm:$0xff]  ;;  %v371_v18 = vld [vmem:[%s1780_s29 + $0x3f0] sm:$0xff] }
  0x2c   : > { %1389 = vmatprep.subr.mxu1 %v298_v47  ;;  %1355 = vmatpush3.msra.mxu0 %v250_v48  ;;  %v277_v12 = vld [vmem:[%s1780_s29 + $0x100] sm:$0xff]  ;;  %v356_v16 = vld [vmem:[%s1780_s29 + $0x378] sm:$0xff]  ;;  %v323_v19 = vld [vmem:[%s1780_s29 + $0x270] sm:$0xff] }
  0x2d   : > { %1390 = vmatpush3.msra.mxu1 %v282_v49  ;;  %1356 = vmatprep.subr.mxu0 %v265_v50  ;;  %v355_v20 = vld [vmem:[%s1780_s29 + $0x370] sm:$0xff]  ;;  %v338_v21 = vld [vmem:[%s1780_s29 + $0x2e8] sm:$0xff]  ;;  %v337_v25 = vld [vmem:[%s1780_s29 + $0x2e0] sm:$0xff] }
  0x2e   : > { %1391 = vmatprep.subr.mxu1 %v297_v51  ;;  %1357 = vmatpush3.msra.mxu0 %v249_v53  ;;  %v370_v22 = vld [vmem:[%s1780_s29 + $0x3e8] sm:$0xff]  ;;  %v369_v26 = vld [vmem:[%s1780_s29 + $0x3e0] sm:$0xff]  ;;  %v336_v29 = vld [vmem:[%s1780_s29 + $0x2d8] sm:$0xff] }
  0x2f   : > { %1392 = vmatpush3.msra.mxu1 %v281_v54  ;;  %1358 = vmatprep.subr.mxu0 %v264_v56  ;;  %v322_v23 = vld [vmem:[%s1780_s29 + $0x268] sm:$0xff]  ;;  %v321_v27 = vld [vmem:[%s1780_s29 + $0x260] sm:$0xff]  ;;  %v368_v30 = vld [vmem:[%s1780_s29 + $0x3d8] sm:$0xff] }
  0x30   : > { %1393 = vmatprep.subr.mxu1 %v296_v57  ;;  %1359 = vmatpush3.msra.mxu0 %v248_v59  ;;  %v354_v24 = vld [vmem:[%s1780_s29 + $0x368] sm:$0xff]  ;;  %v353_v28 = vld [vmem:[%s1780_s29 + $0x360] sm:$0xff]  ;;  %v320_v31 = vld [vmem:[%s1780_s29 + $0x258] sm:$0xff] }
  0x31   : > { %1394 = vmatpush3.msra.mxu1 %v280_v60  ;;  %1360 = vmatprep.subr.mxu0 %v263_v61  ;;  %v352_v32 = vld [vmem:[%s1780_s29 + $0x358] sm:$0xff]  ;;  %v335_v33 = vld [vmem:[%s1780_s29 + $0x2d0] sm:$0xff]  ;;  %v334_v37 = vld [vmem:[%s1780_s29 + $0x2c8] sm:$0xff] }
  0x32   : > { %1395 = vmatprep.subr.mxu1 %v295_v62  ;;  %1361 = vmatpush3.msra.mxu0 %v247_v0  ;;  %v367_v34 = vld [vmem:[%s1780_s29 + $0x3d0] sm:$0xff]  ;;  %v366_v38 = vld [vmem:[%s1780_s29 + $0x3c8] sm:$0xff]  ;;  %v333_v41 = vld [vmem:[%s1780_s29 + $0x2c0] sm:$0xff] }
  0x33   : > { %1396 = vmatpush3.msra.mxu1 %v279_v1  ;;  %1362 = vmatprep.subr.mxu0 %v262_v3  ;;  %v319_v35 = vld [vmem:[%s1780_s29 + $0x250] sm:$0xff]  ;;  %v318_v39 = vld [vmem:[%s1780_s29 + $0x248] sm:$0xff]  ;;  %v365_v42 = vld [vmem:[%s1780_s29 + $0x3c0] sm:$0xff] }
  0x34   : > { %1397 = vmatprep.subr.mxu1 %v294_v4  ;;  %1363 = vmatpush3.msra.mxu0 %v246_v5  ;;  %v351_v36 = vld [vmem:[%s1780_s29 + $0x350] sm:$0xff]  ;;  %v350_v40 = vld [vmem:[%s1780_s29 + $0x348] sm:$0xff]  ;;  %v317_v43 = vld [vmem:[%s1780_s29 + $0x240] sm:$0xff] }
  0x35   : > { %1398 = vmatpush3.msra.mxu1 %v278_v6  ;;  %1364 = vmatprep.subr.mxu0 %v261_v7  ;;  %v349_v44 = vld [vmem:[%s1780_s29 + $0x340] sm:$0xff]  ;;  %v332_v45 = vld [vmem:[%s1780_s29 + $0x2b8] sm:$0xff]  ;;  %v331_v49 = vld [vmem:[%s1780_s29 + $0x2b0] sm:$0xff] }
  0x36   : > { %1399 = vmatprep.subr.mxu1 %v293_v8  ;;  %1365 = vmatpush3.msra.mxu0 %v245_v10  ;;  %v364_v46 = vld [vmem:[%s1780_s29 + $0x3b8] sm:$0xff]  ;;  %v363_v50 = vld [vmem:[%s1780_s29 + $0x3b0] sm:$0xff]  ;;  %v330_v54 = vld [vmem:[%s1780_s29 + $0x2a8] sm:$0xff] }
  0x37   : > { %653 = vmatprep.mubr.f32.mxu0 %v520_v9  ;;  %1400 = vmatpush3.msra.mxu1 %v277_v12  ;;  %v316_v47 = vld [vmem:[%s1780_s29 + $0x238] sm:$0xff]  ;;  %v315_v51 = vld [vmem:[%s1780_s29 + $0x230] sm:$0xff]  ;;  %v362_v55 = vld [vmem:[%s1780_s29 + $0x3a8] sm:$0xff] }
  0x38   : > { %723 = vmatprep.mubr.f32.mxu1 %v521_v11  ;;  %654 = vmatmul.mubr.f32.vlgmr.msra.gmra.mxu0 %v512_v63  ;;  %v348_v48 = vld [vmem:[%s1780_s29 + $0x338] sm:$0xff]  ;;  %v347_v53 = vld [vmem:[%s1780_s29 + $0x330] sm:$0xff]  ;;  %v314_v56 = vld [vmem:[%s1780_s29 + $0x228] sm:$0xff] }
  0x39   : > { %724 = vmatmul.mubr.f32.vlgmr.msra.gmra.mxu1 %v519_v2  ;;  %1404 = vmatprep.subr.mxu0 %v340_v13  ;;  %v346_v57 = vld [vmem:[%s1780_s29 + $0x328] sm:$0xff]  ;;  %v329_v59 = vld [vmem:[%s1780_s29 + $0x2a0] sm:$0xff]  ;;  %v328_v63 = vld [vmem:[%s1780_s29 + $0x298] sm:$0xff] }
  0x3a   : > { %1439 = vmatprep.subr.mxu1 %v372_v14  ;;  %1405 = vmatpush3.msra.mxu0 %v324_v15  ;;  %v242_v58 = vld [vmem:[%s1775_s25 + $0x8] sm:$0xff]  ;;  %v361_v60 = vld [vmem:[%s1780_s29 + $0x3a0] sm:$0xff]  ;;  %v360_v0 = vld [vmem:[%s1780_s29 + $0x398] sm:$0xff] }
  0x3b   : > { %1440 = vmatpush3.msra.mxu1 %v356_v16  ;;  %1406 = vmatprep.subr.mxu0 %v339_v17  ;;  %v313_v61 = vld [vmem:[%s1780_s29 + $0x220] sm:$0xff]  ;;  %v522_v1 = vcombine.high %v242_v58, %v242_v58  ;;  %v312_v2 = vld [vmem:[%s1780_s29 + $0x218] sm:$0xff]  ;;  %v327_v4 = vld [vmem:[%s1780_s29 + $0x290] sm:$0xff]  ;;  %v529_v6 = vrot.slane %v242_v58, %v1829_v52 }
  0x3c   : > { %1441 = vmatprep.subr.mxu1 %v371_v18  ;;  %1407 = vmatpush3.msra.mxu0 %v323_v19  ;;  %v345_v62 = vld [vmem:[%s1780_s29 + $0x320] sm:$0xff]  ;;  %v344_v3 = vld [vmem:[%s1780_s29 + $0x318] sm:$0xff]  ;;  %v359_v5 = vld [vmem:[%s1780_s29 + $0x390] sm:$0xff] }
  0x3d   : > { %1442 = vmatpush3.msra.mxu1 %v355_v20  ;;  %1408 = vmatprep.subr.mxu0 %v338_v21  ;;  %v311_v7 = vld [vmem:[%s1780_s29 + $0x210] sm:$0xff]  ;;  %v326_v9 = vld [vmem:[%s1780_s29 + $0x288] sm:$0xff]  ;;  %v536_v11 = vrot.slane %v522_v1, %v1829_v52  ;;  %v325_v14 = vld [vmem:[%s1780_s29 + $0x280] sm:$0xff]  ;;  %v537_v16 = vcombine.high %v529_v6, %v529_v6 }
  0x3e   : > { %1443 = vmatprep.subr.mxu1 %v370_v22  ;;  %1409 = vmatpush3.msra.mxu0 %v322_v23  ;;  %v343_v8 = vld [vmem:[%s1780_s29 + $0x310] sm:$0xff]  ;;  %v358_v10 = vld [vmem:[%s1780_s29 + $0x388] sm:$0xff]  ;;  %v357_v15 = vld [vmem:[%s1780_s29 + $0x380] sm:$0xff] }
  0x3f   : > { %1444 = vmatpush3.msra.mxu1 %v354_v24  ;;  %1410 = vmatprep.subr.mxu0 %v337_v25  ;;  %v310_v12 = vld [vmem:[%s1780_s29 + $0x208] sm:$0xff]  ;;  %v309_v17 = vld [vmem:[%s1780_s29 + $0x200] sm:$0xff]  ;;  %v538_v19 = vcombine.high %v536_v11, %v536_v11  ;;  %v404_v20 = vld [vmem:[%s1780_s29 + $0x4f8] sm:$0xff] }
  0x40   : > { %1445 = vmatprep.subr.mxu1 %v369_v26  ;;  %1411 = vmatpush3.msra.mxu0 %v321_v27  ;;  %v342_v13 = vld [vmem:[%s1780_s29 + $0x308] sm:$0xff]  ;;  %v341_v18 = vld [vmem:[%s1780_s29 + $0x300] sm:$0xff]  ;;  %v436_v21 = vld [vmem:[%s1780_s29 + $0x5f8] sm:$0xff] }
  0x41   : > { %1446 = vmatpush3.msra.mxu1 %v353_v28  ;;  %1412 = vmatprep.subr.mxu0 %v336_v29  ;;  %v388_v22 = vld [vmem:[%s1780_s29 + $0x478] sm:$0xff]  ;;  %v403_v24 = vld [vmem:[%s1780_s29 + $0x4f0] sm:$0xff]  ;;  %v402_v28 = vld [vmem:[%s1780_s29 + $0x4e8] sm:$0xff] }
  0x42   : > { %1447 = vmatprep.subr.mxu1 %v368_v30  ;;  %1413 = vmatpush3.msra.mxu0 %v320_v31  ;;  %v420_v23 = vld [vmem:[%s1780_s29 + $0x578] sm:$0xff]  ;;  %v435_v25 = vld [vmem:[%s1780_s29 + $0x5f0] sm:$0xff]  ;;  %v434_v29 = vld [vmem:[%s1780_s29 + $0x5e8] sm:$0xff] }
  0x43   : > { %1448 = vmatpush3.msra.mxu1 %v352_v32  ;;  %1414 = vmatprep.subr.mxu0 %v335_v33  ;;  %v387_v26 = vld [vmem:[%s1780_s29 + $0x470] sm:$0xff]  ;;  %v386_v30 = vld [vmem:[%s1780_s29 + $0x468] sm:$0xff]  ;;  %v401_v32 = vld [vmem:[%s1780_s29 + $0x4e0] sm:$0xff] }
  0x44   : > { %1449 = vmatprep.subr.mxu1 %v367_v34  ;;  %1415 = vmatpush3.msra.mxu0 %v319_v35  ;;  %v419_v27 = vld [vmem:[%s1780_s29 + $0x570] sm:$0xff]  ;;  %v418_v31 = vld [vmem:[%s1780_s29 + $0x568] sm:$0xff]  ;;  %v433_v33 = vld [vmem:[%s1780_s29 + $0x5e0] sm:$0xff] }
  0x45   : > { %1450 = vmatpush3.msra.mxu1 %v351_v36  ;;  %1416 = vmatprep.subr.mxu0 %v334_v37  ;;  %v385_v34 = vld [vmem:[%s1780_s29 + $0x460] sm:$0xff]  ;;  %v400_v36 = vld [vmem:[%s1780_s29 + $0x4d8] sm:$0xff]  ;;  %v427_v58 = vld [vmem:[%s1780_s29 + $0x5b0] sm:$0xff] }
  0x46   : > { %1451 = vmatprep.subr.mxu1 %v366_v38  ;;  %1417 = vmatpush3.msra.mxu0 %v318_v39  ;;  %v417_v35 = vld [vmem:[%s1780_s29 + $0x560] sm:$0xff]  ;;  %v432_v37 = vld [vmem:[%s1780_s29 + $0x5d8] sm:$0xff]  ;;  %v243_v1 = vld [vmem:[%s1775_s25 + $0x10] sm:$0xff] }
  0x47   : > { %1452 = vmatpush3.msra.mxu1 %v350_v40  ;;  %1418 = vmatprep.subr.mxu0 %v333_v41  ;;  %v384_v38 = vld [vmem:[%s1780_s29 + $0x458] sm:$0xff]  ;;  %v399_v40 = vld [vmem:[%s1780_s29 + $0x4d0] sm:$0xff] }
  0x48   : > { %1453 = vmatprep.subr.mxu1 %v365_v42  ;;  %1419 = vmatpush3.msra.mxu0 %v317_v43  ;;  %v416_v39 = vld [vmem:[%s1780_s29 + $0x558] sm:$0xff]  ;;  %v431_v41 = vld [vmem:[%s1780_s29 + $0x5d0] sm:$0xff] }
  0x49   : > { %1454 = vmatpush3.msra.mxu1 %v349_v44  ;;  %1420 = vmatprep.subr.mxu0 %v332_v45  ;;  %v383_v42 = vld [vmem:[%s1780_s29 + $0x450] sm:$0xff]  ;;  %v398_v44 = vld [vmem:[%s1780_s29 + $0x4c8] sm:$0xff] }
  0x4a   : > { %1455 = vmatprep.subr.mxu1 %v364_v46  ;;  %1421 = vmatpush3.msra.mxu0 %v316_v47  ;;  %v415_v43 = vld [vmem:[%s1780_s29 + $0x550] sm:$0xff]  ;;  %v430_v45 = vld [vmem:[%s1780_s29 + $0x5c8] sm:$0xff] }
  0x4b   : > { %1456 = vmatpush3.msra.mxu1 %v348_v48  ;;  %1422 = vmatprep.subr.mxu0 %v331_v49  ;;  %v382_v46 = vld [vmem:[%s1780_s29 + $0x448] sm:$0xff]  ;;  %v397_v48 = vld [vmem:[%s1780_s29 + $0x4c0] sm:$0xff] }
  0x4c   : > { %1457 = vmatprep.subr.mxu1 %v363_v50  ;;  %1423 = vmatpush3.msra.mxu0 %v315_v51  ;;  %v414_v47 = vld [vmem:[%s1780_s29 + $0x548] sm:$0xff]  ;;  %v429_v49 = vld [vmem:[%s1780_s29 + $0x5c0] sm:$0xff] }
  0x4d   : > { %1458 = vmatpush3.msra.mxu1 %v347_v53  ;;  %1424 = vmatprep.subr.mxu0 %v330_v54  ;;  %v381_v50 = vld [vmem:[%s1780_s29 + $0x440] sm:$0xff]  ;;  %v396_v53 = vld [vmem:[%s1780_s29 + $0x4b8] sm:$0xff] }
  0x4e   : > { %1459 = vmatprep.subr.mxu1 %v362_v55  ;;  %1425 = vmatpush3.msra.mxu0 %v314_v56  ;;  %v413_v51 = vld [vmem:[%s1780_s29 + $0x540] sm:$0xff]  ;;  %v428_v54 = vld [vmem:[%s1780_s29 + $0x5b8] sm:$0xff] }
  0x4f   : > { %1460 = vmatpush3.msra.mxu1 %v346_v57  ;;  %1426 = vmatprep.subr.mxu0 %v329_v59  ;;  %v380_v55 = vld [vmem:[%s1780_s29 + $0x438] sm:$0xff]  ;;  %v395_v57 = vld [vmem:[%s1780_s29 + $0x4b0] sm:$0xff] }
  0x50   : > { %1461 = vmatprep.subr.mxu1 %v361_v60  ;;  %1427 = vmatpush3.msra.mxu0 %v313_v61  ;;  %v412_v56 = vld [vmem:[%s1780_s29 + $0x538] sm:$0xff]  ;;  %v379_v59 = vld [vmem:[%s1780_s29 + $0x430] sm:$0xff]  ;;  %v394_v61 = vld [vmem:[%s1780_s29 + $0x4a8] sm:$0xff] }
  0x51   : > { %1462 = vmatpush3.msra.mxu1 %v345_v62  ;;  %1428 = vmatprep.subr.mxu0 %v328_v63  ;;  %v411_v60 = vld [vmem:[%s1780_s29 + $0x530] sm:$0xff]  ;;  %v426_v62 = vld [vmem:[%s1780_s29 + $0x5a8] sm:$0xff] }
  0x52   : > { %1463 = vmatprep.subr.mxu1 %v360_v0  ;;  %1429 = vmatpush3.msra.mxu0 %v312_v2  ;;  %v378_v63 = vld [vmem:[%s1780_s29 + $0x428] sm:$0xff]  ;;  %v393_v2 = vld [vmem:[%s1780_s29 + $0x4a0] sm:$0xff] }
  0x53   : > { %1464 = vmatpush3.msra.mxu1 %v344_v3  ;;  %1430 = vmatprep.subr.mxu0 %v327_v4  ;;  %v410_v0 = vld [vmem:[%s1780_s29 + $0x528] sm:$0xff]  ;;  %v425_v3 = vld [vmem:[%s1780_s29 + $0x5a0] sm:$0xff] }
  0x54   : > { %1465 = vmatprep.subr.mxu1 %v359_v5  ;;  %1431 = vmatpush3.msra.mxu0 %v311_v7  ;;  %v377_v4 = vld [vmem:[%s1780_s29 + $0x420] sm:$0xff]  ;;  %v424_v7 = vld [vmem:[%s1780_s29 + $0x598] sm:$0xff] }
  0x55   : > { %1466 = vmatpush3.msra.mxu1 %v343_v8  ;;  %1432 = vmatprep.subr.mxu0 %v326_v9  ;;  %v409_v5 = vld [vmem:[%s1780_s29 + $0x520] sm:$0xff]  ;;  %v539_v8 = vcombine.high %v243_v1, %v243_v1  ;;  %v376_v9 = vld [vmem:[%s1780_s29 + $0x418] sm:$0xff] }
  0x56   : > { %1467 = vmatprep.subr.mxu1 %v358_v10  ;;  %1433 = vmatpush3.msra.mxu0 %v310_v12  ;;  %v408_v10 = vld [vmem:[%s1780_s29 + $0x518] sm:$0xff]  ;;  %v423_v12 = vld [vmem:[%s1780_s29 + $0x590] sm:$0xff] }
  0x57   : > { %1468 = vmatpush3.msra.mxu1 %v342_v13  ;;  %1434 = vmatprep.subr.mxu0 %v325_v14  ;;  %v546_v13 = vrot.slane %v243_v1, %v1829_v52  ;;  %v375_v14 = vld [vmem:[%s1780_s29 + $0x410] sm:$0xff] }
  0x58   : > { %1469 = vmatprep.subr.mxu1 %v357_v15  ;;  %1435 = vmatpush3.msra.mxu0 %v309_v17  ;;  %v407_v15 = vld [vmem:[%s1780_s29 + $0x510] sm:$0xff]  ;;  %v422_v17 = vld [vmem:[%s1780_s29 + $0x588] sm:$0xff] }
  0x59   : > { %793 = vmatprep.mubr.f32.mxu0 %v537_v16  ;;  %1470 = vmatpush3.msra.mxu1 %v341_v18  ;;  %v390_v16 = vld [vmem:[%s1780_s29 + $0x488] sm:$0xff]  ;;  %v553_v18 = vrot.slane %v539_v8, %v1829_v52  ;;  %v491_v1 = vld [vmem:[%s1780_s29 + $0x7b0] sm:$0xff] }
  0x5a   : > { %794 = vmatmul.mubr.f32.vlgmr.msra.gmra.mxu0 %v529_v6  ;;  %863 = vmatprep.mubr.f32.mxu1 %v538_v19  ;;  %v392_v6 = vld [vmem:[%s1780_s29 + $0x498] sm:$0xff]  ;;  %v374_v19 = vld [vmem:[%s1780_s29 + $0x408] sm:$0xff] }
  0x5b   : > { %1474 = vmatprep.subr.mxu0 %v404_v20  ;;  %1509 = vmatprep.subr.mxu1 %v436_v21  ;;  %v406_v20 = vld [vmem:[%s1780_s29 + $0x508] sm:$0xff]  ;;  %v389_v21 = vld [vmem:[%s1780_s29 + $0x480] sm:$0xff] }
  0x5c   : > { %864 = vmatmul.mubr.f32.vlgmr.msra.gmra.mxu1 %v536_v11  ;;  %1475 = vmatpush3.msra.mxu0 %v388_v22  ;;  %v391_v11 = vld [vmem:[%s1780_s29 + $0x490] sm:$0xff]  ;;  %v421_v22 = vld [vmem:[%s1780_s29 + $0x580] sm:$0xff]  ;;  %v474_v8 = vld [vmem:[%s1780_s29 + $0x728] sm:$0xff] }
  0x5d   : > { %1510 = vmatpush3.msra.mxu1 %v420_v23  ;;  %1476 = vmatprep.subr.mxu0 %v403_v24  ;;  %v554_v23 = vcombine.high %v546_v13, %v546_v13  ;;  %v373_v24 = vld [vmem:[%s1780_s29 + $0x400] sm:$0xff] }
  0x5e   : > { %1511 = vmatprep.subr.mxu1 %v435_v25  ;;  %1477 = vmatpush3.msra.mxu0 %v387_v26  ;;  %v405_v25 = vld [vmem:[%s1780_s29 + $0x500] sm:$0xff]  ;;  %v555_v26 = vcombine.high %v553_v18, %v553_v18 }
  0x5f   : > { %1512 = vmatpush3.msra.mxu1 %v419_v27  ;;  %1478 = vmatprep.subr.mxu0 %v402_v28  ;;  %v468_v27 = vld [vmem:[%s1780_s29 + $0x6f8] sm:$0xff] }
  0x60   : > { %1513 = vmatprep.subr.mxu1 %v434_v29  ;;  %1479 = vmatpush3.msra.mxu0 %v386_v30  ;;  %v500_v28 = vld [vmem:[%s1780_s29 + $0x7f8] sm:$0xff] }
  0x61   : > { %1514 = vmatpush3.msra.mxu1 %v418_v31  ;;  %1480 = vmatprep.subr.mxu0 %v401_v32  ;;  %v452_v29 = vld [vmem:[%s1780_s29 + $0x678] sm:$0xff]  ;;  %v467_v31 = vld [vmem:[%s1780_s29 + $0x6f0] sm:$0xff] }
  0x62   : > { %1515 = vmatprep.subr.mxu1 %v433_v33  ;;  %1481 = vmatpush3.msra.mxu0 %v385_v34  ;;  %v484_v30 = vld [vmem:[%s1780_s29 + $0x778] sm:$0xff]  ;;  %v499_v32 = vld [vmem:[%s1780_s29 + $0x7f0] sm:$0xff] }
  0x63   : > { %1516 = vmatpush3.msra.mxu1 %v417_v35  ;;  %1482 = vmatprep.subr.mxu0 %v400_v36  ;;  %v451_v33 = vld [vmem:[%s1780_s29 + $0x670] sm:$0xff]  ;;  %v466_v35 = vld [vmem:[%s1780_s29 + $0x6e8] sm:$0xff] }
  0x64   : > { %1517 = vmatprep.subr.mxu1 %v432_v37  ;;  %1483 = vmatpush3.msra.mxu0 %v384_v38  ;;  %v483_v34 = vld [vmem:[%s1780_s29 + $0x770] sm:$0xff]  ;;  %v498_v36 = vld [vmem:[%s1780_s29 + $0x7e8] sm:$0xff] }
  0x65   : > { %1518 = vmatpush3.msra.mxu1 %v416_v39  ;;  %1484 = vmatprep.subr.mxu0 %v399_v40  ;;  %v450_v37 = vld [vmem:[%s1780_s29 + $0x668] sm:$0xff]  ;;  %v465_v39 = vld [vmem:[%s1780_s29 + $0x6e0] sm:$0xff] }
  0x66   : > { %1519 = vmatprep.subr.mxu1 %v431_v41  ;;  %1485 = vmatpush3.msra.mxu0 %v383_v42  ;;  %v482_v38 = vld [vmem:[%s1780_s29 + $0x768] sm:$0xff]  ;;  %v497_v40 = vld [vmem:[%s1780_s29 + $0x7e0] sm:$0xff] }
  0x67   : > { %1520 = vmatpush3.msra.mxu1 %v415_v43  ;;  %1486 = vmatprep.subr.mxu0 %v398_v44  ;;  %v449_v41 = vld [vmem:[%s1780_s29 + $0x660] sm:$0xff]  ;;  %v464_v43 = vld [vmem:[%s1780_s29 + $0x6d8] sm:$0xff] }
  0x68   : > { %1521 = vmatprep.subr.mxu1 %v430_v45  ;;  %1487 = vmatpush3.msra.mxu0 %v382_v46  ;;  %v481_v42 = vld [vmem:[%s1780_s29 + $0x760] sm:$0xff]  ;;  %v496_v44 = vld [vmem:[%s1780_s29 + $0x7d8] sm:$0xff] }
  0x69   : > { %1522 = vmatpush3.msra.mxu1 %v414_v47  ;;  %1488 = vmatprep.subr.mxu0 %v397_v48  ;;  %v448_v45 = vld [vmem:[%s1780_s29 + $0x658] sm:$0xff]  ;;  %v463_v47 = vld [vmem:[%s1780_s29 + $0x6d0] sm:$0xff] }
  0x6a   : > { %1523 = vmatprep.subr.mxu1 %v429_v49  ;;  %1489 = vmatpush3.msra.mxu0 %v381_v50  ;;  %v480_v46 = vld [vmem:[%s1780_s29 + $0x758] sm:$0xff]  ;;  %v495_v48 = vld [vmem:[%s1780_s29 + $0x7d0] sm:$0xff] }
  0x6b   : > { %1524 = vmatpush3.msra.mxu1 %v413_v51  ;;  %1490 = vmatprep.subr.mxu0 %v396_v53  ;;  %v447_v49 = vld [vmem:[%s1780_s29 + $0x650] sm:$0xff]  ;;  %v462_v51 = vld [vmem:[%s1780_s29 + $0x6c8] sm:$0xff] }
  0x6c   : > { %1525 = vmatprep.subr.mxu1 %v428_v54  ;;  %1491 = vmatpush3.msra.mxu0 %v380_v55  ;;  %v479_v50 = vld [vmem:[%s1780_s29 + $0x750] sm:$0xff]  ;;  %v494_v53 = vld [vmem:[%s1780_s29 + $0x7c8] sm:$0xff] }
  0x6d   : > { %1526 = vmatpush3.msra.mxu1 %v412_v56  ;;  %1492 = vmatprep.subr.mxu0 %v395_v57  ;;  %v446_v54 = vld [vmem:[%s1780_s29 + $0x648] sm:$0xff]  ;;  %v461_v56 = vld [vmem:[%s1780_s29 + $0x6c0] sm:$0xff] }
  0x6e   : > { %1527 = vmatprep.subr.mxu1 %v427_v58  ;;  %1493 = vmatpush3.msra.mxu0 %v379_v59  ;;  %v478_v55 = vld [vmem:[%s1780_s29 + $0x748] sm:$0xff]  ;;  %v493_v57 = vld [vmem:[%s1780_s29 + $0x7c0] sm:$0xff] }
  0x6f   : > { %1528 = vmatpush3.msra.mxu1 %v411_v60  ;;  %1494 = vmatprep.subr.mxu0 %v394_v61  ;;  %v445_v58 = vld [vmem:[%s1780_s29 + $0x640] sm:$0xff]  ;;  %v460_v60 = vld [vmem:[%s1780_s29 + $0x6b8] sm:$0xff] }
  0x70   : > { %1529 = vmatprep.subr.mxu1 %v426_v62  ;;  %1495 = vmatpush3.msra.mxu0 %v378_v63  ;;  %v477_v59 = vld [vmem:[%s1780_s29 + $0x740] sm:$0xff]  ;;  %v492_v61 = vld [vmem:[%s1780_s29 + $0x7b8] sm:$0xff] }
  0x71   : > { %1530 = vmatpush3.msra.mxu1 %v410_v0  ;;  %1496 = vmatprep.subr.mxu0 %v393_v2  ;;  %v444_v62 = vld [vmem:[%s1780_s29 + $0x638] sm:$0xff]  ;;  %v459_v0 = vld [vmem:[%s1780_s29 + $0x6b0] sm:$0xff] }
  0x72   : > { %1531 = vmatprep.subr.mxu1 %v425_v3  ;;  %1497 = vmatpush3.msra.mxu0 %v377_v4  ;;  %v476_v63 = vld [vmem:[%s1780_s29 + $0x738] sm:$0xff]  ;;  %v443_v2 = vld [vmem:[%s1780_s29 + $0x630] sm:$0xff]  ;;  %v458_v4 = vld [vmem:[%s1780_s29 + $0x6a8] sm:$0xff] }
  0x73   : > { %1532 = vmatpush3.msra.mxu1 %v409_v5  ;;  %1498 = vmatprep.subr.mxu0 %v392_v6  ;;  %v475_v3 = vld [vmem:[%s1780_s29 + $0x730] sm:$0xff]  ;;  %v490_v5 = vld [vmem:[%s1780_s29 + $0x7a8] sm:$0xff]  ;;  %v244_v6 = vld [vmem:[%s1775_s25 + $0x18] sm:$0xff] }
  0x74   : > { %1533 = vmatprep.subr.mxu1 %v424_v7  ;;  %1499 = vmatpush3.msra.mxu0 %v376_v9  ;;  %v442_v7 = vld [vmem:[%s1780_s29 + $0x628] sm:$0xff]  ;;  %v457_v9 = vld [vmem:[%s1780_s29 + $0x6a0] sm:$0xff] }
  0x75   : > { %1534 = vmatpush3.msra.mxu1 %v408_v10  ;;  %1500 = vmatprep.subr.mxu0 %v391_v11  ;;  %v489_v10 = vld [vmem:[%s1780_s29 + $0x7a0] sm:$0xff] }
  0x76   : > { %1535 = vmatprep.subr.mxu1 %v423_v12  ;;  %1501 = vmatpush3.msra.mxu0 %v375_v14  ;;  %v441_v11 = vld [vmem:[%s1780_s29 + $0x620] sm:$0xff]  ;;  %v456_v14 = vld [vmem:[%s1780_s29 + $0x698] sm:$0xff] }
  0x77   : > { %1536 = vmatpush3.msra.mxu1 %v407_v15  ;;  %1502 = vmatprep.subr.mxu0 %v390_v16  ;;  %v473_v12 = vld [vmem:[%s1780_s29 + $0x720] sm:$0xff]  ;;  %v488_v15 = vld [vmem:[%s1780_s29 + $0x798] sm:$0xff] }
  0x78   : > { %1537 = vmatprep.subr.mxu1 %v422_v17  ;;  %1503 = vmatpush3.msra.mxu0 %v374_v19  ;;  %v440_v16 = vld [vmem:[%s1780_s29 + $0x618] sm:$0xff]  ;;  %v487_v19 = vld [vmem:[%s1780_s29 + $0x790] sm:$0xff] }
  0x79   : > { %1538 = vmatpush3.msra.mxu1 %v406_v20  ;;  %1504 = vmatprep.subr.mxu0 %v389_v21  ;;  %v472_v17 = vld [vmem:[%s1780_s29 + $0x718] sm:$0xff]  ;;  %v563_v20 = vrot.slane %v244_v6, %v1829_v52  ;;  %v439_v21 = vld [vmem:[%s1780_s29 + $0x610] sm:$0xff] }
  0x7a   : > { %1539 = vmatprep.subr.mxu1 %v421_v22  ;;  %1505 = vmatpush3.msra.mxu0 %v373_v24  ;;  %v471_v22 = vld [vmem:[%s1780_s29 + $0x710] sm:$0xff]  ;;  %v454_v24 = vld [vmem:[%s1780_s29 + $0x688] sm:$0xff] }
  0x7b   : > { %933 = vmatprep.mubr.f32.mxu0 %v554_v23  ;;  %1540 = vmatpush3.msra.mxu1 %v405_v25  ;;  %v486_v25 = vld [vmem:[%s1780_s29 + $0x788] sm:$0xff] }
  0x7c   : > { %934 = vmatmul.mubr.f32.vlgmr.msra.gmra.mxu0 %v546_v13  ;;  %1003 = vmatprep.mubr.f32.mxu1 %v555_v26  ;;  %v556_v13 = vcombine.high %v244_v6, %v244_v6  ;;  %v438_v26 = vld [vmem:[%s1780_s29 + $0x608] sm:$0xff] }
  0x7d   : > { %1544 = vmatprep.subr.mxu0 %v468_v27  ;;  %1579 = vmatprep.subr.mxu1 %v500_v28  ;;  %v470_v27 = vld [vmem:[%s1780_s29 + $0x708] sm:$0xff]  ;;  %v453_v28 = vld [vmem:[%s1780_s29 + $0x680] sm:$0xff] }
  0x7e   : > { %1004 = vmatmul.mubr.f32.vlgmr.msra.gmra.mxu1 %v553_v18  ;;  %1545 = vmatpush3.msra.mxu0 %v452_v29  ;;  %v455_v18 = vld [vmem:[%s1780_s29 + $0x690] sm:$0xff]  ;;  %v570_v23 = vrot.slane %v556_v13, %v1829_v52  ;;  %v485_v29 = vld [vmem:[%s1780_s29 + $0x780] sm:$0xff] }
  0x7f   : > { %1580 = vmatpush3.msra.mxu1 %v484_v30  ;;  %1546 = vmatprep.subr.mxu0 %v467_v31  ;;  %v571_v30 = vcombine.high %v563_v20, %v563_v20  ;;  %v437_v31 = vld [vmem:[%s1780_s29 + $0x600] sm:$0xff] }
  0x80   : > { %1581 = vmatprep.subr.mxu1 %v499_v32  ;;  %1547 = vmatpush3.msra.mxu0 %v451_v33  ;;  %v572_v32 = vcombine.high %v570_v23, %v570_v23  ;;  %v469_v52 = vld [vmem:[%s1780_s29 + $0x700] sm:$0xff] }
  0x81   : > { %1582 = vmatpush3.msra.mxu1 %v483_v34  ;;  %1548 = vmatprep.subr.mxu0 %v466_v35 }
  0x82   : > { %1583 = vmatprep.subr.mxu1 %v498_v36  ;;  %1549 = vmatpush3.msra.mxu0 %v450_v37 }
  0x83   : > { %1584 = vmatpush3.msra.mxu1 %v482_v38  ;;  %1550 = vmatprep.subr.mxu0 %v465_v39 }
  0x84   : > { %1585 = vmatprep.subr.mxu1 %v497_v40  ;;  %1551 = vmatpush3.msra.mxu0 %v449_v41 }
  0x85   : > { %1586 = vmatpush3.msra.mxu1 %v481_v42  ;;  %1552 = vmatprep.subr.mxu0 %v464_v43 }
  0x86   : > { %1587 = vmatprep.subr.mxu1 %v496_v44  ;;  %1553 = vmatpush3.msra.mxu0 %v448_v45 }
  0x87   : > { %1588 = vmatpush3.msra.mxu1 %v480_v46  ;;  %1554 = vmatprep.subr.mxu0 %v463_v47 }
  0x88   : > { %1589 = vmatprep.subr.mxu1 %v495_v48  ;;  %1555 = vmatpush3.msra.mxu0 %v447_v49 }
  0x89   : > { %1590 = vmatpush3.msra.mxu1 %v479_v50  ;;  %1556 = vmatprep.subr.mxu0 %v462_v51 }
  0x8a   : > { %1591 = vmatprep.subr.mxu1 %v494_v53  ;;  %1557 = vmatpush3.msra.mxu0 %v446_v54 }
  0x8b   : > { %1592 = vmatpush3.msra.mxu1 %v478_v55  ;;  %1558 = vmatprep.subr.mxu0 %v461_v56 }
  0x8c   : > { %1593 = vmatprep.subr.mxu1 %v493_v57  ;;  %1559 = vmatpush3.msra.mxu0 %v445_v58 }
  0x8d   : > { %1594 = vmatpush3.msra.mxu1 %v477_v59  ;;  %1560 = vmatprep.subr.mxu0 %v460_v60 }
  0x8e   : > { %1595 = vmatprep.subr.mxu1 %v492_v61  ;;  %1561 = vmatpush3.msra.mxu0 %v444_v62 }
  0x8f   : > { %1596 = vmatpush3.msra.mxu1 %v476_v63  ;;  %1562 = vmatprep.subr.mxu0 %v459_v0  ;;  %v240_v0 = vld [vmem:[#allocation2] sm:$0x3] }
  0x90   : > { %1597 = vmatprep.subr.mxu1 %v491_v1  ;;  %1563 = vmatpush3.msra.mxu0 %v443_v2 }
  0x91   : > { %1598 = vmatpush3.msra.mxu1 %v475_v3  ;;  %1564 = vmatprep.subr.mxu0 %v458_v4 }
  0x92   : > { %1599 = vmatprep.subr.mxu1 %v490_v5  ;;  %1565 = vmatpush3.msra.mxu0 %v442_v7 }
  0x93   : > { %1600 = vmatpush3.msra.mxu1 %v474_v8  ;;  %1566 = vmatprep.subr.mxu0 %v457_v9 }
  0x94   : > { %1601 = vmatprep.subr.mxu1 %v489_v10  ;;  %1567 = vmatpush3.msra.mxu0 %v441_v11 }
  0x95   : > { %1602 = vmatpush3.msra.mxu1 %v473_v12  ;;  %1568 = vmatprep.subr.mxu0 %v456_v14 }
  0x96   : > { %1603 = vmatprep.subr.mxu1 %v488_v15  ;;  %1569 = vmatpush3.msra.mxu0 %v440_v16 }
  0x97   : > { %1604 = vmatpush3.msra.mxu1 %v472_v17  ;;  %1570 = vmatprep.subr.mxu0 %v455_v18 }
  0x98   : > { %1605 = vmatprep.subr.mxu1 %v487_v19  ;;  %1571 = vmatpush3.msra.mxu0 %v439_v21 }
  0x99   : > { %1606 = vmatpush3.msra.mxu1 %v471_v22  ;;  %1572 = vmatprep.subr.mxu0 %v454_v24 }
  0x9a   : > { %1607 = vmatprep.subr.mxu1 %v486_v25  ;;  %1573 = vmatpush3.msra.mxu0 %v438_v26 }
  0x9b   : > { %1608 = vmatpush3.msra.mxu1 %v470_v27  ;;  %1574 = vmatprep.subr.mxu0 %v453_v28 }
  0x9c   : > { %1609 = vmatprep.subr.mxu1 %v485_v29  ;;  %1575 = vmatpush3.msra.mxu0 %v437_v31 }
  0x9d   : > { %1073 = vmatprep.mubr.f32.mxu0 %v571_v30  ;;  %1610 = vmatpush3.msra.mxu1 %v469_v52 }
  0x9e   : > { %1143 = vmatprep.mubr.f32.mxu1 %v572_v32  ;;  %1074 = vmatmul.mubr.f32.vlgmr.msra.gmra.mxu0 %v563_v20 }
  0x9f   : > { %1144 = vmatmul.mubr.f32.vlgmr.msra.gmra.mxu1 %v570_v23 }
  0xf8   : > { %v1366_v33 = vpop.f32.mrf.mxu0 }
  0xf9   : > { %v1401_v34 = vpop.f32.mrf.mxu1 }
  0xfa   : > { %v1367_v35 = vpop.f32.mrf.mxu0 }
  0xfb   : > { %v1402_v37 = vpop.f32.mrf.mxu1  ;;  %v1368_v40 = vadd.f32 %v1367_v35, %v1366_v33 }
  0xfc   : > { %v1403_v41 = vadd.f32 %v1402_v37, %v1401_v34 }
  0xfe   : > { %v726_v45 = vadd.f32 %v1403_v41, %v1368_v40 }
 0x11a   : > { %v1436_v36 = vpop.f32.mrf.mxu0 }
 0x11c   : > { %v1471_v38 = vpop.f32.mrf.mxu1  ;;  %v1437_v39 = vpop.f32.mrf.mxu0 }
 0x11d   : > { %v1438_v43 = vadd.f32 %v1437_v39, %v1436_v36 }
 0x11e   : > { %v1472_v44 = vpop.f32.mrf.mxu1 }
 0x11f   : > { %v796_v48 = vadd.f32 %v1438_v43, %v726_v45  ;;  %v1473_v49 = vadd.f32 %v1472_v44, %v1471_v38 }
 0x121   : > { %v866_v53 = vadd.f32 %v1473_v49, %v796_v48 }
 0x13c   : > { %v1506_v42 = vpop.f32.mrf.mxu0 }
 0x13e   : > { %v1541_v46 = vpop.f32.mrf.mxu1  ;;  %v1507_v47 = vpop.f32.mrf.mxu0 }
 0x13f   : > { %v1508_v50 = vadd.f32 %v1507_v47, %v1506_v42 }
 0x140   : > { %v1542_v51 = vpop.f32.mrf.mxu1 }
 0x141   : > { %v936_v54 = vadd.f32 %v1508_v50, %v866_v53  ;;  %v1543_v55 = vadd.f32 %v1542_v51, %v1541_v46 }
 0x143   : > { %v1006_v60 = vadd.f32 %v1543_v55, %v936_v54 }
 0x15e   : > { %v1576_v56 = vpop.f32.mrf.mxu0 }
 0x15f   : > { %v1611_v57 = vpop.f32.mrf.mxu1 }
 0x160   : > { %v1577_v58 = vpop.f32.mrf.mxu0 }
 0x161   : > { %v1612_v59 = vpop.f32.mrf.mxu1  ;;  %v1578_v61 = vadd.f32 %v1577_v58, %v1576_v56 }
 0x162   : > { %v1613_v63 = vadd.f32 %v1612_v59, %v1611_v57 }
 0x163   : > { %v1076_v62 = vadd.f32 %v1578_v61, %v1006_v60 }
 0x165   : > { %v1146_v1 = vadd.f32 %v1613_v63, %v1076_v62  ;;  %1154 = sbr.rel (%p1327_p6) target bundleno = 591 (0x24f), region = 48 }
 0x167   : > { %v1149_v2 = vadd.f32 %v1146_v1, %v240_v0 }
 0x169   : > { %1150 = vst [vmem:[#allocation2] sm:$0x3] %v1149_v2 }
 0x16a   : > { %v1180_v3 = vld [vmem:[%s2126_s3 + $0x78] sm:$0xff]  ;;  %v1727_v4 = vmov 0.0   ;;  %v1179_v5 = vld [vmem:[%s2126_s3 + $0x70] sm:$0xff]  ;;  %vm1728_vm0 = vmmov 0   ;;  %v1178_v6 = vld [vmem:[%s2126_s3 + $0x68] sm:$0xff]  ;;  %vm1258_vm1 = vcmask 41984  }
 0x16b   : > { %1631 = vmatprep.subr.mxu0 %v1727_v4  ;;  %1663 = vmatprep.mubr.msk.f32.mxu0 %vm1728_vm0, %v1727_v4  ;;  %v1177_v7 = vld [vmem:[%s2126_s3 + $0x60] sm:$0xff]  ;;  %v1176_v8 = vld [vmem:[%s2126_s3 + $0x58] sm:$0xff]  ;;  %v1175_v9 = vld [vmem:[%s2126_s3 + $0x50] sm:$0xff] }
 0x16c   : > { %1632 = vmatpush3.msra.mxu0 %v1180_v3  ;;  %v1174_v10 = vld [vmem:[%s2126_s3 + $0x48] sm:$0xff]  ;;  %v1173_v11 = vld [vmem:[%s2126_s3 + $0x40] sm:$0xff]  ;;  %v1172_v12 = vld [vmem:[%s2126_s3 + $0x38] sm:$0xff] }
 0x16d   : > { %1633 = vmatprep.subr.mxu0 %v1727_v4  ;;  %v1171_v13 = vld [vmem:[%s2126_s3 + $0x30] sm:$0xff]  ;;  %v1170_v14 = vld [vmem:[%s2126_s3 + $0x28] sm:$0xff]  ;;  %v1169_v15 = vld [vmem:[%s2126_s3 + $0x20] sm:$0xff] }
 0x16e   : > { %1634 = vmatpush3.msra.mxu0 %v1179_v5  ;;  %v1328_v17 = vld [vmem:[%s2125_s2] ss:$0 sm:$0xff]  ;;  %v1168_v18 = vld [vmem:[%s2126_s3 + $0x18] sm:$0xff]  ;;  %v1167_v19 = vld [vmem:[%s2126_s3 + $0x10] sm:$0xff] }
 0x16f   : > { %1635 = vmatprep.subr.mxu0 %v1727_v4  ;;  %v1166_v21 = vld [vmem:[%s2126_s3 + $0x8] sm:$0xff]  ;;  %v1165_v22 = vld [vmem:[%s2126_s3] sm:$0xff] }
 0x170   : > { %1636 = vmatpush3.msra.mxu0 %v1178_v6  ;;  %v1155_v16 = vld [vmem:[#allocation2] sm:$0x3] }
 0x171   : > { %1637 = vmatprep.subr.mxu0 %v1727_v4  ;;  %v1163_v20 = vadd.f32 %v1328_v17, %v1155_v16  ;;  %v1329_v24 = vld [vmem:[%s2127_s4] ss:$0 sm:$0xff] }
 0x172   : > { %1638 = vmatpush3.msra.mxu0 %v1177_v7 }
 0x173   : > { %1639 = vmatprep.subr.mxu0 %v1727_v4  ;;  %v1164_v23 = vmax.f32 %v1163_v20, 0.0 }
 0x174   : > { %1640 = vmatpush3.msra.mxu0 %v1176_v8 }
 0x175   : > { %1641 = vmatprep.subr.mxu0 %v1727_v4 }
 0x176   : > { %1642 = vmatpush3.msra.mxu0 %v1175_v9 }
 0x177   : > { %1643 = vmatprep.subr.mxu0 %v1727_v4 }
 0x178   : > { %1644 = vmatpush3.msra.mxu0 %v1174_v10 }
 0x179   : > { %1645 = vmatprep.subr.mxu0 %v1727_v4 }
 0x17a   : > { %1646 = vmatpush3.msra.mxu0 %v1173_v11 }
 0x17b   : > { %1647 = vmatprep.subr.mxu0 %v1727_v4 }
 0x17c   : > { %1648 = vmatpush3.msra.mxu0 %v1172_v12 }
 0x17d   : > { %1649 = vmatprep.subr.mxu0 %v1727_v4 }
 0x17e   : > { %1650 = vmatpush3.msra.mxu0 %v1171_v13 }
 0x17f   : > { %1651 = vmatprep.subr.mxu0 %v1727_v4 }
 0x180   : > { %1652 = vmatpush3.msra.mxu0 %v1170_v14 }
 0x181   : > { %1653 = vmatprep.subr.mxu0 %v1727_v4 }
 0x182   : > { %1654 = vmatpush3.msra.mxu0 %v1169_v15 }
 0x183   : > { %1655 = vmatprep.subr.mxu0 %v1727_v4 }
 0x184   : > { %1656 = vmatpush3.msra.mxu0 %v1168_v18 }
 0x185   : > { %1657 = vmatprep.subr.mxu0 %v1727_v4 }
 0x186   : > { %1658 = vmatpush3.msra.mxu0 %v1167_v19 }
 0x187   : > { %1659 = vmatprep.subr.mxu0 %v1727_v4 }
 0x188   : > { %1660 = vmatpush3.msra.mxu0 %v1166_v21 }
 0x189   : > { %1661 = vmatprep.subr.mxu0 %v1727_v4 }
 0x18a   : > { %1662 = vmatpush3.msra.mxu0 %v1165_v22 }
 0x18b   : > { %1664 = vmatmul.mubr.f32.vlgmr.msra.gmra.mxu0 %v1164_v23 }
 0x24b   : > { %v1254_v25 = vpop.f32.mrf.mxu0 }
 0x24c   : > { %v1255_v26 = vadd.f32 %v1329_v24, %v1254_v25 }
 0x24d   : > { %v1665_v27 = vpop.f32.mrf.mxu0 }
 0x24e   : > { %1259 = vst.msk [vmem:[#allocation3] sm:$0x3] %vm1258_vm1, %v1255_v26 }
 0x24f PF: > { %p1670_p7 = scmp.eq.s32.totalorder %s1766_s19, 7  ;;  %s1729_s20 = smov [#allocation3]  }
 0x250   : > { %s1267_s21 = sshll.u32 %s1729_s20, 4  ;;  %s1268_s21 = int_to_ptr.vmem [resolvable:$true] %s1267_s21 }
 0x251   : > { %s1689_s22 = scalar_lea.vmem %s1268_s21, 32  ;;  %p1696_p11 = scmp.lt.s32.totalorder %s1268_s21, %s1268_s21 }
 0x252   : > { %p1690_p8 = scmp.ne.s32.totalorder %s1268_s21, %s1689_s22  ;;  %p1697_p12 = scmp.lt.s32.totalorder %s1689_s22, %s1689_s22 }
 0x254   : > { %p1691_p9 = pnand %p1690_p8, %p1670_p7  ;;  %p1698_p13 = por %p1697_p12, %p1696_p11 }
 0x256   : > { %p1692_p10 = pneg %p1691_p9 }
 0x258   : > { %p1699_p0 = pnand %p1698_p13, %p1692_p10 }
 0x25a   : > { %1702 = shalt.err (!%p1699_p0)
}
 0x25b   : > { %1667 = dma.vmem_to_hbm [thread:$0]  (%p1670_p7), %s1268_s21, 32, %s2128_s5, [#allocation4]  }
 0x25c   : > { %1718 = dma.done.wait (%p1670_p7), [#allocation4], 32  }
 0x25d   : > { %1720 = vsyncadd (%p1670_p7), [#allocation4], 4294967264 }
 0x25e PF: > { %s16_s18 = sadd.s32 1, %s1723_s18  }
 0x25f   : > { %p13_p1 = scmp.ge.s32.totalorder %s16_s18, 10  }
 0x261   :  { %15 = sbr.rel (!%p13_p1) target bundleno = 1 (0x1), region = 78 }
 0x266   :  { %1280 = vsyncpa [#allocation4], 1 }
 0x267   :  { %1282 = vsyncpa [#allocation4 + $0x1], 1 }

</bundles_post_ra>
